<compile_context>
chip_gen: v6e
topology: v6e:2x2x1
jax: 0.10.0
libtpu: 0.0.40
codegen_flags: <defaults>
</compile_context>

<pallas_src>
import math
import numpy as np
import jax
import jax.numpy as jnp
from jax.experimental import pallas as pl
from jax.experimental.pallas import tpu as pltpu


# --------------------------------------------------------------------------- #
# Kernel A: LSTM cell + visual sentinel + adaptive attention (per batch tile). #
# --------------------------------------------------------------------------- #
def state_attn_kernel(
    g1_ref,     # (TB, E+2H) f32   [emb ++ v_g ++ h_old]
    h_ref,      # (TB, H)    f32   old hidden
    m_ref,      # (TB, H)    f32   old cell
    v_ref,      # (R, TB, H) f32   encoder regions, region-major
    wf_ref,     # (E+2H, 5H) cdt   fused [W_ih|W_lin ; W_hh|W_lin]
    bf_ref,     # (1, 5H)    f32   fused [b_ih + b_hh ; b_lin]
    watt_ref,   # (3, H, H)  cdt   [W_v.T, W_g.T, W_s.T]
    avec_ref,   # (4, H)     f32   [b_v, b_g, b_s, w_h]
    hout_ref,   # (TB, H)    f32
    mout_ref,   # (TB, H)    f32
    cout_ref,   # (TB, H)    f32   fused context (h_new + c_att) * sqrt(0.5)
):
    f32 = jnp.float32
    cdt = wf_ref.dtype
    TB, H = h_ref.shape
    R = v_ref.shape[0]

    g1 = g1_ref[...]
    h = h_ref[...]
    m = m_ref[...]

    # One fused MXU push: [LSTM gates (4H) | sentinel-gate pre-act (H)].
    # Bias added as a single VPU add (K stays E+2H: no ragged K tile).
    fused = (jnp.dot(g1.astype(cdt), wf_ref[...], preferred_element_type=f32)
             + bf_ref[...])
    # NOTE: H-multiple lane slices; 128-aligned at production H (512).
    i_g = jax.nn.sigmoid(fused[:, 0 * H:1 * H])
    f_g = jax.nn.sigmoid(fused[:, 1 * H:2 * H])
    c_g = jnp.tanh(fused[:, 2 * H:3 * H])
    o_g = jax.nn.sigmoid(fused[:, 3 * H:4 * H])
    sent_g = jax.nn.sigmoid(fused[:, 4 * H:5 * H])     # sigmoid(linear([x, h_old]))

    m_new = f_g * m + i_g * c_g
    h_new = o_g * jnp.tanh(m_new)
    s = sent_g * jnp.tanh(m_new)                       # visual sentinel

    av = avec_ref[...]
    b_v, b_g, b_s, w_h = av[0:1], av[1:2], av[2:3], av[3:4]     # (1, H) each

    h_proj = jnp.dot(h_new.astype(cdt), watt_ref[1], preferred_element_type=f32) + b_g
    s_proj = jnp.dot(s.astype(cdt), watt_ref[2], preferred_element_type=f32) + b_s

    # Region projection as one (R*TB, H) @ (H, H) MXU matmul.  TB % 8 == 0, so the
    # (R, TB, H) -> (R*TB, H) merge is a tile-aligned layout no-op.
    v3 = v_ref[...]
    v2 = v3.reshape(R * TB, H)
    vproj = (jnp.dot(v2.astype(cdt), watt_ref[0], preferred_element_type=f32)
             + b_v).reshape(R, TB, H)

    # Adaptive-attention scores; the shared +b_h bias cancels inside the softmax
    # over [regions ; sentinel] so it is dropped (exact).
    z = jnp.sum(jnp.tanh(vproj + h_proj[None, :, :]) * w_h,
                axis=-1, keepdims=True)                # (R, TB, 1)
    z_s = jnp.sum(jnp.tanh(s_proj + h_proj) * w_h,
                  axis=-1, keepdims=True)              # (TB, 1)

    m_all = jnp.maximum(jnp.max(z, axis=0), z_s)       # (TB, 1)
    e_z = jnp.exp(z - m_all[None, :, :])               # (R, TB, 1)
    e_s = jnp.exp(z_s - m_all)                         # (TB, 1)
    inv = pl.reciprocal(jnp.sum(e_z, axis=0) + e_s, approx=True)   # EUP slot
    alpha = e_z * inv[None, :, :]                      # (R, TB, 1)
    beta = e_s * inv                                   # (TB, 1)

    c_att = jnp.sum(alpha * v3, axis=0) + beta * s     # (TB, H)
    cout_ref[...] = (h_new + c_att) * math.sqrt(0.5)   # dropout = identity (eval)
    hout_ref[...] = h_new
    mout_ref[...] = m_new


# --------------------------------------------------------------------------- #
# Kernel B: vocab projection; W_out streamed in lane-dense (H, TN) tiles.      #
# --------------------------------------------------------------------------- #
def vocab_kernel(c_ref, wout_ref, bout_ref, logits_ref):
    logits_ref[...] = (
        jnp.dot(c_ref[...].astype(wout_ref.dtype), wout_ref[...],
                preferred_element_type=jnp.float32)
        + bout_ref[...])


# --------------------------------------------------------------------------- #
# One-time preprocessing (hoisted out of the per-token call).                  #
# --------------------------------------------------------------------------- #
def prepare_weights(params, compute_dtype=jnp.bfloat16):
    """One-time weight fusion.  Call once and reuse across all decode steps."""
    f32 = jnp.float32
    cdt = compute_dtype
    E = params["embedding"].shape[1]
    H = params["w_hh"].shape[1]

    w_ih_t, w_hh_t = params["w_ih"].T, params["w_hh"].T            # (E+H,4H), (H,4H)
    w_lin_t = params["w_lin"].T                                    # (E+2H, H)
    w_fused = jnp.concatenate([
        jnp.concatenate([w_ih_t, w_lin_t[:E + H]], axis=1),
        jnp.concatenate([w_hh_t, w_lin_t[E + H:]], axis=1),
    ], axis=0).astype(cdt)                                         # (E+2H, 5H)
    b_fused = jnp.concatenate(
        [params["b_ih"] + params["b_hh"], params["b_lin"]])[None, :].astype(f32)  # (1,5H)

    w_att = jnp.stack(
        [params["w_v"].T, params["w_g"].T, params["w_s"].T]).astype(cdt)       # (3,H,H)
    att_vec = jnp.stack(
        [params["b_v"], params["b_g"], params["b_s"], params["w_h"][0]]).astype(f32)  # (4,H)

    return dict(
        embedding=params["embedding"].astype(f32),
        w_fused=w_fused, b_fused=b_fused, w_att=w_att, att_vec=att_vec,
        w_out_t=params["w_out"].T.astype(cdt),                     # (H, V)
        b_out=params["b_out"][None, :].astype(f32),                # (1, V)
        E=E, H=H, V=params["w_out"].shape[0],
    )


def prepare_encoder(enc_out):
    """One-time per image: region-major layout for the attention kernel."""
    v, v_g = enc_out
    return jnp.transpose(v, (1, 0, 2)).astype(jnp.float32), v_g.astype(jnp.float32)


# --------------------------------------------------------------------------- #
# Per-token decode step.                                                       #
# --------------------------------------------------------------------------- #
def decoder_forward(prep, x_ids, state, enc_prep, *, block_b=128, block_v=2048):
    """One decode step. Returns (logits [B, V], (h_new [B, H], m_new [B, H]))."""
    f32 = jnp.float32
    v_rm, v_g = enc_prep                                           # (R, B, H), (B, H)
    h, m = state
    R, B, H = v_rm.shape
    E, V = prep["E"], prep["V"]

    TB = min(block_b, B)                  # default covers the whole batch -> nb = 1
    TN = min(block_v, V)
    assert B % TB == 0 and TB % 8 == 0, "batch tile must be a multiple of 8"
    assert V % TN == 0 and (TN == V or TN % 128 == 0), "vocab tile must be lane aligned"
    nb, nv = B // TB, V // TN

    # Per-token glue: embedding gather + [x ; h] concat (tiny vs. the W_out stream).
    emb = prep["embedding"][x_ids[:, 0]]                           # (B, E)
    g1 = jnp.concatenate([emb, v_g, h], axis=1).astype(f32)        # (B, E+2H)

    vmem_cap = 48 * 1024 * 1024   # fits v7x's 64 MiB physical VMEM with headroom

    def run(use_pm):
        def pm(n):
            # Buffered(1): single-buffer grid-invariant weights (halves their VMEM).
            # Buffered(3): deeper pipelining on the HBM-streamed W_out tiles.
            return dict(pipeline_mode=pl.Buffered(n)) if use_pm else {}

        # ---- Kernel A: LSTM + sentinel + adaptive attention -------------------
        h_new, m_new, c = pl.pallas_call(
            state_attn_kernel,
            grid=(nb,),
            in_specs=[
                pl.BlockSpec((TB, E + 2 * H), lambda bi: (bi, 0)),           # g1
                pl.BlockSpec((TB, H), lambda bi: (bi, 0)),                   # h
                pl.BlockSpec((TB, H), lambda bi: (bi, 0)),                   # m
                pl.BlockSpec((R, TB, H), lambda bi: (0, bi, 0)),             # v (R-major)
                pl.BlockSpec((E + 2 * H, 5 * H), lambda bi: (0, 0), **pm(1)),  # W fused
                pl.BlockSpec((1, 5 * H), lambda bi: (0, 0), **pm(1)),          # b fused
                pl.BlockSpec((3, H, H), lambda bi: (0, 0, 0), **pm(1)),        # W att
                pl.BlockSpec((4, H), lambda bi: (0, 0), **pm(1)),              # att vecs
            ],
            out_specs=(
                pl.BlockSpec((TB, H), lambda bi: (bi, 0)),                   # h_new
                pl.BlockSpec((TB, H), lambda bi: (bi, 0)),                   # m_new
                pl.BlockSpec((TB, H), lambda bi: (bi, 0)),                   # c
            ),
            out_shape=(
                jax.ShapeDtypeStruct((B, H), f32),
                jax.ShapeDtypeStruct((B, H), f32),
                jax.ShapeDtypeStruct((B, H), f32),
            ),
            compiler_params=pltpu.CompilerParams(
                dimension_semantics=("parallel",),
                vmem_limit_bytes=vmem_cap),
        )(g1, h, m, v_rm, prep["w_fused"], prep["b_fused"],
          prep["w_att"], prep["att_vec"])

        # ---- Kernel B: vocab projection (both axes parallel -> v7x megacore) --
        logits = pl.pallas_call(
            vocab_kernel,
            grid=(nb, nv),
            in_specs=[
                pl.BlockSpec((TB, H), lambda bi, vi: (bi, 0)),               # c
                pl.BlockSpec((H, TN), lambda bi, vi: (0, vi), **pm(3)),      # W_out tile
                pl.BlockSpec((1, TN), lambda bi, vi: (0, vi), **pm(3)),      # b_out tile
            ],
            out_specs=pl.BlockSpec((TB, TN), lambda bi, vi: (bi, vi)),
            out_shape=jax.ShapeDtypeStruct((B, V), f32),
            compiler_params=pltpu.CompilerParams(
                dimension_semantics=("parallel", "parallel"),
                vmem_limit_bytes=vmem_cap),
        )(c, prep["w_out_t"], prep["b_out"])
        return logits, h_new, m_new

    try:
        logits, h_new, m_new = run(True)
    except Exception:
        # Fallback for environments without BlockSpec pipeline_mode / Buffered.
        logits, h_new, m_new = run(False)
    return logits, (h_new, m_new)


# --------------------------------------------------------------------------- #
# Params, pure-JAX reference, test.                                            #
# --------------------------------------------------------------------------- #
def init_params(key, vocab, E, H):
    ks = jax.random.split(key, 19)
    nrm = lambda k, s: jax.random.normal(k, s, jnp.float32) * 0.1
    return dict(
        embedding=nrm(ks[0], (vocab, E)),
        w_lin=nrm(ks[1], (H, E + 2 * H)), b_lin=nrm(ks[2], (H,)),
        w_ih=nrm(ks[3], (4 * H, E + H)), b_ih=nrm(ks[4], (4 * H,)),
        w_hh=nrm(ks[5], (4 * H, H)), b_hh=nrm(ks[6], (4 * H,)),
        w_v=nrm(ks[7], (H, H)), b_v=nrm(ks[8], (H,)),
        w_g=nrm(ks[9], (H, H)), b_g=nrm(ks[10], (H,)),
        w_s=nrm(ks[11], (H, H)), b_s=nrm(ks[12], (H,)),
        w_h=nrm(ks[13], (1, H)), b_h=nrm(ks[14], (1,)),
        w_out=nrm(ks[15], (vocab, H)), b_out=nrm(ks[16], (vocab,)),
        h0=nrm(ks[17], (1, H)), m0=nrm(ks[18], (1, H)),
    )


def decoder_reference(params, x_ids, state, enc_out):
    """Pure-JAX reference mirroring the PyTorch forward (eval mode)."""
    v, v_g = enc_out
    h, m = state
    H = h.shape[1]
    emb = params["embedding"][x_ids[:, 0]]
    x = jnp.concatenate([emb, v_g], axis=1)
    g_in = jnp.concatenate([x, h], axis=1)
    g = jax.nn.sigmoid(g_in @ params["w_lin"].T + params["b_lin"])
    gates = x @ params["w_ih"].T + params["b_ih"] + h @ params["w_hh"].T + params["b_hh"]
    i_g = jax.nn.sigmoid(gates[:, :H])
    f_g = jax.nn.sigmoid(gates[:, H:2 * H])
    c_g = jnp.tanh(gates[:, 2 * H:3 * H])
    o_g = jax.nn.sigmoid(gates[:, 3 * H:])
    m_new = f_g * m + i_g * c_g
    h_new = o_g * jnp.tanh(m_new)
    s = g * jnp.tanh(m_new)
    v_proj = v @ params["w_v"].T + params["b_v"]
    h_proj = h_new @ params["w_g"].T + params["b_g"]
    s_proj = s @ params["w_s"].T + params["b_s"]
    z = jnp.einsum("brh,h->br", jnp.tanh(v_proj + h_proj[:, None, :]),
                   params["w_h"][0]) + params["b_h"]
    z_s = jnp.sum(jnp.tanh(s_proj + h_proj) * params["w_h"][0],
                  axis=-1, keepdims=True) + params["b_h"]
    alpha = jax.nn.softmax(jnp.concatenate([z, z_s], axis=1), axis=1)
    c = jnp.einsum("br,brh->bh", alpha[:, :-1], v) + alpha[:, -1:] * s
    c = (h_new + c) * math.sqrt(0.5)
    logits = c @ params["w_out"].T + params["b_out"]
    return logits, (h_new, m_new)


if __name__ == "__main__":
    B, R, H, E, V = 16, 49, 32, 32, 512   # bsz, regions, hidden, embed, vocab
    key = jax.random.PRNGKey(0)
    kp, kv, kvg, kx = jax.random.split(key, 4)
    params = init_params(kp, V, E, H)

    v = jax.random.normal(kv, (B, R, H), jnp.float32)     # encoder region features
    v_g = jax.random.normal(kvg, (B, H), jnp.float32)     # global encoder feature
    x_ids = jax.random.randint(kx, (B, 1), 0, V)          # current token ids
    h0 = jnp.broadcast_to(params["h0"], (B, H))
    m0 = jnp.broadcast_to(params["m0"], (B, H))

    ref_logits, (ref_h, ref_m) = decoder_reference(params, x_ids, (h0, m0), (v, v_g))

    # One-time prep (hoisted out of the per-token call; reused for every token).
    enc_prep = prepare_encoder((v, v_g))

    # f32 weights: tight check (approx-reciprocal softmax is the only deviation).
    prep_f32 = prepare_weights(params, compute_dtype=jnp.float32)
    logits, (h_new, m_new) = jax.block_until_ready(
        decoder_forward(prep_f32, x_ids, (h0, m0), enc_prep))
    np.testing.assert_allclose(np.asarray(h_new), np.asarray(ref_h), rtol=1e-4, atol=1e-4)
    np.testing.assert_allclose(np.asarray(m_new), np.asarray(ref_m), rtol=1e-4, atol=1e-4)
    np.testing.assert_allclose(np.asarray(logits), np.asarray(ref_logits), rtol=5e-3, atol=5e-3)

    # bf16 weights / MXU operands (default), f32 accumulation (halves weight HBM traffic).
    prep_bf16 = prepare_weights(params)                   # compute_dtype=bf16 default
    logits_bf, (h_bf, m_bf) = jax.block_until_ready(
        decoder_forward(prep_bf16, x_ids, (h0, m0), enc_prep))
    np.testing.assert_allclose(np.asarray(h_bf), np.asarray(ref_h), rtol=5e-2, atol=5e-2)
    np.testing.assert_allclose(np.asarray(m_bf), np.asarray(ref_m), rtol=5e-2, atol=5e-2)
    np.testing.assert_allclose(np.asarray(logits_bf), np.asarray(ref_logits), rtol=8e-2, atol=8e-2)

    print("KERNEL_OK")
</pallas_src>

<mosaic_0001>
module attributes {stable_mosaic.version = 11 : i64} {
  func.func @state_attn_kernel(%arg0: i32, %arg1: memref<16x96xf32, #tpu.memory_space<vmem>>, %arg2: memref<16x32xf32, #tpu.memory_space<vmem>>, %arg3: memref<16x32xf32, #tpu.memory_space<vmem>>, %arg4: memref<49x16x32xf32, #tpu.memory_space<vmem>>, %arg5: memref<96x160xf32, #tpu.memory_space<vmem>>, %arg6: memref<1x160xf32, #tpu.memory_space<vmem>>, %arg7: memref<3x32x32xf32, #tpu.memory_space<vmem>>, %arg8: memref<4x32xf32, #tpu.memory_space<vmem>>, %arg9: memref<16x32xf32, #tpu.memory_space<vmem>>, %arg10: memref<16x32xf32, #tpu.memory_space<vmem>>, %arg11: memref<16x32xf32, #tpu.memory_space<vmem>>) attributes {dimension_semantics = [#tpu.dimension_semantics<parallel>], iteration_bounds = array<i64: 1>, scalar_prefetch = 0 : i64, scratch_operands = 0 : i64, tpu.core_type = #tpu.core_type<tc>, window_params = [{transform_indices = @transform_0, window_bounds = array<i64: 16, 96>}, {transform_indices = @transform_1, window_bounds = array<i64: 16, 32>}, {transform_indices = @transform_2, window_bounds = array<i64: 16, 32>}, {transform_indices = @transform_3, window_bounds = array<i64: 49, 16, 32>}, {pipeline_mode = #tpu.pipeline_mode<synchronous>, transform_indices = @transform_4, window_bounds = array<i64: 96, 160>}, {pipeline_mode = #tpu.pipeline_mode<synchronous>, transform_indices = @transform_5, window_bounds = array<i64: 1, 160>}, {pipeline_mode = #tpu.pipeline_mode<synchronous>, transform_indices = @transform_6, window_bounds = array<i64: 3, 32, 32>}, {pipeline_mode = #tpu.pipeline_mode<synchronous>, transform_indices = @transform_7, window_bounds = array<i64: 4, 32>}, {transform_indices = @transform_8, window_bounds = array<i64: 16, 32>}, {transform_indices = @transform_9, window_bounds = array<i64: 16, 32>}, {transform_indices = @transform_10, window_bounds = array<i64: 16, 32>}]} {
    %c0 = arith.constant 0 : index
    %c0_0 = arith.constant 0 : index
    %0 = vector.load %arg1[%c0, %c0_0] : memref<16x96xf32, #tpu.memory_space<vmem>>, vector<16x96xf32>
    %c0_1 = arith.constant 0 : index
    %c0_2 = arith.constant 0 : index
    %1 = vector.load %arg3[%c0_1, %c0_2] : memref<16x32xf32, #tpu.memory_space<vmem>>, vector<16x32xf32>
    %c0_3 = arith.constant 0 : index
    %c0_4 = arith.constant 0 : index
    %2 = vector.load %arg5[%c0_3, %c0_4] : memref<96x160xf32, #tpu.memory_space<vmem>>, vector<96x160xf32>
    %cst = arith.constant dense<0.000000e+00> : vector<16x160xf32>
    %3 = tpu.matmul %0, %2, %cst {dimension_numbers = #tpu.dot_dimension_numbers<[1], [0], [0], [1], [0, 0, 1, 1], [], []>} : vector<16x96xf32>, vector<96x160xf32>, vector<16x160xf32> -> vector<16x160xf32>
    %c0_5 = arith.constant 0 : index
    %c0_6 = arith.constant 0 : index
    %4 = vector.load %arg6[%c0_5, %c0_6] : memref<1x160xf32, #tpu.memory_space<vmem>>, vector<1x160xf32>
    %5 = vector.broadcast %4 : vector<1x160xf32> to vector<16x160xf32>
    %6 = arith.addf %3, %5 : vector<16x160xf32>
    %7 = vector.extract_strided_slice %6 {offsets = [0, 0], sizes = [16, 32], strides = [1, 1]} : vector<16x160xf32> to vector<16x32xf32>
    %8 = arith.negf %7 : vector<16x32xf32>
    %9 = math.exp %8 : vector<16x32xf32>
    %cst_7 = arith.constant 1.000000e+00 : f32
    %10 = vector.broadcast %cst_7 : f32 to vector<16x32xf32>
    %11 = arith.addf %10, %9 : vector<16x32xf32>
    %12 = arith.divf %10, %11 : vector<16x32xf32>
    %13 = vector.extract_strided_slice %6 {offsets = [0, 32], sizes = [16, 32], strides = [1, 1]} : vector<16x160xf32> to vector<16x32xf32>
    %14 = arith.negf %13 : vector<16x32xf32>
    %15 = math.exp %14 : vector<16x32xf32>
    %cst_8 = arith.constant 1.000000e+00 : f32
    %16 = vector.broadcast %cst_8 : f32 to vector<16x32xf32>
    %17 = arith.addf %16, %15 : vector<16x32xf32>
    %18 = arith.divf %16, %17 : vector<16x32xf32>
    %19 = vector.extract_strided_slice %6 {offsets = [0, 64], sizes = [16, 32], strides = [1, 1]} : vector<16x160xf32> to vector<16x32xf32>
    %20 = math.tanh %19 : vector<16x32xf32>
    %21 = vector.extract_strided_slice %6 {offsets = [0, 96], sizes = [16, 32], strides = [1, 1]} : vector<16x160xf32> to vector<16x32xf32>
    %22 = arith.negf %21 : vector<16x32xf32>
    %23 = math.exp %22 : vector<16x32xf32>
    %cst_9 = arith.constant 1.000000e+00 : f32
    %24 = vector.broadcast %cst_9 : f32 to vector<16x32xf32>
    %25 = arith.addf %24, %23 : vector<16x32xf32>
    %26 = arith.divf %24, %25 : vector<16x32xf32>
    %27 = vector.extract_strided_slice %6 {offsets = [0, 128], sizes = [16, 32], strides = [1, 1]} : vector<16x160xf32> to vector<16x32xf32>
    %28 = arith.negf %27 : vector<16x32xf32>
    %29 = math.exp %28 : vector<16x32xf32>
    %cst_10 = arith.constant 1.000000e+00 : f32
    %30 = vector.broadcast %cst_10 : f32 to vector<16x32xf32>
    %31 = arith.addf %30, %29 : vector<16x32xf32>
    %32 = arith.divf %30, %31 : vector<16x32xf32>
    %33 = arith.mulf %18, %1 : vector<16x32xf32>
    %34 = arith.mulf %12, %20 : vector<16x32xf32>
    %35 = arith.addf %33, %34 : vector<16x32xf32>
    %36 = math.tanh %35 : vector<16x32xf32>
    %37 = arith.mulf %26, %36 : vector<16x32xf32>
    %38 = math.tanh %35 : vector<16x32xf32>
    %39 = arith.mulf %32, %38 : vector<16x32xf32>
    %c0_11 = arith.constant 0 : index
    %c0_12 = arith.constant 0 : index
    %40 = vector.load %arg8[%c0_11, %c0_12] : memref<4x32xf32, #tpu.memory_space<vmem>>, vector<4x32xf32>
    %41 = vector.extract_strided_slice %40 {offsets = [0, 0], sizes = [1, 32], strides = [1, 1]} : vector<4x32xf32> to vector<1x32xf32>
    %42 = vector.extract_strided_slice %40 {offsets = [1, 0], sizes = [1, 32], strides = [1, 1]} : vector<4x32xf32> to vector<1x32xf32>
    %43 = vector.extract_strided_slice %40 {offsets = [2, 0], sizes = [1, 32], strides = [1, 1]} : vector<4x32xf32> to vector<1x32xf32>
    %44 = vector.extract_strided_slice %40 {offsets = [3, 0], sizes = [1, 32], strides = [1, 1]} : vector<4x32xf32> to vector<1x32xf32>
    %c1 = arith.constant 1 : index
    %c0_13 = arith.constant 0 : index
    %c0_14 = arith.constant 0 : index
    %45 = vector.load %arg7[%c1, %c0_13, %c0_14] : memref<3x32x32xf32, #tpu.memory_space<vmem>>, vector<1x32x32xf32>
    %46 = vector.shape_cast %45 : vector<1x32x32xf32> to vector<32x32xf32>
    %cst_15 = arith.constant dense<0.000000e+00> : vector<16x32xf32>
    %47 = tpu.matmul %37, %46, %cst_15 {dimension_numbers = #tpu.dot_dimension_numbers<[1], [0], [0], [1], [0, 0, 1, 1], [], []>} : vector<16x32xf32>, vector<32x32xf32>, vector<16x32xf32> -> vector<16x32xf32>
    %48 = vector.broadcast %42 : vector<1x32xf32> to vector<16x32xf32>
    %49 = arith.addf %47, %48 : vector<16x32xf32>
    %c2 = arith.constant 2 : index
    %c0_16 = arith.constant 0 : index
    %c0_17 = arith.constant 0 : index
    %50 = vector.load %arg7[%c2, %c0_16, %c0_17] : memref<3x32x32xf32, #tpu.memory_space<vmem>>, vector<1x32x32xf32>
    %51 = vector.shape_cast %50 : vector<1x32x32xf32> to vector<32x32xf32>
    %cst_18 = arith.constant dense<0.000000e+00> : vector<16x32xf32>
    %52 = tpu.matmul %39, %51, %cst_18 {dimension_numbers = #tpu.dot_dimension_numbers<[1], [0], [0], [1], [0, 0, 1, 1], [], []>} : vector<16x32xf32>, vector<32x32xf32>, vector<16x32xf32> -> vector<16x32xf32>
    %53 = vector.broadcast %43 : vector<1x32xf32> to vector<16x32xf32>
    %54 = arith.addf %52, %53 : vector<16x32xf32>
    %c0_19 = arith.constant 0 : index
    %c0_20 = arith.constant 0 : index
    %c0_21 = arith.constant 0 : index
    %55 = vector.load %arg4[%c0_19, %c0_20, %c0_21] : memref<49x16x32xf32, #tpu.memory_space<vmem>>, vector<49x16x32xf32>
    %56 = vector.shape_cast %55 : vector<49x16x32xf32> to vector<784x32xf32>
    %c0_22 = arith.constant 0 : index
    %c0_23 = arith.constant 0 : index
    %c0_24 = arith.constant 0 : index
    %57 = vector.load %arg7[%c0_22, %c0_23, %c0_24] : memref<3x32x32xf32, #tpu.memory_space<vmem>>, vector<1x32x32xf32>
    %58 = vector.shape_cast %57 : vector<1x32x32xf32> to vector<32x32xf32>
    %cst_25 = arith.constant dense<0.000000e+00> : vector<784x32xf32>
    %59 = tpu.matmul %56, %58, %cst_25 {dimension_numbers = #tpu.dot_dimension_numbers<[1], [0], [0], [1], [0, 0, 1, 1], [], []>} : vector<784x32xf32>, vector<32x32xf32>, vector<784x32xf32> -> vector<784x32xf32>
    %60 = vector.broadcast %41 : vector<1x32xf32> to vector<784x32xf32>
    %61 = arith.addf %59, %60 : vector<784x32xf32>
    %62 = vector.shape_cast %61 : vector<784x32xf32> to vector<49x16x32xf32>
    %63 = vector.shape_cast %49 : vector<16x32xf32> to vector<1x16x32xf32>
    %64 = vector.broadcast %63 : vector<1x16x32xf32> to vector<49x16x32xf32>
    %65 = arith.addf %62, %64 : vector<49x16x32xf32>
    %66 = math.tanh %65 : vector<49x16x32xf32>
    %67 = vector.shape_cast %44 : vector<1x32xf32> to vector<1x1x32xf32>
    %68 = vector.broadcast %67 : vector<1x1x32xf32> to vector<49x16x32xf32>
    %69 = arith.mulf %66, %68 : vector<49x16x32xf32>
    %cst_26 = arith.constant dense<0.000000e+00> : vector<49x16xf32>
    %70 = vector.multi_reduction <add>, %69, %cst_26 [2] : vector<49x16x32xf32> to vector<49x16xf32>
    %71 = vector.shape_cast %70 : vector<49x16xf32> to vector<49x16x1xf32>
    %72 = arith.addf %54, %49 : vector<16x32xf32>
    %73 = math.tanh %72 : vector<16x32xf32>
    %74 = vector.broadcast %44 : vector<1x32xf32> to vector<16x32xf32>
    %75 = arith.mulf %73, %74 : vector<16x32xf32>
    %cst_27 = arith.constant dense<0.000000e+00> : vector<16xf32>
    %76 = vector.multi_reduction <add>, %75, %cst_27 [1] : vector<16x32xf32> to vector<16xf32>
    %77 = vector.shape_cast %76 : vector<16xf32> to vector<16x1xf32>
    %cst_28 = arith.constant dense<0xFF800000> : vector<16x1xf32>
    %78 = vector.multi_reduction <maximumf>, %71, %cst_28 [0] : vector<49x16x1xf32> to vector<16x1xf32>
    %79 = arith.maximumf %78, %77 : vector<16x1xf32>
    %80 = vector.shape_cast %79 : vector<16x1xf32> to vector<1x16x1xf32>
    %81 = vector.broadcast %80 : vector<1x16x1xf32> to vector<49x16x1xf32>
    %82 = arith.subf %71, %81 : vector<49x16x1xf32>
    %83 = math.exp %82 : vector<49x16x1xf32>
    %84 = arith.subf %77, %79 : vector<16x1xf32>
    %85 = math.exp %84 : vector<16x1xf32>
    %cst_29 = arith.constant dense<0.000000e+00> : vector<16x1xf32>
    %86 = vector.multi_reduction <add>, %83, %cst_29 [0] : vector<49x16x1xf32> to vector<16x1xf32>
    %87 = arith.addf %86, %85 : vector<16x1xf32>
    %88 = tpu.reciprocal %87 {approx = true} : vector<16x1xf32> -> vector<16x1xf32>
    %89 = vector.shape_cast %88 : vector<16x1xf32> to vector<1x16x1xf32>
    %90 = vector.broadcast %89 : vector<1x16x1xf32> to vector<49x16x1xf32>
    %91 = arith.mulf %83, %90 : vector<49x16x1xf32>
    %92 = arith.mulf %85, %88 : vector<16x1xf32>
    %93 = vector.broadcast %91 : vector<49x16x1xf32> to vector<49x16x32xf32>
    %94 = arith.mulf %93, %55 : vector<49x16x32xf32>
    %cst_30 = arith.constant dense<0.000000e+00> : vector<16x32xf32>
    %95 = vector.multi_reduction <add>, %94, %cst_30 [0] : vector<49x16x32xf32> to vector<16x32xf32>
    %96 = vector.broadcast %92 : vector<16x1xf32> to vector<16x32xf32>
    %97 = arith.mulf %96, %39 : vector<16x32xf32>
    %98 = arith.addf %95, %97 : vector<16x32xf32>
    %99 = arith.addf %37, %98 : vector<16x32xf32>
    %cst_31 = arith.constant 0.707106769 : f32
    %100 = vector.broadcast %cst_31 : f32 to vector<16x32xf32>
    %101 = arith.mulf %99, %100 : vector<16x32xf32>
    %c0_32 = arith.constant 0 : index
    %c0_33 = arith.constant 0 : index
    %102 = vector.load %arg11[%c0_32, %c0_33] : memref<16x32xf32, #tpu.memory_space<vmem>>, vector<16x32xf32>
    tpu.vector_store %arg11[%c0_32, %c0_33], %101 {strides = array<i32>} : memref<16x32xf32, #tpu.memory_space<vmem>>, vector<16x32xf32>,
    %c0_34 = arith.constant 0 : index
    %c0_35 = arith.constant 0 : index
    %103 = vector.load %arg9[%c0_34, %c0_35] : memref<16x32xf32, #tpu.memory_space<vmem>>, vector<16x32xf32>
    tpu.vector_store %arg9[%c0_34, %c0_35], %37 {strides = array<i32>} : memref<16x32xf32, #tpu.memory_space<vmem>>, vector<16x32xf32>,
    %c0_36 = arith.constant 0 : index
    %c0_37 = arith.constant 0 : index
    %104 = vector.load %arg10[%c0_36, %c0_37] : memref<16x32xf32, #tpu.memory_space<vmem>>, vector<16x32xf32>
    tpu.vector_store %arg10[%c0_36, %c0_37], %35 {strides = array<i32>} : memref<16x32xf32, #tpu.memory_space<vmem>>, vector<16x32xf32>,
    return
  }
  func.func @transform_0(%arg0: i32) -> (i32, i32) {
    %c0_i32 = arith.constant 0 : i32
    %c0_i32_0 = arith.constant 0 : i32
    return %arg0, %c0_i32 : i32, i32
  }
  func.func @transform_1(%arg0: i32) -> (i32, i32) {
    %c0_i32 = arith.constant 0 : i32
    %c0_i32_0 = arith.constant 0 : i32
    return %arg0, %c0_i32 : i32, i32
  }
  func.func @transform_2(%arg0: i32) -> (i32, i32) {
    %c0_i32 = arith.constant 0 : i32
    %c0_i32_0 = arith.constant 0 : i32
    return %arg0, %c0_i32 : i32, i32
  }
  func.func @transform_3(%arg0: i32) -> (i32, i32, i32) {
    %c0_i32 = arith.constant 0 : i32
    %c0_i32_0 = arith.constant 0 : i32
    %c0_i32_1 = arith.constant 0 : i32
    return %c0_i32, %arg0, %c0_i32_0 : i32, i32, i32
  }
  func.func @transform_4(%arg0: i32) -> (i32, i32) {
    %c0_i32 = arith.constant 0 : i32
    %c0_i32_0 = arith.constant 0 : i32
    %c0_i32_1 = arith.constant 0 : i32
    return %c0_i32, %c0_i32_0 : i32, i32
  }
  func.func @transform_5(%arg0: i32) -> (i32, i32) {
    %c0_i32 = arith.constant 0 : i32
    %c0_i32_0 = arith.constant 0 : i32
    %c0_i32_1 = arith.constant 0 : i32
    return %c0_i32, %c0_i32_0 : i32, i32
  }
  func.func @transform_6(%arg0: i32) -> (i32, i32, i32) {
    %c0_i32 = arith.constant 0 : i32
    %c0_i32_0 = arith.constant 0 : i32
    %c0_i32_1 = arith.constant 0 : i32
    %c0_i32_2 = arith.constant 0 : i32
    return %c0_i32, %c0_i32_0, %c0_i32_1 : i32, i32, i32
  }
  func.func @transform_7(%arg0: i32) -> (i32, i32) {
    %c0_i32 = arith.constant 0 : i32
    %c0_i32_0 = arith.constant 0 : i32
    %c0_i32_1 = arith.constant 0 : i32
    return %c0_i32, %c0_i32_0 : i32, i32
  }
  func.func @transform_8(%arg0: i32) -> (i32, i32) {
    %c0_i32 = arith.constant 0 : i32
    %c0_i32_0 = arith.constant 0 : i32
    return %arg0, %c0_i32 : i32, i32
  }
  func.func @transform_9(%arg0: i32) -> (i32, i32) {
    %c0_i32 = arith.constant 0 : i32
    %c0_i32_0 = arith.constant 0 : i32
    return %arg0, %c0_i32 : i32, i32
  }
  func.func @transform_10(%arg0: i32) -> (i32, i32) {
    %c0_i32 = arith.constant 0 : i32
    %c0_i32_0 = arith.constant 0 : i32
    return %arg0, %c0_i32 : i32, i32
  }
}

module attributes {stable_mosaic.version = 11 : i64} {
  func.func @state_attn_kernel(%arg0: i32, %arg1: memref<16x96xf32, #tpu.memory_space<vmem>>, %arg2: memref<16x32xf32, #tpu.memory_space<vmem>>, %arg3: memref<16x32xf32, #tpu.memory_space<vmem>>, %arg4: memref<49x16x32xf32, #tpu.memory_space<vmem>>, %arg5: memref<96x160xf32, #tpu.memory_space<vmem>>, %arg6: memref<1x160xf32, #tpu.memory_space<vmem>>, %arg7: memref<3x32x32xf32, #tpu.memory_space<vmem>>, %arg8: memref<4x32xf32, #tpu.memory_space<vmem>>, %arg9: memref<16x32xf32, #tpu.memory_space<vmem>>, %arg10: memref<16x32xf32, #tpu.memory_space<vmem>>, %arg11: memref<16x32xf32, #tpu.memory_space<vmem>>) attributes {dimension_semantics = [#tpu.dimension_semantics<parallel>], iteration_bounds = array<i64: 1>, scalar_prefetch = 0 : i64, scratch_operands = 0 : i64, tpu.core_type = #tpu.core_type<tc>, window_params = [{transform_indices = @transform_0, window_bounds = array<i64: 16, 96>}, {transform_indices = @transform_1, window_bounds = array<i64: 16, 32>}, {transform_indices = @transform_2, window_bounds = array<i64: 16, 32>}, {transform_indices = @transform_3, window_bounds = array<i64: 49, 16, 32>}, {pipeline_mode = #tpu.pipeline_mode<synchronous>, transform_indices = @transform_4, window_bounds = array<i64: 96, 160>}, {pipeline_mode = #tpu.pipeline_mode<synchronous>, transform_indices = @transform_5, window_bounds = array<i64: 1, 160>}, {pipeline_mode = #tpu.pipeline_mode<synchronous>, transform_indices = @transform_6, window_bounds = array<i64: 3, 32, 32>}, {pipeline_mode = #tpu.pipeline_mode<synchronous>, transform_indices = @transform_7, window_bounds = array<i64: 4, 32>}, {transform_indices = @transform_8, window_bounds = array<i64: 16, 32>}, {transform_indices = @transform_9, window_bounds = array<i64: 16, 32>}, {transform_indices = @transform_10, window_bounds = array<i64: 16, 32>}]} {
    %c0 = arith.constant 0 : index
    %c0_0 = arith.constant 0 : index
    %0 = vector.load %arg1[%c0, %c0_0] : memref<16x96xf32, #tpu.memory_space<vmem>>, vector<16x96xf32>
    %c0_1 = arith.constant 0 : index
    %c0_2 = arith.constant 0 : index
    %1 = vector.load %arg3[%c0_1, %c0_2] : memref<16x32xf32, #tpu.memory_space<vmem>>, vector<16x32xf32>
    %c0_3 = arith.constant 0 : index
    %c0_4 = arith.constant 0 : index
    %2 = vector.load %arg5[%c0_3, %c0_4] : memref<96x160xf32, #tpu.memory_space<vmem>>, vector<96x160xf32>
    %cst = arith.constant dense<0.000000e+00> : vector<16x160xf32>
    %3 = tpu.matmul %0, %2, %cst {dimension_numbers = #tpu.dot_dimension_numbers<[1], [0], [0], [1], [0, 0, 1, 1], [], []>} : vector<16x96xf32>, vector<96x160xf32>, vector<16x160xf32> -> vector<16x160xf32>
    %c0_5 = arith.constant 0 : index
    %c0_6 = arith.constant 0 : index
    %4 = vector.load %arg6[%c0_5, %c0_6] : memref<1x160xf32, #tpu.memory_space<vmem>>, vector<1x160xf32>
    %5 = vector.broadcast %4 : vector<1x160xf32> to vector<16x160xf32>
    %6 = arith.addf %3, %5 : vector<16x160xf32>
    %7 = vector.extract_strided_slice %6 {offsets = [0, 0], sizes = [16, 32], strides = [1, 1]} : vector<16x160xf32> to vector<16x32xf32>
    %8 = arith.negf %7 : vector<16x32xf32>
    %9 = math.exp %8 : vector<16x32xf32>
    %cst_7 = arith.constant 1.000000e+00 : f32
    %10 = vector.broadcast %cst_7 : f32 to vector<16x32xf32>
    %11 = arith.addf %10, %9 : vector<16x32xf32>
    %12 = arith.divf %10, %11 : vector<16x32xf32>
    %13 = vector.extract_strided_slice %6 {offsets = [0, 32], sizes = [16, 32], strides = [1, 1]} : vector<16x160xf32> to vector<16x32xf32>
    %14 = arith.negf %13 : vector<16x32xf32>
    %15 = math.exp %14 : vector<16x32xf32>
    %cst_8 = arith.constant 1.000000e+00 : f32
    %16 = vector.broadcast %cst_8 : f32 to vector<16x32xf32>
    %17 = arith.addf %16, %15 : vector<16x32xf32>
    %18 = arith.divf %16, %17 : vector<16x32xf32>
    %19 = vector.extract_strided_slice %6 {offsets = [0, 64], sizes = [16, 32], strides = [1, 1]} : vector<16x160xf32> to vector<16x32xf32>
    %20 = math.tanh %19 : vector<16x32xf32>
    %21 = vector.extract_strided_slice %6 {offsets = [0, 96], sizes = [16, 32], strides = [1, 1]} : vector<16x160xf32> to vector<16x32xf32>
    %22 = arith.negf %21 : vector<16x32xf32>
    %23 = math.exp %22 : vector<16x32xf32>
    %cst_9 = arith.constant 1.000000e+00 : f32
    %24 = vector.broadcast %cst_9 : f32 to vector<16x32xf32>
    %25 = arith.addf %24, %23 : vector<16x32xf32>
    %26 = arith.divf %24, %25 : vector<16x32xf32>
    %27 = vector.extract_strided_slice %6 {offsets = [0, 128], sizes = [16, 32], strides = [1, 1]} : vector<16x160xf32> to vector<16x32xf32>
    %28 = arith.negf %27 : vector<16x32xf32>
    %29 = math.exp %28 : vector<16x32xf32>
    %cst_10 = arith.constant 1.000000e+00 : f32
    %30 = vector.broadcast %cst_10 : f32 to vector<16x32xf32>
    %31 = arith.addf %30, %29 : vector<16x32xf32>
    %32 = arith.divf %30, %31 : vector<16x32xf32>
    %33 = arith.mulf %18, %1 : vector<16x32xf32>
    %34 = arith.mulf %12, %20 : vector<16x32xf32>
    %35 = arith.addf %33, %34 : vector<16x32xf32>
    %36 = math.tanh %35 : vector<16x32xf32>
    %37 = arith.mulf %26, %36 : vector<16x32xf32>
    %38 = math.tanh %35 : vector<16x32xf32>
    %39 = arith.mulf %32, %38 : vector<16x32xf32>
    %c0_11 = arith.constant 0 : index
    %c0_12 = arith.constant 0 : index
    %40 = vector.load %arg8[%c0_11, %c0_12] : memref<4x32xf32, #tpu.memory_space<vmem>>, vector<4x32xf32>
    %41 = vector.extract_strided_slice %40 {offsets = [0, 0], sizes = [1, 32], strides = [1, 1]} : vector<4x32xf32> to vector<1x32xf32>
    %42 = vector.extract_strided_slice %40 {offsets = [1, 0], sizes = [1, 32], strides = [1, 1]} : vector<4x32xf32> to vector<1x32xf32>
    %43 = vector.extract_strided_slice %40 {offsets = [2, 0], sizes = [1, 32], strides = [1, 1]} : vector<4x32xf32> to vector<1x32xf32>
    %44 = vector.extract_strided_slice %40 {offsets = [3, 0], sizes = [1, 32], strides = [1, 1]} : vector<4x32xf32> to vector<1x32xf32>
    %c1 = arith.constant 1 : index
    %c0_13 = arith.constant 0 : index
    %c0_14 = arith.constant 0 : index
    %45 = vector.load %arg7[%c1, %c0_13, %c0_14] : memref<3x32x32xf32, #tpu.memory_space<vmem>>, vector<1x32x32xf32>
    %46 = vector.shape_cast %45 : vector<1x32x32xf32> to vector<32x32xf32>
    %cst_15 = arith.constant dense<0.000000e+00> : vector<16x32xf32>
    %47 = tpu.matmul %37, %46, %cst_15 {dimension_numbers = #tpu.dot_dimension_numbers<[1], [0], [0], [1], [0, 0, 1, 1], [], []>} : vector<16x32xf32>, vector<32x32xf32>, vector<16x32xf32> -> vector<16x32xf32>
    %48 = vector.broadcast %42 : vector<1x32xf32> to vector<16x32xf32>
    %49 = arith.addf %47, %48 : vector<16x32xf32>
    %c2 = arith.constant 2 : index
    %c0_16 = arith.constant 0 : index
    %c0_17 = arith.constant 0 : index
    %50 = vector.load %arg7[%c2, %c0_16, %c0_17] : memref<3x32x32xf32, #tpu.memory_space<vmem>>, vector<1x32x32xf32>
    %51 = vector.shape_cast %50 : vector<1x32x32xf32> to vector<32x32xf32>
    %cst_18 = arith.constant dense<0.000000e+00> : vector<16x32xf32>
    %52 = tpu.matmul %39, %51, %cst_18 {dimension_numbers = #tpu.dot_dimension_numbers<[1], [0], [0], [1], [0, 0, 1, 1], [], []>} : vector<16x32xf32>, vector<32x32xf32>, vector<16x32xf32> -> vector<16x32xf32>
    %53 = vector.broadcast %43 : vector<1x32xf32> to vector<16x32xf32>
    %54 = arith.addf %52, %53 : vector<16x32xf32>
    %c0_19 = arith.constant 0 : index
    %c0_20 = arith.constant 0 : index
    %c0_21 = arith.constant 0 : index
    %55 = vector.load %arg4[%c0_19, %c0_20, %c0_21] : memref<49x16x32xf32, #tpu.memory_space<vmem>>, vector<49x16x32xf32>
    %56 = vector.shape_cast %55 : vector<49x16x32xf32> to vector<784x32xf32>
    %c0_22 = arith.constant 0 : index
    %c0_23 = arith.constant 0 : index
    %c0_24 = arith.constant 0 : index
    %57 = vector.load %arg7[%c0_22, %c0_23, %c0_24] : memref<3x32x32xf32, #tpu.memory_space<vmem>>, vector<1x32x32xf32>
    %58 = vector.shape_cast %57 : vector<1x32x32xf32> to vector<32x32xf32>
    %cst_25 = arith.constant dense<0.000000e+00> : vector<784x32xf32>
    %59 = tpu.matmul %56, %58, %cst_25 {dimension_numbers = #tpu.dot_dimension_numbers<[1], [0], [0], [1], [0, 0, 1, 1], [], []>} : vector<784x32xf32>, vector<32x32xf32>, vector<784x32xf32> -> vector<784x32xf32>
    %60 = vector.broadcast %41 : vector<1x32xf32> to vector<784x32xf32>
    %61 = arith.addf %59, %60 : vector<784x32xf32>
    %62 = vector.shape_cast %61 : vector<784x32xf32> to vector<49x16x32xf32>
    %63 = vector.shape_cast %49 : vector<16x32xf32> to vector<1x16x32xf32>
    %64 = vector.broadcast %63 : vector<1x16x32xf32> to vector<49x16x32xf32>
    %65 = arith.addf %62, %64 : vector<49x16x32xf32>
    %66 = math.tanh %65 : vector<49x16x32xf32>
    %67 = vector.shape_cast %44 : vector<1x32xf32> to vector<1x1x32xf32>
    %68 = vector.broadcast %67 : vector<1x1x32xf32> to vector<49x16x32xf32>
    %69 = arith.mulf %66, %68 : vector<49x16x32xf32>
    %cst_26 = arith.constant dense<0.000000e+00> : vector<49x16xf32>
    %70 = vector.multi_reduction <add>, %69, %cst_26 [2] : vector<49x16x32xf32> to vector<49x16xf32>
    %71 = vector.shape_cast %70 : vector<49x16xf32> to vector<49x16x1xf32>
    %72 = arith.addf %54, %49 : vector<16x32xf32>
    %73 = math.tanh %72 : vector<16x32xf32>
    %74 = vector.broadcast %44 : vector<1x32xf32> to vector<16x32xf32>
    %75 = arith.mulf %73, %74 : vector<16x32xf32>
    %cst_27 = arith.constant dense<0.000000e+00> : vector<16xf32>
    %76 = vector.multi_reduction <add>, %75, %cst_27 [1] : vector<16x32xf32> to vector<16xf32>
    %77 = vector.shape_cast %76 : vector<16xf32> to vector<16x1xf32>
    %cst_28 = arith.constant dense<0xFF800000> : vector<16x1xf32>
    %78 = vector.multi_reduction <maximumf>, %71, %cst_28 [0] : vector<49x16x1xf32> to vector<16x1xf32>
    %79 = arith.maximumf %78, %77 : vector<16x1xf32>
    %80 = vector.shape_cast %79 : vector<16x1xf32> to vector<1x16x1xf32>
    %81 = vector.broadcast %80 : vector<1x16x1xf32> to vector<49x16x1xf32>
    %82 = arith.subf %71, %81 : vector<49x16x1xf32>
    %83 = math.exp %82 : vector<49x16x1xf32>
    %84 = arith.subf %77, %79 : vector<16x1xf32>
    %85 = math.exp %84 : vector<16x1xf32>
    %cst_29 = arith.constant dense<0.000000e+00> : vector<16x1xf32>
    %86 = vector.multi_reduction <add>, %83, %cst_29 [0] : vector<49x16x1xf32> to vector<16x1xf32>
    %87 = arith.addf %86, %85 : vector<16x1xf32>
    %88 = tpu.reciprocal %87 {approx = true} : vector<16x1xf32> -> vector<16x1xf32>
    %89 = vector.shape_cast %88 : vector<16x1xf32> to vector<1x16x1xf32>
    %90 = vector.broadcast %89 : vector<1x16x1xf32> to vector<49x16x1xf32>
    %91 = arith.mulf %83, %90 : vector<49x16x1xf32>
    %92 = arith.mulf %85, %88 : vector<16x1xf32>
    %93 = vector.broadcast %91 : vector<49x16x1xf32> to vector<49x16x32xf32>
    %94 = arith.mulf %93, %55 : vector<49x16x32xf32>
    %cst_30 = arith.constant dense<0.000000e+00> : vector<16x32xf32>
    %95 = vector.multi_reduction <add>, %94, %cst_30 [0] : vector<49x16x32xf32> to vector<16x32xf32>
    %96 = vector.broadcast %92 : vector<16x1xf32> to vector<16x32xf32>
    %97 = arith.mulf %96, %39 : vector<16x32xf32>
    %98 = arith.addf %95, %97 : vector<16x32xf32>
    %99 = arith.addf %37, %98 : vector<16x32xf32>
    %cst_31 = arith.constant 0.707106769 : f32
    %100 = vector.broadcast %cst_31 : f32 to vector<16x32xf32>
    %101 = arith.mulf %99, %100 : vector<16x32xf32>
    %c0_32 = arith.constant 0 : index
    %c0_33 = arith.constant 0 : index
    %102 = vector.load %arg11[%c0_32, %c0_33] : memref<16x32xf32, #tpu.memory_space<vmem>>, vector<16x32xf32>
    tpu.vector_store %arg11[%c0_32, %c0_33], %101 {strides = array<i32>} : memref<16x32xf32, #tpu.memory_space<vmem>>, vector<16x32xf32>,
    %c0_34 = arith.constant 0 : index
    %c0_35 = arith.constant 0 : index
    %103 = vector.load %arg9[%c0_34, %c0_35] : memref<16x32xf32, #tpu.memory_space<vmem>>, vector<16x32xf32>
    tpu.vector_store %arg9[%c0_34, %c0_35], %37 {strides = array<i32>} : memref<16x32xf32, #tpu.memory_space<vmem>>, vector<16x32xf32>,
    %c0_36 = arith.constant 0 : index
    %c0_37 = arith.constant 0 : index
    %104 = vector.load %arg10[%c0_36, %c0_37] : memref<16x32xf32, #tpu.memory_space<vmem>>, vector<16x32xf32>
    tpu.vector_store %arg10[%c0_36, %c0_37], %35 {strides = array<i32>} : memref<16x32xf32, #tpu.memory_space<vmem>>, vector<16x32xf32>,
    return
  }
  func.func @transform_0(%arg0: i32) -> (i32, i32) {
    %c0_i32 = arith.constant 0 : i32
    %c0_i32_0 = arith.constant 0 : i32
    return %arg0, %c0_i32 : i32, i32
  }
  func.func @transform_1(%arg0: i32) -> (i32, i32) {
    %c0_i32 = arith.constant 0 : i32
    %c0_i32_0 = arith.constant 0 : i32
    return %arg0, %c0_i32 : i32, i32
  }
  func.func @transform_2(%arg0: i32) -> (i32, i32) {
    %c0_i32 = arith.constant 0 : i32
    %c0_i32_0 = arith.constant 0 : i32
    return %arg0, %c0_i32 : i32, i32
  }
  func.func @transform_3(%arg0: i32) -> (i32, i32, i32) {
    %c0_i32 = arith.constant 0 : i32
    %c0_i32_0 = arith.constant 0 : i32
    %c0_i32_1 = arith.constant 0 : i32
    return %c0_i32, %arg0, %c0_i32_0 : i32, i32, i32
  }
  func.func @transform_4(%arg0: i32) -> (i32, i32) {
    %c0_i32 = arith.constant 0 : i32
    %c0_i32_0 = arith.constant 0 : i32
    %c0_i32_1 = arith.constant 0 : i32
    return %c0_i32, %c0_i32_0 : i32, i32
  }
  func.func @transform_5(%arg0: i32) -> (i32, i32) {
    %c0_i32 = arith.constant 0 : i32
    %c0_i32_0 = arith.constant 0 : i32
    %c0_i32_1 = arith.constant 0 : i32
    return %c0_i32, %c0_i32_0 : i32, i32
  }
  func.func @transform_6(%arg0: i32) -> (i32, i32, i32) {
    %c0_i32 = arith.constant 0 : i32
    %c0_i32_0 = arith.constant 0 : i32
    %c0_i32_1 = arith.constant 0 : i32
    %c0_i32_2 = arith.constant 0 : i32
    return %c0_i32, %c0_i32_0, %c0_i32_1 : i32, i32, i32
  }
  func.func @transform_7(%arg0: i32) -> (i32, i32) {
    %c0_i32 = arith.constant 0 : i32
    %c0_i32_0 = arith.constant 0 : i32
    %c0_i32_1 = arith.constant 0 : i32
    return %c0_i32, %c0_i32_0 : i32, i32
  }
  func.func @transform_8(%arg0: i32) -> (i32, i32) {
    %c0_i32 = arith.constant 0 : i32
    %c0_i32_0 = arith.constant 0 : i32
    return %arg0, %c0_i32 : i32, i32
  }
  func.func @transform_9(%arg0: i32) -> (i32, i32) {
    %c0_i32 = arith.constant 0 : i32
    %c0_i32_0 = arith.constant 0 : i32
    return %arg0, %c0_i32 : i32, i32
  }
  func.func @transform_10(%arg0: i32) -> (i32, i32) {
    %c0_i32 = arith.constant 0 : i32
    %c0_i32_0 = arith.constant 0 : i32
    return %arg0, %c0_i32 : i32, i32
  }
}

</mosaic_0001>

<bundles_post_ra>
// kernel: tpu_custom_call.1
= control target key start
LH: loop header
LB: loop body
LE: loop exit
PB: predicated region body
PF: predicated region fallthrough
CT: control target
= control target key end

     0   :  { %16 = vsyncpa [#allocation3], 0  ;;  %v3971_v4 = vmov 0.0   ;;  %s3972_s17 = smov 32   ;;  %s6906_s0 = inlined_call_operand.vmem [shape: f32[16,96], index: 0, kind: input, shape index: {}]   ;;  %s6907_s1 = inlined_call_operand.vmem [shape: f32[16,32], index: 1, kind: input, shape index: {}]   ;;  %s6908_s2 = inlined_call_operand.vmem [shape: f32[16,32], index: 2, kind: input, shape index: {}]   ;;  %s6909_s3 = inlined_call_operand.vmem [shape: f32[49,16,32], index: 3, kind: input, shape index: {}]   ;;  %s6910_s4 = inlined_call_operand.vmem [shape: f32[96,160], index: 4, kind: input, shape index: {}]   ;;  %s6911_s5 = inlined_call_operand.vmem [shape: f32[1,160], index: 5, kind: input, shape index: {}]   ;;  %s6912_s6 = inlined_call_operand.vmem [shape: f32[3,32,32], index: 6, kind: input, shape index: {}]   ;;  %s6913_s7 = inlined_call_operand.vmem [shape: f32[4,32], index: 7, kind: input, shape index: {}]   ;;  %s6914_s8 = inlined_call_operand.hbm [shape: f32[16,32], index: 8, kind: output, shape index: {0}]   ;;  %s6915_s9 = inlined_call_operand.hbm [shape: f32[16,32], index: 9, kind: output, shape index: {1}]   ;;  %s6916_s10 = inlined_call_operand.hbm [shape: f32[16,32], index: 10, kind: output, shape index: {2}]  }
   0x1   :  { %v61_v0 = vld [vmem:[%s6910_s4 + $0xb8] sm:$0xff]  ;;  %v60_v1 = vld [vmem:[%s6910_s4 + $0xb0] sm:$0xff]  ;;  %v59_v2 = vld [vmem:[%s6910_s4 + $0xa8] sm:$0xff]  ;;  %145 = vmatprep.mubr.f32.mxu0 %v3971_v4 }
   0x2   :  { %89 = vmatprep.subr.mxu0 %v61_v0  ;;  %v58_v3 = vld [vmem:[%s6910_s4 + $0xa0] sm:$0xff]  ;;  %v57_v5 = vld [vmem:[%s6910_s4 + $0x98] sm:$0xff]  ;;  %v56_v6 = vld [vmem:[%s6910_s4 + $0x90] sm:$0xff] }
   0x3   :  { %90 = vmatpush1.msra.mxu0 %v60_v1  ;;  %v55_v7 = vld [vmem:[%s6910_s4 + $0x88] sm:$0xff]  ;;  %v54_v8 = vld [vmem:[%s6910_s4 + $0x80] sm:$0xff]  ;;  %v53_v9 = vld [vmem:[%s6910_s4 + $0x78] sm:$0xff] }
   0x4   :  { %91 = vmatprep.subr.mxu0 %v59_v2  ;;  %v52_v10 = vld [vmem:[%s6910_s4 + $0x70] sm:$0xff]  ;;  %v51_v11 = vld [vmem:[%s6910_s4 + $0x68] sm:$0xff]  ;;  %v36_v12 = vld [vmem:[%s6908_s2] sm:$0xff] }
   0x5   :  { %92 = vmatpush1.msra.mxu0 %v58_v3  ;;  %v50_v13 = vld [vmem:[%s6910_s4 + $0x60] sm:$0xff]  ;;  %186 = vrot.lane.b32.xlu1 %v36_v12, %s3972_s17 }
   0x6   :  { %93 = vmatprep.subr.mxu0 %v57_v5 }
   0x7   :  { %94 = vmatpush1.msra.mxu0 %v56_v6 }
   0x8   :  { %95 = vmatprep.subr.mxu0 %v55_v7 }
   0x9   :  { %96 = vmatpush1.msra.mxu0 %v54_v8 }
   0xa   :  { %97 = vmatprep.subr.mxu0 %v53_v9 }
   0xb   :  { %17 = vsyncpa [#allocation5], 0  ;;  %98 = vmatpush1.msra.mxu0 %v52_v10  ;;  %v49_v14 = vld [vmem:[%s6910_s4 + $0x58] sm:$0xff]  ;;  %v37_v15 = vld [vmem:[%s6908_s2 + $0x8] sm:$0xff]  ;;  %vm74_vm0 = vcmask 785408   ;;  %v64_v29 = vlaneseq  ;;  %vm250_vm1 = vcmask 261120  }
   0xc   :  { %99 = vmatprep.subr.mxu0 %v51_v11  ;;  %v48_v16 = vld [vmem:[%s6910_s4 + $0x50] sm:$0xff]  ;;  %v47_v17 = vld [vmem:[%s6910_s4 + $0x48] sm:$0xff]  ;;  %v46_v18 = vld [vmem:[%s6910_s4 + $0x40] sm:$0xff]  ;;  %188 = vrot.lane.b32.xlu1 %v37_v15, %s3972_s17  ;;  %s3974_s20 = smov 96   ;;  %s3976_s30 = smov [#allocation2]  }
   0xd   :  { %100 = vmatpush1.msra.mxu0 %v50_v13  ;;  %v45_v19 = vld [vmem:[%s6910_s4 + $0x38] sm:$0xff]  ;;  %v44_v20 = vld [vmem:[%s6910_s4 + $0x30] sm:$0xff]  ;;  %v43_v21 = vld [vmem:[%s6910_s4 + $0x28] sm:$0xff]  ;;  %v4121_v30 = vshrl.u32 %v64_v29, 7  ;;  %s2914_s11 = sshll.u32 %s3976_s30, 4  ;;  %s2915_s11 = int_to_ptr.vmem [resolvable:$true] %s2914_s11 }
   0xe   :  { %101 = vmatprep.subr.mxu0 %v49_v14  ;;  %v42_v22 = vld [vmem:[%s6910_s4 + $0x20] sm:$0xff]  ;;  %v41_v23 = vld [vmem:[%s6910_s4 + $0x18] sm:$0xff]  ;;  %v40_v24 = vld [vmem:[%s6910_s4 + $0x10] sm:$0xff] }
   0xf   :  { %102 = vmatpush1.msra.mxu0 %v48_v16  ;;  %v39_v25 = vld [vmem:[%s6910_s4 + $0x8] sm:$0xff]  ;;  %v38_v26 = vld [vmem:[%s6910_s4] sm:$0xff]  ;;  %v66_v31 = vsub.s32 0, %v4121_v30  ;;  %v4155_v61 = vld [vmem:[%s6912_s6 + $0x18] sm:$0xff] }
  0x10   :  { %103 = vmatprep.subr.mxu0 %v47_v17  ;;  %v34_v27 = vld [vmem:[%s6906_s0] sm:$0xff]  ;;  %v35_v28 = vld [vmem:[%s6906_s0 + $0x8] sm:$0xff]  ;;  %s3973_s0 = smov 64   ;;  %v4160_v62 = vld [vmem:[%s6912_s6 + $0x10] sm:$0xff] }
  0x11   :  { %104 = vmatpush1.msra.mxu0 %v46_v18  ;;  %v4127_v32 = vld [vmem:[%s6911_s5] sm:$0x3]  ;;  %v4174_v1 = vld [vmem:[%s6912_s6 + $0x8] sm:$0xff]  ;;  %v422_v5 = vld [vmem:[%s6909_s3 + $0x10] sm:$0xff] }
  0x12   :  { %105 = vmatprep.subr.mxu0 %v45_v19  ;;  %v67_v33 = vrot.slane %v4127_v32, %v66_v31  ;;  %v420_v0 = vld [vmem:[%s6909_s3] sm:$0xff]  ;;  %v423_v6 = vld [vmem:[%s6909_s3 + $0x18] sm:$0xff]  ;;  %v425_v8 = vld [vmem:[%s6909_s3 + $0x28] sm:$0xff] }
  0x13   :  { %106 = vmatpush1.msra.mxu0 %v44_v20  ;;  %v4182_v2 = vld [vmem:[%s6912_s6] sm:$0xff]  ;;  %v2965_v9 = vld [vmem:[%s6912_s6 + $0x38] sm:$0xff]  ;;  %v426_v10 = vld [vmem:[%s6909_s3 + $0x30] sm:$0xff] }
  0x14   :  { %107 = vmatprep.subr.mxu0 %v43_v21  ;;  %v424_v7 = vld [vmem:[%s6909_s3 + $0x20] sm:$0xff]  ;;  %3186 = vmatprep.subr.mxu1 %v2965_v9  ;;  %v2964_v11 = vld [vmem:[%s6912_s6 + $0x30] sm:$0xff]  ;;  %v2963_v12 = vld [vmem:[%s6912_s6 + $0x28] sm:$0xff] }
  0x15   :  { %108 = vmatpush1.msra.mxu0 %v42_v22  ;;  %3187 = vmatpush3.msra.mxu1 %v2965_v9  ;;  %v427_v13 = vld [vmem:[%s6909_s3 + $0x38] sm:$0xff]  ;;  %v428_v14 = vld [vmem:[%s6909_s3 + $0x40] sm:$0xff]  ;;  %v429_v15 = vld [vmem:[%s6909_s3 + $0x48] sm:$0xff] }
  0x16   :  { %109 = vmatprep.subr.mxu0 %v41_v23  ;;  %3188 = vmatprep.subr.mxu1 %v2964_v11  ;;  %v430_v16 = vld [vmem:[%s6909_s3 + $0x50] sm:$0xff]  ;;  %v431_v17 = vld [vmem:[%s6909_s3 + $0x58] sm:$0xff]  ;;  %v432_v18 = vld [vmem:[%s6909_s3 + $0x60] sm:$0xff] }
  0x17   :  { %110 = vmatpush1.msra.mxu0 %v40_v24  ;;  %3189 = vmatpush3.msra.mxu1 %v2964_v11  ;;  %v433_v19 = vld [vmem:[%s6909_s3 + $0x68] sm:$0xff]  ;;  %v434_v20 = vld [vmem:[%s6909_s3 + $0x70] sm:$0xff]  ;;  %v435_v21 = vld [vmem:[%s6909_s3 + $0x78] sm:$0xff] }
  0x18   :  { %111 = vmatprep.subr.mxu0 %v39_v25  ;;  %3190 = vmatprep.subr.mxu1 %v2963_v12  ;;  %v436_v22 = vld [vmem:[%s6909_s3 + $0x80] sm:$0xff]  ;;  %v437_v23 = vld [vmem:[%s6909_s3 + $0x88] sm:$0xff]  ;;  %v438_v24 = vld [vmem:[%s6909_s3 + $0x90] sm:$0xff] }
  0x19   :  { %112 = vmatpush1.msra.mxu0 %v38_v26  ;;  %3191 = vmatpush3.msra.mxu1 %v2963_v12  ;;  %v439_v25 = vld [vmem:[%s6909_s3 + $0x98] sm:$0xff]  ;;  %v440_v26 = vld [vmem:[%s6909_s3 + $0xa0] sm:$0xff] }
  0x1a   :  { %2956 = vmatmul.mubr.msk.f32.vlgmr.msra.gmra.mxu0 %vm74_vm0, %v34_v27  ;;  %3208 = vmatprep.subr.mxu0 %v4155_v61  ;;  %v441_v27 = vld [vmem:[%s6909_s3 + $0xa8] sm:$0xff]  ;;  %v443_v29 = vld [vmem:[%s6909_s3 + $0xb8] sm:$0xff] }
  0x1b   :  { %151 = vmatprep.mubr.f32.mxu0 %v3971_v4  ;;  %3209 = vmatpush3.msra.mxu0 %v4155_v61  ;;  %v421_v4 = vld [vmem:[%s6909_s3 + $0x8] sm:$0xff] }
  0x1c   :  { %3210 = vmatprep.subr.mxu0 %v4160_v62 }
  0x1d   :  { %3211 = vmatpush3.msra.mxu0 %v4160_v62 }
  0x1e   :  { %2957 = vmatmul.mubr.msk.f32.gmra.mxu0 %vm74_vm0, %v35_v28  ;;  %3212 = vmatprep.subr.mxu0 %v4174_v1  ;;  %v442_v28 = vld [vmem:[%s6909_s3 + $0xb0] sm:$0xff] }
  0x1f   :  { %3216 = vmatprep.mubr.msk.f32.mxu0 %vm250_vm1, %v420_v0  ;;  %3213 = vmatpush3.msra.mxu0 %v4174_v1  ;;  %v465_v0 = vld [vmem:[%s6909_s3 + $0x168] sm:$0xff] }
  0x20   :  { %3214 = vmatprep.subr.mxu0 %v4182_v2 }
  0x21   :  { %3215 = vmatpush3.msra.mxu0 %v4182_v2 }
  0x22   :  { %3217 = vmatmul.mubr.msk.f32.vlgmr.msra.gmra.mxu0 %vm250_vm1, %v421_v4 }
  0x23   :  { %3219 = vmatprep.mubr.msk.f32.mxu0 %vm250_vm1, %v422_v5 }
  0x26   :  { %3220 = vmatmul.mubr.msk.f32.gmra.mxu0 %vm250_vm1, %v423_v6 }
  0x27   :  { %3222 = vmatprep.mubr.msk.f32.mxu0 %vm250_vm1, %v424_v7 }
  0x2a   :  { %3223 = vmatmul.mubr.msk.f32.gmra.mxu0 %vm250_vm1, %v425_v8 }
  0x2b   :  { %3225 = vmatprep.mubr.msk.f32.mxu0 %vm250_vm1, %v426_v10 }
  0x2e   :  { %3226 = vmatmul.mubr.msk.f32.gmra.mxu0 %vm250_vm1, %v427_v13 }
  0x2f   :  { %3228 = vmatprep.mubr.msk.f32.mxu0 %vm250_vm1, %v428_v14 }
  0x32   :  { %3229 = vmatmul.mubr.msk.f32.gmra.mxu0 %vm250_vm1, %v429_v15 }
  0x33   :  { %3231 = vmatprep.mubr.msk.f32.mxu0 %vm250_vm1, %v430_v16 }
  0x36   :  { %3232 = vmatmul.mubr.msk.f32.gmra.mxu0 %vm250_vm1, %v431_v17 }
  0x37   :  { %3234 = vmatprep.mubr.msk.f32.mxu0 %vm250_vm1, %v432_v18  ;;  %v2970_v18 = vld [vmem:[%s6912_s6 + $0x50] sm:$0xff] }
  0x3a   :  { %3235 = vmatmul.mubr.msk.f32.gmra.mxu0 %vm250_vm1, %v433_v19  ;;  %v2969_v19 = vld [vmem:[%s6912_s6 + $0x48] sm:$0xff] }
  0x3b   :  { %3237 = vmatprep.mubr.msk.f32.mxu0 %vm250_vm1, %v434_v20 }
  0x3e   :  { %3238 = vmatmul.mubr.msk.f32.gmra.mxu0 %vm250_vm1, %v435_v21 }
  0x3f   :  { %3240 = vmatprep.mubr.msk.f32.mxu0 %vm250_vm1, %v436_v22  ;;  %v2968_v22 = vld [vmem:[%s6912_s6 + $0x40] sm:$0xff] }
  0x42   :  { %3241 = vmatmul.mubr.msk.f32.gmra.mxu0 %vm250_vm1, %v437_v23 }
  0x43   :  { %3243 = vmatprep.mubr.msk.f32.mxu0 %vm250_vm1, %v438_v24  ;;  %v466_v24 = vld [vmem:[%s6909_s3 + $0x170] sm:$0xff] }
  0x46   :  { %3244 = vmatmul.mubr.msk.f32.gmra.mxu0 %vm250_vm1, %v439_v25  ;;  %v467_v25 = vld [vmem:[%s6909_s3 + $0x178] sm:$0xff] }
  0x47   :  { %3246 = vmatprep.mubr.msk.f32.mxu0 %vm250_vm1, %v440_v26  ;;  %v472_v26 = vld [vmem:[%s6909_s3 + $0x1a0] sm:$0xff] }
  0x4a   :  { %3247 = vmatmul.mubr.msk.f32.gmra.mxu0 %vm250_vm1, %v441_v27  ;;  %v473_v27 = vld [vmem:[%s6909_s3 + $0x1a8] sm:$0xff] }
  0x4b   :  { %3249 = vmatprep.mubr.msk.f32.mxu0 %vm250_vm1, %v442_v28  ;;  %v474_v28 = vld [vmem:[%s6909_s3 + $0x1b0] sm:$0xff] }
  0x4e   :  { %3250 = vmatmul.mubr.msk.f32.gmra.mxu0 %vm250_vm1, %v443_v29  ;;  %v475_v29 = vld [vmem:[%s6909_s3 + $0x1b8] sm:$0xff] }
  0x77   :  { %v187_v53 = vpop.permute.xlu1 %186 }
  0x7e   :  { %v189_v56 = vpop.permute.xlu1 %188 }
  0xda   :  { %v147_v34 = vpop.f32.mrf.mxu0 }
  0xdb   :  { %v148_v35 = vadd.f32 %v147_v34, %v67_v33  ;;  %v445_v34 = vld [vmem:[%s6909_s3 + $0xc8] sm:$0xff] }
  0xdc   :  { %v4132_v36 = vpop.f32.mrf.mxu0 }
  0xdd   :  { %3380 = vtanh.f32 %v148_v35  ;;  %v2958_v41 = vmul.f32 -1.442695, %v148_v35  ;;  %v446_v35 = vld [vmem:[%s6909_s3 + $0xd0] sm:$0xff] }
  0xde   :  { %v153_v37 = vpop.f32.mrf.mxu0 }
  0xdf   :  { %v154_v38 = vadd.f32 %v153_v37, %v67_v33  ;;  %v444_v33 = vld [vmem:[%s6909_s3 + $0xc0] sm:$0xff]  ;;  %v447_v37 = vld [vmem:[%s6909_s3 + $0xd8] sm:$0xff] }
  0xe0   :  { %3252 = vmatprep.mubr.msk.f32.mxu0 %vm250_vm1, %v444_v33  ;;  %v476_v33 = vld [vmem:[%s6909_s3 + $0x1c0] sm:$0xff] }
  0xe1   :  { %3382 = vtanh.f32 %v154_v38  ;;  %v2959_v42 = vmul.f32 -1.442695, %v154_v38  ;;  %3253 = vmatmul.mubr.msk.f32.gmra.mxu0 %vm250_vm1, %v445_v34  ;;  %v448_v38 = vld [vmem:[%s6909_s3 + $0xe0] sm:$0xff]  ;;  %v477_v34 = vld [vmem:[%s6909_s3 + $0x1c8] sm:$0xff] }
  0xe2   :  { %3384 = vpow2.f32 %v2958_v41  ;;  %3255 = vmatprep.mubr.msk.f32.mxu0 %vm250_vm1, %v446_v35  ;;  %v451_v41 = vld [vmem:[%s6909_s3 + $0xf8] sm:$0xff]  ;;  %v478_v35 = vld [vmem:[%s6909_s3 + $0x1d0] sm:$0xff] }
  0xe3   :  { %3386 = vpow2.f32 %v2959_v42  ;;  %v452_v42 = vld [vmem:[%s6909_s3 + $0x100] sm:$0xff] }
  0xe5   :  { %3256 = vmatmul.mubr.msk.f32.gmra.mxu0 %vm250_vm1, %v447_v37  ;;  %v479_v37 = vld [vmem:[%s6909_s3 + $0x1d8] sm:$0xff] }
  0xe6   :  { %3258 = vmatprep.mubr.msk.f32.mxu0 %vm250_vm1, %v448_v38  ;;  %v480_v38 = vld [vmem:[%s6909_s3 + $0x1e0] sm:$0xff] }
  0xea   :  { %v3381_v39 = vpop.eup %3380 }
  0xeb   :  { %196 = vrot.lane.b32.xlu0 %v3381_v39, %s3973_s0  ;;  %v449_v39 = vld [vmem:[%s6909_s3 + $0xe8] sm:$0xff] }
  0xec   :  { %3259 = vmatmul.mubr.msk.f32.gmra.mxu0 %vm250_vm1, %v449_v39  ;;  %v481_v39 = vld [vmem:[%s6909_s3 + $0x1e8] sm:$0xff] }
  0xee   :  { %v3383_v40 = vpop.eup %3382 }
  0xef   :  { %198 = vrot.lane.b32.xlu0 %v3383_v40, %s3973_s0  ;;  %v3385_v43 = vpop.eup %3384  ;;  %v450_v40 = vld [vmem:[%s6909_s3 + $0xf0] sm:$0xff] }
  0xf0   :  { %v164_v44 = vadd.f32 1.0, %v3385_v43  ;;  %v3387_v45 = vpop.eup %3386  ;;  %3261 = vmatprep.mubr.msk.f32.mxu0 %vm250_vm1, %v450_v40  ;;  %v453_v43 = vld [vmem:[%s6909_s3 + $0x108] sm:$0xff]  ;;  %v482_v40 = vld [vmem:[%s6909_s3 + $0x1f0] sm:$0xff] }
  0xf1   :  { %v165_v46 = vadd.f32 1.0, %v3387_v45  ;;  %3262 = vmatmul.mubr.msk.f32.gmra.mxu0 %vm250_vm1, %v451_v41  ;;  %v455_v45 = vld [vmem:[%s6909_s3 + $0x118] sm:$0xff] }
  0xf2   :  { %3388 = vrcp.f32 %v164_v44  ;;  %3264 = vmatprep.mubr.msk.f32.mxu0 %vm250_vm1, %v452_v42  ;;  %v454_v44 = vld [vmem:[%s6909_s3 + $0x110] sm:$0xff]  ;;  %v483_v41 = vld [vmem:[%s6909_s3 + $0x1f8] sm:$0xff]  ;;  %v484_v42 = vld [vmem:[%s6909_s3 + $0x200] sm:$0xff] }
  0xf3   :  { %3390 = vrcp.f32 %v165_v46  ;;  %v456_v46 = vld [vmem:[%s6909_s3 + $0x120] sm:$0xff] }
  0xf5   :  { %3265 = vmatmul.mubr.msk.f32.gmra.mxu0 %vm250_vm1, %v453_v43  ;;  %v485_v43 = vld [vmem:[%s6909_s3 + $0x208] sm:$0xff] }
  0xf6   :  { %3267 = vmatprep.mubr.msk.f32.mxu0 %vm250_vm1, %v454_v44  ;;  %v486_v44 = vld [vmem:[%s6909_s3 + $0x210] sm:$0xff] }
  0xf9   :  { %3268 = vmatmul.mubr.msk.f32.gmra.mxu0 %vm250_vm1, %v455_v45  ;;  %v487_v45 = vld [vmem:[%s6909_s3 + $0x218] sm:$0xff] }
  0xfa   :  { %3270 = vmatprep.mubr.msk.f32.mxu0 %vm250_vm1, %v456_v46  ;;  %v488_v46 = vld [vmem:[%s6909_s3 + $0x220] sm:$0xff] }
  0xff   :  { %v4136_v47 = vpop.eup %3388 }
 0x100   :  { %v4140_v50 = vpop.eup %3390  ;;  %v192_v54 = vmul.f32 %v4136_v47, %v187_v53  ;;  %v461_v53 = vld [vmem:[%s6909_s3 + $0x148] sm:$0xff] }
 0x101   :  { %v193_v58 = vmul.f32 %v4140_v50, %v189_v56  ;;  %v2962_v56 = vld [vmem:[%s6912_s6 + $0x20] sm:$0xff] }
 0x102   :  { %3192 = vmatprep.subr.mxu1 %v2962_v56 }
 0x103   :  { %3193 = vmatpush3.msra.mxu1 %v2962_v56  ;;  %v496_v56 = vld [vmem:[%s6909_s3 + $0x260] sm:$0xff] }
 0x15d   :  { %v197_v48 = vpop.permute.xlu0 %196 }
 0x15e   :  { %v202_v49 = vmul.f32 %v4136_v47, %v197_v48  ;;  %v457_v48 = vld [vmem:[%s6909_s3 + $0x128] sm:$0xff] }
 0x15f   :  { %3271 = vmatmul.mubr.msk.f32.gmra.mxu0 %vm250_vm1, %v457_v48  ;;  %v489_v48 = vld [vmem:[%s6909_s3 + $0x228] sm:$0xff] }
 0x160   :  { %206 = vrot.lane.b32.xlu0 %v202_v49, %s3972_s17  ;;  %v458_v49 = vld [vmem:[%s6909_s3 + $0x130] sm:$0xff] }
 0x161   :  { %v199_v51 = vpop.permute.xlu0 %198  ;;  %3273 = vmatprep.mubr.msk.f32.mxu0 %vm250_vm1, %v458_v49  ;;  %v490_v49 = vld [vmem:[%s6909_s3 + $0x230] sm:$0xff] }
 0x162   :  { %v203_v52 = vmul.f32 %v4140_v50, %v199_v51  ;;  %v459_v51 = vld [vmem:[%s6909_s3 + $0x138] sm:$0xff] }
 0x163   :  { %3274 = vmatmul.mubr.msk.f32.gmra.mxu0 %vm250_vm1, %v459_v51  ;;  %v491_v51 = vld [vmem:[%s6909_s3 + $0x238] sm:$0xff] }
 0x164   :  { %208 = vrot.lane.b32.xlu1 %v203_v52, %s3972_s17  ;;  %v460_v52 = vld [vmem:[%s6909_s3 + $0x140] sm:$0xff] }
 0x165   :  { %3276 = vmatprep.mubr.msk.f32.mxu0 %vm250_vm1, %v460_v52  ;;  %v492_v52 = vld [vmem:[%s6909_s3 + $0x240] sm:$0xff] }
 0x167   :  { %3277 = vmatmul.mubr.msk.f32.gmra.mxu0 %vm250_vm1, %v461_v53  ;;  %v493_v53 = vld [vmem:[%s6909_s3 + $0x248] sm:$0xff] }
 0x1d2   :  { %v207_v55 = vpop.permute.xlu0 %206 }
 0x1d3   :  { %v4145_v57 = vadd.f32 %v207_v55, %v192_v54  ;;  %v462_v54 = vld [vmem:[%s6909_s3 + $0x150] sm:$0xff]  ;;  %v463_v55 = vld [vmem:[%s6909_s3 + $0x158] sm:$0xff] }
 0x1d4   :  { %3279 = vmatprep.mubr.msk.f32.mxu0 %vm250_vm1, %v462_v54  ;;  %v494_v54 = vld [vmem:[%s6909_s3 + $0x250] sm:$0xff] }
 0x1d5   :  { %7021 = vst [vmem:[#allocation9_spill] sm:$0xff] %v4145_v57  ;;  %3392 = vtanh.f32 %v4145_v57  ;;  %3280 = vmatmul.mubr.msk.f32.gmra.mxu0 %vm250_vm1, %v463_v55  ;;  %v495_v55 = vld [vmem:[%s6909_s3 + $0x258] sm:$0xff] }
 0x1d6   :  { %v209_v59 = vpop.permute.xlu1 %208 }
 0x1d7   :  { %v4149_v60 = vadd.f32 %v209_v59, %v193_v58  ;;  %v2971_v58 = vld [vmem:[%s6912_s6 + $0x58] sm:$0xff]  ;;  %v464_v59 = vld [vmem:[%s6909_s3 + $0x160] sm:$0xff] }
 0x1d8   :  { %3282 = vmatprep.mubr.msk.f32.mxu0 %vm250_vm1, %v464_v59  ;;  %3197 = vmatprep.subr.mxu1 %v2971_v58  ;;  %v498_v59 = vld [vmem:[%s6909_s3 + $0x270] sm:$0xff] }
 0x1d9   :  { %7022 = vst [vmem:[#allocation10_spill] sm:$0xff] %v4149_v60  ;;  %3394 = vtanh.f32 %v4149_v60  ;;  %3283 = vmatmul.mubr.msk.f32.gmra.mxu0 %vm250_vm1, %v465_v0  ;;  %v499_v0 = vld [vmem:[%s6909_s3 + $0x278] sm:$0xff] }
 0x1e2   :  { %v4162_v63 = vpop.eup %3392 }
 0x1e3   :  { %218 = vrot.lane.b32.xlu0 %v4162_v63, %s3973_s0 }
 0x1e6   :  { %v4185_v3 = vpop.eup %3394 }
 0x1e7   :  { %220 = vrot.lane.b32.xlu1 %v4185_v3, %s3973_s0 }
 0x255   :  { %v219_v4 = vpop.permute.xlu0 %218 }
 0x256   :  { %v4388_v5 = vmul.f32 %v4136_v47, %v219_v4  ;;  %v70_v47 = vsub.s32 1, %v4121_v30  ;;  %v500_v4 = vld [vmem:[%s6909_s3 + $0x280] sm:$0xff] }
 0x258   :  { %7023 = vst [vmem:[#allocation11_spill] sm:$0xff] %v4388_v5  ;;  %246 = vrot.lane.b32.xlu0 %v4388_v5, %s3972_s17  ;;  %v71_v8 = vrot.slane %v4127_v32, %v70_v47 }
 0x259   :  { %v221_v6 = vpop.permute.xlu1 %220 }
 0x25a   :  { %v4393_v7 = vmul.f32 %v4140_v50, %v221_v6  ;;  %v150_v9 = vadd.f32 %v4132_v36, %v71_v8  ;;  %v155_v50 = vpop.f32.mrf.mxu0  ;;  %v501_v6 = vld [vmem:[%s6909_s3 + $0x288] sm:$0xff] }
 0x25b   :  { %v156_v11 = vadd.f32 %v155_v50, %v71_v8  ;;  %v502_v8 = vld [vmem:[%s6909_s3 + $0x290] sm:$0xff]  ;;  %v504_v50 = vld [vmem:[%s6909_s3 + $0x2a0] sm:$0xff] }
 0x25c   :  { %7024 = vst [vmem:[#allocation12_spill] sm:$0xff] %v4393_v7  ;;  %226 = vrot.lane.b32.xlu0 %v4162_v63, %s3974_s20  ;;  %248 = vrot.lane.b32.xlu1 %v4393_v7, %s3972_s17  ;;  %v2960_v10 = vmul.f32 -1.442695, %v150_v9  ;;  %v503_v9 = vld [vmem:[%s6909_s3 + $0x298] sm:$0xff] }
 0x25d   :  { %v2961_v12 = vmul.f32 -1.442695, %v156_v11  ;;  %v506_v11 = vld [vmem:[%s6909_s3 + $0x2b0] sm:$0xff] }
 0x25e   :  { %3396 = vpow2.f32 %v2960_v10  ;;  %v505_v10 = vld [vmem:[%s6909_s3 + $0x2a8] sm:$0xff] }
 0x25f   :  { %3398 = vpow2.f32 %v2961_v12  ;;  %v507_v12 = vld [vmem:[%s6909_s3 + $0x2b8] sm:$0xff] }
 0x260   :  { %228 = vrot.lane.b32.xlu1 %v4185_v3, %s3974_s20 }
 0x26b   :  { %v3397_v63 = vpop.eup %3396 }
 0x26c   :  { %v178_v13 = vadd.f32 1.0, %v3397_v63  ;;  %v3399_v14 = vpop.eup %3398  ;;  %v508_v63 = vld [vmem:[%s6909_s3 + $0x2c0] sm:$0xff] }
 0x26d   :  { %v179_v15 = vadd.f32 1.0, %v3399_v14  ;;  %v509_v14 = vld [vmem:[%s6909_s3 + $0x2c8] sm:$0xff] }
 0x26e   :  { %3400 = vrcp.f32 %v178_v13  ;;  %v3218_v13 = vpop.f32.mrf.mxu0 }
 0x26f   :  { %3402 = vrcp.f32 %v179_v15  ;;  %v510_v15 = vld [vmem:[%s6909_s3 + $0x2d0] sm:$0xff] }
 0x27b   :  { %v3401_v32 = vpop.eup %3400 }
 0x27c   :  { %v3403_v20 = vpop.eup %3402 }
 0x2ca   :  { %v247_v3 = vpop.permute.xlu0 %246 }
 0x2cb   :  { %2897 = vst.msk [vmem:[#allocation2] sm:$0xff] %vm250_vm1, %v247_v3  ;;  %3194 = vmatprep.mubr.msk.f32.mxu1 %vm250_vm1, %v247_v3  ;;  %v4613_v3 = vpop.f32.mrf.mxu0 }
 0x2ce   :  { %v227_v16 = vpop.permute.xlu0 %226  ;;  %v249_v36 = vpop.permute.xlu1 %248 }
 0x2cf   :  { %v4408_v17 = vmul.f32 %v3401_v32, %v227_v16  ;;  %2898 = vst.msk [vmem:[#allocation2 + $0x8] sm:$0xff] %vm250_vm1, %v249_v36  ;;  %3195 = vmatmul.mubr.msk.f32.vlgmr.msra.gmra.mxu1 %vm250_vm1, %v249_v36  ;;  %v511_v32 = vld [vmem:[%s6909_s3 + $0x2d8] sm:$0xff]  ;;  %v512_v16 = vld [vmem:[%s6909_s3 + $0x2e0] sm:$0xff]  ;;  %v3221_v36 = vpop.f32.mrf.mxu0 }
 0x2d0   :  { %3198 = vmatpush3.msra.mxu1 %v2971_v58  ;;  %v497_v58 = vld [vmem:[%s6909_s3 + $0x268] sm:$0xff] }
 0x2d1   :  { %7025 = vst [vmem:[#allocation13_spill] sm:$0xff] %v4408_v17  ;;  %3205 = vmatprep.mubr.msk.f32.mxu1 %vm250_vm1, %v4408_v17  ;;  %3199 = vmatprep.subr.mxu1 %v2970_v18 }
 0x2d2   :  { %3200 = vmatpush3.msra.mxu1 %v2970_v18  ;;  %v229_v21 = vpop.permute.xlu1 %228  ;;  %v513_v18 = vld [vmem:[%s6909_s3 + $0x2e8] sm:$0xff] }
 0x2d3   :  { %v4423_v23 = vmul.f32 %v3403_v20, %v229_v21  ;;  %3201 = vmatprep.subr.mxu1 %v2969_v19  ;;  %v4631_v20 = vpop.f32.mrf.mxu0  ;;  %v515_v21 = vld [vmem:[%s6909_s3 + $0x2f8] sm:$0xff] }
 0x2d4   :  { %3202 = vmatpush3.msra.mxu1 %v2969_v19  ;;  %v514_v19 = vld [vmem:[%s6909_s3 + $0x2f0] sm:$0xff] }
 0x2d5   :  { %7026 = vst [vmem:[#allocation14_spill] sm:$0xff] %v4423_v23  ;;  %3203 = vmatprep.subr.mxu1 %v2968_v22 }
 0x2d6   :  { %3204 = vmatpush3.msra.mxu1 %v2968_v22  ;;  %v516_v22 = vld [vmem:[%s6909_s3 + $0x300] sm:$0xff] }
 0x2d7   :  { %3206 = vmatmul.mubr.msk.f32.vlgmr.msra.gmra.mxu1 %vm250_vm1, %v4423_v23  ;;  %3363 = vmatprep.subr.mxu1 %v4155_v61 }
 0x2d8   :  { %3367 = vmatpush3.msra.mxu1 %v4155_v61  ;;  %3285 = vmatprep.mubr.msk.f32.mxu1 %vm250_vm1, %v466_v24  ;;  %v468_v61 = vld [vmem:[%s6909_s3 + $0x180] sm:$0xff]  ;;  %v3224_v24 = vpop.f32.mrf.mxu0 }
 0x2d9   :  { %3364 = vmatprep.subr.mxu1 %v4160_v62 }
 0x2da   :  { %3368 = vmatpush3.msra.mxu1 %v4160_v62  ;;  %v469_v62 = vld [vmem:[%s6909_s3 + $0x188] sm:$0xff] }
 0x2db   :  { %3365 = vmatprep.subr.mxu1 %v4174_v1 }
 0x2dc   :  { %3369 = vmatpush3.msra.mxu1 %v4174_v1  ;;  %v470_v1 = vld [vmem:[%s6909_s3 + $0x190] sm:$0xff] }
 0x2dd   :  { %3366 = vmatprep.subr.mxu1 %v4182_v2 }
 0x2de   :  { %3370 = vmatpush3.msra.mxu1 %v4182_v2  ;;  %v471_v2 = vld [vmem:[%s6909_s3 + $0x198] sm:$0xff] }
 0x2df   :  { %3286 = vmatmul.mubr.msk.f32.vlgmr.msra.gmra.mxu1 %vm250_vm1, %v467_v25  ;;  %v517_v25 = vld [vmem:[%s6909_s3 + $0x308] sm:$0xff] }
 0x2e0   :  { %3288 = vmatprep.mubr.msk.f32.mxu1 %vm250_vm1, %v468_v61  ;;  %v4646_v61 = vpop.f32.mrf.mxu0 }
 0x2e3   :  { %3289 = vmatmul.mubr.msk.f32.gmra.mxu1 %vm250_vm1, %v469_v62  ;;  %v3227_v62 = vpop.f32.mrf.mxu0 }
 0x2e4   :  { %3291 = vmatprep.mubr.msk.f32.mxu1 %vm250_vm1, %v470_v1 }
 0x2e5   :  { %v4649_v1 = vpop.f32.mrf.mxu0 }
 0x2e7   :  { %3292 = vmatmul.mubr.msk.f32.gmra.mxu1 %vm250_vm1, %v471_v2  ;;  %v3230_v2 = vpop.f32.mrf.mxu0 }
 0x2e8   :  { %3294 = vmatprep.mubr.msk.f32.mxu1 %vm250_vm1, %v472_v26 }
 0x2e9   :  { %v4651_v26 = vpop.f32.mrf.mxu0 }
 0x2eb   :  { %3295 = vmatmul.mubr.msk.f32.gmra.mxu1 %vm250_vm1, %v473_v27  ;;  %v3233_v27 = vpop.f32.mrf.mxu0 }
 0x2ec   :  { %3297 = vmatprep.mubr.msk.f32.mxu1 %vm250_vm1, %v474_v28 }
 0x2ed   :  { %v4653_v28 = vpop.f32.mrf.mxu0 }
 0x2ef   :  { %3298 = vmatmul.mubr.msk.f32.gmra.mxu1 %vm250_vm1, %v475_v29  ;;  %v3236_v29 = vpop.f32.mrf.mxu0 }
 0x2f0   :  { %3300 = vmatprep.mubr.msk.f32.mxu1 %vm250_vm1, %v476_v33 }
 0x2f1   :  { %v4655_v33 = vpop.f32.mrf.mxu0 }
 0x2f3   :  { %3301 = vmatmul.mubr.msk.f32.gmra.mxu1 %vm250_vm1, %v477_v34  ;;  %v3239_v34 = vpop.f32.mrf.mxu0 }
 0x2f4   :  { %3303 = vmatprep.mubr.msk.f32.mxu1 %vm250_vm1, %v478_v35 }
 0x2f5   :  { %v4657_v35 = vpop.f32.mrf.mxu0 }
 0x2f7   :  { %3304 = vmatmul.mubr.msk.f32.gmra.mxu1 %vm250_vm1, %v479_v37  ;;  %v3242_v37 = vpop.f32.mrf.mxu0 }
 0x2f8   :  { %3306 = vmatprep.mubr.msk.f32.mxu1 %vm250_vm1, %v480_v38 }
 0x2f9   :  { %v4659_v38 = vpop.f32.mrf.mxu0 }
 0x2fb   :  { %3307 = vmatmul.mubr.msk.f32.gmra.mxu1 %vm250_vm1, %v481_v39  ;;  %v4661_v39 = vpop.f32.mrf.mxu0 }
 0x2fc   :  { %3309 = vmatprep.mubr.msk.f32.mxu1 %vm250_vm1, %v482_v40 }
 0x2fd   :  { %v4663_v40 = vpop.f32.mrf.mxu0 }
 0x2ff   :  { %3310 = vmatmul.mubr.msk.f32.gmra.mxu1 %vm250_vm1, %v483_v41  ;;  %v4665_v41 = vpop.f32.mrf.mxu0 }
 0x300   :  { %3312 = vmatprep.mubr.msk.f32.mxu1 %vm250_vm1, %v484_v42 }
 0x301   :  { %v4667_v42 = vpop.f32.mrf.mxu0 }
 0x303   :  { %3313 = vmatmul.mubr.msk.f32.gmra.mxu1 %vm250_vm1, %v485_v43  ;;  %v4669_v43 = vpop.f32.mrf.mxu0 }
 0x304   :  { %3315 = vmatprep.mubr.msk.f32.mxu1 %vm250_vm1, %v486_v44  ;;  %v234_v44 = vld [vmem:[%s6913_s7] sm:$0xf] }
 0x307   :  { %3316 = vmatmul.mubr.msk.f32.gmra.mxu1 %vm250_vm1, %v487_v45  ;;  %v4674_v45 = vpop.f32.mrf.mxu0 }
 0x308   :  { %3318 = vmatprep.mubr.msk.f32.mxu1 %vm250_vm1, %v488_v46  ;;  %v243_v46 = vrot.slane %v234_v44, %v70_v47 }
 0x30b   :  { %3319 = vmatmul.mubr.msk.f32.gmra.mxu1 %vm250_vm1, %v489_v48  ;;  %v4680_v48 = vrot.slane %v234_v44, %v66_v31 }
 0x30c   :  { %3321 = vmatprep.mubr.msk.f32.mxu1 %vm250_vm1, %v490_v49  ;;  %v4682_v49 = vpop.f32.mrf.mxu0 }
 0x30d   :  { %v922_v31 = vadd.f32 %v3227_v62, %v4680_v48  ;;  %v962_v62 = vadd.f32 %v3239_v34, %v4680_v48  ;;  %v917_v34 = vadd.f32 %v4649_v1, %v4680_v48 }
 0x30f   :  { %3322 = vmatmul.mubr.msk.f32.gmra.mxu1 %vm250_vm1, %v491_v51 }
 0x310   :  { %3324 = vmatprep.mubr.msk.f32.mxu1 %vm250_vm1, %v492_v52 }
 0x313   :  { %3325 = vmatmul.mubr.msk.f32.gmra.mxu1 %vm250_vm1, %v493_v53  ;;  %v892_v53 = vadd.f32 %v3218_v13, %v4680_v48 }
 0x314   :  { %3327 = vmatprep.mubr.msk.f32.mxu1 %vm250_vm1, %v494_v54  ;;  %v912_v54 = vadd.f32 %v3224_v24, %v4680_v48 }
 0x317   :  { %3328 = vmatmul.mubr.msk.f32.gmra.mxu1 %vm250_vm1, %v495_v55  ;;  %v4688_v55 = vpop.f32.mrf.mxu0 }
 0x318   :  { %3330 = vmatprep.mubr.msk.f32.mxu1 %vm250_vm1, %v496_v56  ;;  %v902_v56 = vadd.f32 %v3221_v36, %v4680_v48 }
 0x31b   :  { %3331 = vmatmul.mubr.msk.f32.gmra.mxu1 %vm250_vm1, %v497_v58 }
 0x31c   :  { %3333 = vmatprep.mubr.msk.f32.mxu1 %vm250_vm1, %v498_v59  ;;  %v4694_v59 = vpop.f32.mrf.mxu0 }
 0x31f   :  { %3334 = vmatmul.mubr.msk.f32.gmra.mxu1 %vm250_vm1, %v499_v0 }
 0x320   :  { %3336 = vmatprep.mubr.msk.f32.mxu1 %vm250_vm1, %v500_v4 }
 0x323   :  { %3337 = vmatmul.mubr.msk.f32.gmra.mxu1 %vm250_vm1, %v501_v6 }
 0x324   :  { %3339 = vmatprep.mubr.msk.f32.mxu1 %vm250_vm1, %v502_v8  ;;  %v932_v8 = vadd.f32 %v3230_v2, %v4680_v48 }
 0x327   :  { %3340 = vmatmul.mubr.msk.f32.gmra.mxu1 %vm250_vm1, %v503_v9  ;;  %v4700_v9 = vpop.f32.mrf.mxu0 }
 0x328   :  { %3342 = vmatprep.mubr.msk.f32.mxu1 %vm250_vm1, %v504_v50 }
 0x32b   :  { %3343 = vmatmul.mubr.msk.f32.gmra.mxu1 %vm250_vm1, %v505_v10  ;;  %v1573_v10 = vsub.s32 3, %v4121_v30 }
 0x32c   :  { %3345 = vmatprep.mubr.msk.f32.mxu1 %vm250_vm1, %v506_v11 }
 0x32f   :  { %3346 = vmatmul.mubr.msk.f32.gmra.mxu1 %vm250_vm1, %v507_v12  ;;  %v942_v12 = vadd.f32 %v3233_v27, %v4680_v48 }
 0x330   :  { %3348 = vmatprep.mubr.msk.f32.mxu1 %vm250_vm1, %v508_v63  ;;  %v4707_v63 = vpop.f32.mrf.mxu0 }
 0x332   :  { %v4717_v36 = vpop.f32.mrf.mxu0 }
 0x333   :  { %3349 = vmatmul.mubr.msk.f32.gmra.mxu1 %vm250_vm1, %v509_v14 }
 0x334   :  { %3351 = vmatprep.mubr.msk.f32.mxu1 %vm250_vm1, %v510_v15  ;;  %v4712_v15 = vrot.slane %v234_v44, %v1573_v10  ;;  %v4726_v2 = vpop.f32.mrf.mxu0 }
 0x337   :  { %3352 = vmatmul.mubr.msk.f32.gmra.mxu1 %vm250_vm1, %v511_v32 }
 0x338   :  { %3354 = vmatprep.mubr.msk.f32.mxu1 %vm250_vm1, %v512_v16  ;;  %v952_v16 = vadd.f32 %v3236_v29, %v4680_v48 }
 0x33b   :  { %3355 = vmatmul.mubr.msk.f32.gmra.mxu1 %vm250_vm1, %v513_v18 }
 0x33c   :  { %3357 = vmatprep.mubr.msk.f32.mxu1 %vm250_vm1, %v514_v19 }
 0x33f   :  { %3358 = vmatmul.mubr.msk.f32.gmra.mxu1 %vm250_vm1, %v515_v21 }
 0x340   :  { %3360 = vmatprep.mubr.msk.f32.mxu1 %vm250_vm1, %v516_v22 }
 0x343   :  { %3361 = vmatmul.mubr.msk.f32.gmra.mxu1 %vm250_vm1, %v517_v25 }
 0x38f   :  { %v3196_v51 = vpop.f32.mrf.mxu1 }
 0x390   :  { %v4684_v52 = vadd.f32 %v3196_v51, %v243_v46 }
 0x391   :  { %v321_v4 = vpop.f32.mrf.mxu1 }
 0x392   :  { %v1376_v58 = vadd.f32 %v892_v53, %v4684_v52  ;;  %v1378_v47 = vadd.f32 %v902_v56, %v4684_v52  ;;  %v1380_v0 = vadd.f32 %v912_v54, %v4684_v52  ;;  %v1382_v50 = vadd.f32 %v922_v31, %v4684_v52  ;;  %v4742_v31 = vpop.f32.mrf.mxu0 }
 0x393   :  { %v1384_v13 = vadd.f32 %v932_v8, %v4684_v52  ;;  %v1386_v18 = vadd.f32 %v942_v12, %v4684_v52  ;;  %v1388_v27 = vadd.f32 %v952_v16, %v4684_v52  ;;  %v4732_v53 = vadd.f32 %v321_v4, %v243_v46 }
 0x394   :  { %3404 = vtanh.f32 %v1376_v58  ;;  %v897_v56 = vadd.f32 %v4631_v20, %v4680_v48  ;;  %v972_v58 = vadd.f32 %v3242_v37, %v4680_v48  ;;  %v927_v20 = vadd.f32 %v4651_v26, %v4680_v48 }
 0x395   :  { %3406 = vtanh.f32 %v1378_v47  ;;  %v982_v37 = vadd.f32 %v4661_v39, %v4680_v48  ;;  %v1381_v16 = vadd.f32 %v917_v34, %v4732_v53  ;;  %v937_v39 = vadd.f32 %v4653_v28, %v4680_v48 }
 0x396   :  { %3408 = vtanh.f32 %v1380_v0  ;;  %v1390_v0 = vadd.f32 %v962_v62, %v4684_v52  ;;  %v1377_v1 = vadd.f32 %v897_v56, %v4732_v53  ;;  %v1392_v10 = vadd.f32 %v972_v58, %v4684_v52 }
 0x397   :  { %v4697_v6 = vpop.f32.mrf.mxu1  ;;  %3410 = vtanh.f32 %v1382_v50  ;;  %v992_v62 = vadd.f32 %v4665_v41, %v4680_v48  ;;  %v947_v58 = vadd.f32 %v4655_v33, %v4680_v48  ;;  %v1385_v41 = vadd.f32 %v937_v39, %v4732_v53 }
 0x398   :  { %3412 = vtanh.f32 %v1384_v13  ;;  %v4757_v13 = vpop.f32.mrf.mxu0 }
 0x399   :  { %v4704_v11 = vpop.f32.mrf.mxu1  ;;  %3414 = vtanh.f32 %v1386_v18 }
 0x39a   :  { %3416 = vtanh.f32 %v1388_v27 }
 0x39b   :  { %3418 = vtanh.f32 %v1390_v0  ;;  %v1002_v0 = vadd.f32 %v4669_v43, %v4680_v48  ;;  %v1387_v43 = vadd.f32 %v947_v58, %v4732_v53 }
 0x39c   :  { %3420 = vtanh.f32 %v1377_v1 }
 0x39d   :  { %3422 = vtanh.f32 %v1392_v10  ;;  %v957_v10 = vadd.f32 %v4657_v35, %v4680_v48  ;;  %v967_v35 = vadd.f32 %v4659_v38, %v4680_v48 }
 0x39e   :  { %3424 = vtanh.f32 %v1381_v16  ;;  %v1012_v16 = vadd.f32 %v4682_v49, %v4680_v48 }
 0x39f   :  { %v4710_v14 = vpop.f32.mrf.mxu1 }
 0x3a1   :  { %v4714_v32 = vpop.f32.mrf.mxu1  ;;  %v3405_v21 = vpop.eup %3404 }
 0x3a2   :  { %v1576_v24 = vmul.f32 %v3405_v21, %v4712_v15  ;;  %v3407_v25 = vpop.eup %3406 }
 0x3a3   :  { %v4720_v19 = vpop.f32.mrf.mxu1  ;;  %v3409_v29 = vpop.eup %3408  ;;  %v1578_v4 = vmul.f32 %v3407_v25, %v4712_v15  ;;  %v1383_v25 = vadd.f32 %v927_v20, %v4732_v53 }
 0x3a4   :  { %v1676_v44 = vsel %vm250_vm1, %v1576_v24, 0.0  ;;  %v1580_v54 = vmul.f32 %v3409_v29, %v4712_v15  ;;  %v3411_v8 = vpop.eup %3410  ;;  %v4771_v29 = vpop.f32.mrf.mxu0 }
 0x3a5   :  { %v4722_v22 = vpop.f32.mrf.mxu1  ;;  %1677 = vadd.xlane.f32.xlu1 %v1676_v44  ;;  %v1682_v18 = vsel %vm250_vm1, %v1578_v4, 0.0  ;;  %v1582_v21 = vmul.f32 %v3411_v8, %v4712_v15  ;;  %v3413_v24 = vpop.eup %3412  ;;  %v1394_v44 = vadd.f32 %v982_v37, %v4684_v52  ;;  %3426 = vtanh.f32 %v1383_v25 }
 0x3a6   :  { %v1688_v46 = vsel %vm250_vm1, %v1580_v54, 0.0  ;;  %v1584_v56 = vmul.f32 %v3413_v24, %v4712_v15  ;;  %v3415_v34 = vpop.eup %3414  ;;  %v4785_v4 = vpop.f32.mrf.mxu0  ;;  %v1396_v8 = vadd.f32 %v992_v62, %v4684_v52 }
 0x3a7   :  { %v4730_v51 = vpop.f32.mrf.mxu1  ;;  %1689 = vadd.xlane.f32.xlu0 %v1688_v46  ;;  %v1694_v54 = vsel %vm250_vm1, %v1582_v21, 0.0  ;;  %3428 = vtanh.f32 %v1394_v44  ;;  %v1586_v1 = vmul.f32 %v3415_v34, %v4712_v15  ;;  %v3417_v37 = vpop.eup %3416  ;;  %v1398_v21 = vadd.f32 %v1002_v0, %v4684_v52 }
 0x3a8   :  { %v1700_v20 = vsel %vm250_vm1, %v1584_v56, 0.0  ;;  %3430 = vtanh.f32 %v1385_v41  ;;  %v1588_v39 = vmul.f32 %v3417_v37, %v4712_v15  ;;  %v3419_v25 = vpop.eup %3418  ;;  %v1389_v44 = vadd.f32 %v957_v10, %v4732_v53 }
 0x3a9   :  { %v4740_v47 = vpop.f32.mrf.mxu1  ;;  %3432 = vtanh.f32 %v1396_v8  ;;  %v1706_v24 = vsel %vm250_vm1, %v1586_v1, 0.0  ;;  %v3421_v49 = vpop.eup %3420  ;;  %v1400_v56 = vadd.f32 %v1012_v16, %v4684_v52  ;;  %v1590_v8 = vmul.f32 %v3419_v25, %v4712_v15 }
 0x3aa   :  { %3434 = vtanh.f32 %v1387_v43  ;;  %v3423_v34 = vpop.eup %3422  ;;  %v1577_v41 = vmul.f32 %v3421_v49, %v4712_v15  ;;  %v1712_v0 = vsel %vm250_vm1, %v1588_v39, 0.0  ;;  %v1032_v16 = vadd.f32 %v4707_v63, %v4680_v48 }
 0x3ab   :  { %v4747_v50 = vpop.f32.mrf.mxu1  ;;  %1683 = vadd.xlane.f32.xlu0 %v1682_v18  ;;  %v4797_v18 = vpop.f32.mrf.mxu0  ;;  %3436 = vtanh.f32 %v1398_v21  ;;  %v1592_v39 = vmul.f32 %v3423_v34, %v4712_v15 }
 0x3ac   :  { %v3425_v38 = vpop.eup %3424  ;;  %3438 = vtanh.f32 %v1389_v44  ;;  %v1679_v37 = vsel %vm250_vm1, %v1577_v41, 0.0 }
 0x3ad   :  { %v4755_v12 = vpop.f32.mrf.mxu1  ;;  %v4810_v58 = vpop.f32.mrf.mxu0  ;;  %v1581_v10 = vmul.f32 %v3425_v38, %v4712_v15  ;;  %1680 = vadd.xlane.f32.xlu1 %v1679_v37  ;;  %3440 = vtanh.f32 %v1400_v56  ;;  %v1042_v56 = vadd.f32 %v4726_v2, %v4680_v48 }
 0x3af   :  { %v4762_v26 = vpop.f32.mrf.mxu1  ;;  %1695 = vadd.xlane.f32.xlu0 %v1694_v54  ;;  %v1022_v54 = vadd.f32 %v4694_v59, %v4680_v48  ;;  %v1391_v59 = vadd.f32 %v967_v35, %v4732_v53  ;;  %v4824_v21 = vpop.f32.mrf.mxu0  ;;  %v987_v35 = vadd.f32 %v4667_v42, %v4680_v48  ;;  %v1691_v63 = vsel %vm250_vm1, %v1581_v10, 0.0 }
 0x3b0   :  { %v1724_v42 = vsel %vm250_vm1, %v1592_v39, 0.0 }
 0x3b1   :  { %v4769_v27 = vpop.f32.mrf.mxu1  ;;  %3442 = vtanh.f32 %v1391_v59  ;;  %1692 = vadd.xlane.f32.xlu1 %v1691_v63  ;;  %v3275_v34 = vpop.f32.mrf.mxu0  ;;  %v1395_v37 = vadd.f32 %v987_v35, %v4732_v53  ;;  %v1007_v35 = vadd.f32 %v4688_v55, %v4680_v48 }
 0x3b2   :  { %v3427_v43 = vpop.eup %3426 }
 0x3b3   :  { %v4776_v28 = vpop.f32.mrf.mxu1  ;;  %1701 = vadd.xlane.f32.xlu0 %v1700_v20  ;;  %v977_v20 = vadd.f32 %v4663_v40, %v4680_v48  ;;  %v1718_v40 = vsel %vm250_vm1, %v1590_v8, 0.0  ;;  %v1583_v41 = vmul.f32 %v3427_v43, %v4712_v15 }
 0x3b4   :  { %v3429_v25 = vpop.eup %3428 }
 0x3b5   :  { %v4783_v46 = vpop.f32.mrf.mxu1  ;;  %v1393_v49 = vadd.f32 %v977_v20, %v4732_v53  ;;  %v1594_v8 = vmul.f32 %v3429_v25, %v4712_v15  ;;  %v997_v20 = vadd.f32 %v4674_v45, %v4680_v48  ;;  %v1697_v2 = vsel %vm250_vm1, %v1583_v41, 0.0 }
 0x3b6   :  { %1698 = vadd.xlane.f32.xlu1 %v1697_v2  ;;  %v1399_v2 = vadd.f32 %v1007_v35, %v4732_v53  ;;  %v1027_v35 = vadd.f32 %v4717_v36, %v4680_v48 }
 0x3b7   :  { %v4790_v33 = vpop.f32.mrf.mxu1  ;;  %1707 = vadd.xlane.f32.xlu0 %v1706_v24  ;;  %v1402_v24 = vadd.f32 %v1022_v54, %v4684_v52  ;;  %v3431_v54 = vpop.eup %3430  ;;  %v1730_v45 = vsel %vm250_vm1, %v1594_v8, 0.0  ;;  %v1397_v63 = vadd.f32 %v997_v20, %v4732_v53  ;;  %v1017_v20 = vadd.f32 %v4700_v9, %v4680_v48 }
 0x3b8   :  { %v3433_v38 = vpop.eup %3432  ;;  %v1585_v10 = vmul.f32 %v3431_v54, %v4712_v15 }
 0x3b9   :  { %v4802_v62 = vpop.f32.mrf.mxu1  ;;  %3444 = vtanh.f32 %v1402_v24  ;;  %v3435_v43 = vpop.eup %3434  ;;  %v1596_v39 = vmul.f32 %v3433_v38, %v4712_v15 }
 0x3ba   :  { %3446 = vtanh.f32 %v1393_v49  ;;  %v4850_v24 = vpop.f32.mrf.mxu0  ;;  %v3437_v25 = vpop.eup %3436  ;;  %v1587_v41 = vmul.f32 %v3435_v43, %v4712_v15 }
 0x3bb   :  { %1713 = vadd.xlane.f32.xlu0 %v1712_v0  ;;  %v4817_v1 = vpop.f32.mrf.mxu1  ;;  %v1404_v0 = vadd.f32 %v1032_v16, %v4684_v52  ;;  %v1052_v16 = vadd.f32 %v4757_v13, %v4680_v48  ;;  %v1703_v13 = vsel %vm250_vm1, %v1585_v10, 0.0  ;;  %v3439_v54 = vpop.eup %3438  ;;  %v1736_v55 = vsel %vm250_vm1, %v1596_v39, 0.0 }
 0x3bc   :  { %1704 = vadd.xlane.f32.xlu1 %v1703_v13  ;;  %v1598_v8 = vmul.f32 %v3437_v25, %v4712_v15  ;;  %v3441_v38 = vpop.eup %3440  ;;  %v1589_v10 = vmul.f32 %v3439_v54, %v4712_v15  ;;  %v1401_v13 = vadd.f32 %v1017_v20, %v4732_v53  ;;  %v1037_v20 = vadd.f32 %v4742_v31, %v4680_v48 }
 0x3bd   :  { %v4831_v44 = vpop.f32.mrf.mxu1  ;;  %3448 = vtanh.f32 %v1404_v0  ;;  %v3278_v0 = vpop.f32.mrf.mxu0  ;;  %v1600_v39 = vmul.f32 %v3441_v38, %v4712_v15 }
 0x3be   :  { %3450 = vtanh.f32 %v1395_v37  ;;  %v3443_v43 = vpop.eup %3442  ;;  %v1742_v9 = vsel %vm250_vm1, %v1598_v8, 0.0 }
 0x3bf   :  { %1719 = vadd.xlane.f32.xlu0 %v1718_v40  ;;  %v4843_v59 = vpop.f32.mrf.mxu1  ;;  %v1406_v40 = vadd.f32 %v1042_v56, %v4684_v52  ;;  %v1062_v56 = vadd.f32 %v4785_v4, %v4680_v48  ;;  %v1709_v4 = vsel %vm250_vm1, %v1587_v41, 0.0  ;;  %v1591_v41 = vmul.f32 %v3443_v43, %v4712_v15 }
 0x3c0   :  { %1710 = vadd.xlane.f32.xlu1 %v1709_v4  ;;  %v1748_v36 = vsel %vm250_vm1, %v1600_v39, 0.0  ;;  %v1403_v4 = vadd.f32 %v1027_v35, %v4732_v53  ;;  %v1047_v35 = vadd.f32 %v4771_v29, %v4680_v48 }
 0x3c1   :  { %v4857_v49 = vpop.f32.mrf.mxu1  ;;  %3452 = vtanh.f32 %v1406_v40  ;;  %v4876_v40 = vpop.f32.mrf.mxu0 }
 0x3c2   :  { %3454 = vtanh.f32 %v1397_v63 }
 0x3c3   :  { %1725 = vadd.xlane.f32.xlu0 %v1724_v42  ;;  %v1408_v42 = vadd.f32 %v1052_v16, %v4684_v52  ;;  %v4869_v37 = vpop.f32.mrf.mxu1  ;;  %v1072_v16 = vadd.f32 %v4810_v58, %v4680_v48  ;;  %v1715_v58 = vsel %vm250_vm1, %v1589_v10, 0.0 }
 0x3c4   :  { %1716 = vadd.xlane.f32.xlu1 %v1715_v58  ;;  %v1405_v58 = vadd.f32 %v1037_v20, %v4732_v53  ;;  %v1057_v20 = vadd.f32 %v4797_v18, %v4680_v48 }
 0x3c5   :  { %3456 = vtanh.f32 %v1408_v42  ;;  %v4883_v63 = vpop.f32.mrf.mxu1  ;;  %v3281_v42 = vpop.f32.mrf.mxu0 }
 0x3c6   :  { %v3445_v25 = vpop.eup %3444  ;;  %3458 = vtanh.f32 %v1399_v2 }
 0x3c7   :  { %1731 = vadd.xlane.f32.xlu0 %v1730_v45  ;;  %v1410_v45 = vadd.f32 %v1062_v56, %v4684_v52  ;;  %v3447_v54 = vpop.eup %3446  ;;  %v1082_v56 = vadd.f32 %v3275_v34, %v4680_v48  ;;  %v1602_v8 = vmul.f32 %v3445_v25, %v4712_v15  ;;  %v4894_v2 = vpop.f32.mrf.mxu1  ;;  %v1721_v34 = vsel %vm250_vm1, %v1591_v41, 0.0 }
 0x3c8   :  { %v1593_v10 = vmul.f32 %v3447_v54, %v4712_v15  ;;  %1722 = vadd.xlane.f32.xlu1 %v1721_v34  ;;  %v1407_v34 = vadd.f32 %v1047_v35, %v4732_v53 }
 0x3c9   :  { %3460 = vtanh.f32 %v1410_v45  ;;  %v4900_v45 = vpop.f32.mrf.mxu0  ;;  %v1754_v31 = vsel %vm250_vm1, %v1602_v8, 0.0 }
 0x3ca   :  { %v3449_v38 = vpop.eup %3448  ;;  %3462 = vtanh.f32 %v1401_v13  ;;  %v4907_v13 = vpop.f32.mrf.mxu1 }
 0x3cb   :  { %1737 = vadd.xlane.f32.xlu0 %v1736_v55  ;;  %v1412_v55 = vadd.f32 %v1072_v16, %v4684_v52  ;;  %v3451_v43 = vpop.eup %3450  ;;  %v1092_v16 = vadd.f32 %v3278_v0, %v4680_v48  ;;  %v1604_v39 = vmul.f32 %v3449_v38, %v4712_v15  ;;  %v1727_v0 = vsel %vm250_vm1, %v1593_v10, 0.0 }
 0x3cc   :  { %v1595_v41 = vmul.f32 %v3451_v43, %v4712_v15  ;;  %1728 = vadd.xlane.f32.xlu1 %v1727_v0 }
 0x3cd   :  { %3464 = vtanh.f32 %v1412_v55  ;;  %v1416_v55 = vadd.f32 %v1092_v16, %v4684_v52  ;;  %v1760_v29 = vsel %vm250_vm1, %v1604_v39, 0.0 }
 0x3ce   :  { %v3453_v25 = vpop.eup %3452  ;;  %3466 = vtanh.f32 %v1403_v4  ;;  %v4918_v4 = vpop.f32.mrf.mxu1 }
 0x3cf   :  { %1743 = vadd.xlane.f32.xlu0 %v1742_v9  ;;  %v1414_v9 = vadd.f32 %v1082_v56, %v4684_v52  ;;  %v3455_v54 = vpop.eup %3454  ;;  %v1102_v56 = vadd.f32 %v3281_v42, %v4680_v48  ;;  %v1606_v8 = vmul.f32 %v3453_v25, %v4712_v15  ;;  %v1733_v42 = vsel %vm250_vm1, %v1595_v41, 0.0 }
 0x3d0   :  { %v1597_v10 = vmul.f32 %v3455_v54, %v4712_v15  ;;  %1734 = vadd.xlane.f32.xlu1 %v1733_v42  ;;  %v1067_v25 = vadd.f32 %v4824_v21, %v4680_v48  ;;  %v4929_v35 = vpop.f32.mrf.mxu1 }
 0x3d1   :  { %3468 = vtanh.f32 %v1414_v9  ;;  %v1418_v9 = vadd.f32 %v1102_v56, %v4684_v52 }
 0x3d2   :  { %v3457_v38 = vpop.eup %3456  ;;  %3470 = vtanh.f32 %v1405_v58  ;;  %v1409_v58 = vadd.f32 %v1057_v20, %v4732_v53  ;;  %v1739_v0 = vsel %vm250_vm1, %v1597_v10, 0.0  ;;  %v1411_v20 = vadd.f32 %v1067_v25, %v4732_v53 }
 0x3d3   :  { %1749 = vadd.xlane.f32.xlu0 %v1748_v36  ;;  %v3284_v36 = vpop.f32.mrf.mxu0  ;;  %v3459_v43 = vpop.eup %3458  ;;  %3472 = vtanh.f32 %v1416_v55  ;;  %v1608_v18 = vmul.f32 %v3457_v38, %v4712_v15 }
 0x3d4   :  { %v1112_v16 = vadd.f32 %v3284_v36, %v4680_v48  ;;  %3474 = vtanh.f32 %v1407_v34  ;;  %v1599_v41 = vmul.f32 %v3459_v43, %v4712_v15  ;;  %1740 = vadd.xlane.f32.xlu1 %v1739_v0  ;;  %v4941_v38 = vpop.f32.mrf.mxu1 }
 0x3d5   :  { %3476 = vtanh.f32 %v1418_v9  ;;  %v1772_v55 = vsel %vm250_vm1, %v1608_v18, 0.0  ;;  %v907_v9 = vadd.f32 %v4646_v61, %v4680_v48  ;;  %v1122_v61 = vadd.f32 %v4710_v14, %v4680_v48 }
 0x3d6   :  { %v3461_v39 = vpop.eup %3460  ;;  %v1420_v56 = vadd.f32 %v1112_v16, %v4684_v52  ;;  %3478 = vtanh.f32 %v1409_v58  ;;  %v1745_v34 = vsel %vm250_vm1, %v1599_v41, 0.0  ;;  %v4953_v18 = vpop.f32.mrf.mxu1 }
 0x3d7   :  { %1755 = vadd.xlane.f32.xlu0 %v1754_v31  ;;  %v1766_v31 = vsel %vm250_vm1, %v1606_v8, 0.0  ;;  %v3463_v54 = vpop.eup %3462  ;;  %v1610_v36 = vmul.f32 %v3461_v39, %v4712_v15  ;;  %v1077_v8 = vadd.f32 %v4850_v24, %v4680_v48  ;;  %v1379_v41 = vadd.f32 %v907_v9, %v4732_v53 }
 0x3d8   :  { %v1601_v42 = vmul.f32 %v3463_v54, %v4712_v15  ;;  %3480 = vtanh.f32 %v1420_v56  ;;  %1746 = vadd.xlane.f32.xlu1 %v1745_v34  ;;  %v1132_v34 = vadd.f32 %v4720_v19, %v4680_v48 }
 0x3d9   :  { %v1413_v39 = vadd.f32 %v1077_v8, %v4732_v53  ;;  %3482 = vtanh.f32 %v1411_v20 }
 0x3da   :  { %v3465_v21 = vpop.eup %3464  ;;  %v1751_v25 = vsel %vm250_vm1, %v1601_v42, 0.0  ;;  %v1422_v42 = vadd.f32 %v1122_v61, %v4684_v52  ;;  %v1117_v61 = vadd.f32 %v4714_v32, %v4680_v48  ;;  %v1152_v32 = vadd.f32 %v4747_v50, %v4680_v48 }
 0x3db   :  { %1761 = vadd.xlane.f32.xlu0 %v1760_v29  ;;  %v887_v29 = vadd.f32 %v4613_v3, %v4680_v48  ;;  %v3467_v10 = vpop.eup %3466  ;;  %v1778_v3 = vsel %vm250_vm1, %v1610_v36, 0.0  ;;  %v1612_v16 = vmul.f32 %v3465_v21, %v4712_v15  ;;  %v4965_v36 = vpop.f32.mrf.mxu1  ;;  %v1162_v50 = vadd.f32 %v4762_v26, %v4680_v48 }
 0x3dc   :  { %v1603_v58 = vmul.f32 %v3467_v10, %v4712_v15  ;;  %1752 = vadd.xlane.f32.xlu1 %v1751_v25 }
 0x3dd   :  { %v1375_v43 = vadd.f32 %v887_v29, %v4732_v53  ;;  %v1106_v29 = vpop.f32.mrf.mxu0 }
 0x3de   :  { %v3469_v24 = vpop.eup %3468  ;;  %v1757_v8 = vsel %vm250_vm1, %v1603_v58, 0.0  ;;  %v1142_v58 = vadd.f32 %v4730_v51, %v4680_v48 }
 0x3df   :  { %1767 = vadd.xlane.f32.xlu0 %v1766_v31  ;;  %v1087_v31 = vadd.f32 %v4876_v40, %v4680_v48  ;;  %v3471_v0 = vpop.eup %3470  ;;  %3484 = vtanh.f32 %v1375_v43  ;;  %v1784_v40 = vsel %vm250_vm1, %v1612_v16, 0.0  ;;  %v1614_v54 = vmul.f32 %v3469_v24, %v4712_v15  ;;  %v4976_v16 = vpop.f32.mrf.mxu1 }
 0x3e0   :  { %v3473_v56 = vpop.eup %3472  ;;  %3486 = vtanh.f32 %v1413_v39  ;;  %v1605_v20 = vmul.f32 %v3471_v0, %v4712_v15  ;;  %1758 = vadd.xlane.f32.xlu1 %v1757_v8  ;;  %v1424_v39 = vadd.f32 %v1132_v34, %v4684_v52 }
 0x3e1   :  { %v1415_v21 = vadd.f32 %v1087_v31, %v4732_v53  ;;  %v3475_v14 = vpop.eup %3474  ;;  %3488 = vtanh.f32 %v1379_v41  ;;  %v1616_v10 = vmul.f32 %v3473_v56, %v4712_v15 }
 0x3e2   :  { %v3477_v43 = vpop.eup %3476  ;;  %v1763_v9 = vsel %vm250_vm1, %v1605_v20, 0.0  ;;  %v1607_v19 = vmul.f32 %v3475_v14, %v4712_v15  ;;  %v1421_v14 = vadd.f32 %v1117_v61, %v4732_v53 }
 0x3e3   :  { %1773 = vadd.xlane.f32.xlu0 %v1772_v55  ;;  %v1097_v55 = vadd.f32 %v4900_v45, %v4680_v48  ;;  %v1790_v45 = vsel %vm250_vm1, %v1614_v54, 0.0  ;;  %3490 = vtanh.f32 %v1415_v21  ;;  %v3479_v31 = vpop.eup %3478  ;;  %v1796_v0 = vsel %vm250_vm1, %v1616_v10, 0.0 }
 0x3e4   :  { %1764 = vadd.xlane.f32.xlu1 %v1763_v9  ;;  %3492 = vtanh.f32 %v1422_v42  ;;  %v1618_v41 = vmul.f32 %v3477_v43, %v4712_v15  ;;  %v1769_v56 = vsel %vm250_vm1, %v1607_v19, 0.0  ;;  %v1127_v42 = vadd.f32 %v4722_v22, %v4680_v48 }
 0x3e5   :  { %v1417_v24 = vadd.f32 %v1097_v55, %v4732_v53  ;;  %v3481_v25 = vpop.eup %3480  ;;  %v1609_v55 = vmul.f32 %v3479_v31, %v4712_v15  ;;  %v1137_v22 = vadd.f32 %v4740_v47, %v4680_v48 }
 0x3e6   :  { %v3483_v21 = vpop.eup %3482  ;;  %v1620_v51 = vmul.f32 %v3481_v25, %v4712_v15  ;;  %v1802_v8 = vsel %vm250_vm1, %v1618_v41, 0.0  ;;  %v1172_v41 = vadd.f32 %v4776_v28, %v4680_v48  ;;  %v1182_v28 = vadd.f32 %v4790_v33, %v4680_v48 }
 0x3e7   :  { %1779 = vadd.xlane.f32.xlu0 %v1778_v3  ;;  %v1107_v3 = vadd.f32 %v1106_v29, %v4680_v48  ;;  %3494 = vtanh.f32 %v1417_v24  ;;  %v1426_v29 = vadd.f32 %v1142_v58, %v4684_v52  ;;  %v1611_v10 = vmul.f32 %v3483_v21, %v4712_v15 }
 0x3e8   :  { %1770 = vadd.xlane.f32.xlu1 %v1769_v56  ;;  %3496 = vtanh.f32 %v1424_v39  ;;  %v1808_v24 = vsel %vm250_vm1, %v1620_v51, 0.0  ;;  %v1423_v39 = vadd.f32 %v1127_v42, %v4732_v53  ;;  %v1425_v56 = vadd.f32 %v1137_v22, %v4732_v53 }
 0x3e9   :  { %v1419_v54 = vadd.f32 %v1107_v3, %v4732_v53  ;;  %v1428_v3 = vadd.f32 %v1152_v32, %v4684_v52  ;;  %v1781_v26 = vsel %vm250_vm1, %v1611_v10, 0.0  ;;  %v1147_v21 = vadd.f32 %v4755_v12, %v4680_v48 }
 0x3ea   :  { %v1157_v12 = vadd.f32 %v4769_v27, %v4680_v48 }
 0x3eb   :  { %1785 = vadd.xlane.f32.xlu0 %v1784_v40  ;;  %v4988_v40 = vpop.f32.mrf.mxu1  ;;  %3498 = vtanh.f32 %v1419_v54  ;;  %v1427_v10 = vadd.f32 %v1147_v21, %v4732_v53 }
 0x3ec   :  { %v3485_v20 = vpop.eup %3484  ;;  %3500 = vtanh.f32 %v1426_v29  ;;  %v1429_v22 = vadd.f32 %v1157_v12, %v4732_v53  ;;  %v1187_v12 = vadd.f32 %v4831_v44, %v4680_v48  ;;  %v1197_v44 = vadd.f32 %v4857_v49, %v4680_v48 }
 0x3ed   :  { %v4999_v34 = vpop.f32.mrf.mxu1  ;;  %v3487_v43 = vpop.eup %3486  ;;  %v1575_v9 = vmul.f32 %v3485_v20, %v4712_v15  ;;  %3502 = vtanh.f32 %v1421_v14 }
 0x3ee   :  { %v3489_v19 = vpop.eup %3488  ;;  %v1613_v25 = vmul.f32 %v3487_v43, %v4712_v15  ;;  %3504 = vtanh.f32 %v1428_v3  ;;  %v1434_v3 = vadd.f32 %v1182_v28, %v4684_v52  ;;  %v1212_v28 = vadd.f32 %v4869_v37, %v4680_v48 }
 0x3ef   :  { %1791 = vadd.xlane.f32.xlu0 %v1790_v45  ;;  %v1775_v45 = vsel %vm250_vm1, %v1609_v55, 0.0  ;;  %v5012_v31 = vpop.f32.mrf.mxu1  ;;  %v1673_v47 = vsel %vm250_vm1, %v1575_v9, 0.0  ;;  %v1579_v61 = vmul.f32 %v3489_v19, %v4712_v15  ;;  %3506 = vtanh.f32 %v1423_v39 }
 0x3f0   :  { %1776 = vadd.xlane.f32.xlu1 %v1775_v45  ;;  %v3491_v58 = vpop.eup %3490  ;;  %v1787_v51 = vsel %vm250_vm1, %v1613_v25, 0.0  ;;  %v1222_v37 = vadd.f32 %v4894_v2, %v4680_v48 }
 0x3f1   :  { %v3493_v54 = vpop.eup %3492  ;;  %v5023_v55 = vpop.f32.mrf.mxu1  ;;  %v1615_v29 = vmul.f32 %v3491_v58, %v4712_v15  ;;  %v1685_v20 = vsel %vm250_vm1, %v1579_v61, 0.0 }
 0x3f2   :  { %v1622_v14 = vmul.f32 %v3493_v54, %v4712_v15 }
 0x3f3   :  { %1797 = vadd.xlane.f32.xlu0 %v1796_v0  ;;  %v1430_v0 = vadd.f32 %v1162_v50, %v4684_v52  ;;  %v5036_v45 = vpop.f32.mrf.mxu1  ;;  %v1793_v33 = vsel %vm250_vm1, %v1615_v29, 0.0 }
 0x3f4   :  { %1782 = vadd.xlane.f32.xlu1 %v1781_v26  ;;  %v3495_v32 = vpop.eup %3494  ;;  %v1814_v27 = vsel %vm250_vm1, %v1622_v14, 0.0  ;;  %v1167_v26 = vadd.f32 %v4783_v46, %v4680_v48  ;;  %v1177_v46 = vadd.f32 %v4802_v62, %v4680_v48 }
 0x3f5   :  { %3508 = vtanh.f32 %v1430_v0  ;;  %v3497_v42 = vpop.eup %3496  ;;  %v1617_v43 = vmul.f32 %v3495_v32, %v4712_v15  ;;  %v5047_v39 = vpop.f32.mrf.mxu1 }
 0x3f6   :  { %3510 = vtanh.f32 %v1425_v56  ;;  %v1624_v9 = vmul.f32 %v3497_v42, %v4712_v15  ;;  %v1431_v21 = vadd.f32 %v1167_v26, %v4732_v53  ;;  %v1433_v14 = vadd.f32 %v1177_v46, %v4732_v53 }
 0x3f7   :  { %1803 = vadd.xlane.f32.xlu0 %v1802_v8  ;;  %v1432_v8 = vadd.f32 %v1172_v41, %v4684_v52  ;;  %v1799_v25 = vsel %vm250_vm1, %v1617_v43, 0.0  ;;  %v5060_v56 = vpop.f32.mrf.mxu1 }
 0x3f8   :  { %1788 = vadd.xlane.f32.xlu1 %v1787_v51  ;;  %v3499_v50 = vpop.eup %3498 }
 0x3f9   :  { %3512 = vtanh.f32 %v1432_v8  ;;  %v3501_v19 = vpop.eup %3500  ;;  %v1619_v58 = vmul.f32 %v3499_v50, %v4712_v15  ;;  %v5071_v42 = vpop.f32.mrf.mxu1  ;;  %v1440_v50 = vadd.f32 %v1212_v28, %v4684_v52 }
 0x3fa   :  { %3514 = vtanh.f32 %v1427_v10  ;;  %v3503_v0 = vpop.eup %3502  ;;  %v1626_v61 = vmul.f32 %v3501_v19, %v4712_v15  ;;  %v1435_v19 = vadd.f32 %v1187_v12, %v4732_v53  ;;  %v1252_v12 = vadd.f32 %v4965_v36, %v4680_v48 }
 0x3fb   :  { %1809 = vadd.xlane.f32.xlu0 %v1808_v24  ;;  %v1192_v24 = vadd.f32 %v4817_v1, %v4680_v48  ;;  %v1202_v1 = vadd.f32 %v4843_v59, %v4680_v48  ;;  %3516 = vtanh.f32 %v1434_v3  ;;  %v3505_v54 = vpop.eup %3504  ;;  %v1805_v59 = vsel %vm250_vm1, %v1619_v58, 0.0 }
 0x3fc   :  { %1794 = vadd.xlane.f32.xlu1 %v1793_v33  ;;  %3518 = vtanh.f32 %v1429_v22  ;;  %v1621_v51 = vmul.f32 %v3503_v0, %v4712_v15  ;;  %v3507_v29 = vpop.eup %3506  ;;  %v1826_v62 = vsel %vm250_vm1, %v1626_v61, 0.0  ;;  %v1628_v8 = vmul.f32 %v3505_v54, %v4712_v15 }
 0x3fd   :  { %v1436_v41 = vadd.f32 %v1192_v24, %v4684_v52  ;;  %v1438_v32 = vadd.f32 %v1202_v1, %v4684_v52  ;;  %v1623_v33 = vmul.f32 %v3507_v29, %v4712_v15  ;;  %v1232_v58 = vadd.f32 %v4918_v4, %v4680_v48 }
 0x3fe   :  { %v1811_v10 = vsel %vm250_vm1, %v1621_v51, 0.0  ;;  %v1832_v3 = vsel %vm250_vm1, %v1628_v8, 0.0  ;;  %v1207_v61 = vadd.f32 %v4883_v63, %v4680_v48  ;;  %v1242_v4 = vadd.f32 %v4941_v38, %v4680_v48 }
 0x3ff   :  { %1674 = vadd.xlane.f32.xlu0 %v1673_v47  ;;  %v1820_v47 = vsel %vm250_vm1, %v1624_v9, 0.0  ;;  %3520 = vtanh.f32 %v1436_v41  ;;  %v5084_v9 = vpop.f32.mrf.mxu1  ;;  %v1817_v2 = vsel %vm250_vm1, %v1623_v33, 0.0  ;;  %v1437_v41 = vadd.f32 %v1197_v44, %v4732_v53 }
 0x400   :  { %1800 = vadd.xlane.f32.xlu1 %v1799_v25  ;;  %3522 = vtanh.f32 %v1431_v21  ;;  %v1442_v25 = vadd.f32 %v1222_v37, %v4684_v52  ;;  %v1217_v63 = vadd.f32 %v4907_v13, %v4680_v48  ;;  %v1262_v36 = vadd.f32 %v4988_v40, %v4680_v48 }
 0x401   :  { %3524 = vtanh.f32 %v1438_v32  ;;  %v1448_v44 = vadd.f32 %v1252_v12, %v4684_v52 }
 0x402   :  { %3526 = vtanh.f32 %v1433_v14  ;;  %v1446_v14 = vadd.f32 %v1242_v4, %v4684_v52 }
 0x403   :  { %1686 = vadd.xlane.f32.xlu0 %v1685_v20  ;;  %v3509_v20 = vpop.eup %3508  ;;  %3528 = vtanh.f32 %v1440_v50  ;;  %v1227_v50 = vadd.f32 %v4929_v35, %v4680_v48  ;;  %v1237_v35 = vadd.f32 %v4953_v18, %v4680_v48 }
 0x404   :  { %1806 = vadd.xlane.f32.xlu1 %v1805_v59  ;;  %v3511_v43 = vpop.eup %3510  ;;  %v1630_v24 = vmul.f32 %v3509_v20, %v4712_v15  ;;  %3530 = vtanh.f32 %v1435_v19  ;;  %v1444_v59 = vadd.f32 %v1232_v58, %v4684_v52 }
 0x405   :  { %v1625_v22 = vmul.f32 %v3511_v43, %v4712_v15  ;;  %3532 = vtanh.f32 %v1442_v25  ;;  %v1441_v43 = vadd.f32 %v1217_v63, %v4732_v53  ;;  %v1443_v25 = vadd.f32 %v1227_v50, %v4732_v53 }
 0x406   :  { %v1838_v49 = vsel %vm250_vm1, %v1630_v24, 0.0  ;;  %3534 = vtanh.f32 %v1437_v41 }
 0x407   :  { %1815 = vadd.xlane.f32.xlu0 %v1814_v27  ;;  %v3513_v27 = vpop.eup %3512  ;;  %v1823_v54 = vsel %vm250_vm1, %v1625_v22, 0.0  ;;  %3536 = vtanh.f32 %v1444_v59 }
 0x408   :  { %1812 = vadd.xlane.f32.xlu1 %v1811_v10  ;;  %v3515_v26 = vpop.eup %3514  ;;  %v1632_v0 = vmul.f32 %v3513_v27, %v4712_v15 }
 0x409   :  { %v3517_v1 = vpop.eup %3516  ;;  %v1627_v46 = vmul.f32 %v3515_v26, %v4712_v15 }
 0x40a   :  { %v3519_v21 = vpop.eup %3518  ;;  %v1844_v51 = vsel %vm250_vm1, %v1632_v0, 0.0  ;;  %v1634_v29 = vmul.f32 %v3517_v1, %v4712_v15  ;;  %v1450_v0 = vadd.f32 %v1262_v36, %v4684_v52  ;;  %v1272_v1 = vadd.f32 %v5012_v31, %v4680_v48 }
 0x40b   :  { %1821 = vadd.xlane.f32.xlu0 %v1820_v47  ;;  %v5095_v47 = vpop.f32.mrf.mxu1  ;;  %v1829_v38 = vsel %vm250_vm1, %v1627_v46, 0.0  ;;  %v1629_v8 = vmul.f32 %v3519_v21, %v4712_v15  ;;  %v1247_v21 = vadd.f32 %v4976_v16, %v4680_v48  ;;  %v1282_v31 = vadd.f32 %v5036_v45, %v4680_v48 }
 0x40c   :  { %1818 = vadd.xlane.f32.xlu1 %v1817_v2  ;;  %v3521_v32 = vpop.eup %3520  ;;  %v1850_v13 = vsel %vm250_vm1, %v1634_v29, 0.0  ;;  %v1452_v29 = vadd.f32 %v1272_v1, %v4684_v52  ;;  %v1257_v16 = vadd.f32 %v4999_v34, %v4680_v48 }
 0x40d   :  { %v5108_v28 = vpop.f32.mrf.mxu1  ;;  %v3523_v20 = vpop.eup %3522  ;;  %v1636_v10 = vmul.f32 %v3521_v32, %v4712_v15  ;;  %v1454_v12 = vadd.f32 %v1282_v31, %v4684_v52 }
 0x40e   :  { %v3525_v33 = vpop.eup %3524  ;;  %v1631_v24 = vmul.f32 %v3523_v20, %v4712_v15 }
 0x40f   :  { %1827 = vadd.xlane.f32.xlu0 %v1826_v62  ;;  %v1439_v62 = vadd.f32 %v1207_v61, %v4732_v53  ;;  %v5119_v37 = vpop.f32.mrf.mxu1  ;;  %v3527_v27 = vpop.eup %3526  ;;  %v1856_v19 = vsel %vm250_vm1, %v1636_v10, 0.0  ;;  %v1638_v2 = vmul.f32 %v3525_v33, %v4712_v15 }
 0x410   :  { %1824 = vadd.xlane.f32.xlu1 %v1823_v54  ;;  %v3529_v22 = vpop.eup %3528  ;;  %v1841_v40 = vsel %vm250_vm1, %v1631_v24, 0.0  ;;  %v1633_v58 = vmul.f32 %v3527_v27, %v4712_v15  ;;  %v1445_v54 = vadd.f32 %v1237_v35, %v4732_v53 }
 0x411   :  { %3538 = vtanh.f32 %v1439_v62  ;;  %v5132_v26 = vpop.f32.mrf.mxu1  ;;  %v1862_v18 = vsel %vm250_vm1, %v1638_v2, 0.0  ;;  %v1640_v41 = vmul.f32 %v3529_v22, %v4712_v15 }
 0x412   :  { %3540 = vtanh.f32 %v1446_v14  ;;  %v1847_v4 = vsel %vm250_vm1, %v1633_v58, 0.0 }
 0x413   :  { %1833 = vadd.xlane.f32.xlu0 %v1832_v3  ;;  %v1835_v3 = vsel %vm250_vm1, %v1629_v8, 0.0  ;;  %3542 = vtanh.f32 %v1441_v43  ;;  %v5143_v46 = vpop.f32.mrf.mxu1  ;;  %v1868_v32 = vsel %vm250_vm1, %v1640_v41, 0.0  ;;  %v1447_v8 = vadd.f32 %v1247_v21, %v4732_v53 }
 0x414   :  { %1830 = vadd.xlane.f32.xlu1 %v1829_v38  ;;  %3544 = vtanh.f32 %v1448_v44  ;;  %v1449_v43 = vadd.f32 %v1257_v16, %v4732_v53  ;;  %v1302_v44 = vadd.f32 %v5084_v9, %v4680_v48 }
 0x415   :  { %3546 = vtanh.f32 %v1443_v25  ;;  %v5156_v38 = vpop.f32.mrf.mxu1 }
 0x416   :  { %3548 = vtanh.f32 %v1450_v0  ;;  %v1458_v1 = vadd.f32 %v1302_v44, %v4684_v52 }
 0x417   :  { %1839 = vadd.xlane.f32.xlu0 %v1838_v49  ;;  %v3531_v49 = vpop.eup %3530  ;;  %3550 = vtanh.f32 %v1445_v54  ;;  %v5167_v50 = vpop.f32.mrf.mxu1 }
 0x418   :  { %1836 = vadd.xlane.f32.xlu1 %v1835_v3  ;;  %v3533_v61 = vpop.eup %3532  ;;  %v1635_v59 = vmul.f32 %v3531_v49, %v4712_v15  ;;  %3552 = vtanh.f32 %v1452_v29  ;;  %v1267_v3 = vadd.f32 %v5023_v55, %v4680_v48  ;;  %v1277_v55 = vadd.f32 %v5047_v39, %v4680_v48 }
 0x419   :  { %v1642_v63 = vmul.f32 %v3533_v61, %v4712_v15  ;;  %3554 = vtanh.f32 %v1447_v8  ;;  %v3353_v25 = vpop.f32.mrf.mxu1 }
 0x41a   :  { %v1853_v45 = vsel %vm250_vm1, %v1635_v59, 0.0  ;;  %3556 = vtanh.f32 %v1454_v12  ;;  %v1453_v54 = vadd.f32 %v1277_v55, %v4732_v53 }
 0x41b   :  { %1845 = vadd.xlane.f32.xlu0 %v1844_v51  ;;  %v3535_v51 = vpop.eup %3534  ;;  %v1874_v34 = vsel %vm250_vm1, %v1642_v63, 0.0  ;;  %3558 = vtanh.f32 %v1449_v43  ;;  %v5193_v21 = vpop.f32.mrf.mxu1 }
 0x41c   :  { %1842 = vadd.xlane.f32.xlu1 %v1841_v40  ;;  %v3537_v62 = vpop.eup %3536  ;;  %v1637_v20 = vmul.f32 %v3535_v51, %v4712_v15  ;;  %v1451_v40 = vadd.f32 %v1267_v3, %v4732_v53  ;;  %v1307_v3 = vadd.f32 %v5119_v37, %v4680_v48  ;;  %v1342_v37 = vadd.f32 %v3353_v25, %v4680_v48 }
 0x41d   :  { %v1644_v10 = vmul.f32 %v3537_v62, %v4712_v15  ;;  %v3356_v8 = vpop.f32.mrf.mxu1 }
 0x41e   :  { %v3539_v14 = vpop.eup %3538  ;;  %v1859_v24 = vsel %vm250_vm1, %v1637_v20, 0.0 }
 0x41f   :  { %1851 = vadd.xlane.f32.xlu0 %v1850_v13  ;;  %v1292_v13 = vadd.f32 %v5060_v56, %v4680_v48  ;;  %v3541_v33 = vpop.eup %3540  ;;  %v1639_v27 = vmul.f32 %v3539_v14, %v4712_v15  ;;  %v1880_v2 = vsel %vm250_vm1, %v1644_v10, 0.0  ;;  %v1332_v10 = vadd.f32 %v5156_v38, %v4680_v48 }
 0x420   :  { %1848 = vadd.xlane.f32.xlu1 %v1847_v4  ;;  %v3543_v56 = vpop.eup %3542  ;;  %v1646_v22 = vmul.f32 %v3541_v33, %v4712_v15  ;;  %v1287_v4 = vadd.f32 %v5071_v42, %v4680_v48  ;;  %v1297_v42 = vadd.f32 %v5095_v47, %v4680_v48 }
 0x421   :  { %v3545_v35 = vpop.eup %3544  ;;  %v1865_v58 = vsel %vm250_vm1, %v1639_v27, 0.0  ;;  %v1641_v9 = vmul.f32 %v3543_v56, %v4712_v15 }
 0x422   :  { %v3547_v0 = vpop.eup %3546  ;;  %v1886_v39 = vsel %vm250_vm1, %v1646_v22, 0.0  ;;  %v1648_v41 = vmul.f32 %v3545_v35, %v4712_v15  ;;  %v1457_v43 = vadd.f32 %v1297_v42, %v4732_v53  ;;  %v1464_v22 = vadd.f32 %v1332_v10, %v4684_v52 }
 0x423   :  { %1857 = vadd.xlane.f32.xlu0 %v1856_v19  ;;  %v1456_v19 = vadd.f32 %v1292_v13, %v4684_v52  ;;  %v3549_v61 = vpop.eup %3548  ;;  %v1871_v59 = vsel %vm250_vm1, %v1641_v9, 0.0  ;;  %v1317_v9 = vadd.f32 %v5143_v46, %v4680_v48 }
 0x424   :  { %1854 = vadd.xlane.f32.xlu1 %v1853_v45  ;;  %v3551_v31 = vpop.eup %3550  ;;  %v1892_v63 = vsel %vm250_vm1, %v1648_v41, 0.0  ;;  %v1650_v62 = vmul.f32 %v3549_v61, %v4712_v15  ;;  %v1455_v45 = vadd.f32 %v1287_v4, %v4732_v53  ;;  %v1466_v61 = vadd.f32 %v1342_v37, %v4684_v52 }
 0x425   :  { %3560 = vtanh.f32 %v1456_v19  ;;  %v3553_v16 = vpop.eup %3552  ;;  %v1645_v14 = vmul.f32 %v3551_v31, %v4712_v15  ;;  %v1461_v31 = vadd.f32 %v1317_v9, %v4732_v53 }
 0x426   :  { %3562 = vtanh.f32 %v1451_v40  ;;  %v1898_v47 = vsel %vm250_vm1, %v1650_v62, 0.0  ;;  %v1652_v33 = vmul.f32 %v3553_v16, %v4712_v15  ;;  %v1459_v40 = vadd.f32 %v1307_v3, %v4732_v53 }
 0x427   :  { %1863 = vadd.xlane.f32.xlu0 %v1862_v18  ;;  %v1312_v18 = vadd.f32 %v5108_v28, %v4680_v48  ;;  %v1643_v28 = vmul.f32 %v3547_v0, %v4712_v15  ;;  %3564 = vtanh.f32 %v1458_v1  ;;  %v1883_v27 = vsel %vm250_vm1, %v1645_v14, 0.0 }
 0x428   :  { %1860 = vadd.xlane.f32.xlu1 %v1859_v24  ;;  %3566 = vtanh.f32 %v1453_v54  ;;  %v5221_v24 = vpop.f32.mrf.mxu1  ;;  %v1904_v35 = vsel %vm250_vm1, %v1652_v33, 0.0  ;;  %v1352_v54 = vadd.f32 %v3356_v8, %v4680_v48  ;;  %v337_v16 = vsub.s32 2, %v4121_v30 }
 0x429   :  { %v1460_v29 = vadd.f32 %v1312_v18, %v4684_v52  ;;  %v1877_v20 = vsel %vm250_vm1, %v1643_v28, 0.0 }
 0x42b   :  { %1869 = vadd.xlane.f32.xlu0 %v1868_v32  ;;  %v1322_v32 = vadd.f32 %v5132_v26, %v4680_v48  ;;  %v3555_v26 = vpop.eup %3554  ;;  %3568 = vtanh.f32 %v1460_v29  ;;  %v1327_v29 = vadd.f32 %v5167_v50, %v4680_v48 }
 0x42c   :  { %1866 = vadd.xlane.f32.xlu1 %v1865_v58  ;;  %v3557_v13 = vpop.eup %3556  ;;  %3570 = vtanh.f32 %v1455_v45  ;;  %v1647_v44 = vmul.f32 %v3555_v26, %v4712_v15  ;;  %v3359_v58 = vpop.f32.mrf.mxu1  ;;  %v1468_v45 = vadd.f32 %v1352_v54, %v4684_v52 }
 0x42d   :  { %v3559_v19 = vpop.eup %3558  ;;  %v1463_v30 = vadd.f32 %v1327_v29, %v4732_v53 }
 0x42e   :  { %v5224_v56 = vpop.xlane.xlu1 %1677  ;;  %v1889_v0 = vsel %vm250_vm1, %v1647_v44, 0.0  ;;  %v1649_v1 = vmul.f32 %v3559_v19, %v4712_v15 }
 0x42f   :  { %1875 = vadd.xlane.f32.xlu0 %v1874_v34  ;;  %v1462_v34 = vadd.f32 %v1322_v32, %v4684_v52 }
 0x430   :  { %v5173_v36 = vpop.xlane.xlu0 %1689  ;;  %1872 = vadd.xlane.f32.xlu1 %v1871_v59  ;;  %v1356_v59 = vpop.f32.mrf.mxu1  ;;  %v1895_v32 = vsel %vm250_vm1, %v1649_v1, 0.0 }
 0x431   :  { %7027 = vst [vmem:[#allocation15_spill] sm:$0xff] %v5173_v36  ;;  %3572 = vtanh.f32 %v1462_v34  ;;  %v1337_v34 = vadd.f32 %v5193_v21, %v4680_v48 }
 0x432   :  { %v3561_v55 = vpop.eup %3560  ;;  %3574 = vtanh.f32 %v1457_v43  ;;  %v3362_v26 = vpop.f32.mrf.mxu1  ;;  %v3808_v43 = vld [vmem:[%s6913_s7] sm:$0xf] }
 0x433   :  { %1881 = vadd.xlane.f32.xlu0 %v1880_v2  ;;  %v1654_v2 = vmul.f32 %v3557_v13, %v4712_v15  ;;  %3576 = vtanh.f32 %v1464_v22  ;;  %v1656_v46 = vmul.f32 %v3561_v55, %v4712_v15  ;;  %v338_v3 = vrot.slane %v3808_v43, %v337_v16 }
 0x434   :  { %v5185_v49 = vpop.xlane.xlu0 %1683  ;;  %1878 = vadd.xlane.f32.xlu1 %v1877_v20  ;;  %3578 = vtanh.f32 %v1459_v40  ;;  %v1362_v20 = vadd.f32 %v3359_v58, %v4680_v48  ;;  %v1372_v19 = vadd.f32 %v3362_v26, %v4680_v48  ;;  %v1465_v55 = vadd.f32 %v1337_v34, %v4732_v53  ;;  %v1366_v29 = vpop.f32.mrf.mxu1 }
 0x435   :  { %7028 = vst [vmem:[#allocation16_spill] sm:$0xff] %v5185_v49  ;;  %v1910_v25 = vsel %vm250_vm1, %v1654_v2, 0.0  ;;  %3580 = vtanh.f32 %v1466_v61  ;;  %v1916_v50 = vsel %vm250_vm1, %v1656_v46, 0.0  ;;  %v1347_v40 = vadd.f32 %v5221_v24, %v4680_v48 }
 0x436   :  { %v5243_v4 = vpop.xlane.xlu1 %1680  ;;  %3582 = vtanh.f32 %v1461_v31  ;;  %v1470_v44 = vadd.f32 %v1362_v20, %v4684_v52  ;;  %v1472_v1 = vadd.f32 %v1372_v19, %v4684_v52  ;;  %v1367_v20 = vadd.f32 %v1366_v29, %v4680_v48 }
 0x437   :  { %1887 = vadd.xlane.f32.xlu0 %v1886_v39  ;;  %v3563_v39 = vpop.eup %3562  ;;  %7031 = vst [vmem:[#allocation19_spill] sm:$0xff] %v5243_v4  ;;  %3584 = vtanh.f32 %v1468_v45  ;;  %v1467_v46 = vadd.f32 %v1347_v40, %v4732_v53 }
 0x438   :  { %v5199_v51 = vpop.xlane.xlu0 %1695  ;;  %1884 = vadd.xlane.f32.xlu1 %v1883_v27  ;;  %v3565_v41 = vpop.eup %3564  ;;  %3586 = vtanh.f32 %v1463_v30 }
 0x439   :  { %7029 = vst [vmem:[#allocation17_spill] sm:$0xff] %v5199_v51  ;;  %v3567_v28 = vpop.eup %3566  ;;  %v1658_v42 = vmul.f32 %v3565_v41, %v4712_v15  ;;  %3588 = vtanh.f32 %v1470_v44 }
 0x43a   :  { %v3569_v8 = vpop.eup %3568  ;;  %v5257_v14 = vpop.xlane.xlu1 %1692  ;;  %v1653_v13 = vmul.f32 %v3567_v28, %v4712_v15  ;;  %3590 = vtanh.f32 %v1465_v55 }
 0x43b   :  { %1893 = vadd.xlane.f32.xlu0 %v1892_v63  ;;  %v1651_v63 = vmul.f32 %v3563_v39, %v4712_v15  ;;  %7033 = vst [vmem:[#allocation21_spill] sm:$0xff] %v5257_v14  ;;  %v3571_v33 = vpop.eup %3570  ;;  %v1922_v27 = vsel %vm250_vm1, %v1658_v42, 0.0  ;;  %v1660_v21 = vmul.f32 %v3569_v8, %v4712_v15  ;;  %3592 = vtanh.f32 %v1472_v1 }
 0x43c   :  { %v5211_v12 = vpop.xlane.xlu0 %1701  ;;  %1890 = vadd.xlane.f32.xlu1 %v1889_v0  ;;  %v1907_v37 = vsel %vm250_vm1, %v1653_v13, 0.0  ;;  %v1655_v58 = vmul.f32 %v3571_v33, %v4712_v15  ;;  %v417_v0 = vadd.f32 %v4697_v6, %v338_v3  ;;  %v1357_v6 = vadd.f32 %v1356_v59, %v4680_v48 }
 0x43d   :  { %v1901_v10 = vsel %vm250_vm1, %v1651_v63, 0.0  ;;  %3594 = vtanh.f32 %v1467_v46  ;;  %v412_v33 = vadd.f32 %v4704_v11, %v338_v3  ;;  %v1471_v48 = vadd.f32 %v1367_v20, %v4732_v53 }
 0x43e   :  { %v3573_v22 = vpop.eup %3572  ;;  %v1913_v28 = vsel %vm250_vm1, %v1655_v58, 0.0  ;;  %v1469_v59 = vadd.f32 %v1357_v6, %v4732_v53 }
 0x43f   :  { %1899 = vadd.xlane.f32.xlu0 %v1898_v47  ;;  %v5273_v2 = vpop.xlane.xlu1 %1698  ;;  %v1662_v41 = vmul.f32 %v3573_v22, %v4712_v15  ;;  %v1967_v11 = vadd.f32 %v412_v33, %v4732_v53 }
 0x440   :  { %v5227_v38 = vpop.xlane.xlu0 %1707  ;;  %1896 = vadd.xlane.f32.xlu1 %v1895_v32  ;;  %7034 = vst [vmem:[#allocation22_spill] sm:$0xff] %v5273_v2  ;;  %v1968_v32 = vadd.f32 %v417_v0, %v4684_v52 }
 0x441   :  { %v1934_v16 = vsel %vm250_vm1, %v1662_v41, 0.0 }
 0x442   :  { %3596 = vtanh.f32 %v1968_v32 }
 0x443   :  { %1905 = vadd.xlane.f32.xlu0 %v1904_v35  ;;  %v3575_v35 = vpop.eup %3574  ;;  %3598 = vtanh.f32 %v1469_v59 }
 0x444   :  { %v5238_v18 = vpop.xlane.xlu0 %1713  ;;  %1902 = vadd.xlane.f32.xlu1 %v1901_v10  ;;  %v3577_v61 = vpop.eup %3576  ;;  %v1657_v54 = vmul.f32 %v3575_v35, %v4712_v15  ;;  %3600 = vtanh.f32 %v1471_v48 }
 0x445   :  { %7030 = vst [vmem:[#allocation18_spill] sm:$0xff] %v5238_v18  ;;  %v5285_v39 = vpop.xlane.xlu1 %1704  ;;  %v3579_v24 = vpop.eup %3578  ;;  %v1664_v42 = vmul.f32 %v3577_v61, %v4712_v15  ;;  %3602 = vtanh.f32 %v1967_v11 }
 0x446   :  { %v3581_v8 = vpop.eup %3580  ;;  %v1919_v45 = vsel %vm250_vm1, %v1657_v54, 0.0 }
 0x447   :  { %1911 = vadd.xlane.f32.xlu0 %v1910_v25  ;;  %v1928_v25 = vsel %vm250_vm1, %v1660_v21, 0.0  ;;  %v3583_v52 = vpop.eup %3582  ;;  %v1940_v30 = vsel %vm250_vm1, %v1664_v42, 0.0  ;;  %v1666_v34 = vmul.f32 %v3581_v8, %v4712_v15 }
 0x448   :  { %v5251_v62 = vpop.xlane.xlu0 %1719  ;;  %1908 = vadd.xlane.f32.xlu1 %v1907_v37  ;;  %v3585_v10 = vpop.eup %3584 }
 0x449   :  { %7032 = vst [vmem:[#allocation20_spill] sm:$0xff] %v5251_v62  ;;  %v5296_v63 = vpop.xlane.xlu1 %1710  ;;  %v3587_v19 = vpop.eup %3586  ;;  %v1946_v22 = vsel %vm250_vm1, %v1666_v34, 0.0  ;;  %v1668_v37 = vmul.f32 %v3585_v10, %v4712_v15 }
 0x44a   :  { %7037 = vst [vmem:[#allocation25_spill] sm:$0xff] %v5296_v63  ;;  %v3589_v35 = vpop.eup %3588  ;;  %v1663_v55 = vmul.f32 %v3587_v19, %v4712_v15 }
 0x44b   :  { %1917 = vadd.xlane.f32.xlu0 %v1916_v50  ;;  %v1659_v50 = vmul.f32 %v3579_v24, %v4712_v15  ;;  %v3591_v58 = vpop.eup %3590  ;;  %v1952_v1 = vsel %vm250_vm1, %v1668_v37, 0.0 }
 0x44c   :  { %v5265_v47 = vpop.xlane.xlu0 %1725  ;;  %1914 = vadd.xlane.f32.xlu1 %v1913_v28  ;;  %v3593_v41 = vpop.eup %3592  ;;  %v1937_v53 = vsel %vm250_vm1, %v1663_v55, 0.0  ;;  %v1665_v61 = vmul.f32 %v3591_v58, %v4712_v15 }
 0x44d   :  { %v5306_v13 = vpop.xlane.xlu1 %1716  ;;  %v1925_v43 = vsel %vm250_vm1, %v1659_v50, 0.0  ;;  %v3595_v24 = vpop.eup %3594  ;;  %v1672_v28 = vmul.f32 %v3593_v41, %v4712_v15 }
 0x44e   :  { %v1943_v32 = vsel %vm250_vm1, %v1665_v61, 0.0 }
 0x44f   :  { %1923 = vadd.xlane.f32.xlu0 %v1922_v27  ;;  %v1661_v27 = vmul.f32 %v3583_v52, %v4712_v15  ;;  %v3597_v29 = vpop.eup %3596  ;;  %v1964_v59 = vsel %vm250_vm1, %v1672_v28, 0.0 }
 0x450   :  { %v5281_v9 = vpop.xlane.xlu0 %1731  ;;  %1920 = vadd.xlane.f32.xlu1 %v1919_v45  ;;  %v3599_v8 = vpop.eup %3598  ;;  %v1972_v20 = vmul.f32 %v3597_v29, %v4712_v15 }
 0x451   :  { %7035 = vst [vmem:[#allocation23_spill] sm:$0xff] %v5281_v9  ;;  %v5316_v21 = vpop.xlane.xlu1 %1722  ;;  %v1931_v3 = vsel %vm250_vm1, %v1661_v27, 0.0  ;;  %v1669_v52 = vmul.f32 %v3599_v8, %v4712_v15  ;;  %v3601_v34 = vpop.eup %3600 }
 0x452   :  { %7040 = vst [vmem:[#allocation28_spill] sm:$0xff] %v5316_v21  ;;  %v1976_v33 = vsel %vm250_vm1, %v1972_v20, 0.0  ;;  %v3603_v19 = vpop.eup %3602 }
 0x453   :  { %1929 = vadd.xlane.f32.xlu0 %v1928_v25  ;;  %v1670_v25 = vmul.f32 %v3589_v35, %v4712_v15  ;;  %v1955_v48 = vsel %vm250_vm1, %v1669_v52, 0.0  ;;  %v1971_v35 = vmul.f32 %v3603_v19, %v4712_v15 }
 0x454   :  { %v5293_v31 = vpop.xlane.xlu0 %1737  ;;  %1926 = vadd.xlane.f32.xlu1 %v1925_v43  ;;  %v1671_v43 = vmul.f32 %v3601_v34, %v4712_v15 }
 0x455   :  { %7036 = vst [vmem:[#allocation24_spill] sm:$0xff] %v5293_v31  ;;  %v5325_v0 = vpop.xlane.xlu1 %1728  ;;  %v1958_v6 = vsel %vm250_vm1, %v1670_v25, 0.0  ;;  %v1973_v55 = vsel %vm250_vm1, %v1971_v35, 0.0 }
 0x456   :  { %v1961_v37 = vsel %vm250_vm1, %v1671_v43, 0.0 }
 0x457   :  { %1935 = vadd.xlane.f32.xlu0 %v1934_v16  ;;  %v1667_v16 = vmul.f32 %v3595_v24, %v4712_v15 }
 0x458   :  { %v5304_v26 = vpop.xlane.xlu0 %1743  ;;  %1932 = vadd.xlane.f32.xlu1 %v1931_v3 }
 0x459   :  { %7038 = vst [vmem:[#allocation26_spill] sm:$0xff] %v5304_v26  ;;  %v5333_v46 = vpop.xlane.xlu1 %1734  ;;  %v1949_v50 = vsel %vm250_vm1, %v1667_v16, 0.0 }
 0x45a   :  { %7043 = vst [vmem:[#allocation31_spill] sm:$0xff] %v5333_v46 }
 0x45b   :  { %1941 = vadd.xlane.f32.xlu0 %v1940_v30 }
 0x45c   :  { %v5314_v44 = vpop.xlane.xlu0 %1749  ;;  %1938 = vadd.xlane.f32.xlu1 %v1937_v53 }
 0x45d   :  { %7039 = vst [vmem:[#allocation27_spill] sm:$0xff] %v5314_v44  ;;  %v5341_v45 = vpop.xlane.xlu1 %1740 }
 0x45f   :  { %1947 = vadd.xlane.f32.xlu0 %v1946_v22 }
 0x460   :  { %v5323_v40 = vpop.xlane.xlu0 %1755  ;;  %1944 = vadd.xlane.f32.xlu1 %v1943_v32 }
 0x461   :  { %7041 = vst [vmem:[#allocation29_spill] sm:$0xff] %v5323_v40  ;;  %v5349_v10 = vpop.xlane.xlu1 %1746 }
 0x462   :  { %7046 = vst [vmem:[#allocation34_spill] sm:$0xff] %v5349_v10 }
 0x463   :  { %1953 = vadd.xlane.f32.xlu0 %v1952_v1 }
 0x464   :  { %v5331_v54 = vpop.xlane.xlu0 %1761  ;;  %1950 = vadd.xlane.f32.xlu1 %v1949_v50 }
 0x465   :  { %7042 = vst [vmem:[#allocation30_spill] sm:$0xff] %v5331_v54  ;;  %v5356_v22 = vpop.xlane.xlu1 %1752 }
 0x467   :  { %1959 = vadd.xlane.f32.xlu0 %v1958_v6 }
 0x468   :  { %v5339_v42 = vpop.xlane.xlu0 %1767  ;;  %1956 = vadd.xlane.f32.xlu1 %v1955_v48 }
 0x469   :  { %7044 = vst [vmem:[#allocation32_spill] sm:$0xff] %v5339_v42  ;;  %v5362_v3 = vpop.xlane.xlu1 %1758 }
 0x46a   :  { %7049 = vst [vmem:[#allocation37_spill] sm:$0xff] %v5362_v3 }
 0x46b   :  { %1965 = vadd.xlane.f32.xlu0 %v1964_v59 }
 0x46c   :  { %v5347_v30 = vpop.xlane.xlu0 %1773  ;;  %1962 = vadd.xlane.f32.xlu1 %v1961_v37 }
 0x46d   :  { %7045 = vst [vmem:[#allocation33_spill] sm:$0xff] %v5347_v30  ;;  %v5367_v1 = vpop.xlane.xlu1 %1764 }
 0x46f   :  { %1977 = vadd.xlane.f32.xlu0 %v1976_v33 }
 0x470   :  { %v5354_v27 = vpop.xlane.xlu0 %1779  ;;  %1974 = vadd.xlane.f32.xlu1 %v1973_v55 }
 0x471   :  { %7047 = vst [vmem:[#allocation35_spill] sm:$0xff] %v5354_v27  ;;  %v5371_v41 = vpop.xlane.xlu1 %1770 }
 0x472   :  { %7052 = vst [vmem:[#allocation40_spill] sm:$0xff] %v5371_v41 }
 0x474   :  { %v5360_v11 = vpop.xlane.xlu0 %1785 }
 0x475   :  { %7048 = vst [vmem:[#allocation36_spill] sm:$0xff] %v5360_v11 }
 0x478   :  { %v5365_v58 = vpop.xlane.xlu0 %1791 }
 0x479   :  { %7050 = vst [vmem:[#allocation38_spill] sm:$0xff] %v5365_v58  ;;  %v5375_v61 = vpop.xlane.xlu1 %1776 }
 0x47a   :  { %7054 = vst [vmem:[#allocation42_spill] sm:$0xff] %v5375_v61 }
 0x47c   :  { %v5369_v25 = vpop.xlane.xlu0 %1797 }
 0x47d   :  { %7051 = vst [vmem:[#allocation39_spill] sm:$0xff] %v5369_v25  ;;  %v5379_v24 = vpop.xlane.xlu1 %1782 }
 0x47e   :  { %7056 = vst [vmem:[#allocation44_spill] sm:$0xff] %v5379_v24 }
 0x480   :  { %v5373_v53 = vpop.xlane.xlu0 %1803 }
 0x481   :  { %7053 = vst [vmem:[#allocation41_spill] sm:$0xff] %v5373_v53  ;;  %v5383_v28 = vpop.xlane.xlu1 %1788 }
 0x484   :  { %v5377_v15 = vpop.xlane.xlu0 %1809 }
 0x485   :  { %7055 = vst [vmem:[#allocation43_spill] sm:$0xff] %v5377_v15  ;;  %v5387_v32 = vpop.xlane.xlu1 %1794 }
 0x486   :  { %7059 = vst [vmem:[#allocation47_spill] sm:$0xff] %v5387_v32 }
 0x488   :  { %v5381_v6 = vpop.xlane.xlu0 %1674 }
 0x489   :  { %7057 = vst [vmem:[#allocation45_spill] sm:$0xff] %v5381_v6  ;;  %v5391_v8 = vpop.xlane.xlu1 %1800 }
 0x48c   :  { %v5385_v29 = vpop.xlane.xlu0 %1686 }
 0x48d   :  { %7058 = vst [vmem:[#allocation46_spill] sm:$0xff] %v5385_v29  ;;  %v5395_v20 = vpop.xlane.xlu1 %1806 }
 0x48e   :  { %7062 = vst [vmem:[#allocation50_spill] sm:$0xff] %v5395_v20 }
 0x490   :  { %v5389_v16 = vpop.xlane.xlu0 %1815 }
 0x491   :  { %7060 = vst [vmem:[#allocation48_spill] sm:$0xff] %v5389_v16  ;;  %v5399_v52 = vpop.xlane.xlu1 %1812 }
 0x494   :  { %v5393_v59 = vpop.xlane.xlu0 %1821 }
 0x495   :  { %7061 = vst [vmem:[#allocation49_spill] sm:$0xff] %v5393_v59  ;;  %v5403_v33 = vpop.xlane.xlu1 %1818 }
 0x496   :  { %7065 = vst [vmem:[#allocation53_spill] sm:$0xff] %v5403_v33 }
 0x498   :  { %v5397_v50 = vpop.xlane.xlu0 %1827 }
 0x499   :  { %7063 = vst [vmem:[#allocation51_spill] sm:$0xff] %v5397_v50  ;;  %v5407_v43 = vpop.xlane.xlu1 %1824 }
 0x49c   :  { %v5401_v34 = vpop.xlane.xlu0 %1833 }
 0x49d   :  { %7064 = vst [vmem:[#allocation52_spill] sm:$0xff] %v5401_v34  ;;  %v5411_v37 = vpop.xlane.xlu1 %1830 }
 0x49e   :  { %7068 = vst [vmem:[#allocation56_spill] sm:$0xff] %v5411_v37 }
 0x4a0   :  { %v5405_v48 = vpop.xlane.xlu0 %1839 }
 0x4a1   :  { %7066 = vst [vmem:[#allocation54_spill] sm:$0xff] %v5405_v48  ;;  %v5415_v55 = vpop.xlane.xlu1 %1836 }
 0x4a4   :  { %v5409_v19 = vpop.xlane.xlu0 %1845 }
 0x4a5   :  { %7067 = vst [vmem:[#allocation55_spill] sm:$0xff] %v5409_v19  ;;  %v5419_v5 = vpop.xlane.xlu1 %1842  ;;  %v1979_v19 = vmax.f32 %v5381_v6, %v5385_v29 }
 0x4a8   :  { %v5413_v35 = vpop.xlane.xlu0 %1851 }
 0x4a9   :  { %7069 = vst [vmem:[#allocation57_spill] sm:$0xff] %v5413_v35  ;;  %v5423_v60 = vpop.xlane.xlu1 %1848  ;;  %v1981_v35 = vmax.f32 %v1979_v19, %v5273_v2 }
 0x4ab   :  { %v1983_v50 = vmax.f32 %v1981_v35, %v5296_v63 }
 0x4ac   :  { %v5417_v7 = vpop.xlane.xlu0 %1857 }
 0x4ad   :  { %7070 = vst [vmem:[#allocation58_spill] sm:$0xff] %v5417_v7  ;;  %v5425_v57 = vpop.xlane.xlu1 %1854  ;;  %v1985_v16 = vmax.f32 %v1983_v50, %v5316_v21 }
 0x4af   :  { %v1987_v29 = vmax.f32 %v1985_v16, %v5333_v46  ;;  %v1980_v16 = vmax.f32 %v5243_v4, %v5257_v14 }
 0x4b0   :  { %v5421_v23 = vpop.xlane.xlu0 %1863 }
 0x4b1   :  { %7071 = vst [vmem:[#allocation59_spill] sm:$0xff] %v5421_v23  ;;  %v5431_v48 = vpop.xlane.xlu1 %1860  ;;  %v1989_v19 = vmax.f32 %v1987_v29, %v5349_v10  ;;  %v1982_v29 = vmax.f32 %v1980_v16, %v5285_v39 }
 0x4b3   :  { %v1991_v35 = vmax.f32 %v1989_v19, %v5362_v3  ;;  %v1984_v19 = vmax.f32 %v1982_v29, %v5306_v13 }
 0x4b4   :  { %v5427_v17 = vpop.xlane.xlu0 %1869 }
 0x4b5   :  { %7072 = vst [vmem:[#allocation60_spill] sm:$0xff] %v5427_v17  ;;  %v5436_v7 = vpop.xlane.xlu1 %1866  ;;  %v1993_v50 = vmax.f32 %v1991_v35, %v5371_v41  ;;  %v1986_v35 = vmax.f32 %v1984_v19, %v5325_v0 }
 0x4b7   :  { %v1995_v46 = vmax.f32 %v1993_v50, %v5379_v24 }
 0x4b8   :  { %v5434_v34 = vpop.xlane.xlu0 %1875 }
 0x4b9   :  { %7073 = vst [vmem:[#allocation61_spill] sm:$0xff] %v5434_v34  ;;  %v5439_v23 = vpop.xlane.xlu1 %1872  ;;  %v1997_v3 = vmax.f32 %v1995_v46, %v5387_v32 }
 0x4bb   :  { %v1999_v14 = vmax.f32 %v1997_v3, %v5395_v20  ;;  %v2027_v20 = vmax.f32 %v5224_v56, %v5173_v36 }
 0x4bc   :  { %v5441_v59 = vpop.xlane.xlu0 %1881 }
 0x4bd   :  { %7074 = vst [vmem:[#allocation62_spill] sm:$0xff] %v5441_v59  ;;  %v5444_v17 = vpop.xlane.xlu1 %1878  ;;  %v2001_v29 = vmax.f32 %v1999_v14, %v5403_v33  ;;  %v2029_v14 = vmax.f32 %v2027_v20, %v5211_v12 }
 0x4be   :  { %7075 = vst [vmem:[#allocation63_spill] sm:$0xff] %v5444_v17 }
 0x4bf   :  { %v2003_v3 = vmax.f32 %v2001_v29, %v5411_v37  ;;  %v2031_v29 = vmax.f32 %v2029_v14, %v5238_v18 }
 0x4c0   :  { %v5447_v6 = vpop.xlane.xlu0 %1887 }
 0x4c1   :  { %7076 = vst [vmem:[#allocation64_spill] sm:$0xff] %v5447_v6  ;;  %v5449_v15 = vpop.xlane.xlu1 %1884 }
 0x4c2   :  { %7077 = vst [vmem:[#allocation65_spill] sm:$0xff] %v5449_v15 }
 0x4c4   :  { %v5454_v34 = vpop.xlane.xlu0 %1893 }
 0x4c5   :  { %v5452_v2 = vpop.xlane.xlu1 %1890  ;;  %7078 = vst [vmem:[#allocation66_spill] sm:$0xff] %v5454_v34 }
 0x4c8   :  { %v5460_v21 = vpop.xlane.xlu0 %1899 }
 0x4c9   :  { %v5457_v63 = vpop.xlane.xlu1 %1896  ;;  %7079 = vst [vmem:[#allocation67_spill] sm:$0xff] %v5460_v21  ;;  %v1988_v21 = vmax.f32 %v1986_v35, %v5341_v45 }
 0x4cb   :  { %v1990_v50 = vmax.f32 %v1988_v21, %v5356_v22 }
 0x4cc   :  { %v5470_v34 = vpop.xlane.xlu0 %1905 }
 0x4cd   :  { %v5462_v59 = vpop.xlane.xlu1 %1902  ;;  %7080 = vst [vmem:[#allocation68_spill] sm:$0xff] %v5470_v34  ;;  %v1992_v24 = vmax.f32 %v1990_v50, %v5367_v1  ;;  %v2028_v50 = vmax.f32 %v5185_v49, %v5199_v51  ;;  %v2033_v51 = vmax.f32 %v2031_v29, %v5265_v47 }
 0x4cf   :  { %v1994_v46 = vmax.f32 %v1992_v24, %v5375_v61  ;;  %v2005_v61 = vmax.f32 %v2003_v3, %v5419_v5 }
 0x4d0   :  { %v5479_v4 = vpop.xlane.xlu0 %1911 }
 0x4d1   :  { %v5468_v10 = vpop.xlane.xlu1 %1908  ;;  %v1996_v35 = vmax.f32 %v1994_v46, %v5383_v28  ;;  %v2030_v46 = vmax.f32 %v2028_v50, %v5227_v38  ;;  %v2035_v50 = vmax.f32 %v2033_v51, %v5293_v31 }
 0x4d3   :  { %v1998_v21 = vmax.f32 %v1996_v35, %v5391_v8  ;;  %v2032_v35 = vmax.f32 %v2030_v46, %v5251_v62  ;;  %v2037_v46 = vmax.f32 %v2035_v50, %v5314_v44 }
 0x4d4   :  { %v5489_v19 = vpop.xlane.xlu0 %1917 }
 0x4d5   :  { %v5475_v41 = vpop.xlane.xlu1 %1914  ;;  %v2000_v24 = vmax.f32 %v1998_v21, %v5399_v52  ;;  %v2007_v21 = vmax.f32 %v2005_v61, %v5425_v57  ;;  %v2034_v3 = vmax.f32 %v2032_v35, %v5281_v9  ;;  %v2039_v51 = vmax.f32 %v2037_v46, %v5331_v54  ;;  %v7088_v54 = vld [vmem:[#allocation57_spill] sm:$0xff] }
 0x4d7   :  { %v2002_v36 = vmax.f32 %v2000_v24, %v5407_v43  ;;  %v2009_v18 = vmax.f32 %v2007_v21, %v5436_v7  ;;  %v2036_v24 = vmax.f32 %v2034_v3, %v5304_v26  ;;  %v2041_v50 = vmax.f32 %v2039_v51, %v5347_v30  ;;  %v7082_v30 = vld [vmem:[#allocation48_spill] sm:$0xff] }
 0x4d8   :  { %v5505_v37 = vpop.xlane.xlu0 %1923 }
 0x4d9   :  { %v5482_v16 = vpop.xlane.xlu1 %1920  ;;  %v2004_v20 = vmax.f32 %v2002_v36, %v5415_v55  ;;  %v2011_v61 = vmax.f32 %v2009_v18, %v5444_v17  ;;  %v2038_v35 = vmax.f32 %v2036_v24, %v5323_v40  ;;  %v2043_v24 = vmax.f32 %v2041_v50, %v5360_v11 }
 0x4db   :  { %v2006_v14 = vmax.f32 %v2004_v20, %v5423_v60  ;;  %v2013_v21 = vmax.f32 %v2011_v61, %v5452_v2  ;;  %v2040_v3 = vmax.f32 %v2038_v35, %v5339_v42  ;;  %v2045_v35 = vmax.f32 %v2043_v24, %v5369_v25  ;;  %v7083_v42 = vld [vmem:[#allocation49_spill] sm:$0xff]  ;;  %v7084_v25 = vld [vmem:[#allocation51_spill] sm:$0xff] }
 0x4dc   :  { %v5520_v62 = vpop.xlane.xlu0 %1929 }
 0x4dd   :  { %v5487_v32 = vpop.xlane.xlu1 %1926  ;;  %v2008_v36 = vmax.f32 %v2006_v14, %v5431_v48  ;;  %v2015_v14 = vmax.f32 %v2013_v21, %v5462_v59  ;;  %v2042_v18 = vmax.f32 %v2040_v3, %v5354_v27  ;;  %v7081_v27 = vld [vmem:[#allocation43_spill] sm:$0xff] }
 0x4de   :  { %v2047_v50 = vmax.f32 %v2045_v35, %v7081_v27  ;;  %v7086_v27 = vld [vmem:[#allocation54_spill] sm:$0xff] }
 0x4df   :  { %v2010_v20 = vmax.f32 %v2008_v36, %v5439_v23  ;;  %v2017_v36 = vmax.f32 %v2015_v14, %v5475_v41  ;;  %v2044_v61 = vmax.f32 %v2042_v18, %v5365_v58 }
 0x4e0   :  { %v5538_v40 = vpop.xlane.xlu0 %1935  ;;  %v2049_v18 = vmax.f32 %v2047_v50, %v7083_v42 }
 0x4e1   :  { %v5499_v33 = vpop.xlane.xlu1 %1932  ;;  %v2012_v26 = vmax.f32 %v2010_v20, %v5449_v15  ;;  %v2019_v21 = vmax.f32 %v2017_v36, %v5487_v32  ;;  %v2046_v3 = vmax.f32 %v2044_v61, %v5373_v53  ;;  %v7085_v53 = vld [vmem:[#allocation52_spill] sm:$0xff]  ;;  %v7089_v15 = vld [vmem:[#allocation58_spill] sm:$0xff] }
 0x4e2   :  { %v2051_v35 = vmax.f32 %v2049_v18, %v7085_v53  ;;  %v7092_v18 = vld [vmem:[#allocation60_spill] sm:$0xff] }
 0x4e3   :  { %v2014_v46 = vmax.f32 %v2012_v26, %v5457_v63  ;;  %v2048_v14 = vmax.f32 %v2046_v3, %v7082_v30  ;;  %v7087_v30 = vld [vmem:[#allocation55_spill] sm:$0xff] }
 0x4e4   :  { %v5554_v58 = vpop.xlane.xlu0 %1941  ;;  %v2053_v50 = vmax.f32 %v2051_v35, %v7087_v30 }
 0x4e5   :  { %v5510_v49 = vpop.xlane.xlu1 %1938  ;;  %v2016_v20 = vmax.f32 %v2014_v46, %v5468_v10  ;;  %v2050_v61 = vmax.f32 %v2048_v14, %v7084_v25  ;;  %v7091_v14 = vld [vmem:[#allocation59_spill] sm:$0xff] }
 0x4e6   :  { %v2021_v26 = vmax.f32 %v2019_v21, %v5510_v49 }
 0x4e7   :  { %v2018_v11 = vmax.f32 %v2016_v20, %v5482_v16  ;;  %v2052_v3 = vmax.f32 %v2050_v61, %v7086_v27  ;;  %v7094_v61 = vld [vmem:[#allocation62_spill] sm:$0xff] }
 0x4e8   :  { %v5569_v9 = vpop.xlane.xlu0 %1947 }
 0x4e9   :  { %v5522_v29 = vpop.xlane.xlu1 %1944  ;;  %v2020_v46 = vmax.f32 %v2018_v11, %v5499_v33  ;;  %v2054_v31 = vmax.f32 %v2052_v3, %v7088_v54  ;;  %v2055_v11 = vmax.f32 %v2053_v50, %v7089_v15  ;;  %7090 = vst [vmem:[#allocation55_spill] sm:$0xff] %v5569_v9  ;;  %v7095_v3 = vld [vmem:[#allocation66_spill] sm:$0xff] }
 0x4eb   :  { %v2022_v20 = vmax.f32 %v2020_v46, %v5522_v29  ;;  %v2056_v25 = vmax.f32 %v2054_v31, %v7091_v14  ;;  %v2057_v53 = vmax.f32 %v2055_v11, %v7092_v18  ;;  %v7098_v11 = vld [vmem:[#allocation45_spill] sm:$0xff] }
 0x4ec   :  { %v5582_v15 = vpop.xlane.xlu0 %1953 }
 0x4ed   :  { %v5532_v44 = vpop.xlane.xlu1 %1950  ;;  %v2059_v27 = vmax.f32 %v2057_v53, %v7094_v61  ;;  %7096 = vst [vmem:[#allocation57_spill] sm:$0xff] %v5582_v15  ;;  %v7100_v53 = vld [vmem:[#allocation46_spill] sm:$0xff]  ;;  %v7101_v61 = vld [vmem:[#allocation21_spill] sm:$0xff] }
 0x4ee   :  { %v2023_v36 = vmax.f32 %v2021_v26, %v5532_v44 }
 0x4ef   :  { %v2061_v50 = vmax.f32 %v2059_v27, %v7095_v3 }
 0x4f1   :  { %v5544_v51 = vpop.xlane.xlu1 %1956  ;;  %v2063_v31 = vmax.f32 %v2061_v50, %v5470_v34  ;;  %v5618_v34 = vpop.xlane.xlu0 %1959 }
 0x4f2   :  { %v2024_v42 = vmax.f32 %v2022_v20, %v5544_v51  ;;  %7102 = vst [vmem:[#allocation45_spill] sm:$0xff] %v5618_v34 }
 0x4f5   :  { %v5556_v24 = vpop.xlane.xlu1 %1962 }
 0x4f6   :  { %v2025_v21 = vmax.f32 %v2023_v36, %v5556_v24  ;;  %v7093_v36 = vld [vmem:[#allocation61_spill] sm:$0xff] }
 0x4f7   :  { %v2058_v17 = vmax.f32 %v2056_v25, %v7093_v36  ;;  %v7099_v25 = vld [vmem:[#allocation19_spill] sm:$0xff] }
 0x4f8   :  { %v2026_v26 = vmax.f32 %v2025_v21, %v2024_v42  ;;  %v7097_v42 = vld [vmem:[#allocation67_spill] sm:$0xff] }
 0x4f9   :  { %v5573_v46 = vpop.xlane.xlu1 %1974  ;;  %v2060_v20 = vmax.f32 %v2058_v17, %v5447_v6 }
 0x4fa   :  { %v5578_v35 = vmax.f32 %v2026_v26, %v5573_v46 }
 0x4fb   :  { %v2062_v21 = vmax.f32 %v2060_v20, %v7097_v42  ;;  %v7103_v20 = vld [vmem:[#allocation22_spill] sm:$0xff] }
 0x4fc   :  { %v2077_v18 = vsub.f32 %v7098_v11, %v5578_v35  ;;  %v2079_v36 = vsub.f32 %v7099_v25, %v5578_v35  ;;  %v2081_v26 = vsub.f32 %v7100_v53, %v5578_v35  ;;  %v2083_v17 = vsub.f32 %v7101_v61, %v5578_v35 }
 0x4fd   :  { %v2065_v53 = vmax.f32 %v2063_v31, %v5489_v19  ;;  %v2085_v3 = vsub.f32 %v7103_v20, %v5578_v35  ;;  %v2064_v50 = vmax.f32 %v2062_v21, %v5479_v4  ;;  %v2087_v25 = vsub.f32 %v5285_v39, %v5578_v35 }
 0x4fe   :  { %v2175_v27 = vmul.f32 1.442695, %v2077_v18  ;;  %v2179_v42 = vmul.f32 1.442695, %v2079_v36  ;;  %v2183_v6 = vmul.f32 1.442695, %v2081_v26  ;;  %v5633_v26 = vpop.xlane.xlu0 %1965  ;;  %v2091_v39 = vsub.f32 %v5306_v13, %v5578_v35 }
 0x4ff   :  { %v2067_v11 = vmax.f32 %v2065_v53, %v5520_v62  ;;  %v2187_v14 = vmul.f32 1.442695, %v2083_v17  ;;  %v2066_v31 = vmax.f32 %v2064_v50, %v5505_v37  ;;  %v7104_v18 = vld [vmem:[#allocation25_spill] sm:$0xff]  ;;  %v2191_v20 = vmul.f32 1.442695, %v2085_v3  ;;  %7105 = vst [vmem:[#allocation19_spill] sm:$0xff] %v5633_v26 }
 0x500   :  { %3604 = vpow2.f32 %v2175_v27  ;;  %v2089_v36 = vsub.f32 %v7104_v18, %v5578_v35  ;;  %v7107_v13 = vld [vmem:[#allocation31_spill] sm:$0xff] }
 0x501   :  { %3606 = vpow2.f32 %v2179_v42  ;;  %v2069_v61 = vmax.f32 %v2067_v11, %v5554_v58  ;;  %v2068_v21 = vmax.f32 %v2066_v31, %v5538_v40  ;;  %v2195_v42 = vmul.f32 1.442695, %v2087_v25  ;;  %v7106_v11 = vld [vmem:[#allocation28_spill] sm:$0xff] }
 0x502   :  { %3608 = vpow2.f32 %v2183_v6  ;;  %v2093_v53 = vsub.f32 %v7106_v11, %v5578_v35  ;;  %v2199_v6 = vmul.f32 1.442695, %v2089_v36  ;;  %v2095_v31 = vsub.f32 %v5325_v0, %v5578_v35  ;;  %v7109_v0 = vld [vmem:[#allocation34_spill] sm:$0xff] }
 0x503   :  { %v2071_v27 = vmax.f32 %v2069_v61, %v5582_v15  ;;  %3610 = vpow2.f32 %v2187_v14  ;;  %v2070_v17 = vmax.f32 %v2068_v21, %v5569_v9  ;;  %v2203_v61 = vmul.f32 1.442695, %v2091_v39  ;;  %v5648_v21 = vpop.xlane.xlu0 %1977 }
 0x504   :  { %3612 = vpow2.f32 %v2191_v20  ;;  %v2097_v14 = vsub.f32 %v7107_v13, %v5578_v35  ;;  %v2207_v25 = vmul.f32 1.442695, %v2093_v53  ;;  %7108 = vst [vmem:[#allocation46_spill] sm:$0xff] %v5648_v21  ;;  %v2099_v36 = vsub.f32 %v5341_v45, %v5578_v35 }
 0x505   :  { %v2073_v50 = vmax.f32 %v2071_v27, %v5633_v26  ;;  %v2072_v3 = vmax.f32 %v2070_v17, %v5618_v34  ;;  %3614 = vpow2.f32 %v2195_v42  ;;  %v2211_v20 = vmul.f32 1.442695, %v2095_v31 }
 0x506   :  { %3616 = vpow2.f32 %v2199_v6  ;;  %v2101_v39 = vsub.f32 %v7109_v0, %v5578_v35  ;;  %v2103_v45 = vsub.f32 %v5356_v22, %v5578_v35  ;;  %v7110_v6 = vld [vmem:[#allocation37_spill] sm:$0xff]  ;;  %v2219_v31 = vmul.f32 1.442695, %v2099_v36 }
 0x507   :  { %v2074_v18 = vmax.f32 %v2073_v50, %v2072_v3  ;;  %3618 = vpow2.f32 %v2203_v61  ;;  %v2215_v50 = vmul.f32 1.442695, %v2097_v14  ;;  %v2105_v3 = vsub.f32 %v7110_v6, %v5578_v35 }
 0x508   :  { %3620 = vpow2.f32 %v2207_v25  ;;  %v2227_v6 = vmul.f32 1.442695, %v2103_v45 }
 0x509   :  { %v5659_v42 = vmax.f32 %v2074_v18, %v5648_v21  ;;  %3622 = vpow2.f32 %v2211_v20  ;;  %v2223_v18 = vmul.f32 1.442695, %v2101_v39  ;;  %v2107_v39 = vsub.f32 %v5367_v1, %v5578_v35  ;;  %v7112_v20 = vld [vmem:[#allocation42_spill] sm:$0xff] }
 0x50a   :  { %3624 = vpow2.f32 %v2215_v50  ;;  %v7111_v50 = vld [vmem:[#allocation40_spill] sm:$0xff]  ;;  %v2231_v0 = vmul.f32 1.442695, %v2105_v3  ;;  %v2111_v26 = vsub.f32 %v7112_v20, %v5578_v35 }
 0x50b   :  { %3626 = vpow2.f32 %v2219_v31  ;;  %v2235_v1 = vmul.f32 1.442695, %v2107_v39 }
 0x50c   :  { %3628 = vpow2.f32 %v2223_v18  ;;  %v2243_v20 = vmul.f32 1.442695, %v2111_v26 }
 0x50d   :  { %v5650_v27 = vpop.eup %3604  ;;  %3630 = vpow2.f32 %v2227_v6 }
 0x50e   :  { %v5654_v17 = vpop.eup %3606  ;;  %3632 = vpow2.f32 %v2231_v0 }
 0x50f   :  { %v2377_v11 = vadd.f32 %v5654_v17, %v5650_v27  ;;  %v5663_v53 = vpop.eup %3608  ;;  %3634 = vpow2.f32 %v2235_v1 }
 0x510   :  { %v5670_v13 = vpop.eup %3610 }
 0x511   :  { %v2378_v61 = vadd.f32 %v5663_v53, %v2377_v11  ;;  %v5683_v11 = vpop.eup %3612 }
 0x512   :  { %v5688_v14 = vpop.eup %3614 }
 0x513   :  { %v2379_v22 = vadd.f32 %v5670_v13, %v2378_v61  ;;  %v2109_v61 = vsub.f32 %v7111_v50, %v5578_v35  ;;  %v5693_v21 = vpop.eup %3616 }
 0x514   :  { %v5698_v31 = vpop.eup %3618 }
 0x515   :  { %v2380_v25 = vadd.f32 %v5683_v11, %v2379_v22  ;;  %v7113_v22 = vld [vmem:[#allocation44_spill] sm:$0xff]  ;;  %v2239_v50 = vmul.f32 1.442695, %v2109_v61  ;;  %v5703_v18 = vpop.eup %3620 }
 0x516   :  { %v2113_v34 = vsub.f32 %v7113_v22, %v5578_v35  ;;  %v5708_v6 = vpop.eup %3622 }
 0x517   :  { %v2381_v36 = vadd.f32 %v5688_v14, %v2380_v25  ;;  %v2115_v25 = vsub.f32 %v5383_v28, %v5578_v35  ;;  %3636 = vpow2.f32 %v2239_v50  ;;  %v5713_v61 = vpop.eup %3624 }
 0x518   :  { %v2247_v22 = vmul.f32 1.442695, %v2113_v34  ;;  %7115 = vst [vmem:[#allocation21_spill] sm:$0xff] %v5713_v61  ;;  %3638 = vpow2.f32 %v2243_v20  ;;  %v5718_v1 = vpop.eup %3626 }
 0x519   :  { %v2382_v45 = vadd.f32 %v5693_v21, %v2381_v36  ;;  %v7114_v36 = vld [vmem:[#allocation47_spill] sm:$0xff]  ;;  %v2251_v28 = vmul.f32 1.442695, %v2115_v25  ;;  %v5723_v50 = vpop.eup %3628 }
 0x51a   :  { %v2117_v15 = vsub.f32 %v7114_v36, %v5578_v35  ;;  %3640 = vpow2.f32 %v2247_v22  ;;  %7117 = vst [vmem:[#allocation22_spill] sm:$0xff] %v5723_v50  ;;  %v5728_v20 = vpop.eup %3630 }
 0x51b   :  { %v2383_v3 = vadd.f32 %v5698_v31, %v2382_v45  ;;  %v2119_v45 = vsub.f32 %v5391_v8, %v5578_v35  ;;  %3642 = vpow2.f32 %v2251_v28  ;;  %7118 = vst [vmem:[#allocation25_spill] sm:$0xff] %v5728_v20  ;;  %v5733_v22 = vpop.eup %3632 }
 0x51c   :  { %v2255_v36 = vmul.f32 1.442695, %v2117_v15  ;;  %7120 = vst [vmem:[#allocation28_spill] sm:$0xff] %v5733_v22 }
 0x51d   :  { %v2384_v39 = vadd.f32 %v5703_v18, %v2383_v3  ;;  %v7116_v3 = vld [vmem:[#allocation50_spill] sm:$0xff]  ;;  %v2259_v8 = vmul.f32 1.442695, %v2119_v45 }
 0x51e   :  { %v2121_v9 = vsub.f32 %v7116_v3, %v5578_v35  ;;  %3644 = vpow2.f32 %v2255_v36  ;;  %v2078_v36 = vsub.f32 %v5224_v56, %v5659_v42 }
 0x51f   :  { %v2385_v0 = vadd.f32 %v5708_v6, %v2384_v39  ;;  %v2123_v39 = vsub.f32 %v5399_v52, %v5578_v35  ;;  %v7121_v52 = vld [vmem:[#allocation56_spill] sm:$0xff]  ;;  %3646 = vpow2.f32 %v2259_v8  ;;  %v2131_v8 = vsub.f32 %v5415_v55, %v5578_v35 }
 0x520   :  { %v2263_v3 = vmul.f32 1.442695, %v2121_v9  ;;  %v2129_v28 = vsub.f32 %v7121_v52, %v5578_v35 }
 0x521   :  { %v2386_v26 = vadd.f32 %v5713_v61, %v2385_v0  ;;  %v7119_v0 = vld [vmem:[#allocation53_spill] sm:$0xff]  ;;  %v2267_v45 = vmul.f32 1.442695, %v2123_v39 }
 0x522   :  { %v2125_v61 = vsub.f32 %v7119_v0, %v5578_v35  ;;  %3648 = vpow2.f32 %v2263_v3  ;;  %v7123_v0 = vld [vmem:[#allocation16_spill] sm:$0xff] }
 0x523   :  { %v2387_v34 = vadd.f32 %v5718_v1, %v2386_v26  ;;  %v2127_v26 = vsub.f32 %v5407_v43, %v5578_v35  ;;  %3650 = vpow2.f32 %v2267_v45 }
 0x524   :  { %v2271_v9 = vmul.f32 1.442695, %v2125_v61  ;;  %v2133_v61 = vsub.f32 %v5419_v5, %v5578_v35  ;;  %v2086_v5 = vsub.f32 %v5211_v12, %v5659_v42  ;;  %v2139_v12 = vsub.f32 %v5431_v48, %v5578_v35  ;;  %v7127_v48 = vld [vmem:[#allocation20_spill] sm:$0xff] }
 0x525   :  { %v2388_v25 = vadd.f32 %v5723_v50, %v2387_v34  ;;  %v5740_v50 = vpop.eup %3634  ;;  %v2275_v39 = vmul.f32 1.442695, %v2127_v26 }
 0x526   :  { %7122 = vst [vmem:[#allocation31_spill] sm:$0xff] %v5740_v50  ;;  %v5747_v43 = vpop.eup %3636  ;;  %3652 = vpow2.f32 %v2271_v9 }
 0x527   :  { %v2389_v15 = vadd.f32 %v5728_v20, %v2388_v25  ;;  %v2080_v20 = vsub.f32 %v7123_v0, %v5659_v42  ;;  %v5754_v3 = vpop.eup %3638  ;;  %3654 = vpow2.f32 %v2275_v39 }
 0x528   :  { %v5761_v45 = vpop.eup %3640 }
 0x529   :  { %v2390_v34 = vadd.f32 %v5733_v22, %v2389_v15  ;;  %v2279_v15 = vmul.f32 1.442695, %v2129_v28  ;;  %v7124_v22 = vld [vmem:[#allocation15_spill] sm:$0xff]  ;;  %v2181_v26 = vmul.f32 1.442695, %v2080_v20  ;;  %v2135_v28 = vsub.f32 %v5423_v60, %v5578_v35  ;;  %v5768_v9 = vpop.eup %3642 }
 0x52a   :  { %v2082_v56 = vsub.f32 %v7124_v22, %v5659_v42  ;;  %v2283_v22 = vmul.f32 1.442695, %v2131_v8  ;;  %v2287_v20 = vmul.f32 1.442695, %v2133_v61  ;;  %v2088_v60 = vsub.f32 %v5227_v38, %v5659_v42 }
 0x52b   :  { %v2391_v25 = vadd.f32 %v5740_v50, %v2390_v34  ;;  %v2177_v34 = vmul.f32 1.442695, %v2078_v36  ;;  %v7125_v50 = vld [vmem:[#allocation17_spill] sm:$0xff]  ;;  %3656 = vpow2.f32 %v2279_v15  ;;  %v5775_v39 = vpop.eup %3644  ;;  %v2291_v15 = vmul.f32 1.442695, %v2135_v28 }
 0x52c   :  { %v2084_v55 = vsub.f32 %v7125_v50, %v5659_v42  ;;  %v2185_v36 = vmul.f32 1.442695, %v2082_v56  ;;  %v2137_v50 = vsub.f32 %v5425_v57, %v5578_v35  ;;  %v7126_v57 = vld [vmem:[#allocation18_spill] sm:$0xff]  ;;  %v2141_v38 = vsub.f32 %v5436_v7, %v5578_v35 }
 0x52d   :  { %v2392_v52 = vadd.f32 %v5747_v43, %v2391_v25  ;;  %3658 = vpow2.f32 %v2177_v34  ;;  %v2090_v61 = vsub.f32 %v7126_v57, %v5659_v42  ;;  %v2193_v34 = vmul.f32 1.442695, %v2086_v5 }
 0x52e   :  { %3660 = vpow2.f32 %v2181_v26  ;;  %v2189_v8 = vmul.f32 1.442695, %v2084_v55  ;;  %v2295_v55 = vmul.f32 1.442695, %v2137_v50  ;;  %v2197_v28 = vmul.f32 1.442695, %v2088_v60 }
 0x52f   :  { %v2393_v0 = vadd.f32 %v5754_v3, %v2392_v52  ;;  %3662 = vpow2.f32 %v2283_v22  ;;  %v2092_v22 = vsub.f32 %v7127_v48, %v5659_v42  ;;  %v2299_v5 = vmul.f32 1.442695, %v2139_v12 }
 0x530   :  { %3664 = vpow2.f32 %v2185_v36  ;;  %v2143_v36 = vsub.f32 %v5439_v23, %v5578_v35  ;;  %v2094_v7 = vsub.f32 %v5265_v47, %v5659_v42  ;;  %v2201_v50 = vmul.f32 1.442695, %v2090_v61  ;;  %v7131_v23 = vld [vmem:[#allocation23_spill] sm:$0xff]  ;;  %v7132_v47 = vld [vmem:[#allocation65_spill] sm:$0xff] }
 0x531   :  { %v2394_v25 = vadd.f32 %v5761_v45, %v2393_v0  ;;  %v5782_v0 = vpop.eup %3646  ;;  %3666 = vpow2.f32 %v2287_v20  ;;  %v2303_v60 = vmul.f32 1.442695, %v2141_v38  ;;  %v2205_v12 = vmul.f32 1.442695, %v2092_v22  ;;  %v7134_v38 = vld [vmem:[#allocation24_spill] sm:$0xff] }
 0x532   :  { %3668 = vpow2.f32 %v2189_v8  ;;  %v2307_v61 = vmul.f32 1.442695, %v2143_v36 }
 0x533   :  { %v2395_v52 = vadd.f32 %v5768_v9, %v2394_v25  ;;  %v5789_v25 = vpop.eup %3648  ;;  %3670 = vpow2.f32 %v2291_v15  ;;  %v2096_v15 = vsub.f32 %v7131_v23, %v5659_v42 }
 0x534   :  { %7128 = vst [vmem:[#allocation34_spill] sm:$0xff] %v5789_v25  ;;  %3672 = vpow2.f32 %v2193_v34  ;;  %v5796_v20 = vpop.eup %3650  ;;  %v2147_v34 = vsub.f32 %v7132_v47, %v5578_v35 }
 0x535   :  { %v2396_v56 = vadd.f32 %v5775_v39, %v2395_v52  ;;  %7129 = vst [vmem:[#allocation37_spill] sm:$0xff] %v5796_v20  ;;  %3674 = vpow2.f32 %v2295_v55  ;;  %v2098_v55 = vsub.f32 %v7134_v38, %v5659_v42  ;;  %v2213_v47 = vmul.f32 1.442695, %v2096_v15 }
 0x536   :  { %3676 = vpow2.f32 %v2197_v28  ;;  %v7142_v15 = vsub.f32 %v5452_v2, %v5578_v35  ;;  %v7147_v2 = vld [vmem:[#allocation30_spill] sm:$0xff] }
 0x537   :  { %v2397_v26 = vadd.f32 %v5782_v0, %v2396_v56  ;;  %v7130_v56 = vld [vmem:[#allocation63_spill] sm:$0xff]  ;;  %3678 = vpow2.f32 %v2299_v5  ;;  %v7137_v5 = vld [vmem:[#allocation26_spill] sm:$0xff] }
 0x538   :  { %v2145_v8 = vsub.f32 %v7130_v56, %v5578_v35  ;;  %3680 = vpow2.f32 %v2201_v50  ;;  %v2100_v36 = vsub.f32 %v7137_v5, %v5659_v42  ;;  %v7139_v50 = vld [vmem:[#allocation27_spill] sm:$0xff] }
 0x539   :  { %v2398_v52 = vadd.f32 %v5789_v25, %v2397_v26  ;;  %v5803_v26 = vpop.eup %3652  ;;  %3682 = vpow2.f32 %v2303_v60  ;;  %v2217_v60 = vmul.f32 1.442695, %v2098_v55 }
 0x53a   :  { %v5807_v48 = vpop.eup %3654  ;;  %v2311_v22 = vmul.f32 1.442695, %v2145_v8  ;;  %3684 = vpow2.f32 %v2205_v12  ;;  %v2319_v12 = vmul.f32 1.442695, %v7142_v15  ;;  %v2106_v15 = vsub.f32 %v7147_v2, %v5659_v42 }
 0x53b   :  { %v2399_v57 = vadd.f32 %v5796_v20, %v2398_v52  ;;  %7133 = vst [vmem:[#allocation40_spill] sm:$0xff] %v5807_v48  ;;  %v2209_v52 = vmul.f32 1.442695, %v2094_v7  ;;  %v5812_v20 = vpop.eup %3656  ;;  %3686 = vpow2.f32 %v2307_v61  ;;  %v2102_v7 = vsub.f32 %v7139_v50, %v5659_v42 }
 0x53c   :  { %7135 = vst [vmem:[#allocation42_spill] sm:$0xff] %v5812_v20  ;;  %v5814_v28 = vpop.eup %3658 }
 0x53d   :  { %v2400_v56 = vadd.f32 %v5803_v26, %v2399_v57  ;;  %7136 = vst [vmem:[#allocation44_spill] sm:$0xff] %v5814_v28  ;;  %v5819_v25 = vpop.eup %3660  ;;  %v2315_v57 = vmul.f32 1.442695, %v2147_v34  ;;  %3688 = vpow2.f32 %v2209_v52  ;;  %v7143_v34 = vld [vmem:[#allocation29_spill] sm:$0xff]  ;;  %v2221_v52 = vmul.f32 1.442695, %v2100_v36 }
 0x53e   :  { %7138 = vst [vmem:[#allocation47_spill] sm:$0xff] %v5819_v25  ;;  %v5823_v38 = vpop.eup %3662  ;;  %3690 = vpow2.f32 %v2311_v22  ;;  %v2104_v61 = vsub.f32 %v7143_v34, %v5659_v42  ;;  %v7146_v22 = vsub.f32 %v5457_v63, %v5578_v35  ;;  %v7150_v63 = vld [vmem:[#allocation32_spill] sm:$0xff] }
 0x53f   :  { %v2401_v23 = vadd.f32 %v5807_v48, %v2400_v56  ;;  %7140 = vst [vmem:[#allocation50_spill] sm:$0xff] %v5823_v38  ;;  %v2425_v56 = vadd.f32 %v5819_v25, %v5814_v28  ;;  %v5828_v48 = vpop.eup %3664  ;;  %3692 = vpow2.f32 %v2213_v47 }
 0x540   :  { %7141 = vst [vmem:[#allocation53_spill] sm:$0xff] %v5828_v48  ;;  %v5835_v5 = vpop.eup %3666  ;;  %3694 = vpow2.f32 %v2315_v57  ;;  %v2323_v25 = vmul.f32 1.442695, %v7146_v22  ;;  %v7149_v57 = vsub.f32 %v5462_v59, %v5578_v35  ;;  %v2108_v22 = vsub.f32 %v7150_v63, %v5659_v42  ;;  %v7153_v59 = vld [vmem:[#allocation33_spill] sm:$0xff] }
 0x541   :  { %v2402_v8 = vadd.f32 %v5812_v20, %v2401_v23  ;;  %7144 = vst [vmem:[#allocation56_spill] sm:$0xff] %v5835_v5  ;;  %v2426_v55 = vadd.f32 %v5828_v48, %v2425_v56  ;;  %v5839_v23 = vpop.eup %3668  ;;  %3696 = vpow2.f32 %v2217_v60 }
 0x542   :  { %7145 = vst [vmem:[#allocation16_spill] sm:$0xff] %v5839_v23  ;;  %v5846_v28 = vpop.eup %3670  ;;  %3698 = vpow2.f32 %v2319_v12  ;;  %v2327_v56 = vmul.f32 1.442695, %v7149_v57  ;;  %v7152_v12 = vsub.f32 %v5468_v10, %v5578_v35  ;;  %v2110_v57 = vsub.f32 %v7153_v59, %v5659_v42 }
 0x543   :  { %v2403_v50 = vadd.f32 %v5823_v38, %v2402_v8  ;;  %v2225_v8 = vmul.f32 1.442695, %v2102_v7  ;;  %v2427_v36 = vadd.f32 %v5839_v23, %v2426_v55  ;;  %v5850_v47 = vpop.eup %3672  ;;  %3700 = vpow2.f32 %v2221_v52 }
 0x544   :  { %7148 = vst [vmem:[#allocation15_spill] sm:$0xff] %v5850_v47  ;;  %v5857_v48 = vpop.eup %3674  ;;  %3702 = vpow2.f32 %v2323_v25  ;;  %v2331_v55 = vmul.f32 1.442695, %v7152_v12  ;;  %v7155_v25 = vsub.f32 %v5475_v41, %v5578_v35  ;;  %v2237_v59 = vmul.f32 1.442695, %v2108_v22 }
 0x545   :  { %v2404_v34 = vadd.f32 %v5835_v5, %v2403_v50  ;;  %v2229_v50 = vmul.f32 1.442695, %v2104_v61  ;;  %v2428_v7 = vadd.f32 %v5850_v47, %v2427_v36  ;;  %v5861_v60 = vpop.eup %3676  ;;  %3704 = vpow2.f32 %v2225_v8 }
 0x546   :  { %7151 = vst [vmem:[#allocation17_spill] sm:$0xff] %v5861_v60  ;;  %v5868_v23 = vpop.eup %3678  ;;  %3706 = vpow2.f32 %v2327_v56  ;;  %v2335_v36 = vmul.f32 1.442695, %v7155_v25  ;;  %v7158_v56 = vld [vmem:[#allocation35_spill] sm:$0xff] }
 0x547   :  { %v2405_v2 = vadd.f32 %v5846_v28, %v2404_v34  ;;  %v2233_v34 = vmul.f32 1.442695, %v2106_v15  ;;  %v2429_v61 = vadd.f32 %v5861_v60, %v2428_v7  ;;  %v5872_v52 = vpop.eup %3680  ;;  %3708 = vpow2.f32 %v2229_v50 }
 0x548   :  { %7154 = vst [vmem:[#allocation18_spill] sm:$0xff] %v5872_v52  ;;  %v5877_v10 = vpop.eup %3682  ;;  %3710 = vpow2.f32 %v2331_v55  ;;  %v7157_v15 = vsub.f32 %v5482_v16, %v5578_v35  ;;  %v2112_v7 = vsub.f32 %v7158_v56, %v5659_v42  ;;  %v7160_v16 = vsub.f32 %v5487_v32, %v5578_v35 }
 0x549   :  { %v2406_v63 = vadd.f32 %v5857_v48, %v2405_v2  ;;  %v2430_v47 = vadd.f32 %v5872_v52, %v2429_v61  ;;  %v5881_v2 = vpop.eup %3684  ;;  %3712 = vpow2.f32 %v2233_v34 }
 0x54a   :  { %7156 = vst [vmem:[#allocation20_spill] sm:$0xff] %v5881_v2  ;;  %v2339_v8 = vmul.f32 1.442695, %v7157_v15  ;;  %v5888_v41 = vpop.eup %3686  ;;  %3714 = vpow2.f32 %v2335_v36  ;;  %v2343_v55 = vmul.f32 1.442695, %v7160_v16  ;;  %v7163_v36 = vsub.f32 %v5499_v33, %v5578_v35 }
 0x54b   :  { %v2407_v12 = vadd.f32 %v5868_v23, %v2406_v63  ;;  %v2241_v63 = vmul.f32 1.442695, %v2110_v57  ;;  %v2431_v22 = vadd.f32 %v5881_v2, %v2430_v47  ;;  %v5892_v50 = vpop.eup %3688  ;;  %3716 = vpow2.f32 %v2237_v59  ;;  %v7162_v57 = vld [vmem:[#allocation36_spill] sm:$0xff] }
 0x54c   :  { %7159 = vst [vmem:[#allocation63_spill] sm:$0xff] %v5892_v50  ;;  %v5894_v61 = vpop.eup %3690  ;;  %3718 = vpow2.f32 %v2339_v8  ;;  %v2114_v47 = vsub.f32 %v7162_v57, %v5659_v42  ;;  %v2245_v34 = vmul.f32 1.442695, %v2112_v7  ;;  %v2347_v2 = vmul.f32 1.442695, %v7163_v36 }
 0x54d   :  { %v2408_v25 = vadd.f32 %v5877_v10, %v2407_v12  ;;  %v2432_v56 = vadd.f32 %v5892_v50, %v2431_v22  ;;  %v5901_v52 = vpop.eup %3692  ;;  %3720 = vpow2.f32 %v2241_v63  ;;  %v7165_v8 = vsub.f32 %v5510_v49, %v5578_v35 }
 0x54e   :  { %7161 = vst [vmem:[#allocation23_spill] sm:$0xff] %v5901_v52  ;;  %v5905_v12 = vpop.eup %3694  ;;  %3722 = vpow2.f32 %v2343_v55  ;;  %v7168_v55 = vsub.f32 %v5522_v29, %v5578_v35  ;;  %v2371_v29 = vsub.f32 %v5573_v46, %v5578_v35  ;;  %v7175_v46 = vsub.f32 %v5556_v24, %v5578_v35 }
 0x54f   :  { %v2409_v15 = vadd.f32 %v5888_v41, %v2408_v25  ;;  %v2433_v59 = vadd.f32 %v5901_v52, %v2432_v56  ;;  %v5912_v25 = vpop.eup %3696  ;;  %v2351_v7 = vmul.f32 1.442695, %v7165_v8  ;;  %3724 = vpow2.f32 %v2245_v34 }
 0x550   :  { %7164 = vst [vmem:[#allocation65_spill] sm:$0xff] %v5912_v25  ;;  %v5914_v22 = vpop.eup %3698  ;;  %v2249_v56 = vmul.f32 1.442695, %v2114_v47  ;;  %3726 = vpow2.f32 %v2347_v2  ;;  %v2355_v52 = vmul.f32 1.442695, %v7168_v55  ;;  %v7170_v34 = vsub.f32 %v5532_v44, %v5578_v35 }
 0x551   :  { %v2410_v32 = vadd.f32 %v5894_v61, %v2409_v15  ;;  %v2434_v57 = vadd.f32 %v5912_v25, %v2433_v59  ;;  %v5921_v33 = vpop.eup %3700  ;;  %v7167_v15 = vld [vmem:[#allocation38_spill] sm:$0xff]  ;;  %3728 = vpow2.f32 %v2351_v7  ;;  %v7173_v44 = vsub.f32 %v5544_v51, %v5578_v35  ;;  %v7177_v51 = vld [vmem:[#allocation41_spill] sm:$0xff] }
 0x552   :  { %7166 = vst [vmem:[#allocation24_spill] sm:$0xff] %v5921_v33  ;;  %v2116_v63 = vsub.f32 %v7167_v15, %v5659_v42  ;;  %v5925_v36 = vpop.eup %3702  ;;  %v2359_v47 = vmul.f32 1.442695, %v7170_v34  ;;  %3730 = vpow2.f32 %v2249_v56 }
 0x553   :  { %v2411_v16 = vadd.f32 %v5905_v12, %v2410_v32  ;;  %v2435_v32 = vadd.f32 %v5921_v33, %v2434_v57  ;;  %v5932_v8 = vpop.eup %3704  ;;  %3732 = vpow2.f32 %v2355_v52  ;;  %v2363_v7 = vmul.f32 1.442695, %v7173_v44 }
 0x554   :  { %7169 = vst [vmem:[#allocation26_spill] sm:$0xff] %v5932_v8  ;;  %v5934_v59 = vpop.eup %3706  ;;  %v2253_v55 = vmul.f32 1.442695, %v2116_v63  ;;  %3734 = vpow2.f32 %v2359_v47  ;;  %v2367_v63 = vmul.f32 1.442695, %v7175_v46 }
 0x555   :  { %v2412_v49 = vadd.f32 %v5914_v22, %v2411_v16  ;;  %v2436_v2 = vadd.f32 %v5932_v8, %v2435_v32  ;;  %v5941_v25 = vpop.eup %3708  ;;  %v7172_v16 = vld [vmem:[#allocation39_spill] sm:$0xff] }
 0x556   :  { %7171 = vst [vmem:[#allocation27_spill] sm:$0xff] %v5941_v25  ;;  %v2118_v57 = vsub.f32 %v7172_v16, %v5659_v42  ;;  %v5947_v33 = vpop.eup %3710  ;;  %3736 = vpow2.f32 %v2253_v55  ;;  %v7179_v55 = vld [vmem:[#allocation43_spill] sm:$0xff] }
 0x557   :  { %v2413_v15 = vadd.f32 %v5925_v36, %v2412_v49  ;;  %v2437_v32 = vadd.f32 %v5941_v25, %v2436_v2  ;;  %v5954_v34 = vpop.eup %3712  ;;  %3738 = vpow2.f32 %v2363_v7  ;;  %v2373_v25 = vmul.f32 1.442695, %v2371_v29 }
 0x558   :  { %7174 = vst [vmem:[#allocation29_spill] sm:$0xff] %v5954_v34  ;;  %v5956_v8 = vpop.eup %3714  ;;  %v2257_v2 = vmul.f32 1.442695, %v2118_v57  ;;  %3740 = vpow2.f32 %v2367_v63  ;;  %v2122_v57 = vsub.f32 %v7179_v55, %v5659_v42 }
 0x559   :  { %v2414_v49 = vadd.f32 %v5934_v59, %v2413_v15  ;;  %v2438_v52 = vadd.f32 %v5954_v34, %v2437_v32  ;;  %v5963_v16 = vpop.eup %3716  ;;  %v2120_v15 = vsub.f32 %v7177_v51, %v5659_v42 }
 0x55a   :  { %7176 = vst [vmem:[#allocation30_spill] sm:$0xff] %v5963_v16  ;;  %v5967_v44 = vpop.eup %3718  ;;  %3742 = vpow2.f32 %v2257_v2  ;;  %v2265_v55 = vmul.f32 1.442695, %v2122_v57 }
 0x55b   :  { %v2415_v56 = vadd.f32 %v5947_v33, %v2414_v49  ;;  %v2439_v24 = vadd.f32 %v5963_v16, %v2438_v52  ;;  %v5971_v35 = vpop.eup %3720  ;;  %v2261_v51 = vmul.f32 1.442695, %v2120_v15  ;;  %3744 = vpow2.f32 %v2373_v25 }
 0x55c   :  { %7178 = vst [vmem:[#allocation32_spill] sm:$0xff] %v5971_v35  ;;  %v5975_v46 = vpop.eup %3722 }
 0x55d   :  { %v2416_v47 = vadd.f32 %v5956_v8, %v2415_v56  ;;  %v2440_v32 = vadd.f32 %v5971_v35, %v2439_v24  ;;  %v5979_v7 = vpop.eup %3724  ;;  %v7181_v24 = vld [vmem:[#allocation48_spill] sm:$0xff]  ;;  %3746 = vpow2.f32 %v2261_v51 }
 0x55e   :  { %7180 = vst [vmem:[#allocation33_spill] sm:$0xff] %v5979_v7  ;;  %v5982_v56 = vpop.eup %3726  ;;  %v2124_v35 = vsub.f32 %v7181_v24, %v5659_v42  ;;  %3748 = vpow2.f32 %v2265_v55 }
 0x55f   :  { %v2417_v49 = vadd.f32 %v5967_v44, %v2416_v47  ;;  %v2441_v63 = vadd.f32 %v5979_v7, %v2440_v32  ;;  %v5986_v47 = vpop.eup %3728 }
 0x560   :  { %v5990_v2 = vpop.eup %3730  ;;  %v2269_v34 = vmul.f32 1.442695, %v2124_v35 }
 0x561   :  { %v2418_v29 = vadd.f32 %v5975_v46, %v2417_v49  ;;  %7182 = vst [vmem:[#allocation35_spill] sm:$0xff] %v5990_v2  ;;  %v5993_v25 = vpop.eup %3732  ;;  %v2442_v49 = vadd.f32 %v5990_v2, %v2441_v63 }
 0x562   :  { %v5997_v32 = vpop.eup %3734  ;;  %3750 = vpow2.f32 %v2269_v34 }
 0x563   :  { %v2419_v52 = vadd.f32 %v5982_v56, %v2418_v29  ;;  %v7183_v29 = vld [vmem:[#allocation49_spill] sm:$0xff]  ;;  %v6001_v24 = vpop.eup %3736 }
 0x564   :  { %v2126_v7 = vsub.f32 %v7183_v29, %v5659_v42  ;;  %7184 = vst [vmem:[#allocation36_spill] sm:$0xff] %v6001_v24  ;;  %v6004_v51 = vpop.eup %3738 }
 0x565   :  { %v2420_v15 = vadd.f32 %v5986_v47, %v2419_v52  ;;  %v2443_v52 = vadd.f32 %v6001_v24, %v2442_v49  ;;  %v6008_v63 = vpop.eup %3740  ;;  %v7187_v49 = vld [vmem:[#allocation52_spill] sm:$0xff] }
 0x566   :  { %v2273_v60 = vmul.f32 1.442695, %v2126_v7 }
 0x567   :  { %v2421_v16 = vadd.f32 %v5993_v25, %v2420_v15  ;;  %v7185_v15 = vld [vmem:[#allocation51_spill] sm:$0xff]  ;;  %v6012_v29 = vpop.eup %3742 }
 0x568   :  { %v2128_v2 = vsub.f32 %v7185_v15, %v5659_v42  ;;  %7186 = vst [vmem:[#allocation38_spill] sm:$0xff] %v6012_v29  ;;  %v6015_v55 = vpop.eup %3744  ;;  %3752 = vpow2.f32 %v2273_v60  ;;  %v2134_v60 = vsub.f32 %v7087_v30, %v5659_v42 }
 0x569   :  { %v2422_v57 = vadd.f32 %v5997_v32, %v2421_v16  ;;  %v2444_v16 = vadd.f32 %v6012_v29, %v2443_v52  ;;  %v7203_v29 = vld [vmem:[#allocation66_spill] sm:$0xff] }
 0x56a   :  { %v2277_v24 = vmul.f32 1.442695, %v2128_v2  ;;  %v6021_v38 = vpop.eup %3746 }
 0x56b   :  { %v2423_v50 = vadd.f32 %v6004_v51, %v2422_v57  ;;  %v2130_v57 = vsub.f32 %v7187_v49, %v5659_v42  ;;  %7188 = vst [vmem:[#allocation39_spill] sm:$0xff] %v6021_v38  ;;  %v2445_v34 = vadd.f32 %v6021_v38, %v2444_v16  ;;  %v6024_v15 = vpop.eup %3748 }
 0x56c   :  { %3754 = vpow2.f32 %v2277_v24  ;;  %7189 = vst [vmem:[#allocation41_spill] sm:$0xff] %v6024_v15  ;;  %v2136_v24 = vsub.f32 %v7088_v54, %v5659_v42  ;;  %v7197_v54 = vld [vmem:[#allocation60_spill] sm:$0xff] }
 0x56d   :  { %v2424_v35 = vadd.f32 %v6008_v63, %v2423_v50  ;;  %v2281_v7 = vmul.f32 1.442695, %v2130_v57  ;;  %v7190_v50 = vld [vmem:[#allocation54_spill] sm:$0xff]  ;;  %v2446_v52 = vadd.f32 %v6024_v15, %v2445_v34  ;;  %v7195_v15 = vld [vmem:[#allocation59_spill] sm:$0xff] }
 0x56e   :  { %v2132_v20 = vsub.f32 %v7190_v50, %v5659_v42  ;;  %v7194_v34 = vld [vmem:[#allocation58_spill] sm:$0xff]  ;;  %v2140_v30 = vsub.f32 %v7195_v15, %v5659_v42 }
 0x56f   :  { %v2473_v5 = vadd.f32 %v6015_v55, %v2424_v35  ;;  %v6029_v35 = vpop.eup %3750 }
 0x570   :  { %7191 = vst [vmem:[#allocation43_spill] sm:$0xff] %v6029_v35  ;;  %v2285_v2 = vmul.f32 1.442695, %v2132_v20  ;;  %v2447_v49 = vadd.f32 %v6029_v35, %v2446_v52  ;;  %v2293_v20 = vmul.f32 1.442695, %v2136_v24 }
 0x571   :  { %3756 = vrcp.f32 %v2473_v5  ;;  %v2289_v5 = vmul.f32 1.442695, %v2134_v60  ;;  %v2142_v60 = vsub.f32 %v7197_v54, %v5659_v42 }
 0x572   :  { %3758 = vpow2.f32 %v2281_v7  ;;  %v2138_v7 = vsub.f32 %v7194_v34, %v5659_v42 }
 0x573   :  { %3760 = vpow2.f32 %v2285_v2  ;;  %v2305_v54 = vmul.f32 1.442695, %v2142_v60 }
 0x574   :  { %3762 = vpow2.f32 %v2289_v5  ;;  %v2297_v2 = vmul.f32 1.442695, %v2138_v7 }
 0x575   :  { %v6034_v16 = vpop.eup %3752  ;;  %3764 = vpow2.f32 %v2293_v20 }
 0x576   :  { %7192 = vst [vmem:[#allocation48_spill] sm:$0xff] %v6034_v16  ;;  %v2448_v57 = vadd.f32 %v6034_v16, %v2447_v49  ;;  %v2301_v49 = vmul.f32 1.442695, %v2140_v30  ;;  %3766 = vpow2.f32 %v2297_v2 }
 0x578   :  { %3768 = vpow2.f32 %v2301_v49 }
 0x579   :  { %v6039_v50 = vpop.eup %3754  ;;  %3770 = vpow2.f32 %v2305_v54 }
 0x57a   :  { %7193 = vst [vmem:[#allocation49_spill] sm:$0xff] %v6039_v50  ;;  %v2449_v52 = vadd.f32 %v6039_v50, %v2448_v57 }
 0x57e   :  { %v6046_v35 = vpop.eup %3756 }
 0x57f   :  { %v6048_v38 = vpop.eup %3758  ;;  %v6054_v34 = vmul.f32 %v6046_v35, %v5846_v28  ;;  %v6058_v15 = vmul.f32 %v6046_v35, %v5857_v48  ;;  %v6062_v24 = vmul.f32 %v6046_v35, %v5868_v23  ;;  %v6067_v57 = vmul.f32 %v6046_v35, %v5877_v10 }
 0x580   :  { %7196 = vst [vmem:[#allocation51_spill] sm:$0xff] %v6048_v38  ;;  %v2450_v5 = vadd.f32 %v6048_v38, %v2449_v52  ;;  %v6071_v7 = vmul.f32 %v6046_v35, %v5888_v41  ;;  %v6075_v28 = vmul.f32 %v6046_v35, %v5894_v61  ;;  %v6079_v48 = vmul.f32 %v6046_v35, %v5905_v12  ;;  %v6125_v30 = vpop.eup %3760  ;;  %v7201_v52 = vld [vmem:[#allocation62_spill] sm:$0xff] }
 0x581   :  { %v6083_v23 = vmul.f32 %v6046_v35, %v5914_v22  ;;  %v6087_v10 = vmul.f32 %v6046_v35, %v5925_v36  ;;  %v6091_v41 = vmul.f32 %v6046_v35, %v5934_v59  ;;  %v6095_v61 = vmul.f32 %v6046_v35, %v5947_v33  ;;  %7199 = vst [vmem:[#allocation54_spill] sm:$0xff] %v6125_v30  ;;  %v6132_v38 = vpop.eup %3762 }
 0x582   :  { %v6099_v12 = vmul.f32 %v6046_v35, %v5956_v8  ;;  %v6103_v22 = vmul.f32 %v6046_v35, %v5967_v44  ;;  %v6107_v36 = vmul.f32 %v6046_v35, %v5975_v46  ;;  %v6111_v59 = vmul.f32 %v6046_v35, %v5982_v56  ;;  %v7200_v46 = vld [vmem:[#allocation61_spill] sm:$0xff]  ;;  %v6137_v16 = vpop.eup %3764 }
 0x583   :  { %v6115_v33 = vmul.f32 %v6046_v35, %v5986_v47  ;;  %v6119_v8 = vmul.f32 %v6046_v35, %v5993_v25  ;;  %v6123_v44 = vmul.f32 %v6046_v35, %v5997_v32  ;;  %v2144_v20 = vsub.f32 %v7200_v46, %v5659_v42  ;;  %v7202_v25 = vld [vmem:[#allocation64_spill] sm:$0xff]  ;;  %v6150_v54 = vpop.eup %3766 }
 0x584   :  { %v2451_v56 = vadd.f32 %v6125_v30, %v2450_v5  ;;  %v2146_v47 = vsub.f32 %v7201_v52, %v5659_v42  ;;  %v2148_v50 = vsub.f32 %v7202_v25, %v5659_v42  ;;  %v2150_v46 = vsub.f32 %v7203_v29, %v5659_v42  ;;  %v7204_v30 = vld [vmem:[#allocation67_spill] sm:$0xff] }
 0x585   :  { %7198 = vst [vmem:[#allocation52_spill] sm:$0xff] %v6123_v44  ;;  %v2309_v32 = vmul.f32 1.442695, %v2144_v20  ;;  %v2152_v52 = vsub.f32 %v7204_v30, %v5659_v42  ;;  %v7205_v44 = vld [vmem:[#allocation68_spill] sm:$0xff]  ;;  %v2477_v20 = vmul.f32 %v6046_v35, %v5650_v27  ;;  %v2156_v30 = vsub.f32 %v5479_v4, %v5659_v42  ;;  %v3810_v4 = vld [vmem:[%s6909_s3 + $0x10] sm:$0xff] }
 0x586   :  { %v2452_v2 = vadd.f32 %v6132_v38, %v2451_v56  ;;  %v2313_v5 = vmul.f32 1.442695, %v2146_v47  ;;  %v2317_v60 = vmul.f32 1.442695, %v2148_v50  ;;  %v2154_v25 = vsub.f32 %v7205_v44, %v5659_v42 }
 0x587   :  { %3772 = vpow2.f32 %v2309_v32  ;;  %v2479_v56 = vmul.f32 %v6046_v35, %v5654_v17  ;;  %v2321_v29 = vmul.f32 1.442695, %v2150_v46  ;;  %v2158_v50 = vsub.f32 %v5489_v19, %v5659_v42  ;;  %v3809_v17 = vld [vmem:[%s6909_s3] sm:$0xff]  ;;  %v6165_v19 = vpop.eup %3768 }
 0x588   :  { %v2453_v49 = vadd.f32 %v6137_v16, %v2452_v2  ;;  %3774 = vpow2.f32 %v2313_v5  ;;  %v2325_v47 = vmul.f32 1.442695, %v2152_v52  ;;  %v2329_v32 = vmul.f32 1.442695, %v2154_v25 }
 0x589   :  { %3776 = vpow2.f32 %v2317_v60  ;;  %v2481_v27 = vmul.f32 %v6046_v35, %v5663_v53  ;;  %v2577_v2 = vmul.f32 %v3809_v17, %v2477_v20  ;;  %v2579_v46 = vmul.f32 %v3810_v4, %v2479_v56  ;;  %v3811_v56 = vld [vmem:[%s6909_s3 + $0x20] sm:$0xff] }
 0x58a   :  { %v2454_v44 = vadd.f32 %v6150_v54, %v2453_v49  ;;  %3778 = vpow2.f32 %v2321_v29  ;;  %v2160_v5 = vsub.f32 %v5505_v37, %v5659_v42  ;;  %v2162_v52 = vsub.f32 %v5520_v62, %v5659_v42 }
 0x58b   :  { %v2333_v53 = vmul.f32 1.442695, %v2156_v30  ;;  %v2483_v60 = vmul.f32 %v6046_v35, %v5670_v13  ;;  %3780 = vpow2.f32 %v2325_v47  ;;  %v2337_v49 = vmul.f32 1.442695, %v2158_v50  ;;  %v6181_v30 = vpop.eup %3770 }
 0x58c   :  { %v2455_v25 = vadd.f32 %v6165_v19, %v2454_v44  ;;  %3782 = vpow2.f32 %v2329_v32  ;;  %v2485_v20 = vmul.f32 %v6046_v35, %v5683_v11  ;;  %v2581_v37 = vmul.f32 %v3811_v56, %v2481_v27  ;;  %v3812_v44 = vld [vmem:[%s6909_s3 + $0x30] sm:$0xff] }
 0x58d   :  { %v2675_v29 = vsel %vm250_vm1, %v2577_v2, 0.0  ;;  %v2676_v62 = vsel %vm250_vm1, %v2579_v46, 0.0  ;;  %v2164_v13 = vsub.f32 %v5538_v40, %v5659_v42  ;;  %3784 = vpow2.f32 %v2333_v53 }
 0x58e   :  { %v2341_v50 = vmul.f32 1.442695, %v2160_v5  ;;  %v2345_v47 = vmul.f32 1.442695, %v2162_v52  ;;  %v2487_v11 = vmul.f32 %v6046_v35, %v5688_v14  ;;  %v2583_v32 = vmul.f32 %v3812_v44, %v2483_v60  ;;  %v3813_v5 = vld [vmem:[%s6909_s3 + $0x40] sm:$0xff] }
 0x58f   :  { %3786 = vpow2.f32 %v2337_v49  ;;  %v2456_v27 = vadd.f32 %v6181_v30, %v2455_v25  ;;  %v2677_v2 = vadd.f32 %v2676_v62, %v2675_v29  ;;  %v6195_v40 = vmul.f32 %v6046_v35, %v6004_v51 }
 0x590   :  { %v6199_v4 = vmul.f32 %v6046_v35, %v6008_v63  ;;  %v6203_v14 = vmul.f32 %v6046_v35, %v6015_v55  ;;  %v2489_v46 = vmul.f32 %v6046_v35, %v5693_v21  ;;  %v2585_v52 = vmul.f32 %v3813_v5, %v2485_v20  ;;  %v3814_v21 = vld [vmem:[%s6909_s3 + $0x50] sm:$0xff] }
 0x591   :  { %v2678_v53 = vsel %vm250_vm1, %v2581_v37, 0.0  ;;  %3788 = vpow2.f32 %v2341_v50  ;;  %v2349_v63 = vmul.f32 1.442695, %v2164_v13  ;;  %v2491_v55 = vmul.f32 %v6046_v35, %v5698_v31  ;;  %v3815_v50 = vld [vmem:[%s6909_s3 + $0x60] sm:$0xff] }
 0x592   :  { %v2679_v49 = vadd.f32 %v2678_v53, %v2677_v2  ;;  %v2587_v25 = vmul.f32 %v3814_v21, %v2487_v11  ;;  %v2680_v56 = vsel %vm250_vm1, %v2583_v32, 0.0  ;;  %3790 = vpow2.f32 %v2345_v47  ;;  %v7207_v47 = vld [vmem:[#allocation55_spill] sm:$0xff]  ;;  %v3816_v53 = vld [vmem:[%s6909_s3 + $0x70] sm:$0xff] }
 0x593   :  { %v7206_v29 = vsub.f32 %v5554_v58, %v5659_v42  ;;  %v2493_v31 = vmul.f32 %v6046_v35, %v5703_v18  ;;  %v2589_v11 = vmul.f32 %v3815_v50, %v2489_v46  ;;  %v2682_v44 = vsel %vm250_vm1, %v2585_v52, 0.0 }
 0x594   :  { %v6191_v17 = vpop.eup %3772  ;;  %v2681_v13 = vadd.f32 %v2680_v56, %v2679_v49  ;;  %3792 = vpow2.f32 %v2349_v63  ;;  %v7208_v58 = vsub.f32 %v7207_v47, %v5659_v42  ;;  %v2495_v18 = vmul.f32 %v6046_v35, %v5708_v6  ;;  %v7209_v63 = vld [vmem:[#allocation57_spill] sm:$0xff] }
 0x595   :  { %v2457_v51 = vadd.f32 %v6191_v17, %v2456_v27  ;;  %v6212_v60 = vpop.eup %3774  ;;  %v2353_v62 = vmul.f32 1.442695, %v7206_v29  ;;  %v2591_v46 = vmul.f32 %v3816_v53, %v2491_v55  ;;  %v2684_v52 = vsel %vm250_vm1, %v2587_v25, 0.0  ;;  %v7211_v6 = vld [vmem:[#allocation21_spill] sm:$0xff]  ;;  %v3817_v55 = vld [vmem:[%s6909_s3 + $0x80] sm:$0xff] }
 0x596   :  { %v6221_v37 = vpop.eup %3776  ;;  %v2357_v2 = vmul.f32 1.442695, %v7208_v58  ;;  %v2683_v5 = vadd.f32 %v2682_v44, %v2681_v13  ;;  %v7210_v21 = vsub.f32 %v7209_v63, %v5659_v42  ;;  %v2497_v13 = vmul.f32 %v6046_v35, %v7211_v6  ;;  %v7214_v58 = vld [vmem:[#allocation46_spill] sm:$0xff]  ;;  %v7215_v6 = vld [vmem:[#allocation19_spill] sm:$0xff] }
 0x597   :  { %v2458_v20 = vadd.f32 %v6212_v60, %v2457_v51  ;;  %v6233_v27 = vpop.eup %3778  ;;  %3794 = vpow2.f32 %v2353_v62  ;;  %v2593_v25 = vmul.f32 %v3817_v55, %v2493_v31  ;;  %v2686_v50 = vsel %vm250_vm1, %v2589_v11, 0.0  ;;  %v7212_v62 = vld [vmem:[#allocation45_spill] sm:$0xff] }
 0x598   :  { %v6245_v49 = vpop.eup %3780  ;;  %v2361_v56 = vmul.f32 1.442695, %v7210_v21  ;;  %3796 = vpow2.f32 %v2357_v2  ;;  %v2499_v63 = vmul.f32 %v6046_v35, %v5718_v1  ;;  %v3818_v31 = vld [vmem:[%s6909_s3 + $0x90] sm:$0xff]  ;;  %v2688_v2 = vsel %vm250_vm1, %v2591_v46, 0.0 }
 0x599   :  { %v2459_v32 = vadd.f32 %v6221_v37, %v2458_v20  ;;  %v2685_v20 = vadd.f32 %v2684_v52, %v2683_v5  ;;  %v6250_v29 = vpop.eup %3782  ;;  %v2372_v5 = vsub.f32 %v7214_v58, %v5659_v42  ;;  %v2595_v11 = vmul.f32 %v3818_v31, %v2495_v18 }
 0x59a   :  { %v6264_v52 = vpop.eup %3784  ;;  %3798 = vpow2.f32 %v2361_v56  ;;  %v2690_v46 = vsel %vm250_vm1, %v2593_v25, 0.0 }
 0x59b   :  { %v2460_v51 = vadd.f32 %v6233_v27, %v2459_v32  ;;  %v7213_v32 = vsub.f32 %v7212_v62, %v5659_v42  ;;  %v2687_v53 = vadd.f32 %v2686_v50, %v2685_v20  ;;  %v7216_v20 = vsub.f32 %v7215_v6, %v5659_v42  ;;  %v7217_v62 = vld [vmem:[#allocation22_spill] sm:$0xff]  ;;  %v7218_v42 = vld [vmem:[#allocation25_spill] sm:$0xff] }
 0x59c   :  { %v6273_v21 = vpop.eup %3786  ;;  %v2501_v1 = vmul.f32 %v6046_v35, %v7217_v62  ;;  %v2375_v58 = vmul.f32 1.442695, %v2372_v5 }
 0x59d   :  { %v2461_v44 = vadd.f32 %v6245_v49, %v2460_v51  ;;  %v2365_v47 = vmul.f32 1.442695, %v7213_v32  ;;  %v2369_v55 = vmul.f32 1.442695, %v7216_v20  ;;  %v2689_v50 = vadd.f32 %v2688_v2, %v2687_v53  ;;  %v3819_v32 = vld [vmem:[%s6909_s3 + $0xa0] sm:$0xff]  ;;  %v3820_v2 = vld [vmem:[%s6909_s3 + $0xb0] sm:$0xff] }
 0x59e   :  { %v2597_v18 = vmul.f32 %v3819_v32, %v2497_v13  ;;  %v6285_v31 = vpop.eup %3788  ;;  %v2503_v53 = vmul.f32 %v6046_v35, %v7218_v42  ;;  %v2599_v6 = vmul.f32 %v3820_v2, %v2499_v63  ;;  %v2692_v20 = vsel %vm250_vm1, %v2595_v11, 0.0 }
 0x59f   :  { %v2462_v51 = vadd.f32 %v6250_v29, %v2461_v44  ;;  %3800 = vpow2.f32 %v2365_v47  ;;  %v2691_v56 = vadd.f32 %v2690_v46, %v2689_v50  ;;  %v7219_v47 = vld [vmem:[#allocation28_spill] sm:$0xff]  ;;  %v3821_v50 = vld [vmem:[%s6909_s3 + $0xc0] sm:$0xff] }
 0x5a0   :  { %3802 = vpow2.f32 %v2369_v55  ;;  %v2505_v5 = vmul.f32 %v6046_v35, %v7219_v47  ;;  %v2601_v62 = vmul.f32 %v3821_v50, %v2501_v1  ;;  %v2694_v32 = vsel %vm250_vm1, %v2597_v18, 0.0  ;;  %v7220_v55 = vld [vmem:[#allocation31_spill] sm:$0xff] }
 0x5a1   :  { %v2463_v44 = vadd.f32 %v6264_v52, %v2462_v51  ;;  %v2693_v25 = vadd.f32 %v2692_v20, %v2691_v56  ;;  %v6294_v51 = vpop.eup %3790  ;;  %3804 = vpow2.f32 %v2375_v58  ;;  %v3822_v56 = vld [vmem:[%s6909_s3 + $0xd0] sm:$0xff]  ;;  %v2696_v2 = vsel %vm250_vm1, %v2599_v6, 0.0 }
 0x5a2   :  { %v6303_v46 = vpop.eup %3792  ;;  %v2603_v42 = vmul.f32 %v3822_v56, %v2503_v53  ;;  %v2509_v58 = vmul.f32 %v6046_v35, %v5747_v43  ;;  %v2698_v47 = vsel %vm250_vm1, %v2601_v62, 0.0  ;;  %v2511_v6 = vmul.f32 %v6046_v35, %v5754_v3 }
 0x5a3   :  { %v2464_v13 = vadd.f32 %v6273_v21, %v2463_v44  ;;  %v2695_v11 = vadd.f32 %v2694_v32, %v2693_v25  ;;  %v2507_v44 = vmul.f32 %v6046_v35, %v7220_v55  ;;  %v2513_v62 = vmul.f32 %v6046_v35, %v5761_v45 }
 0x5a4   :  { %v6312_v18 = vpop.eup %3794 }
 0x5a5   :  { %v2465_v63 = vadd.f32 %v6285_v31, %v2464_v13  ;;  %v2697_v20 = vadd.f32 %v2696_v2, %v2695_v11  ;;  %v3823_v13 = vld [vmem:[%s6909_s3 + $0xe0] sm:$0xff]  ;;  %v6321_v32 = vpop.eup %3796  ;;  %v2700_v11 = vsel %vm250_vm1, %v2603_v42, 0.0  ;;  %v2515_v42 = vmul.f32 %v6046_v35, %v5768_v9 }
 0x5a6   :  { %v2605_v25 = vmul.f32 %v3823_v13, %v2505_v5  ;;  %v3825_v2 = vld [vmem:[%s6909_s3 + $0x100] sm:$0xff] }
 0x5a7   :  { %v2466_v1 = vadd.f32 %v6294_v51, %v2465_v63  ;;  %v2699_v53 = vadd.f32 %v2698_v47, %v2697_v20  ;;  %v3824_v63 = vld [vmem:[%s6909_s3 + $0xf0] sm:$0xff]  ;;  %v6330_v56 = vpop.eup %3798  ;;  %v2609_v3 = vmul.f32 %v3825_v2, %v2509_v58 }
 0x5a8   :  { %v2607_v43 = vmul.f32 %v3824_v63, %v2507_v44  ;;  %v3826_v47 = vld [vmem:[%s6909_s3 + $0x110] sm:$0xff] }
 0x5a9   :  { %v2467_v50 = vadd.f32 %v6303_v46, %v2466_v1  ;;  %v2701_v5 = vadd.f32 %v2700_v11, %v2699_v53  ;;  %v2702_v1 = vsel %vm250_vm1, %v2605_v25, 0.0  ;;  %v2611_v45 = vmul.f32 %v3826_v47, %v2511_v6  ;;  %v3827_v11 = vld [vmem:[%s6909_s3 + $0x120] sm:$0xff] }
 0x5aa   :  { %v2517_v25 = vmul.f32 %v6046_v35, %v5775_v39  ;;  %v2613_v9 = vmul.f32 %v3827_v11, %v2513_v62 }
 0x5ab   :  { %v2468_v55 = vadd.f32 %v6312_v18, %v2467_v50  ;;  %v2703_v44 = vadd.f32 %v2702_v1, %v2701_v5  ;;  %v2704_v50 = vsel %vm250_vm1, %v2607_v43, 0.0  ;;  %v2519_v43 = vmul.f32 %v6046_v35, %v5782_v0  ;;  %v3828_v1 = vld [vmem:[%s6909_s3 + $0x130] sm:$0xff] }
 0x5ac   :  { %v6339_v13 = vpop.eup %3800  ;;  %v2615_v39 = vmul.f32 %v3828_v1, %v2515_v42  ;;  %v3830_v42 = vld [vmem:[%s6909_s3 + $0x150] sm:$0xff] }
 0x5ad   :  { %v2469_v20 = vadd.f32 %v6321_v32, %v2468_v55  ;;  %v2705_v58 = vadd.f32 %v2704_v50, %v2703_v44  ;;  %v6348_v63 = vpop.eup %3802  ;;  %v2706_v55 = vsel %vm250_vm1, %v2609_v3, 0.0  ;;  %v3829_v3 = vld [vmem:[%s6909_s3 + $0x140] sm:$0xff]  ;;  %v2710_v50 = vsel %vm250_vm1, %v2613_v9, 0.0 }
 0x5ae   :  { %v6357_v2 = vpop.eup %3804  ;;  %v2617_v47 = vmul.f32 %v3829_v3, %v2517_v25  ;;  %v7222_v25 = vld [vmem:[#allocation37_spill] sm:$0xff] }
 0x5af   :  { %v2470_v53 = vadd.f32 %v6330_v56, %v2469_v20  ;;  %v2707_v6 = vadd.f32 %v2706_v55, %v2705_v58  ;;  %v2708_v20 = vsel %vm250_vm1, %v2611_v45, 0.0  ;;  %v7221_v58 = vld [vmem:[#allocation34_spill] sm:$0xff]  ;;  %v2619_v45 = vmul.f32 %v3830_v42, %v2519_v43 }
 0x5b0   :  { %v2521_v11 = vmul.f32 %v6046_v35, %v7221_v58  ;;  %v2712_v55 = vsel %vm250_vm1, %v2615_v39, 0.0  ;;  %v2523_v9 = vmul.f32 %v6046_v35, %v7222_v25  ;;  %v2525_v43 = vmul.f32 %v6046_v35, %v5803_v26  ;;  %v3832_v39 = vld [vmem:[%s6909_s3 + $0x170] sm:$0xff]  ;;  %v7223_v58 = vld [vmem:[#allocation40_spill] sm:$0xff] }
 0x5b1   :  { %v2471_v5 = vadd.f32 %v6339_v13, %v2470_v53  ;;  %v2709_v62 = vadd.f32 %v2708_v20, %v2707_v6  ;;  %v2714_v6 = vsel %vm250_vm1, %v2617_v47, 0.0  ;;  %v3831_v20 = vld [vmem:[%s6909_s3 + $0x160] sm:$0xff]  ;;  %v2527_v42 = vmul.f32 %v6046_v35, %v7223_v58 }
 0x5b2   :  { %v2623_v47 = vmul.f32 %v3832_v39, %v2523_v9  ;;  %v7225_v9 = vld [vmem:[#allocation50_spill] sm:$0xff] }
 0x5b3   :  { %v2472_v44 = vadd.f32 %v6348_v63, %v2471_v5  ;;  %v2711_v0 = vadd.f32 %v2710_v50, %v2709_v62  ;;  %v2716_v62 = vsel %vm250_vm1, %v2619_v45, 0.0 }
 0x5b5   :  { %v2474_v53 = vadd.f32 %v6357_v2, %v2472_v44  ;;  %v2713_v5 = vadd.f32 %v2712_v55, %v2711_v0  ;;  %v2621_v44 = vmul.f32 %v3831_v20, %v2521_v11  ;;  %v3833_v11 = vld [vmem:[%s6909_s3 + $0x180] sm:$0xff]  ;;  %v7224_v55 = vld [vmem:[#allocation42_spill] sm:$0xff]  ;;  %v2531_v20 = vmul.f32 %v6046_v35, %v7225_v9 }
 0x5b6   :  { %v2625_v45 = vmul.f32 %v3833_v11, %v2525_v43  ;;  %v2529_v26 = vmul.f32 %v6046_v35, %v7224_v55 }
 0x5b7   :  { %v2715_v1 = vadd.f32 %v2714_v6, %v2713_v5  ;;  %3806 = vrcp.f32 %v2474_v53  ;;  %v2718_v50 = vsel %vm250_vm1, %v2621_v44, 0.0  ;;  %v2720_v53 = vsel %vm250_vm1, %v2623_v47, 0.0  ;;  %v3834_v6 = vld [vmem:[%s6909_s3 + $0x190] sm:$0xff]  ;;  %v7226_v44 = vld [vmem:[#allocation56_spill] sm:$0xff] }
 0x5b8   :  { %v2722_v25 = vsel %vm250_vm1, %v2625_v45, 0.0 }
 0x5b9   :  { %v2717_v3 = vadd.f32 %v2716_v62, %v2715_v1  ;;  %v2627_v1 = vmul.f32 %v3834_v6, %v2527_v42  ;;  %v2533_v62 = vmul.f32 %v6046_v35, %v7226_v44  ;;  %v3837_v42 = vld [vmem:[%s6909_s3 + $0x1c0] sm:$0xff]  ;;  %v3840_v44 = vld [vmem:[%s6909_s3 + $0x1f0] sm:$0xff] }
 0x5bb   :  { %v2719_v0 = vadd.f32 %v2718_v50, %v2717_v3  ;;  %v3835_v3 = vld [vmem:[%s6909_s3 + $0x1a0] sm:$0xff]  ;;  %v2724_v50 = vsel %vm250_vm1, %v2627_v1, 0.0  ;;  %v2633_v35 = vmul.f32 %v3837_v42, %v2533_v62  ;;  %v2639_v62 = vmul.f32 %v3840_v44, %v6062_v24 }
 0x5bc   :  { %v2629_v43 = vmul.f32 %v3835_v3, %v2529_v26 }
 0x5bd   :  { %v2721_v5 = vadd.f32 %v2720_v53, %v2719_v0  ;;  %v3836_v0 = vld [vmem:[%s6909_s3 + $0x1b0] sm:$0xff]  ;;  %v2736_v24 = vsel %vm250_vm1, %v2639_v62, 0.0 }
 0x5be   :  { %v2631_v58 = vmul.f32 %v3836_v0, %v2531_v20  ;;  %v2726_v11 = vsel %vm250_vm1, %v2629_v43, 0.0  ;;  %v2730_v20 = vsel %vm250_vm1, %v2633_v35, 0.0  ;;  %v3841_v43 = vld [vmem:[%s6909_s3 + $0x200] sm:$0xff]  ;;  %v3842_v0 = vld [vmem:[%s6909_s3 + $0x210] sm:$0xff] }
 0x5bf   :  { %v2723_v39 = vadd.f32 %v2722_v25, %v2721_v5  ;;  %v3843_v35 = vld [vmem:[%s6909_s3 + $0x220] sm:$0xff] }
 0x5c0   :  { %v2728_v25 = vsel %vm250_vm1, %v2631_v58, 0.0  ;;  %v2643_v58 = vmul.f32 %v3842_v0, %v6071_v7  ;;  %v3848_v0 = vld [vmem:[%s6909_s3 + $0x8] sm:$0xff] }
 0x5c1   :  { %v2725_v45 = vadd.f32 %v2724_v50, %v2723_v39  ;;  %v2641_v39 = vmul.f32 %v3841_v43, %v6067_v57 }
 0x5c2   :  { %v2740_v7 = vsel %vm250_vm1, %v2643_v58, 0.0 }
 0x5c3   :  { %v2727_v1 = vadd.f32 %v2726_v11, %v2725_v45  ;;  %v2645_v11 = vmul.f32 %v3843_v35, %v6075_v28  ;;  %v2738_v57 = vsel %vm250_vm1, %v2641_v39, 0.0 }
 0x5c4   :  { %v6409_v47 = vpop.eup %3806 }
 0x5c5   :  { %v6421_v53 = vmul.f32 %v6409_v47, %v6181_v30  ;;  %v6425_v55 = vmul.f32 %v6409_v47, %v6191_v17  ;;  %v6429_v26 = vmul.f32 %v6409_v47, %v6212_v60  ;;  %v6433_v5 = vmul.f32 %v6409_v47, %v6221_v37 }
 0x5c6   :  { %v6437_v6 = vmul.f32 %v6409_v47, %v6233_v27  ;;  %v6441_v30 = vmul.f32 %v6409_v47, %v6245_v49  ;;  %v6445_v17 = vmul.f32 %v6409_v47, %v6250_v29  ;;  %v6449_v60 = vmul.f32 %v6409_v47, %v6264_v52 }
 0x5c7   :  { %v6453_v37 = vmul.f32 %v6409_v47, %v6273_v21  ;;  %v6457_v27 = vmul.f32 %v6409_v47, %v6285_v31  ;;  %v6461_v49 = vmul.f32 %v6409_v47, %v6294_v51  ;;  %v6465_v29 = vmul.f32 %v6409_v47, %v6303_v46  ;;  %v3838_v51 = vld [vmem:[%s6909_s3 + $0x1d0] sm:$0xff] }
 0x5c8   :  { %v6469_v52 = vmul.f32 %v6409_v47, %v6312_v18  ;;  %v6473_v21 = vmul.f32 %v6409_v47, %v6321_v32  ;;  %v6477_v31 = vmul.f32 %v6409_v47, %v6330_v56  ;;  %v2635_v46 = vmul.f32 %v3838_v51, %v6054_v34  ;;  %v3839_v18 = vld [vmem:[%s6909_s3 + $0x1e0] sm:$0xff] }
 0x5c9   :  { %v2729_v9 = vadd.f32 %v2728_v25, %v2727_v1  ;;  %v2637_v32 = vmul.f32 %v3839_v18, %v6058_v15  ;;  %v3844_v1 = vld [vmem:[%s6909_s3 + $0x230] sm:$0xff]  ;;  %v3845_v25 = vld [vmem:[%s6909_s3 + $0x240] sm:$0xff]  ;;  %v2742_v28 = vsel %vm250_vm1, %v2645_v11, 0.0  ;;  %v7227_v18 = vld [vmem:[#allocation44_spill] sm:$0xff] }
 0x5ca   :  { %v2732_v34 = vsel %vm250_vm1, %v2635_v46, 0.0  ;;  %v2647_v51 = vmul.f32 %v3844_v1, %v6079_v48  ;;  %v3846_v48 = vld [vmem:[%s6909_s3 + $0x250] sm:$0xff]  ;;  %v3851_v11 = vld [vmem:[%s6909_s3 + $0x280] sm:$0xff]  ;;  %v7230_v1 = vld [vmem:[#allocation16_spill] sm:$0xff] }
 0x5cb   :  { %v2731_v56 = vadd.f32 %v2730_v20, %v2729_v9  ;;  %v2734_v15 = vsel %vm250_vm1, %v2637_v32, 0.0  ;;  %v2649_v9 = vmul.f32 %v3845_v25, %v6083_v23  ;;  %v2478_v32 = vmul.f32 %v6409_v47, %v7227_v18  ;;  %v7228_v20 = vld [vmem:[#allocation47_spill] sm:$0xff] }
 0x5cc   :  { %v2651_v62 = vmul.f32 %v3846_v48, %v6087_v10  ;;  %v3847_v23 = vld [vmem:[%s6909_s3 + $0x260] sm:$0xff]  ;;  %v3849_v10 = vld [vmem:[%s6909_s3 + $0x18] sm:$0xff] }
 0x5cd   :  { %v2733_v3 = vadd.f32 %v2732_v34, %v2731_v56  ;;  %v2480_v56 = vmul.f32 %v6409_v47, %v7228_v20  ;;  %v2744_v34 = vsel %vm250_vm1, %v2647_v51, 0.0  ;;  %v2746_v39 = vsel %vm250_vm1, %v2649_v9, 0.0  ;;  %v7231_v25 = vld [vmem:[#allocation15_spill] sm:$0xff] }
 0x5ce   :  { %v2578_v58 = vmul.f32 %v3848_v0, %v2478_v32  ;;  %v2484_v51 = vmul.f32 %v6409_v47, %v7230_v1  ;;  %v2486_v9 = vmul.f32 %v6409_v47, %v7231_v25  ;;  %v3853_v32 = vld [vmem:[%s6909_s3 + $0x290] sm:$0xff]  ;;  %v7233_v0 = vld [vmem:[#allocation18_spill] sm:$0xff] }
 0x5cf   :  { %v2735_v50 = vadd.f32 %v2734_v15, %v2733_v3  ;;  %v2653_v3 = vmul.f32 %v3847_v23, %v6091_v41  ;;  %v7229_v15 = vld [vmem:[#allocation53_spill] sm:$0xff]  ;;  %v2659_v20 = vmul.f32 %v3853_v32, %v6103_v22 }
 0x5d0   :  { %v3850_v41 = vld [vmem:[%s6909_s3 + $0x270] sm:$0xff]  ;;  %v2772_v18 = vsel %vm250_vm1, %v2578_v58, 0.0  ;;  %v2490_v58 = vmul.f32 %v6409_v47, %v7233_v0 }
 0x5d1   :  { %v2737_v42 = vadd.f32 %v2736_v24, %v2735_v50  ;;  %v2482_v50 = vmul.f32 %v6409_v47, %v7229_v15  ;;  %v2580_v24 = vmul.f32 %v3849_v10, %v2480_v56  ;;  %v2655_v35 = vmul.f32 %v3850_v41, %v6095_v61  ;;  %v3852_v61 = vld [vmem:[%s6909_s3 + $0x28] sm:$0xff]  ;;  %v3854_v56 = vld [vmem:[%s6909_s3 + $0x2a0] sm:$0xff]  ;;  %v7232_v23 = vld [vmem:[#allocation17_spill] sm:$0xff] }
 0x5d2   :  { %v3856_v10 = vld [vmem:[%s6909_s3 + $0x48] sm:$0xff]  ;;  %v6591_v41 = vmul.f32 %v6409_v47, %v6357_v2 }
 0x5d3   :  { %v2739_v45 = vadd.f32 %v2738_v57, %v2737_v42  ;;  %v2657_v57 = vmul.f32 %v3851_v11, %v6099_v12  ;;  %v2773_v12 = vsel %vm250_vm1, %v2580_v24, 0.0  ;;  %v2586_v24 = vmul.f32 %v3856_v10, %v2486_v9  ;;  %v7238_v10 = vld [vmem:[#allocation65_spill] sm:$0xff] }
 0x5d4   :  { %v2774_v15 = vadd.f32 %v2773_v12, %v2772_v18  ;;  %v3860_v12 = vld [vmem:[%s6909_s3 + $0x68] sm:$0xff] }
 0x5d5   :  { %v2741_v46 = vadd.f32 %v2740_v7, %v2739_v45  ;;  %v2748_v45 = vsel %vm250_vm1, %v2651_v62, 0.0  ;;  %v2750_v7 = vsel %vm250_vm1, %v2653_v3, 0.0  ;;  %v2752_v62 = vsel %vm250_vm1, %v2655_v35, 0.0 }
 0x5d6   :  { %v2488_v3 = vmul.f32 %v6409_v47, %v7232_v23  ;;  %v2590_v32 = vmul.f32 %v3860_v12, %v2490_v58 }
 0x5d7   :  { %v2743_v44 = vadd.f32 %v2742_v28, %v2741_v46  ;;  %v2582_v28 = vmul.f32 %v3852_v61, %v2482_v50  ;;  %v6577_v50 = vmul.f32 %v6409_v47, %v6339_v13  ;;  %v3857_v13 = vld [vmem:[%s6909_s3 + $0x2b0] sm:$0xff] }
 0x5d9   :  { %v2745_v43 = vadd.f32 %v2744_v34, %v2743_v44  ;;  %v2661_v44 = vmul.f32 %v3854_v56, %v6107_v36  ;;  %v2754_v34 = vsel %vm250_vm1, %v2657_v57, 0.0  ;;  %v6581_v36 = vmul.f32 %v6409_v47, %v6348_v63  ;;  %v3861_v56 = vld [vmem:[%s6909_s3 + $0x2d0] sm:$0xff] }
 0x5da   :  { %v2663_v63 = vmul.f32 %v3857_v13, %v6111_v59  ;;  %v2756_v57 = vsel %vm250_vm1, %v2659_v20, 0.0  ;;  %v2779_v20 = vsel %vm250_vm1, %v2586_v24, 0.0  ;;  %v2498_v24 = vmul.f32 %v6409_v47, %v7238_v10  ;;  %v3864_v13 = vld [vmem:[%s6909_s3 + $0x88] sm:$0xff] }
 0x5db   :  { %v2747_v42 = vadd.f32 %v2746_v39, %v2745_v43  ;;  %v3855_v43 = vld [vmem:[%s6909_s3 + $0x38] sm:$0xff]  ;;  %v2758_v61 = vsel %vm250_vm1, %v2661_v44, 0.0 }
 0x5dc   :  { %v2584_v39 = vmul.f32 %v3855_v43, %v2484_v51  ;;  %v3858_v51 = vld [vmem:[%s6909_s3 + $0x58] sm:$0xff]  ;;  %v2760_v23 = vsel %vm250_vm1, %v2663_v63, 0.0 }
 0x5dd   :  { %v2749_v46 = vadd.f32 %v2748_v45, %v2747_v42  ;;  %v2775_v42 = vsel %vm250_vm1, %v2582_v28, 0.0  ;;  %v7234_v45 = vld [vmem:[#allocation20_spill] sm:$0xff]  ;;  %v7235_v28 = vld [vmem:[#allocation63_spill] sm:$0xff] }
 0x5de   :  { %v2776_v11 = vadd.f32 %v2775_v42, %v2774_v15  ;;  %v2492_v1 = vmul.f32 %v6409_v47, %v7234_v45  ;;  %v2777_v2 = vsel %vm250_vm1, %v2584_v39, 0.0  ;;  %v2494_v18 = vmul.f32 %v6409_v47, %v7235_v28  ;;  %v7237_v15 = vld [vmem:[#allocation52_spill] sm:$0xff] }
 0x5df   :  { %v2751_v48 = vadd.f32 %v2750_v7, %v2749_v46  ;;  %v2588_v7 = vmul.f32 %v3858_v51, %v2488_v3  ;;  %v3859_v46 = vld [vmem:[%s6909_s3 + $0x2c0] sm:$0xff]  ;;  %v3862_v3 = vld [vmem:[%s6909_s3 + $0x78] sm:$0xff]  ;;  %v7239_v51 = vld [vmem:[#allocation24_spill] sm:$0xff] }
 0x5e0   :  { %v2665_v59 = vmul.f32 %v3859_v46, %v6115_v33  ;;  %v2778_v9 = vadd.f32 %v2777_v2, %v2776_v11  ;;  %v2667_v33 = vmul.f32 %v3861_v56, %v6119_v8  ;;  %v2592_v43 = vmul.f32 %v3862_v3, %v2492_v1  ;;  %v3865_v11 = vld [vmem:[%s6909_s3 + $0x2f0] sm:$0xff]  ;;  %v3866_v46 = vld [vmem:[%s6909_s3 + $0x98] sm:$0xff] }
 0x5e1   :  { %v2753_v22 = vadd.f32 %v2752_v62, %v2751_v48  ;;  %v2781_v39 = vsel %vm250_vm1, %v2588_v7, 0.0  ;;  %v2594_v63 = vmul.f32 %v3864_v13, %v2494_v18  ;;  %v2500_v7 = vmul.f32 %v6409_v47, %v7239_v51  ;;  %v7240_v18 = vld [vmem:[#allocation26_spill] sm:$0xff]  ;;  %v7243_v13 = vld [vmem:[#allocation13_spill] sm:$0xff] }
 0x5e2   :  { %v2780_v62 = vadd.f32 %v2779_v20, %v2778_v9  ;;  %v2762_v42 = vsel %vm250_vm1, %v2665_v59, 0.0  ;;  %v2764_v2 = vsel %vm250_vm1, %v2667_v33, 0.0  ;;  %v3867_v9 = vld [vmem:[%s6909_s3 + $0x300] sm:$0xff]  ;;  %v2502_v12 = vmul.f32 %v6409_v47, %v7240_v18  ;;  %v3868_v20 = vld [vmem:[%s6909_s3 + $0xa8] sm:$0xff]  ;;  %v3873_v18 = vld [vmem:[%s6909_s3 + $0xf8] sm:$0xff] }
 0x5e3   :  { %v2755_v35 = vadd.f32 %v2754_v34, %v2753_v22  ;;  %v7236_v34 = vld [vmem:[#allocation23_spill] sm:$0xff]  ;;  %v2598_v56 = vmul.f32 %v3868_v20, %v2498_v24  ;;  %v2787_v33 = vsel %vm250_vm1, %v2594_v63, 0.0  ;;  %v2869_v63 = vmul.f32 %v6203_v14, %v7243_v13  ;;  %v3872_v14 = vld [vmem:[%s6909_s3 + $0xe8] sm:$0xff] }
 0x5e4   :  { %v2496_v44 = vmul.f32 %v6409_v47, %v7236_v34  ;;  %v3863_v22 = vld [vmem:[%s6909_s3 + $0x2e0] sm:$0xff]  ;;  %v2782_v58 = vadd.f32 %v2781_v39, %v2780_v62 }
 0x5e5   :  { %v2757_v25 = vadd.f32 %v2756_v57, %v2755_v35  ;;  %v2669_v8 = vmul.f32 %v3863_v22, %v7237_v15  ;;  %v2783_v35 = vsel %vm250_vm1, %v2590_v32, 0.0  ;;  %v2671_v57 = vmul.f32 %v3865_v11, %v6195_v40  ;;  %v7241_v34 = vld [vmem:[#allocation27_spill] sm:$0xff]  ;;  %v7242_v15 = vld [vmem:[#allocation29_spill] sm:$0xff]  ;;  %v7244_v11 = vld [vmem:[#allocation30_spill] sm:$0xff] }
 0x5e6   :  { %v2784_v1 = vadd.f32 %v2783_v35, %v2782_v58  ;;  %v2596_v59 = vmul.f32 %v3866_v46, %v2496_v44  ;;  %v2673_v40 = vmul.f32 %v3867_v9, %v6199_v4  ;;  %v2504_v44 = vmul.f32 %v6409_v47, %v7241_v34  ;;  %v3870_v58 = vld [vmem:[%s6909_s3 + $0xc8] sm:$0xff] }
 0x5e7   :  { %v2759_v48 = vadd.f32 %v2758_v61, %v2757_v25  ;;  %v2785_v25 = vsel %vm250_vm1, %v2592_v43, 0.0  ;;  %v2766_v32 = vsel %vm250_vm1, %v2669_v8, 0.0  ;;  %v2768_v4 = vsel %vm250_vm1, %v2671_v57, 0.0  ;;  %v7245_v46 = vld [vmem:[#allocation32_spill] sm:$0xff] }
 0x5e8   :  { %v2786_v28 = vadd.f32 %v2785_v25, %v2784_v1  ;;  %v2789_v43 = vsel %vm250_vm1, %v2596_v59, 0.0  ;;  %v2506_v8 = vmul.f32 %v6409_v47, %v7242_v15  ;;  %v2602_v10 = vmul.f32 %v3870_v58, %v2502_v12  ;;  %v3876_v58 = vld [vmem:[%s6909_s3 + $0x128] sm:$0xff] }
 0x5e9   :  { %v2761_v0 = vadd.f32 %v2760_v23, %v2759_v48  ;;  %v3869_v23 = vld [vmem:[%s6909_s3 + $0xb8] sm:$0xff]  ;;  %v2791_v24 = vsel %vm250_vm1, %v2598_v56, 0.0  ;;  %v2508_v57 = vmul.f32 %v6409_v47, %v7244_v11  ;;  %v2510_v59 = vmul.f32 %v6409_v47, %v7245_v46  ;;  %v7247_v56 = vld [vmem:[#allocation35_spill] sm:$0xff] }
 0x5ea   :  { %v2788_v62 = vadd.f32 %v2787_v33, %v2786_v28  ;;  %v2600_v3 = vmul.f32 %v3869_v23, %v2500_v7  ;;  %v2606_v25 = vmul.f32 %v3872_v14, %v2506_v8  ;;  %v2795_v9 = vsel %vm250_vm1, %v2602_v10, 0.0  ;;  %v7249_v23 = vld [vmem:[#allocation36_spill] sm:$0xff]  ;;  %v7250_v8 = vld [vmem:[#allocation38_spill] sm:$0xff] }
 0x5eb   :  { %v2763_v45 = vadd.f32 %v2762_v42, %v2761_v0  ;;  %v2770_v0 = vsel %vm250_vm1, %v2673_v40, 0.0  ;;  %v2608_v12 = vmul.f32 %v3873_v18, %v2508_v57  ;;  %v2514_v33 = vmul.f32 %v6409_v47, %v7247_v56  ;;  %v3877_v11 = vld [vmem:[%s6909_s3 + $0x138] sm:$0xff] }
 0x5ec   :  { %v2790_v22 = vadd.f32 %v2789_v43, %v2788_v62  ;;  %v2793_v51 = vsel %vm250_vm1, %v2600_v3, 0.0  ;;  %v2799_v34 = vsel %vm250_vm1, %v2606_v25, 0.0  ;;  %v2516_v3 = vmul.f32 %v6409_v47, %v7249_v23  ;;  %v3875_v43 = vld [vmem:[%s6909_s3 + $0x118] sm:$0xff]  ;;  %v7254_v25 = vld [vmem:[#allocation43_spill] sm:$0xff] }
 0x5ed   :  { %v2765_v61 = vadd.f32 %v2764_v2, %v2763_v45  ;;  %v3871_v45 = vld [vmem:[%s6909_s3 + $0xd8] sm:$0xff]  ;;  %v2614_v10 = vmul.f32 %v3876_v58, %v2514_v33 }
 0x5ee   :  { %v2792_v35 = vadd.f32 %v2791_v24, %v2790_v22  ;;  %v2604_v1 = vmul.f32 %v3871_v45, %v2504_v44  ;;  %v7248_v44 = vld [vmem:[#allocation9_spill] sm:$0xff]  ;;  %v2801_v22 = vsel %vm250_vm1, %v2608_v12, 0.0  ;;  %v2616_v57 = vmul.f32 %v3877_v11, %v2516_v3  ;;  %v7255_v12 = vld [vmem:[#allocation48_spill] sm:$0xff]  ;;  %v7258_v58 = vld [vmem:[#allocation54_spill] sm:$0xff] }
 0x5ef   :  { %v2767_v48 = vadd.f32 %v2766_v32, %v2765_v61  ;;  %v7246_v61 = vld [vmem:[#allocation33_spill] sm:$0xff]  ;;  %v3884_v11 = vld [vmem:[%s6909_s3 + $0x1a8] sm:$0xff] }
 0x5f0   :  { %v2794_v2 = vadd.f32 %v2793_v51, %v2792_v35  ;;  %v2512_v28 = vmul.f32 %v6409_v47, %v7246_v61  ;;  %v2797_v32 = vsel %vm250_vm1, %v2604_v1, 0.0  ;;  %v7253_v51 = vld [vmem:[#allocation41_spill] sm:$0xff] }
 0x5f1   :  { %v2769_v39 = vadd.f32 %v2768_v4, %v2767_v48  ;;  %v3874_v48 = vld [vmem:[%s6909_s3 + $0x108] sm:$0xff] }
 0x5f2   :  { %v2796_v40 = vadd.f32 %v2795_v9, %v2794_v2  ;;  %v2610_v62 = vmul.f32 %v3874_v48, %v2510_v59  ;;  %v3878_v2 = vld [vmem:[%s6909_s3 + $0x148] sm:$0xff]  ;;  %v2807_v59 = vsel %vm250_vm1, %v2614_v10, 0.0  ;;  %v2524_v9 = vmul.f32 %v6409_v47, %v7254_v25 }
 0x5f3   :  { %v2771_v42 = vadd.f32 %v2770_v0, %v2769_v39  ;;  %v2612_v39 = vmul.f32 %v3875_v43, %v2512_v28  ;;  %v2518_v0 = vmul.f32 %v6409_v47, %v7250_v8  ;;  %v2809_v28 = vsel %vm250_vm1, %v2616_v57, 0.0  ;;  %v7257_v43 = vld [vmem:[#allocation51_spill] sm:$0xff] }
 0x5f4   :  { %v2798_v20 = vadd.f32 %v2797_v32, %v2796_v40  ;;  %v2803_v24 = vsel %vm250_vm1, %v2610_v62, 0.0  ;;  %v3879_v40 = vld [vmem:[%s6909_s3 + $0x158] sm:$0xff]  ;;  %v2526_v32 = vmul.f32 %v6409_v47, %v7255_v12  ;;  %v7256_v62 = vld [vmem:[#allocation49_spill] sm:$0xff]  ;;  %v2532_v10 = vmul.f32 %v6409_v47, %v7258_v58 }
 0x5f5   :  { %v2871_v7 = vadd.f32 %v2869_v63, %v2771_v42  ;;  %v7251_v42 = vld [vmem:[#allocation10_spill] sm:$0xff]  ;;  %v7252_v63 = vld [vmem:[#allocation39_spill] sm:$0xff]  ;;  %v2805_v45 = vsel %vm250_vm1, %v2612_v39, 0.0  ;;  %v2618_v46 = vmul.f32 %v3878_v2, %v2518_v0  ;;  %v2530_v39 = vmul.f32 %v6409_v47, %v7257_v43 }
 0x5f6   :  { %v2800_v4 = vadd.f32 %v2799_v34, %v2798_v20  ;;  %v2520_v35 = vmul.f32 %v6409_v47, %v7252_v63  ;;  %v3880_v20 = vld [vmem:[%s6909_s3 + $0x168] sm:$0xff]  ;;  %v2528_v34 = vmul.f32 %v6409_v47, %v7256_v62 }
 0x5f7   :  { %2875 = vrot.lane.b32.xlu1 %v2871_v7, %s3974_s20  ;;  %v2522_v7 = vmul.f32 %v6409_v47, %v7253_v51  ;;  %v2811_v33 = vsel %vm250_vm1, %v2618_v46, 0.0  ;;  %v2630_v57 = vmul.f32 %v3884_v11, %v2530_v39  ;;  %v2536_v51 = vmul.f32 %v6409_v47, %v6137_v16  ;;  %v3890_v62 = vld [vmem:[%s6909_s3 + $0x208] sm:$0xff] }
 0x5f8   :  { %v2802_v15 = vadd.f32 %v2801_v22, %v2800_v4  ;;  %v2620_v61 = vmul.f32 %v3879_v40, %v2520_v35  ;;  %v3882_v22 = vld [vmem:[%s6909_s3 + $0x188] sm:$0xff]  ;;  %v2534_v35 = vmul.f32 %v6409_v47, %v6132_v38  ;;  %v2538_v38 = vmul.f32 %v6409_v47, %v6150_v54 }
 0x5f9   :  { %v2622_v56 = vmul.f32 %v3880_v20, %v2522_v7  ;;  %v3885_v7 = vld [vmem:[%s6909_s3 + $0x1b8] sm:$0xff]  ;;  %v2540_v16 = vmul.f32 %v6409_v47, %v6165_v19  ;;  %v3888_v54 = vld [vmem:[%s6909_s3 + $0x1e8] sm:$0xff] }
 0x5fa   :  { %v2804_v13 = vadd.f32 %v2803_v24, %v2802_v15  ;;  %v2813_v23 = vsel %vm250_vm1, %v2620_v61, 0.0  ;;  %v2626_v15 = vmul.f32 %v3882_v22, %v2526_v32  ;;  %v3883_v24 = vld [vmem:[%s6909_s3 + $0x198] sm:$0xff]  ;;  %v2632_v2 = vmul.f32 %v3885_v7, %v2532_v10  ;;  %v3892_v22 = vld [vmem:[%s6909_s3 + $0x228] sm:$0xff] }
 0x5fb   :  { %2901 = vrot.lane.b32.xlu1 %v7248_v44, %s3974_s20  ;;  %v3881_v44 = vld [vmem:[%s6909_s3 + $0x178] sm:$0xff]  ;;  %v2815_v8 = vsel %vm250_vm1, %v2622_v56, 0.0  ;;  %v2638_v32 = vmul.f32 %v3888_v54, %v2538_v38  ;;  %v3902_v54 = vld [vmem:[%s6909_s3 + $0x2c8] sm:$0xff] }
 0x5fc   :  { %v2806_v1 = vadd.f32 %v2805_v45, %v2804_v13  ;;  %v2624_v4 = vmul.f32 %v3881_v44, %v2524_v9  ;;  %v2819_v45 = vsel %vm250_vm1, %v2626_v15, 0.0  ;;  %v2823_v9 = vsel %vm250_vm1, %v2630_v57, 0.0  ;;  %v3887_v61 = vld [vmem:[%s6909_s3 + $0x1d8] sm:$0xff]  ;;  %v3896_v57 = vld [vmem:[%s6909_s3 + $0x268] sm:$0xff] }
 0x5fd   :  { %v3889_v19 = vld [vmem:[%s6909_s3 + $0x1f8] sm:$0xff]  ;;  %v2831_v44 = vsel %vm250_vm1, %v2638_v32, 0.0  ;;  %v2646_v15 = vmul.f32 %v3892_v22, %v6429_v26  ;;  %v2666_v32 = vmul.f32 %v3902_v54, %v6469_v52 }
 0x5fe   :  { %v2808_v14 = vadd.f32 %v2807_v59, %v2806_v1  ;;  %v2817_v13 = vsel %vm250_vm1, %v2624_v4, 0.0  ;;  %v2640_v47 = vmul.f32 %v3889_v19, %v2540_v16 }
 0x5ff   :  { %2903 = vrot.lane.b32.xlu1 %v7251_v42, %s3974_s20  ;;  %v2628_v42 = vmul.f32 %v3883_v24, %v2528_v34  ;;  %v2642_v34 = vmul.f32 %v3890_v62, %v6421_v53  ;;  %v3894_v24 = vld [vmem:[%s6909_s3 + $0x248] sm:$0xff]  ;;  %v2839_v26 = vsel %vm250_vm1, %v2646_v15, 0.0  ;;  %v2859_v52 = vsel %vm250_vm1, %v2666_v32, 0.0 }
 0x600   :  { %v2810_v18 = vadd.f32 %v2809_v28, %v2808_v14  ;;  %v3886_v14 = vld [vmem:[%s6909_s3 + $0x1c8] sm:$0xff]  ;;  %v2636_v28 = vmul.f32 %v3887_v61, %v2536_v51  ;;  %v2833_v43 = vsel %vm250_vm1, %v2640_v47, 0.0  ;;  %v3897_v51 = vld [vmem:[%s6909_s3 + $0x278] sm:$0xff] }
 0x601   :  { %v2821_v46 = vsel %vm250_vm1, %v2628_v42, 0.0  ;;  %v2634_v25 = vmul.f32 %v3886_v14, %v2534_v35  ;;  %v2835_v53 = vsel %vm250_vm1, %v2642_v34, 0.0  ;;  %v2650_v42 = vmul.f32 %v3894_v24, %v6437_v6  ;;  %v3899_v14 = vld [vmem:[%s6909_s3 + $0x298] sm:$0xff] }
 0x602   :  { %v2812_v48 = vadd.f32 %v2811_v33, %v2810_v18  ;;  %v2825_v18 = vsel %vm250_vm1, %v2632_v2, 0.0  ;;  %v2829_v33 = vsel %vm250_vm1, %v2636_v28, 0.0  ;;  %v2656_v7 = vmul.f32 %v3897_v51, %v6449_v60  ;;  %v3901_v28 = vld [vmem:[%s6909_s3 + $0x2b8] sm:$0xff] }
 0x603   :  { %v2827_v20 = vsel %vm250_vm1, %v2634_v25, 0.0  ;;  %v2843_v6 = vsel %vm250_vm1, %v2650_v42, 0.0  ;;  %v2660_v25 = vmul.f32 %v3899_v14, %v6457_v27  ;;  %v3905_v34 = vld [vmem:[%s6909_s3 + $0x2f8] sm:$0xff] }
 0x604   :  { %v2814_v3 = vadd.f32 %v2813_v23, %v2812_v48  ;;  %v3891_v23 = vld [vmem:[%s6909_s3 + $0x218] sm:$0xff]  ;;  %v2849_v60 = vsel %vm250_vm1, %v2656_v7, 0.0 }
 0x605   :  { %v2853_v27 = vsel %vm250_vm1, %v2660_v25, 0.0 }
 0x606   :  { %v2816_v0 = vadd.f32 %v2815_v8, %v2814_v3  ;;  %v2644_v3 = vmul.f32 %v3891_v23, %v6425_v55  ;;  %v3906_v23 = vld [vmem:[%s6909_s3 + $0x308] sm:$0xff] }
 0x608   :  { %v2818_v63 = vadd.f32 %v2817_v13, %v2816_v0  ;;  %v3893_v0 = vld [vmem:[%s6909_s3 + $0x238] sm:$0xff]  ;;  %v2837_v55 = vsel %vm250_vm1, %v2644_v3, 0.0  ;;  %v2674_v3 = vmul.f32 %v3906_v23, %v6581_v36 }
 0x609   :  { %v2648_v58 = vmul.f32 %v3893_v0, %v6433_v5 }
 0x60a   :  { %v2820_v1 = vadd.f32 %v2819_v45, %v2818_v63  ;;  %v3895_v63 = vld [vmem:[%s6909_s3 + $0x258] sm:$0xff]  ;;  %v2654_v45 = vmul.f32 %v3896_v57, %v6445_v17  ;;  %v2867_v15 = vsel %vm250_vm1, %v2674_v3, 0.0 }
 0x60b   :  { %v2652_v35 = vmul.f32 %v3895_v63, %v6441_v30  ;;  %v2841_v5 = vsel %vm250_vm1, %v2648_v58, 0.0 }
 0x60c   :  { %v2822_v59 = vadd.f32 %v2821_v46, %v2820_v1  ;;  %v3898_v46 = vld [vmem:[%s6909_s3 + $0x288] sm:$0xff]  ;;  %v2847_v17 = vsel %vm250_vm1, %v2654_v45, 0.0 }
 0x60d   :  { %v2845_v30 = vsel %vm250_vm1, %v2652_v35, 0.0 }
 0x60e   :  { %v2824_v40 = vadd.f32 %v2823_v9, %v2822_v59  ;;  %v2658_v59 = vmul.f32 %v3898_v46, %v6453_v37 }
 0x610   :  { %v2826_v12 = vadd.f32 %v2825_v18, %v2824_v40  ;;  %v3900_v40 = vld [vmem:[%s6909_s3 + $0x2a8] sm:$0xff]  ;;  %v2851_v37 = vsel %vm250_vm1, %v2658_v59, 0.0  ;;  %v2664_v18 = vmul.f32 %v3901_v28, %v6465_v29 }
 0x611   :  { %v2662_v16 = vmul.f32 %v3900_v40, %v6461_v49 }
 0x612   :  { %v2828_v56 = vadd.f32 %v2827_v20, %v2826_v12  ;;  %v2857_v29 = vsel %vm250_vm1, %v2664_v18, 0.0 }
 0x613   :  { %v2855_v49 = vsel %vm250_vm1, %v2662_v16, 0.0 }
 0x614   :  { %v2830_v48 = vadd.f32 %v2829_v33, %v2828_v56  ;;  %v3903_v56 = vld [vmem:[%s6909_s3 + $0x2d8] sm:$0xff]  ;;  %v3904_v33 = vld [vmem:[%s6909_s3 + $0x2e8] sm:$0xff]  ;;  %s3975_s3 = smov [#allocation4]  }
 0x615   :  { %v2668_v19 = vmul.f32 %v3903_v56, %v6473_v21  ;;  %s2926_s29 = sshll.u32 %s3975_s3, 4  ;;  %s2927_s29 = int_to_ptr.vmem [resolvable:$true] %s2926_s29 }
 0x616   :  { %v2832_v4 = vadd.f32 %v2831_v44, %v2830_v48  ;;  %v2670_v48 = vmul.f32 %v3904_v33, %v6477_v31  ;;  %v2672_v44 = vmul.f32 %v3905_v34, %v6577_v50  ;;  %s3907_s12 = scalar_lea.vmem %s2927_s29, 256  ;;  %p3912_p1 = scmp.lt.s32.totalorder %s2927_s29, %s2927_s29 }
 0x617   :  { %v2861_v21 = vsel %vm250_vm1, %v2668_v19, 0.0  ;;  %p3908_p0 = scmp.ne.s32.totalorder %s2927_s29, %s3907_s12  ;;  %p3913_p2 = scmp.lt.s32.totalorder %s3907_s12, %s3907_s12 }
 0x618   :  { %v2834_v39 = vadd.f32 %v2833_v43, %v2832_v4  ;;  %v2863_v31 = vsel %vm250_vm1, %v2670_v48, 0.0 }
 0x619   :  { %p3914_p3 = por %p3913_p2, %p3912_p1 }
 0x61a   :  { %v2836_v8 = vadd.f32 %v2835_v53, %v2834_v39  ;;  %v2865_v39 = vsel %vm250_vm1, %v2672_v44, 0.0 }
 0x61b   :  { %p3915_p4 = pnand %p3914_p3, %p3908_p0 }
 0x61c   :  { %v2838_v10 = vadd.f32 %v2837_v55, %v2836_v8  ;;  %v7259_v8 = vld [vmem:[#allocation14_spill] sm:$0xff]  ;;  %v7260_v55 = vld [vmem:[#allocation11_spill] sm:$0xff] }
 0x61d   :  { %v2870_v50 = vmul.f32 %v6591_v41, %v7259_v8 }
 0x61e   :  { %v2840_v13 = vadd.f32 %v2839_v26, %v2838_v10 }
 0x620   :  { %v2842_v11 = vadd.f32 %v2841_v5, %v2840_v13 }
 0x622   :  { %v2844_v1 = vadd.f32 %v2843_v6, %v2842_v11 }
 0x624   :  { %v2846_v2 = vadd.f32 %v2845_v30, %v2844_v1 }
 0x626   :  { %v2848_v38 = vadd.f32 %v2847_v17, %v2846_v2 }
 0x628   :  { %v2850_v9 = vadd.f32 %v2849_v60, %v2848_v38 }
 0x62a   :  { %v2852_v61 = vadd.f32 %v2851_v37, %v2850_v9 }
 0x62c   :  { %v2854_v12 = vadd.f32 %v2853_v27, %v2852_v61 }
 0x62e   :  { %v2856_v20 = vadd.f32 %v2855_v49, %v2854_v12 }
 0x630   :  { %v2858_v47 = vadd.f32 %v2857_v29, %v2856_v20 }
 0x632   :  { %v2860_v62 = vadd.f32 %v2859_v52, %v2858_v47 }
 0x634   :  { %v2862_v4 = vadd.f32 %v2861_v21, %v2860_v62 }
 0x636   :  { %v2864_v43 = vadd.f32 %v2863_v31, %v2862_v4 }
 0x638   :  { %v2866_v22 = vadd.f32 %v2865_v39, %v2864_v43 }
 0x63a   :  { %v2868_v53 = vadd.f32 %v2867_v15, %v2866_v22 }
 0x63c   :  { %v2872_v0 = vadd.f32 %v2870_v50, %v2868_v53 }
 0x63e   :  { %2877 = vrot.lane.b32.xlu0 %v2872_v0, %s3974_s20 }
 0x669   :  { %v2876_v58 = vpop.permute.xlu1 %2875 }
 0x66a   :  { %v2881_v10 = vadd.f32 %v2876_v58, %v7260_v55 }
 0x66c   :  { %v2883_v24 = vmul.f32 0.70710677, %v2881_v10 }
 0x66d   :  { %v2902_v36 = vpop.permute.xlu1 %2901 }
 0x66e   :  { %2907 = vst.msk [vmem:[#allocation4] sm:$0xff] %vm250_vm1, %v2902_v36  ;;  %2887 = vrot.lane.b32.xlu0 %v2883_v24, %s3972_s17 }
 0x671   :  { %v2904_v42 = vpop.permute.xlu1 %2903 }
 0x672   :  { %2908 = vst.msk [vmem:[#allocation4 + $0x8] sm:$0xff] %vm250_vm1, %v2904_v42 }
 0x673   :  { %3918 = shalt.err (!%p3915_p4)
}
 0x674   :  { %s3977_s20 = smov 128   ;;  %s3978_s7 = smov 8  }
 0x675   :  { %2932 = dma.vmem_to_hbm [thread:$0]  %s2927_s29, 256, %s6915_s9, [#allocation5], %s3977_s20, %s3977_s20, %s3978_s7  }
 0x676   :  { %s3927_s15 = scalar_lea.vmem %s2915_s11, 256  ;;  %p3932_p6 = scmp.lt.s32.totalorder %s2915_s11, %s2915_s11 }
 0x677   :  { %p3928_p5 = scmp.ne.s32.totalorder %s2915_s11, %s3927_s15  ;;  %p3933_p7 = scmp.lt.s32.totalorder %s3927_s15, %s3927_s15 }
 0x679   :  { %p3934_p8 = por %p3933_p7, %p3932_p6 }
 0x67b   :  { %p3935_p9 = pnand %p3934_p8, %p3928_p5 }
 0x67d   :  { %3938 = shalt.err (!%p3935_p9)
}
 0x67e   :  { %2920 = dma.vmem_to_hbm [thread:$0]  %s2915_s11, 256, %s6914_s8, [#allocation3], %s3977_s20, %s3977_s20, %s3978_s7   ;;  %v7261_v26 = vld [vmem:[#allocation12_spill] sm:$0xff] }
 0x67f   :  { %s3979_s9 = smov [#allocation6]  }
 0x680   :  { %s2938_s19 = sshll.u32 %s3979_s9, 4  ;;  %s2939_s19 = int_to_ptr.vmem [resolvable:$true] %s2938_s19 }
 0x681   :  { %s3947_s21 = scalar_lea.vmem %s2939_s19, 256  ;;  %p3952_p11 = scmp.lt.s32.totalorder %s2939_s19, %s2939_s19 }
 0x682   :  { %p3948_p10 = scmp.ne.s32.totalorder %s2939_s19, %s3947_s21  ;;  %p3953_p12 = scmp.lt.s32.totalorder %s3947_s21, %s3947_s21 }
 0x684   :  { %p3954_p13 = por %p3953_p12, %p3952_p11 }
 0x686   :  { %p3955_p0 = pnand %p3954_p13, %p3948_p10 }
 0x6b0   :  { %v2878_v41 = vpop.permute.xlu0 %2877 }
 0x6b1   :  { %v2882_v13 = vadd.f32 %v2878_v41, %v7261_v26 }
 0x6b3   :  { %v2884_v63 = vmul.f32 0.70710677, %v2882_v13 }
 0x6b5   :  { %2889 = vrot.lane.b32.xlu1 %v2884_v63, %s3972_s17 }
 0x6e0   :  { %v2888_v35 = vpop.permute.xlu0 %2887 }
 0x6e1   :  { %2893 = vst.msk [vmem:[#allocation6] sm:$0xff] %vm250_vm1, %v2888_v35 }
 0x727   :  { %v2890_v5 = vpop.permute.xlu1 %2889 }
 0x728   :  { %2894 = vst.msk [vmem:[#allocation6 + $0x8] sm:$0xff] %vm250_vm1, %v2890_v5 }
 0x729   :  { %3958 = shalt.err (!%p3955_p0)
}
 0x72a   :  { %2944 = dma.vmem_to_hbm [thread:$0]  %s2939_s19, 256, %s6916_s10, [#allocation5], %s3977_s20, %s3977_s20, %s3978_s7  }
 0x72b   :  { %3967 = dma.done.wait [#allocation3], 256  }
 0x72c   :  { %3968 = vsyncadd [#allocation3], 4294967040 }
 0x72d   :  { %3969 = dma.done.wait [#allocation5], 512  }
 0x72e   :  { %3970 = vsyncadd [#allocation5], 4294966784 }
 0x72f   :  { %2954 = vsyncpa [#allocation3], 1 }
 0x730   :  { %2955 = vsyncpa [#allocation5], 1 }

// kernel: tpu_custom_call.1
= control target key start
LH: loop header
LB: loop body
LE: loop exit
PB: predicated region body
PF: predicated region fallthrough
CT: control target
= control target key end

     0   :  { %16 = vsyncpa [#allocation3], 0  ;;  %v3971_v4 = vmov 0.0   ;;  %s3972_s17 = smov 32   ;;  %s6906_s0 = inlined_call_operand.vmem [shape: f32[16,96], index: 0, kind: input, shape index: {}]   ;;  %s6907_s1 = inlined_call_operand.vmem [shape: f32[16,32], index: 1, kind: input, shape index: {}]   ;;  %s6908_s2 = inlined_call_operand.vmem [shape: f32[16,32], index: 2, kind: input, shape index: {}]   ;;  %s6909_s3 = inlined_call_operand.vmem [shape: f32[49,16,32], index: 3, kind: input, shape index: {}]   ;;  %s6910_s4 = inlined_call_operand.vmem [shape: f32[96,160], index: 4, kind: input, shape index: {}]   ;;  %s6911_s5 = inlined_call_operand.vmem [shape: f32[1,160], index: 5, kind: input, shape index: {}]   ;;  %s6912_s6 = inlined_call_operand.vmem [shape: f32[3,32,32], index: 6, kind: input, shape index: {}]   ;;  %s6913_s7 = inlined_call_operand.vmem [shape: f32[4,32], index: 7, kind: input, shape index: {}]   ;;  %s6914_s8 = inlined_call_operand.hbm [shape: f32[16,32], index: 8, kind: output, shape index: {0}]   ;;  %s6915_s9 = inlined_call_operand.hbm [shape: f32[16,32], index: 9, kind: output, shape index: {1}]   ;;  %s6916_s10 = inlined_call_operand.hbm [shape: f32[16,32], index: 10, kind: output, shape index: {2}]  }
   0x1   :  { %v61_v0 = vld [vmem:[%s6910_s4 + $0xb8] sm:$0xff]  ;;  %v60_v1 = vld [vmem:[%s6910_s4 + $0xb0] sm:$0xff]  ;;  %v59_v2 = vld [vmem:[%s6910_s4 + $0xa8] sm:$0xff]  ;;  %145 = vmatprep.mubr.f32.mxu0 %v3971_v4 }
   0x2   :  { %89 = vmatprep.subr.mxu0 %v61_v0  ;;  %v58_v3 = vld [vmem:[%s6910_s4 + $0xa0] sm:$0xff]  ;;  %v57_v5 = vld [vmem:[%s6910_s4 + $0x98] sm:$0xff]  ;;  %v56_v6 = vld [vmem:[%s6910_s4 + $0x90] sm:$0xff] }
   0x3   :  { %90 = vmatpush1.msra.mxu0 %v60_v1  ;;  %v55_v7 = vld [vmem:[%s6910_s4 + $0x88] sm:$0xff]  ;;  %v54_v8 = vld [vmem:[%s6910_s4 + $0x80] sm:$0xff]  ;;  %v53_v9 = vld [vmem:[%s6910_s4 + $0x78] sm:$0xff] }
   0x4   :  { %91 = vmatprep.subr.mxu0 %v59_v2  ;;  %v52_v10 = vld [vmem:[%s6910_s4 + $0x70] sm:$0xff]  ;;  %v51_v11 = vld [vmem:[%s6910_s4 + $0x68] sm:$0xff]  ;;  %v36_v12 = vld [vmem:[%s6908_s2] sm:$0xff] }
   0x5   :  { %92 = vmatpush1.msra.mxu0 %v58_v3  ;;  %v50_v13 = vld [vmem:[%s6910_s4 + $0x60] sm:$0xff]  ;;  %186 = vrot.lane.b32.xlu1 %v36_v12, %s3972_s17 }
   0x6   :  { %93 = vmatprep.subr.mxu0 %v57_v5 }
   0x7   :  { %94 = vmatpush1.msra.mxu0 %v56_v6 }
   0x8   :  { %95 = vmatprep.subr.mxu0 %v55_v7 }
   0x9   :  { %96 = vmatpush1.msra.mxu0 %v54_v8 }
   0xa   :  { %97 = vmatprep.subr.mxu0 %v53_v9 }
   0xb   :  { %17 = vsyncpa [#allocation5], 0  ;;  %98 = vmatpush1.msra.mxu0 %v52_v10  ;;  %v49_v14 = vld [vmem:[%s6910_s4 + $0x58] sm:$0xff]  ;;  %v37_v15 = vld [vmem:[%s6908_s2 + $0x8] sm:$0xff]  ;;  %vm74_vm0 = vcmask 785408   ;;  %v64_v29 = vlaneseq  ;;  %vm250_vm1 = vcmask 261120  }
   0xc   :  { %99 = vmatprep.subr.mxu0 %v51_v11  ;;  %v48_v16 = vld [vmem:[%s6910_s4 + $0x50] sm:$0xff]  ;;  %v47_v17 = vld [vmem:[%s6910_s4 + $0x48] sm:$0xff]  ;;  %v46_v18 = vld [vmem:[%s6910_s4 + $0x40] sm:$0xff]  ;;  %188 = vrot.lane.b32.xlu1 %v37_v15, %s3972_s17  ;;  %s3974_s20 = smov 96   ;;  %s3976_s30 = smov [#allocation2]  }
   0xd   :  { %100 = vmatpush1.msra.mxu0 %v50_v13  ;;  %v45_v19 = vld [vmem:[%s6910_s4 + $0x38] sm:$0xff]  ;;  %v44_v20 = vld [vmem:[%s6910_s4 + $0x30] sm:$0xff]  ;;  %v43_v21 = vld [vmem:[%s6910_s4 + $0x28] sm:$0xff]  ;;  %v4121_v30 = vshrl.u32 %v64_v29, 7  ;;  %s2914_s11 = sshll.u32 %s3976_s30, 4  ;;  %s2915_s11 = int_to_ptr.vmem [resolvable:$true] %s2914_s11 }
   0xe   :  { %101 = vmatprep.subr.mxu0 %v49_v14  ;;  %v42_v22 = vld [vmem:[%s6910_s4 + $0x20] sm:$0xff]  ;;  %v41_v23 = vld [vmem:[%s6910_s4 + $0x18] sm:$0xff]  ;;  %v40_v24 = vld [vmem:[%s6910_s4 + $0x10] sm:$0xff] }
   0xf   :  { %102 = vmatpush1.msra.mxu0 %v48_v16  ;;  %v39_v25 = vld [vmem:[%s6910_s4 + $0x8] sm:$0xff]  ;;  %v38_v26 = vld [vmem:[%s6910_s4] sm:$0xff]  ;;  %v66_v31 = vsub.s32 0, %v4121_v30  ;;  %v4155_v61 = vld [vmem:[%s6912_s6 + $0x18] sm:$0xff] }
  0x10   :  { %103 = vmatprep.subr.mxu0 %v47_v17  ;;  %v34_v27 = vld [vmem:[%s6906_s0] sm:$0xff]  ;;  %v35_v28 = vld [vmem:[%s6906_s0 + $0x8] sm:$0xff]  ;;  %s3973_s0 = smov 64   ;;  %v4160_v62 = vld [vmem:[%s6912_s6 + $0x10] sm:$0xff] }
  0x11   :  { %104 = vmatpush1.msra.mxu0 %v46_v18  ;;  %v4127_v32 = vld [vmem:[%s6911_s5] sm:$0x3]  ;;  %v4174_v1 = vld [vmem:[%s6912_s6 + $0x8] sm:$0xff]  ;;  %v422_v5 = vld [vmem:[%s6909_s3 + $0x10] sm:$0xff] }
  0x12   :  { %105 = vmatprep.subr.mxu0 %v45_v19  ;;  %v67_v33 = vrot.slane %v4127_v32, %v66_v31  ;;  %v420_v0 = vld [vmem:[%s6909_s3] sm:$0xff]  ;;  %v423_v6 = vld [vmem:[%s6909_s3 + $0x18] sm:$0xff]  ;;  %v425_v8 = vld [vmem:[%s6909_s3 + $0x28] sm:$0xff] }
  0x13   :  { %106 = vmatpush1.msra.mxu0 %v44_v20  ;;  %v4182_v2 = vld [vmem:[%s6912_s6] sm:$0xff]  ;;  %v2965_v9 = vld [vmem:[%s6912_s6 + $0x38] sm:$0xff]  ;;  %v426_v10 = vld [vmem:[%s6909_s3 + $0x30] sm:$0xff] }
  0x14   :  { %107 = vmatprep.subr.mxu0 %v43_v21  ;;  %v424_v7 = vld [vmem:[%s6909_s3 + $0x20] sm:$0xff]  ;;  %3186 = vmatprep.subr.mxu1 %v2965_v9  ;;  %v2964_v11 = vld [vmem:[%s6912_s6 + $0x30] sm:$0xff]  ;;  %v2963_v12 = vld [vmem:[%s6912_s6 + $0x28] sm:$0xff] }
  0x15   :  { %108 = vmatpush1.msra.mxu0 %v42_v22  ;;  %3187 = vmatpush3.msra.mxu1 %v2965_v9  ;;  %v427_v13 = vld [vmem:[%s6909_s3 + $0x38] sm:$0xff]  ;;  %v428_v14 = vld [vmem:[%s6909_s3 + $0x40] sm:$0xff]  ;;  %v429_v15 = vld [vmem:[%s6909_s3 + $0x48] sm:$0xff] }
  0x16   :  { %109 = vmatprep.subr.mxu0 %v41_v23  ;;  %3188 = vmatprep.subr.mxu1 %v2964_v11  ;;  %v430_v16 = vld [vmem:[%s6909_s3 + $0x50] sm:$0xff]  ;;  %v431_v17 = vld [vmem:[%s6909_s3 + $0x58] sm:$0xff]  ;;  %v432_v18 = vld [vmem:[%s6909_s3 + $0x60] sm:$0xff] }
  0x17   :  { %110 = vmatpush1.msra.mxu0 %v40_v24  ;;  %3189 = vmatpush3.msra.mxu1 %v2964_v11  ;;  %v433_v19 = vld [vmem:[%s6909_s3 + $0x68] sm:$0xff]  ;;  %v434_v20 = vld [vmem:[%s6909_s3 + $0x70] sm:$0xff]  ;;  %v435_v21 = vld [vmem:[%s6909_s3 + $0x78] sm:$0xff] }
  0x18   :  { %111 = vmatprep.subr.mxu0 %v39_v25  ;;  %3190 = vmatprep.subr.mxu1 %v2963_v12  ;;  %v436_v22 = vld [vmem:[%s6909_s3 + $0x80] sm:$0xff]  ;;  %v437_v23 = vld [vmem:[%s6909_s3 + $0x88] sm:$0xff]  ;;  %v438_v24 = vld [vmem:[%s6909_s3 + $0x90] sm:$0xff] }
  0x19   :  { %112 = vmatpush1.msra.mxu0 %v38_v26  ;;  %3191 = vmatpush3.msra.mxu1 %v2963_v12  ;;  %v439_v25 = vld [vmem:[%s6909_s3 + $0x98] sm:$0xff]  ;;  %v440_v26 = vld [vmem:[%s6909_s3 + $0xa0] sm:$0xff] }
  0x1a   :  { %2956 = vmatmul.mubr.msk.f32.vlgmr.msra.gmra.mxu0 %vm74_vm0, %v34_v27  ;;  %3208 = vmatprep.subr.mxu0 %v4155_v61  ;;  %v441_v27 = vld [vmem:[%s6909_s3 + $0xa8] sm:$0xff]  ;;  %v443_v29 = vld [vmem:[%s6909_s3 + $0xb8] sm:$0xff] }
  0x1b   :  { %151 = vmatprep.mubr.f32.mxu0 %v3971_v4  ;;  %3209 = vmatpush3.msra.mxu0 %v4155_v61  ;;  %v421_v4 = vld [vmem:[%s6909_s3 + $0x8] sm:$0xff] }
  0x1c   :  { %3210 = vmatprep.subr.mxu0 %v4160_v62 }
  0x1d   :  { %3211 = vmatpush3.msra.mxu0 %v4160_v62 }
  0x1e   :  { %2957 = vmatmul.mubr.msk.f32.gmra.mxu0 %vm74_vm0, %v35_v28  ;;  %3212 = vmatprep.subr.mxu0 %v4174_v1  ;;  %v442_v28 = vld [vmem:[%s6909_s3 + $0xb0] sm:$0xff] }
  0x1f   :  { %3216 = vmatprep.mubr.msk.f32.mxu0 %vm250_vm1, %v420_v0  ;;  %3213 = vmatpush3.msra.mxu0 %v4174_v1  ;;  %v465_v0 = vld [vmem:[%s6909_s3 + $0x168] sm:$0xff] }
  0x20   :  { %3214 = vmatprep.subr.mxu0 %v4182_v2 }
  0x21   :  { %3215 = vmatpush3.msra.mxu0 %v4182_v2 }
  0x22   :  { %3217 = vmatmul.mubr.msk.f32.vlgmr.msra.gmra.mxu0 %vm250_vm1, %v421_v4 }
  0x23   :  { %3219 = vmatprep.mubr.msk.f32.mxu0 %vm250_vm1, %v422_v5 }
  0x26   :  { %3220 = vmatmul.mubr.msk.f32.gmra.mxu0 %vm250_vm1, %v423_v6 }
  0x27   :  { %3222 = vmatprep.mubr.msk.f32.mxu0 %vm250_vm1, %v424_v7 }
  0x2a   :  { %3223 = vmatmul.mubr.msk.f32.gmra.mxu0 %vm250_vm1, %v425_v8 }
  0x2b   :  { %3225 = vmatprep.mubr.msk.f32.mxu0 %vm250_vm1, %v426_v10 }
  0x2e   :  { %3226 = vmatmul.mubr.msk.f32.gmra.mxu0 %vm250_vm1, %v427_v13 }
  0x2f   :  { %3228 = vmatprep.mubr.msk.f32.mxu0 %vm250_vm1, %v428_v14 }
  0x32   :  { %3229 = vmatmul.mubr.msk.f32.gmra.mxu0 %vm250_vm1, %v429_v15 }
  0x33   :  { %3231 = vmatprep.mubr.msk.f32.mxu0 %vm250_vm1, %v430_v16 }
  0x36   :  { %3232 = vmatmul.mubr.msk.f32.gmra.mxu0 %vm250_vm1, %v431_v17 }
  0x37   :  { %3234 = vmatprep.mubr.msk.f32.mxu0 %vm250_vm1, %v432_v18  ;;  %v2970_v18 = vld [vmem:[%s6912_s6 + $0x50] sm:$0xff] }
  0x3a   :  { %3235 = vmatmul.mubr.msk.f32.gmra.mxu0 %vm250_vm1, %v433_v19  ;;  %v2969_v19 = vld [vmem:[%s6912_s6 + $0x48] sm:$0xff] }
  0x3b   :  { %3237 = vmatprep.mubr.msk.f32.mxu0 %vm250_vm1, %v434_v20 }
  0x3e   :  { %3238 = vmatmul.mubr.msk.f32.gmra.mxu0 %vm250_vm1, %v435_v21 }
  0x3f   :  { %3240 = vmatprep.mubr.msk.f32.mxu0 %vm250_vm1, %v436_v22  ;;  %v2968_v22 = vld [vmem:[%s6912_s6 + $0x40] sm:$0xff] }
  0x42   :  { %3241 = vmatmul.mubr.msk.f32.gmra.mxu0 %vm250_vm1, %v437_v23 }
  0x43   :  { %3243 = vmatprep.mubr.msk.f32.mxu0 %vm250_vm1, %v438_v24  ;;  %v466_v24 = vld [vmem:[%s6909_s3 + $0x170] sm:$0xff] }
  0x46   :  { %3244 = vmatmul.mubr.msk.f32.gmra.mxu0 %vm250_vm1, %v439_v25  ;;  %v467_v25 = vld [vmem:[%s6909_s3 + $0x178] sm:$0xff] }
  0x47   :  { %3246 = vmatprep.mubr.msk.f32.mxu0 %vm250_vm1, %v440_v26  ;;  %v472_v26 = vld [vmem:[%s6909_s3 + $0x1a0] sm:$0xff] }
  0x4a   :  { %3247 = vmatmul.mubr.msk.f32.gmra.mxu0 %vm250_vm1, %v441_v27  ;;  %v473_v27 = vld [vmem:[%s6909_s3 + $0x1a8] sm:$0xff] }
  0x4b   :  { %3249 = vmatprep.mubr.msk.f32.mxu0 %vm250_vm1, %v442_v28  ;;  %v474_v28 = vld [vmem:[%s6909_s3 + $0x1b0] sm:$0xff] }
  0x4e   :  { %3250 = vmatmul.mubr.msk.f32.gmra.mxu0 %vm250_vm1, %v443_v29  ;;  %v475_v29 = vld [vmem:[%s6909_s3 + $0x1b8] sm:$0xff] }
  0x77   :  { %v187_v53 = vpop.permute.xlu1 %186 }
  0x7e   :  { %v189_v56 = vpop.permute.xlu1 %188 }
  0xda   :  { %v147_v34 = vpop.f32.mrf.mxu0 }
  0xdb   :  { %v148_v35 = vadd.f32 %v147_v34, %v67_v33  ;;  %v445_v34 = vld [vmem:[%s6909_s3 + $0xc8] sm:$0xff] }
  0xdc   :  { %v4132_v36 = vpop.f32.mrf.mxu0 }
  0xdd   :  { %3380 = vtanh.f32 %v148_v35  ;;  %v2958_v41 = vmul.f32 -1.442695, %v148_v35  ;;  %v446_v35 = vld [vmem:[%s6909_s3 + $0xd0] sm:$0xff] }
  0xde   :  { %v153_v37 = vpop.f32.mrf.mxu0 }
  0xdf   :  { %v154_v38 = vadd.f32 %v153_v37, %v67_v33  ;;  %v444_v33 = vld [vmem:[%s6909_s3 + $0xc0] sm:$0xff]  ;;  %v447_v37 = vld [vmem:[%s6909_s3 + $0xd8] sm:$0xff] }
  0xe0   :  { %3252 = vmatprep.mubr.msk.f32.mxu0 %vm250_vm1, %v444_v33  ;;  %v476_v33 = vld [vmem:[%s6909_s3 + $0x1c0] sm:$0xff] }
  0xe1   :  { %3382 = vtanh.f32 %v154_v38  ;;  %v2959_v42 = vmul.f32 -1.442695, %v154_v38  ;;  %3253 = vmatmul.mubr.msk.f32.gmra.mxu0 %vm250_vm1, %v445_v34  ;;  %v448_v38 = vld [vmem:[%s6909_s3 + $0xe0] sm:$0xff]  ;;  %v477_v34 = vld [vmem:[%s6909_s3 + $0x1c8] sm:$0xff] }
  0xe2   :  { %3384 = vpow2.f32 %v2958_v41  ;;  %3255 = vmatprep.mubr.msk.f32.mxu0 %vm250_vm1, %v446_v35  ;;  %v451_v41 = vld [vmem:[%s6909_s3 + $0xf8] sm:$0xff]  ;;  %v478_v35 = vld [vmem:[%s6909_s3 + $0x1d0] sm:$0xff] }
  0xe3   :  { %3386 = vpow2.f32 %v2959_v42  ;;  %v452_v42 = vld [vmem:[%s6909_s3 + $0x100] sm:$0xff] }
  0xe5   :  { %3256 = vmatmul.mubr.msk.f32.gmra.mxu0 %vm250_vm1, %v447_v37  ;;  %v479_v37 = vld [vmem:[%s6909_s3 + $0x1d8] sm:$0xff] }
  0xe6   :  { %3258 = vmatprep.mubr.msk.f32.mxu0 %vm250_vm1, %v448_v38  ;;  %v480_v38 = vld [vmem:[%s6909_s3 + $0x1e0] sm:$0xff] }
  0xea   :  { %v3381_v39 = vpop.eup %3380 }
  0xeb   :  { %196 = vrot.lane.b32.xlu0 %v3381_v39, %s3973_s0  ;;  %v449_v39 = vld [vmem:[%s6909_s3 + $0xe8] sm:$0xff] }
  0xec   :  { %3259 = vmatmul.mubr.msk.f32.gmra.mxu0 %vm250_vm1, %v449_v39  ;;  %v481_v39 = vld [vmem:[%s6909_s3 + $0x1e8] sm:$0xff] }
  0xee   :  { %v3383_v40 = vpop.eup %3382 }
  0xef   :  { %198 = vrot.lane.b32.xlu0 %v3383_v40, %s3973_s0  ;;  %v3385_v43 = vpop.eup %3384  ;;  %v450_v40 = vld [vmem:[%s6909_s3 + $0xf0] sm:$0xff] }
  0xf0   :  { %v164_v44 = vadd.f32 1.0, %v3385_v43  ;;  %v3387_v45 = vpop.eup %3386  ;;  %3261 = vmatprep.mubr.msk.f32.mxu0 %vm250_vm1, %v450_v40  ;;  %v453_v43 = vld [vmem:[%s6909_s3 + $0x108] sm:$0xff]  ;;  %v482_v40 = vld [vmem:[%s6909_s3 + $0x1f0] sm:$0xff] }
  0xf1   :  { %v165_v46 = vadd.f32 1.0, %v3387_v45  ;;  %3262 = vmatmul.mubr.msk.f32.gmra.mxu0 %vm250_vm1, %v451_v41  ;;  %v455_v45 = vld [vmem:[%s6909_s3 + $0x118] sm:$0xff] }
  0xf2   :  { %3388 = vrcp.f32 %v164_v44  ;;  %3264 = vmatprep.mubr.msk.f32.mxu0 %vm250_vm1, %v452_v42  ;;  %v454_v44 = vld [vmem:[%s6909_s3 + $0x110] sm:$0xff]  ;;  %v483_v41 = vld [vmem:[%s6909_s3 + $0x1f8] sm:$0xff]  ;;  %v484_v42 = vld [vmem:[%s6909_s3 + $0x200] sm:$0xff] }
  0xf3   :  { %3390 = vrcp.f32 %v165_v46  ;;  %v456_v46 = vld [vmem:[%s6909_s3 + $0x120] sm:$0xff] }
  0xf5   :  { %3265 = vmatmul.mubr.msk.f32.gmra.mxu0 %vm250_vm1, %v453_v43  ;;  %v485_v43 = vld [vmem:[%s6909_s3 + $0x208] sm:$0xff] }
  0xf6   :  { %3267 = vmatprep.mubr.msk.f32.mxu0 %vm250_vm1, %v454_v44  ;;  %v486_v44 = vld [vmem:[%s6909_s3 + $0x210] sm:$0xff] }
  0xf9   :  { %3268 = vmatmul.mubr.msk.f32.gmra.mxu0 %vm250_vm1, %v455_v45  ;;  %v487_v45 = vld [vmem:[%s6909_s3 + $0x218] sm:$0xff] }
  0xfa   :  { %3270 = vmatprep.mubr.msk.f32.mxu0 %vm250_vm1, %v456_v46  ;;  %v488_v46 = vld [vmem:[%s6909_s3 + $0x220] sm:$0xff] }
  0xff   :  { %v4136_v47 = vpop.eup %3388 }
 0x100   :  { %v4140_v50 = vpop.eup %3390  ;;  %v192_v54 = vmul.f32 %v4136_v47, %v187_v53  ;;  %v461_v53 = vld [vmem:[%s6909_s3 + $0x148] sm:$0xff] }
 0x101   :  { %v193_v58 = vmul.f32 %v4140_v50, %v189_v56  ;;  %v2962_v56 = vld [vmem:[%s6912_s6 + $0x20] sm:$0xff] }
 0x102   :  { %3192 = vmatprep.subr.mxu1 %v2962_v56 }
 0x103   :  { %3193 = vmatpush3.msra.mxu1 %v2962_v56  ;;  %v496_v56 = vld [vmem:[%s6909_s3 + $0x260] sm:$0xff] }
 0x15d   :  { %v197_v48 = vpop.permute.xlu0 %196 }
 0x15e   :  { %v202_v49 = vmul.f32 %v4136_v47, %v197_v48  ;;  %v457_v48 = vld [vmem:[%s6909_s3 + $0x128] sm:$0xff] }
 0x15f   :  { %3271 = vmatmul.mubr.msk.f32.gmra.mxu0 %vm250_vm1, %v457_v48  ;;  %v489_v48 = vld [vmem:[%s6909_s3 + $0x228] sm:$0xff] }
 0x160   :  { %206 = vrot.lane.b32.xlu0 %v202_v49, %s3972_s17  ;;  %v458_v49 = vld [vmem:[%s6909_s3 + $0x130] sm:$0xff] }
 0x161   :  { %v199_v51 = vpop.permute.xlu0 %198  ;;  %3273 = vmatprep.mubr.msk.f32.mxu0 %vm250_vm1, %v458_v49  ;;  %v490_v49 = vld [vmem:[%s6909_s3 + $0x230] sm:$0xff] }
 0x162   :  { %v203_v52 = vmul.f32 %v4140_v50, %v199_v51  ;;  %v459_v51 = vld [vmem:[%s6909_s3 + $0x138] sm:$0xff] }
 0x163   :  { %3274 = vmatmul.mubr.msk.f32.gmra.mxu0 %vm250_vm1, %v459_v51  ;;  %v491_v51 = vld [vmem:[%s6909_s3 + $0x238] sm:$0xff] }
 0x164   :  { %208 = vrot.lane.b32.xlu1 %v203_v52, %s3972_s17  ;;  %v460_v52 = vld [vmem:[%s6909_s3 + $0x140] sm:$0xff] }
 0x165   :  { %3276 = vmatprep.mubr.msk.f32.mxu0 %vm250_vm1, %v460_v52  ;;  %v492_v52 = vld [vmem:[%s6909_s3 + $0x240] sm:$0xff] }
 0x167   :  { %3277 = vmatmul.mubr.msk.f32.gmra.mxu0 %vm250_vm1, %v461_v53  ;;  %v493_v53 = vld [vmem:[%s6909_s3 + $0x248] sm:$0xff] }
 0x1d2   :  { %v207_v55 = vpop.permute.xlu0 %206 }
 0x1d3   :  { %v4145_v57 = vadd.f32 %v207_v55, %v192_v54  ;;  %v462_v54 = vld [vmem:[%s6909_s3 + $0x150] sm:$0xff]  ;;  %v463_v55 = vld [vmem:[%s6909_s3 + $0x158] sm:$0xff] }
 0x1d4   :  { %3279 = vmatprep.mubr.msk.f32.mxu0 %vm250_vm1, %v462_v54  ;;  %v494_v54 = vld [vmem:[%s6909_s3 + $0x250] sm:$0xff] }
 0x1d5   :  { %7021 = vst [vmem:[#allocation9_spill] sm:$0xff] %v4145_v57  ;;  %3392 = vtanh.f32 %v4145_v57  ;;  %3280 = vmatmul.mubr.msk.f32.gmra.mxu0 %vm250_vm1, %v463_v55  ;;  %v495_v55 = vld [vmem:[%s6909_s3 + $0x258] sm:$0xff] }
 0x1d6   :  { %v209_v59 = vpop.permute.xlu1 %208 }
 0x1d7   :  { %v4149_v60 = vadd.f32 %v209_v59, %v193_v58  ;;  %v2971_v58 = vld [vmem:[%s6912_s6 + $0x58] sm:$0xff]  ;;  %v464_v59 = vld [vmem:[%s6909_s3 + $0x160] sm:$0xff] }
 0x1d8   :  { %3282 = vmatprep.mubr.msk.f32.mxu0 %vm250_vm1, %v464_v59  ;;  %3197 = vmatprep.subr.mxu1 %v2971_v58  ;;  %v498_v59 = vld [vmem:[%s6909_s3 + $0x270] sm:$0xff] }
 0x1d9   :  { %7022 = vst [vmem:[#allocation10_spill] sm:$0xff] %v4149_v60  ;;  %3394 = vtanh.f32 %v4149_v60  ;;  %3283 = vmatmul.mubr.msk.f32.gmra.mxu0 %vm250_vm1, %v465_v0  ;;  %v499_v0 = vld [vmem:[%s6909_s3 + $0x278] sm:$0xff] }
 0x1e2   :  { %v4162_v63 = vpop.eup %3392 }
 0x1e3   :  { %218 = vrot.lane.b32.xlu0 %v4162_v63, %s3973_s0 }
 0x1e6   :  { %v4185_v3 = vpop.eup %3394 }
 0x1e7   :  { %220 = vrot.lane.b32.xlu1 %v4185_v3, %s3973_s0 }
 0x255   :  { %v219_v4 = vpop.permute.xlu0 %218 }
 0x256   :  { %v4388_v5 = vmul.f32 %v4136_v47, %v219_v4  ;;  %v70_v47 = vsub.s32 1, %v4121_v30  ;;  %v500_v4 = vld [vmem:[%s6909_s3 + $0x280] sm:$0xff] }
 0x258   :  { %7023 = vst [vmem:[#allocation11_spill] sm:$0xff] %v4388_v5  ;;  %246 = vrot.lane.b32.xlu0 %v4388_v5, %s3972_s17  ;;  %v71_v8 = vrot.slane %v4127_v32, %v70_v47 }
 0x259   :  { %v221_v6 = vpop.permute.xlu1 %220 }
 0x25a   :  { %v4393_v7 = vmul.f32 %v4140_v50, %v221_v6  ;;  %v150_v9 = vadd.f32 %v4132_v36, %v71_v8  ;;  %v155_v50 = vpop.f32.mrf.mxu0  ;;  %v501_v6 = vld [vmem:[%s6909_s3 + $0x288] sm:$0xff] }
 0x25b   :  { %v156_v11 = vadd.f32 %v155_v50, %v71_v8  ;;  %v502_v8 = vld [vmem:[%s6909_s3 + $0x290] sm:$0xff]  ;;  %v504_v50 = vld [vmem:[%s6909_s3 + $0x2a0] sm:$0xff] }
 0x25c   :  { %7024 = vst [vmem:[#allocation12_spill] sm:$0xff] %v4393_v7  ;;  %226 = vrot.lane.b32.xlu0 %v4162_v63, %s3974_s20  ;;  %248 = vrot.lane.b32.xlu1 %v4393_v7, %s3972_s17  ;;  %v2960_v10 = vmul.f32 -1.442695, %v150_v9  ;;  %v503_v9 = vld [vmem:[%s6909_s3 + $0x298] sm:$0xff] }
 0x25d   :  { %v2961_v12 = vmul.f32 -1.442695, %v156_v11  ;;  %v506_v11 = vld [vmem:[%s6909_s3 + $0x2b0] sm:$0xff] }
 0x25e   :  { %3396 = vpow2.f32 %v2960_v10  ;;  %v505_v10 = vld [vmem:[%s6909_s3 + $0x2a8] sm:$0xff] }
 0x25f   :  { %3398 = vpow2.f32 %v2961_v12  ;;  %v507_v12 = vld [vmem:[%s6909_s3 + $0x2b8] sm:$0xff] }
 0x260   :  { %228 = vrot.lane.b32.xlu1 %v4185_v3, %s3974_s20 }
 0x26b   :  { %v3397_v63 = vpop.eup %3396 }
 0x26c   :  { %v178_v13 = vadd.f32 1.0, %v3397_v63  ;;  %v3399_v14 = vpop.eup %3398  ;;  %v508_v63 = vld [vmem:[%s6909_s3 + $0x2c0] sm:$0xff] }
 0x26d   :  { %v179_v15 = vadd.f32 1.0, %v3399_v14  ;;  %v509_v14 = vld [vmem:[%s6909_s3 + $0x2c8] sm:$0xff] }
 0x26e   :  { %3400 = vrcp.f32 %v178_v13  ;;  %v3218_v13 = vpop.f32.mrf.mxu0 }
 0x26f   :  { %3402 = vrcp.f32 %v179_v15  ;;  %v510_v15 = vld [vmem:[%s6909_s3 + $0x2d0] sm:$0xff] }
 0x27b   :  { %v3401_v32 = vpop.eup %3400 }
 0x27c   :  { %v3403_v20 = vpop.eup %3402 }
 0x2ca   :  { %v247_v3 = vpop.permute.xlu0 %246 }
 0x2cb   :  { %2897 = vst.msk [vmem:[#allocation2] sm:$0xff] %vm250_vm1, %v247_v3  ;;  %3194 = vmatprep.mubr.msk.f32.mxu1 %vm250_vm1, %v247_v3  ;;  %v4613_v3 = vpop.f32.mrf.mxu0 }
 0x2ce   :  { %v227_v16 = vpop.permute.xlu0 %226  ;;  %v249_v36 = vpop.permute.xlu1 %248 }
 0x2cf   :  { %v4408_v17 = vmul.f32 %v3401_v32, %v227_v16  ;;  %2898 = vst.msk [vmem:[#allocation2 + $0x8] sm:$0xff] %vm250_vm1, %v249_v36  ;;  %3195 = vmatmul.mubr.msk.f32.vlgmr.msra.gmra.mxu1 %vm250_vm1, %v249_v36  ;;  %v511_v32 = vld [vmem:[%s6909_s3 + $0x2d8] sm:$0xff]  ;;  %v512_v16 = vld [vmem:[%s6909_s3 + $0x2e0] sm:$0xff]  ;;  %v3221_v36 = vpop.f32.mrf.mxu0 }
 0x2d0   :  { %3198 = vmatpush3.msra.mxu1 %v2971_v58  ;;  %v497_v58 = vld [vmem:[%s6909_s3 + $0x268] sm:$0xff] }
 0x2d1   :  { %7025 = vst [vmem:[#allocation13_spill] sm:$0xff] %v4408_v17  ;;  %3205 = vmatprep.mubr.msk.f32.mxu1 %vm250_vm1, %v4408_v17  ;;  %3199 = vmatprep.subr.mxu1 %v2970_v18 }
 0x2d2   :  { %3200 = vmatpush3.msra.mxu1 %v2970_v18  ;;  %v229_v21 = vpop.permute.xlu1 %228  ;;  %v513_v18 = vld [vmem:[%s6909_s3 + $0x2e8] sm:$0xff] }
 0x2d3   :  { %v4423_v23 = vmul.f32 %v3403_v20, %v229_v21  ;;  %3201 = vmatprep.subr.mxu1 %v2969_v19  ;;  %v4631_v20 = vpop.f32.mrf.mxu0  ;;  %v515_v21 = vld [vmem:[%s6909_s3 + $0x2f8] sm:$0xff] }
 0x2d4   :  { %3202 = vmatpush3.msra.mxu1 %v2969_v19  ;;  %v514_v19 = vld [vmem:[%s6909_s3 + $0x2f0] sm:$0xff] }
 0x2d5   :  { %7026 = vst [vmem:[#allocation14_spill] sm:$0xff] %v4423_v23  ;;  %3203 = vmatprep.subr.mxu1 %v2968_v22 }
 0x2d6   :  { %3204 = vmatpush3.msra.mxu1 %v2968_v22  ;;  %v516_v22 = vld [vmem:[%s6909_s3 + $0x300] sm:$0xff] }
 0x2d7   :  { %3206 = vmatmul.mubr.msk.f32.vlgmr.msra.gmra.mxu1 %vm250_vm1, %v4423_v23  ;;  %3363 = vmatprep.subr.mxu1 %v4155_v61 }
 0x2d8   :  { %3367 = vmatpush3.msra.mxu1 %v4155_v61  ;;  %3285 = vmatprep.mubr.msk.f32.mxu1 %vm250_vm1, %v466_v24  ;;  %v468_v61 = vld [vmem:[%s6909_s3 + $0x180] sm:$0xff]  ;;  %v3224_v24 = vpop.f32.mrf.mxu0 }
 0x2d9   :  { %3364 = vmatprep.subr.mxu1 %v4160_v62 }
 0x2da   :  { %3368 = vmatpush3.msra.mxu1 %v4160_v62  ;;  %v469_v62 = vld [vmem:[%s6909_s3 + $0x188] sm:$0xff] }
 0x2db   :  { %3365 = vmatprep.subr.mxu1 %v4174_v1 }
 0x2dc   :  { %3369 = vmatpush3.msra.mxu1 %v4174_v1  ;;  %v470_v1 = vld [vmem:[%s6909_s3 + $0x190] sm:$0xff] }
 0x2dd   :  { %3366 = vmatprep.subr.mxu1 %v4182_v2 }
 0x2de   :  { %3370 = vmatpush3.msra.mxu1 %v4182_v2  ;;  %v471_v2 = vld [vmem:[%s6909_s3 + $0x198] sm:$0xff] }
 0x2df   :  { %3286 = vmatmul.mubr.msk.f32.vlgmr.msra.gmra.mxu1 %vm250_vm1, %v467_v25  ;;  %v517_v25 = vld [vmem:[%s6909_s3 + $0x308] sm:$0xff] }
 0x2e0   :  { %3288 = vmatprep.mubr.msk.f32.mxu1 %vm250_vm1, %v468_v61  ;;  %v4646_v61 = vpop.f32.mrf.mxu0 }
 0x2e3   :  { %3289 = vmatmul.mubr.msk.f32.gmra.mxu1 %vm250_vm1, %v469_v62  ;;  %v3227_v62 = vpop.f32.mrf.mxu0 }
 0x2e4   :  { %3291 = vmatprep.mubr.msk.f32.mxu1 %vm250_vm1, %v470_v1 }
 0x2e5   :  { %v4649_v1 = vpop.f32.mrf.mxu0 }
 0x2e7   :  { %3292 = vmatmul.mubr.msk.f32.gmra.mxu1 %vm250_vm1, %v471_v2  ;;  %v3230_v2 = vpop.f32.mrf.mxu0 }
 0x2e8   :  { %3294 = vmatprep.mubr.msk.f32.mxu1 %vm250_vm1, %v472_v26 }
 0x2e9   :  { %v4651_v26 = vpop.f32.mrf.mxu0 }
 0x2eb   :  { %3295 = vmatmul.mubr.msk.f32.gmra.mxu1 %vm250_vm1, %v473_v27  ;;  %v3233_v27 = vpop.f32.mrf.mxu0 }
 0x2ec   :  { %3297 = vmatprep.mubr.msk.f32.mxu1 %vm250_vm1, %v474_v28 }
 0x2ed   :  { %v4653_v28 = vpop.f32.mrf.mxu0 }
 0x2ef   :  { %3298 = vmatmul.mubr.msk.f32.gmra.mxu1 %vm250_vm1, %v475_v29  ;;  %v3236_v29 = vpop.f32.mrf.mxu0 }
 0x2f0   :  { %3300 = vmatprep.mubr.msk.f32.mxu1 %vm250_vm1, %v476_v33 }
 0x2f1   :  { %v4655_v33 = vpop.f32.mrf.mxu0 }
 0x2f3   :  { %3301 = vmatmul.mubr.msk.f32.gmra.mxu1 %vm250_vm1, %v477_v34  ;;  %v3239_v34 = vpop.f32.mrf.mxu0 }
 0x2f4   :  { %3303 = vmatprep.mubr.msk.f32.mxu1 %vm250_vm1, %v478_v35 }
 0x2f5   :  { %v4657_v35 = vpop.f32.mrf.mxu0 }
 0x2f7   :  { %3304 = vmatmul.mubr.msk.f32.gmra.mxu1 %vm250_vm1, %v479_v37  ;;  %v3242_v37 = vpop.f32.mrf.mxu0 }
 0x2f8   :  { %3306 = vmatprep.mubr.msk.f32.mxu1 %vm250_vm1, %v480_v38 }
 0x2f9   :  { %v4659_v38 = vpop.f32.mrf.mxu0 }
 0x2fb   :  { %3307 = vmatmul.mubr.msk.f32.gmra.mxu1 %vm250_vm1, %v481_v39  ;;  %v4661_v39 = vpop.f32.mrf.mxu0 }
 0x2fc   :  { %3309 = vmatprep.mubr.msk.f32.mxu1 %vm250_vm1, %v482_v40 }
 0x2fd   :  { %v4663_v40 = vpop.f32.mrf.mxu0 }
 0x2ff   :  { %3310 = vmatmul.mubr.msk.f32.gmra.mxu1 %vm250_vm1, %v483_v41  ;;  %v4665_v41 = vpop.f32.mrf.mxu0 }
 0x300   :  { %3312 = vmatprep.mubr.msk.f32.mxu1 %vm250_vm1, %v484_v42 }
 0x301   :  { %v4667_v42 = vpop.f32.mrf.mxu0 }
 0x303   :  { %3313 = vmatmul.mubr.msk.f32.gmra.mxu1 %vm250_vm1, %v485_v43  ;;  %v4669_v43 = vpop.f32.mrf.mxu0 }
 0x304   :  { %3315 = vmatprep.mubr.msk.f32.mxu1 %vm250_vm1, %v486_v44  ;;  %v234_v44 = vld [vmem:[%s6913_s7] sm:$0xf] }
 0x307   :  { %3316 = vmatmul.mubr.msk.f32.gmra.mxu1 %vm250_vm1, %v487_v45  ;;  %v4674_v45 = vpop.f32.mrf.mxu0 }
 0x308   :  { %3318 = vmatprep.mubr.msk.f32.mxu1 %vm250_vm1, %v488_v46  ;;  %v243_v46 = vrot.slane %v234_v44, %v70_v47 }
 0x30b   :  { %3319 = vmatmul.mubr.msk.f32.gmra.mxu1 %vm250_vm1, %v489_v48  ;;  %v4680_v48 = vrot.slane %v234_v44, %v66_v31 }
 0x30c   :  { %3321 = vmatprep.mubr.msk.f32.mxu1 %vm250_vm1, %v490_v49  ;;  %v4682_v49 = vpop.f32.mrf.mxu0 }
 0x30d   :  { %v922_v31 = vadd.f32 %v3227_v62, %v4680_v48  ;;  %v962_v62 = vadd.f32 %v3239_v34, %v4680_v48  ;;  %v917_v34 = vadd.f32 %v4649_v1, %v4680_v48 }
 0x30f   :  { %3322 = vmatmul.mubr.msk.f32.gmra.mxu1 %vm250_vm1, %v491_v51 }
 0x310   :  { %3324 = vmatprep.mubr.msk.f32.mxu1 %vm250_vm1, %v492_v52 }
 0x313   :  { %3325 = vmatmul.mubr.msk.f32.gmra.mxu1 %vm250_vm1, %v493_v53  ;;  %v892_v53 = vadd.f32 %v3218_v13, %v4680_v48 }
 0x314   :  { %3327 = vmatprep.mubr.msk.f32.mxu1 %vm250_vm1, %v494_v54  ;;  %v912_v54 = vadd.f32 %v3224_v24, %v4680_v48 }
 0x317   :  { %3328 = vmatmul.mubr.msk.f32.gmra.mxu1 %vm250_vm1, %v495_v55  ;;  %v4688_v55 = vpop.f32.mrf.mxu0 }
 0x318   :  { %3330 = vmatprep.mubr.msk.f32.mxu1 %vm250_vm1, %v496_v56  ;;  %v902_v56 = vadd.f32 %v3221_v36, %v4680_v48 }
 0x31b   :  { %3331 = vmatmul.mubr.msk.f32.gmra.mxu1 %vm250_vm1, %v497_v58 }
 0x31c   :  { %3333 = vmatprep.mubr.msk.f32.mxu1 %vm250_vm1, %v498_v59  ;;  %v4694_v59 = vpop.f32.mrf.mxu0 }
 0x31f   :  { %3334 = vmatmul.mubr.msk.f32.gmra.mxu1 %vm250_vm1, %v499_v0 }
 0x320   :  { %3336 = vmatprep.mubr.msk.f32.mxu1 %vm250_vm1, %v500_v4 }
 0x323   :  { %3337 = vmatmul.mubr.msk.f32.gmra.mxu1 %vm250_vm1, %v501_v6 }
 0x324   :  { %3339 = vmatprep.mubr.msk.f32.mxu1 %vm250_vm1, %v502_v8  ;;  %v932_v8 = vadd.f32 %v3230_v2, %v4680_v48 }
 0x327   :  { %3340 = vmatmul.mubr.msk.f32.gmra.mxu1 %vm250_vm1, %v503_v9  ;;  %v4700_v9 = vpop.f32.mrf.mxu0 }
 0x328   :  { %3342 = vmatprep.mubr.msk.f32.mxu1 %vm250_vm1, %v504_v50 }
 0x32b   :  { %3343 = vmatmul.mubr.msk.f32.gmra.mxu1 %vm250_vm1, %v505_v10  ;;  %v1573_v10 = vsub.s32 3, %v4121_v30 }
 0x32c   :  { %3345 = vmatprep.mubr.msk.f32.mxu1 %vm250_vm1, %v506_v11 }
 0x32f   :  { %3346 = vmatmul.mubr.msk.f32.gmra.mxu1 %vm250_vm1, %v507_v12  ;;  %v942_v12 = vadd.f32 %v3233_v27, %v4680_v48 }
 0x330   :  { %3348 = vmatprep.mubr.msk.f32.mxu1 %vm250_vm1, %v508_v63  ;;  %v4707_v63 = vpop.f32.mrf.mxu0 }
 0x332   :  { %v4717_v36 = vpop.f32.mrf.mxu0 }
 0x333   :  { %3349 = vmatmul.mubr.msk.f32.gmra.mxu1 %vm250_vm1, %v509_v14 }
 0x334   :  { %3351 = vmatprep.mubr.msk.f32.mxu1 %vm250_vm1, %v510_v15  ;;  %v4712_v15 = vrot.slane %v234_v44, %v1573_v10  ;;  %v4726_v2 = vpop.f32.mrf.mxu0 }
 0x337   :  { %3352 = vmatmul.mubr.msk.f32.gmra.mxu1 %vm250_vm1, %v511_v32 }
 0x338   :  { %3354 = vmatprep.mubr.msk.f32.mxu1 %vm250_vm1, %v512_v16  ;;  %v952_v16 = vadd.f32 %v3236_v29, %v4680_v48 }
 0x33b   :  { %3355 = vmatmul.mubr.msk.f32.gmra.mxu1 %vm250_vm1, %v513_v18 }
 0x33c   :  { %3357 = vmatprep.mubr.msk.f32.mxu1 %vm250_vm1, %v514_v19 }
 0x33f   :  { %3358 = vmatmul.mubr.msk.f32.gmra.mxu1 %vm250_vm1, %v515_v21 }
 0x340   :  { %3360 = vmatprep.mubr.msk.f32.mxu1 %vm250_vm1, %v516_v22 }
 0x343   :  { %3361 = vmatmul.mubr.msk.f32.gmra.mxu1 %vm250_vm1, %v517_v25 }
 0x38f   :  { %v3196_v51 = vpop.f32.mrf.mxu1 }
 0x390   :  { %v4684_v52 = vadd.f32 %v3196_v51, %v243_v46 }
 0x391   :  { %v321_v4 = vpop.f32.mrf.mxu1 }
 0x392   :  { %v1376_v58 = vadd.f32 %v892_v53, %v4684_v52  ;;  %v1378_v47 = vadd.f32 %v902_v56, %v4684_v52  ;;  %v1380_v0 = vadd.f32 %v912_v54, %v4684_v52  ;;  %v1382_v50 = vadd.f32 %v922_v31, %v4684_v52  ;;  %v4742_v31 = vpop.f32.mrf.mxu0 }
 0x393   :  { %v1384_v13 = vadd.f32 %v932_v8, %v4684_v52  ;;  %v1386_v18 = vadd.f32 %v942_v12, %v4684_v52  ;;  %v1388_v27 = vadd.f32 %v952_v16, %v4684_v52  ;;  %v4732_v53 = vadd.f32 %v321_v4, %v243_v46 }
 0x394   :  { %3404 = vtanh.f32 %v1376_v58  ;;  %v897_v56 = vadd.f32 %v4631_v20, %v4680_v48  ;;  %v972_v58 = vadd.f32 %v3242_v37, %v4680_v48  ;;  %v927_v20 = vadd.f32 %v4651_v26, %v4680_v48 }
 0x395   :  { %3406 = vtanh.f32 %v1378_v47  ;;  %v982_v37 = vadd.f32 %v4661_v39, %v4680_v48  ;;  %v1381_v16 = vadd.f32 %v917_v34, %v4732_v53  ;;  %v937_v39 = vadd.f32 %v4653_v28, %v4680_v48 }
 0x396   :  { %3408 = vtanh.f32 %v1380_v0  ;;  %v1390_v0 = vadd.f32 %v962_v62, %v4684_v52  ;;  %v1377_v1 = vadd.f32 %v897_v56, %v4732_v53  ;;  %v1392_v10 = vadd.f32 %v972_v58, %v4684_v52 }
 0x397   :  { %v4697_v6 = vpop.f32.mrf.mxu1  ;;  %3410 = vtanh.f32 %v1382_v50  ;;  %v992_v62 = vadd.f32 %v4665_v41, %v4680_v48  ;;  %v947_v58 = vadd.f32 %v4655_v33, %v4680_v48  ;;  %v1385_v41 = vadd.f32 %v937_v39, %v4732_v53 }
 0x398   :  { %3412 = vtanh.f32 %v1384_v13  ;;  %v4757_v13 = vpop.f32.mrf.mxu0 }
 0x399   :  { %v4704_v11 = vpop.f32.mrf.mxu1  ;;  %3414 = vtanh.f32 %v1386_v18 }
 0x39a   :  { %3416 = vtanh.f32 %v1388_v27 }
 0x39b   :  { %3418 = vtanh.f32 %v1390_v0  ;;  %v1002_v0 = vadd.f32 %v4669_v43, %v4680_v48  ;;  %v1387_v43 = vadd.f32 %v947_v58, %v4732_v53 }
 0x39c   :  { %3420 = vtanh.f32 %v1377_v1 }
 0x39d   :  { %3422 = vtanh.f32 %v1392_v10  ;;  %v957_v10 = vadd.f32 %v4657_v35, %v4680_v48  ;;  %v967_v35 = vadd.f32 %v4659_v38, %v4680_v48 }
 0x39e   :  { %3424 = vtanh.f32 %v1381_v16  ;;  %v1012_v16 = vadd.f32 %v4682_v49, %v4680_v48 }
 0x39f   :  { %v4710_v14 = vpop.f32.mrf.mxu1 }
 0x3a1   :  { %v4714_v32 = vpop.f32.mrf.mxu1  ;;  %v3405_v21 = vpop.eup %3404 }
 0x3a2   :  { %v1576_v24 = vmul.f32 %v3405_v21, %v4712_v15  ;;  %v3407_v25 = vpop.eup %3406 }
 0x3a3   :  { %v4720_v19 = vpop.f32.mrf.mxu1  ;;  %v3409_v29 = vpop.eup %3408  ;;  %v1578_v4 = vmul.f32 %v3407_v25, %v4712_v15  ;;  %v1383_v25 = vadd.f32 %v927_v20, %v4732_v53 }
 0x3a4   :  { %v1676_v44 = vsel %vm250_vm1, %v1576_v24, 0.0  ;;  %v1580_v54 = vmul.f32 %v3409_v29, %v4712_v15  ;;  %v3411_v8 = vpop.eup %3410  ;;  %v4771_v29 = vpop.f32.mrf.mxu0 }
 0x3a5   :  { %v4722_v22 = vpop.f32.mrf.mxu1  ;;  %1677 = vadd.xlane.f32.xlu1 %v1676_v44  ;;  %v1682_v18 = vsel %vm250_vm1, %v1578_v4, 0.0  ;;  %v1582_v21 = vmul.f32 %v3411_v8, %v4712_v15  ;;  %v3413_v24 = vpop.eup %3412  ;;  %v1394_v44 = vadd.f32 %v982_v37, %v4684_v52  ;;  %3426 = vtanh.f32 %v1383_v25 }
 0x3a6   :  { %v1688_v46 = vsel %vm250_vm1, %v1580_v54, 0.0  ;;  %v1584_v56 = vmul.f32 %v3413_v24, %v4712_v15  ;;  %v3415_v34 = vpop.eup %3414  ;;  %v4785_v4 = vpop.f32.mrf.mxu0  ;;  %v1396_v8 = vadd.f32 %v992_v62, %v4684_v52 }
 0x3a7   :  { %v4730_v51 = vpop.f32.mrf.mxu1  ;;  %1689 = vadd.xlane.f32.xlu0 %v1688_v46  ;;  %v1694_v54 = vsel %vm250_vm1, %v1582_v21, 0.0  ;;  %3428 = vtanh.f32 %v1394_v44  ;;  %v1586_v1 = vmul.f32 %v3415_v34, %v4712_v15  ;;  %v3417_v37 = vpop.eup %3416  ;;  %v1398_v21 = vadd.f32 %v1002_v0, %v4684_v52 }
 0x3a8   :  { %v1700_v20 = vsel %vm250_vm1, %v1584_v56, 0.0  ;;  %3430 = vtanh.f32 %v1385_v41  ;;  %v1588_v39 = vmul.f32 %v3417_v37, %v4712_v15  ;;  %v3419_v25 = vpop.eup %3418  ;;  %v1389_v44 = vadd.f32 %v957_v10, %v4732_v53 }
 0x3a9   :  { %v4740_v47 = vpop.f32.mrf.mxu1  ;;  %3432 = vtanh.f32 %v1396_v8  ;;  %v1706_v24 = vsel %vm250_vm1, %v1586_v1, 0.0  ;;  %v3421_v49 = vpop.eup %3420  ;;  %v1400_v56 = vadd.f32 %v1012_v16, %v4684_v52  ;;  %v1590_v8 = vmul.f32 %v3419_v25, %v4712_v15 }
 0x3aa   :  { %3434 = vtanh.f32 %v1387_v43  ;;  %v3423_v34 = vpop.eup %3422  ;;  %v1577_v41 = vmul.f32 %v3421_v49, %v4712_v15  ;;  %v1712_v0 = vsel %vm250_vm1, %v1588_v39, 0.0  ;;  %v1032_v16 = vadd.f32 %v4707_v63, %v4680_v48 }
 0x3ab   :  { %v4747_v50 = vpop.f32.mrf.mxu1  ;;  %1683 = vadd.xlane.f32.xlu0 %v1682_v18  ;;  %v4797_v18 = vpop.f32.mrf.mxu0  ;;  %3436 = vtanh.f32 %v1398_v21  ;;  %v1592_v39 = vmul.f32 %v3423_v34, %v4712_v15 }
 0x3ac   :  { %v3425_v38 = vpop.eup %3424  ;;  %3438 = vtanh.f32 %v1389_v44  ;;  %v1679_v37 = vsel %vm250_vm1, %v1577_v41, 0.0 }
 0x3ad   :  { %v4755_v12 = vpop.f32.mrf.mxu1  ;;  %v4810_v58 = vpop.f32.mrf.mxu0  ;;  %v1581_v10 = vmul.f32 %v3425_v38, %v4712_v15  ;;  %1680 = vadd.xlane.f32.xlu1 %v1679_v37  ;;  %3440 = vtanh.f32 %v1400_v56  ;;  %v1042_v56 = vadd.f32 %v4726_v2, %v4680_v48 }
 0x3af   :  { %v4762_v26 = vpop.f32.mrf.mxu1  ;;  %1695 = vadd.xlane.f32.xlu0 %v1694_v54  ;;  %v1022_v54 = vadd.f32 %v4694_v59, %v4680_v48  ;;  %v1391_v59 = vadd.f32 %v967_v35, %v4732_v53  ;;  %v4824_v21 = vpop.f32.mrf.mxu0  ;;  %v987_v35 = vadd.f32 %v4667_v42, %v4680_v48  ;;  %v1691_v63 = vsel %vm250_vm1, %v1581_v10, 0.0 }
 0x3b0   :  { %v1724_v42 = vsel %vm250_vm1, %v1592_v39, 0.0 }
 0x3b1   :  { %v4769_v27 = vpop.f32.mrf.mxu1  ;;  %3442 = vtanh.f32 %v1391_v59  ;;  %1692 = vadd.xlane.f32.xlu1 %v1691_v63  ;;  %v3275_v34 = vpop.f32.mrf.mxu0  ;;  %v1395_v37 = vadd.f32 %v987_v35, %v4732_v53  ;;  %v1007_v35 = vadd.f32 %v4688_v55, %v4680_v48 }
 0x3b2   :  { %v3427_v43 = vpop.eup %3426 }
 0x3b3   :  { %v4776_v28 = vpop.f32.mrf.mxu1  ;;  %1701 = vadd.xlane.f32.xlu0 %v1700_v20  ;;  %v977_v20 = vadd.f32 %v4663_v40, %v4680_v48  ;;  %v1718_v40 = vsel %vm250_vm1, %v1590_v8, 0.0  ;;  %v1583_v41 = vmul.f32 %v3427_v43, %v4712_v15 }
 0x3b4   :  { %v3429_v25 = vpop.eup %3428 }
 0x3b5   :  { %v4783_v46 = vpop.f32.mrf.mxu1  ;;  %v1393_v49 = vadd.f32 %v977_v20, %v4732_v53  ;;  %v1594_v8 = vmul.f32 %v3429_v25, %v4712_v15  ;;  %v997_v20 = vadd.f32 %v4674_v45, %v4680_v48  ;;  %v1697_v2 = vsel %vm250_vm1, %v1583_v41, 0.0 }
 0x3b6   :  { %1698 = vadd.xlane.f32.xlu1 %v1697_v2  ;;  %v1399_v2 = vadd.f32 %v1007_v35, %v4732_v53  ;;  %v1027_v35 = vadd.f32 %v4717_v36, %v4680_v48 }
 0x3b7   :  { %v4790_v33 = vpop.f32.mrf.mxu1  ;;  %1707 = vadd.xlane.f32.xlu0 %v1706_v24  ;;  %v1402_v24 = vadd.f32 %v1022_v54, %v4684_v52  ;;  %v3431_v54 = vpop.eup %3430  ;;  %v1730_v45 = vsel %vm250_vm1, %v1594_v8, 0.0  ;;  %v1397_v63 = vadd.f32 %v997_v20, %v4732_v53  ;;  %v1017_v20 = vadd.f32 %v4700_v9, %v4680_v48 }
 0x3b8   :  { %v3433_v38 = vpop.eup %3432  ;;  %v1585_v10 = vmul.f32 %v3431_v54, %v4712_v15 }
 0x3b9   :  { %v4802_v62 = vpop.f32.mrf.mxu1  ;;  %3444 = vtanh.f32 %v1402_v24  ;;  %v3435_v43 = vpop.eup %3434  ;;  %v1596_v39 = vmul.f32 %v3433_v38, %v4712_v15 }
 0x3ba   :  { %3446 = vtanh.f32 %v1393_v49  ;;  %v4850_v24 = vpop.f32.mrf.mxu0  ;;  %v3437_v25 = vpop.eup %3436  ;;  %v1587_v41 = vmul.f32 %v3435_v43, %v4712_v15 }
 0x3bb   :  { %1713 = vadd.xlane.f32.xlu0 %v1712_v0  ;;  %v4817_v1 = vpop.f32.mrf.mxu1  ;;  %v1404_v0 = vadd.f32 %v1032_v16, %v4684_v52  ;;  %v1052_v16 = vadd.f32 %v4757_v13, %v4680_v48  ;;  %v1703_v13 = vsel %vm250_vm1, %v1585_v10, 0.0  ;;  %v3439_v54 = vpop.eup %3438  ;;  %v1736_v55 = vsel %vm250_vm1, %v1596_v39, 0.0 }
 0x3bc   :  { %1704 = vadd.xlane.f32.xlu1 %v1703_v13  ;;  %v1598_v8 = vmul.f32 %v3437_v25, %v4712_v15  ;;  %v3441_v38 = vpop.eup %3440  ;;  %v1589_v10 = vmul.f32 %v3439_v54, %v4712_v15  ;;  %v1401_v13 = vadd.f32 %v1017_v20, %v4732_v53  ;;  %v1037_v20 = vadd.f32 %v4742_v31, %v4680_v48 }
 0x3bd   :  { %v4831_v44 = vpop.f32.mrf.mxu1  ;;  %3448 = vtanh.f32 %v1404_v0  ;;  %v3278_v0 = vpop.f32.mrf.mxu0  ;;  %v1600_v39 = vmul.f32 %v3441_v38, %v4712_v15 }
 0x3be   :  { %3450 = vtanh.f32 %v1395_v37  ;;  %v3443_v43 = vpop.eup %3442  ;;  %v1742_v9 = vsel %vm250_vm1, %v1598_v8, 0.0 }
 0x3bf   :  { %1719 = vadd.xlane.f32.xlu0 %v1718_v40  ;;  %v4843_v59 = vpop.f32.mrf.mxu1  ;;  %v1406_v40 = vadd.f32 %v1042_v56, %v4684_v52  ;;  %v1062_v56 = vadd.f32 %v4785_v4, %v4680_v48  ;;  %v1709_v4 = vsel %vm250_vm1, %v1587_v41, 0.0  ;;  %v1591_v41 = vmul.f32 %v3443_v43, %v4712_v15 }
 0x3c0   :  { %1710 = vadd.xlane.f32.xlu1 %v1709_v4  ;;  %v1748_v36 = vsel %vm250_vm1, %v1600_v39, 0.0  ;;  %v1403_v4 = vadd.f32 %v1027_v35, %v4732_v53  ;;  %v1047_v35 = vadd.f32 %v4771_v29, %v4680_v48 }
 0x3c1   :  { %v4857_v49 = vpop.f32.mrf.mxu1  ;;  %3452 = vtanh.f32 %v1406_v40  ;;  %v4876_v40 = vpop.f32.mrf.mxu0 }
 0x3c2   :  { %3454 = vtanh.f32 %v1397_v63 }
 0x3c3   :  { %1725 = vadd.xlane.f32.xlu0 %v1724_v42  ;;  %v1408_v42 = vadd.f32 %v1052_v16, %v4684_v52  ;;  %v4869_v37 = vpop.f32.mrf.mxu1  ;;  %v1072_v16 = vadd.f32 %v4810_v58, %v4680_v48  ;;  %v1715_v58 = vsel %vm250_vm1, %v1589_v10, 0.0 }
 0x3c4   :  { %1716 = vadd.xlane.f32.xlu1 %v1715_v58  ;;  %v1405_v58 = vadd.f32 %v1037_v20, %v4732_v53  ;;  %v1057_v20 = vadd.f32 %v4797_v18, %v4680_v48 }
 0x3c5   :  { %3456 = vtanh.f32 %v1408_v42  ;;  %v4883_v63 = vpop.f32.mrf.mxu1  ;;  %v3281_v42 = vpop.f32.mrf.mxu0 }
 0x3c6   :  { %v3445_v25 = vpop.eup %3444  ;;  %3458 = vtanh.f32 %v1399_v2 }
 0x3c7   :  { %1731 = vadd.xlane.f32.xlu0 %v1730_v45  ;;  %v1410_v45 = vadd.f32 %v1062_v56, %v4684_v52  ;;  %v3447_v54 = vpop.eup %3446  ;;  %v1082_v56 = vadd.f32 %v3275_v34, %v4680_v48  ;;  %v1602_v8 = vmul.f32 %v3445_v25, %v4712_v15  ;;  %v4894_v2 = vpop.f32.mrf.mxu1  ;;  %v1721_v34 = vsel %vm250_vm1, %v1591_v41, 0.0 }
 0x3c8   :  { %v1593_v10 = vmul.f32 %v3447_v54, %v4712_v15  ;;  %1722 = vadd.xlane.f32.xlu1 %v1721_v34  ;;  %v1407_v34 = vadd.f32 %v1047_v35, %v4732_v53 }
 0x3c9   :  { %3460 = vtanh.f32 %v1410_v45  ;;  %v4900_v45 = vpop.f32.mrf.mxu0  ;;  %v1754_v31 = vsel %vm250_vm1, %v1602_v8, 0.0 }
 0x3ca   :  { %v3449_v38 = vpop.eup %3448  ;;  %3462 = vtanh.f32 %v1401_v13  ;;  %v4907_v13 = vpop.f32.mrf.mxu1 }
 0x3cb   :  { %1737 = vadd.xlane.f32.xlu0 %v1736_v55  ;;  %v1412_v55 = vadd.f32 %v1072_v16, %v4684_v52  ;;  %v3451_v43 = vpop.eup %3450  ;;  %v1092_v16 = vadd.f32 %v3278_v0, %v4680_v48  ;;  %v1604_v39 = vmul.f32 %v3449_v38, %v4712_v15  ;;  %v1727_v0 = vsel %vm250_vm1, %v1593_v10, 0.0 }
 0x3cc   :  { %v1595_v41 = vmul.f32 %v3451_v43, %v4712_v15  ;;  %1728 = vadd.xlane.f32.xlu1 %v1727_v0 }
 0x3cd   :  { %3464 = vtanh.f32 %v1412_v55  ;;  %v1416_v55 = vadd.f32 %v1092_v16, %v4684_v52  ;;  %v1760_v29 = vsel %vm250_vm1, %v1604_v39, 0.0 }
 0x3ce   :  { %v3453_v25 = vpop.eup %3452  ;;  %3466 = vtanh.f32 %v1403_v4  ;;  %v4918_v4 = vpop.f32.mrf.mxu1 }
 0x3cf   :  { %1743 = vadd.xlane.f32.xlu0 %v1742_v9  ;;  %v1414_v9 = vadd.f32 %v1082_v56, %v4684_v52  ;;  %v3455_v54 = vpop.eup %3454  ;;  %v1102_v56 = vadd.f32 %v3281_v42, %v4680_v48  ;;  %v1606_v8 = vmul.f32 %v3453_v25, %v4712_v15  ;;  %v1733_v42 = vsel %vm250_vm1, %v1595_v41, 0.0 }
 0x3d0   :  { %v1597_v10 = vmul.f32 %v3455_v54, %v4712_v15  ;;  %1734 = vadd.xlane.f32.xlu1 %v1733_v42  ;;  %v1067_v25 = vadd.f32 %v4824_v21, %v4680_v48  ;;  %v4929_v35 = vpop.f32.mrf.mxu1 }
 0x3d1   :  { %3468 = vtanh.f32 %v1414_v9  ;;  %v1418_v9 = vadd.f32 %v1102_v56, %v4684_v52 }
 0x3d2   :  { %v3457_v38 = vpop.eup %3456  ;;  %3470 = vtanh.f32 %v1405_v58  ;;  %v1409_v58 = vadd.f32 %v1057_v20, %v4732_v53  ;;  %v1739_v0 = vsel %vm250_vm1, %v1597_v10, 0.0  ;;  %v1411_v20 = vadd.f32 %v1067_v25, %v4732_v53 }
 0x3d3   :  { %1749 = vadd.xlane.f32.xlu0 %v1748_v36  ;;  %v3284_v36 = vpop.f32.mrf.mxu0  ;;  %v3459_v43 = vpop.eup %3458  ;;  %3472 = vtanh.f32 %v1416_v55  ;;  %v1608_v18 = vmul.f32 %v3457_v38, %v4712_v15 }
 0x3d4   :  { %v1112_v16 = vadd.f32 %v3284_v36, %v4680_v48  ;;  %3474 = vtanh.f32 %v1407_v34  ;;  %v1599_v41 = vmul.f32 %v3459_v43, %v4712_v15  ;;  %1740 = vadd.xlane.f32.xlu1 %v1739_v0  ;;  %v4941_v38 = vpop.f32.mrf.mxu1 }
 0x3d5   :  { %3476 = vtanh.f32 %v1418_v9  ;;  %v1772_v55 = vsel %vm250_vm1, %v1608_v18, 0.0  ;;  %v907_v9 = vadd.f32 %v4646_v61, %v4680_v48  ;;  %v1122_v61 = vadd.f32 %v4710_v14, %v4680_v48 }
 0x3d6   :  { %v3461_v39 = vpop.eup %3460  ;;  %v1420_v56 = vadd.f32 %v1112_v16, %v4684_v52  ;;  %3478 = vtanh.f32 %v1409_v58  ;;  %v1745_v34 = vsel %vm250_vm1, %v1599_v41, 0.0  ;;  %v4953_v18 = vpop.f32.mrf.mxu1 }
 0x3d7   :  { %1755 = vadd.xlane.f32.xlu0 %v1754_v31  ;;  %v1766_v31 = vsel %vm250_vm1, %v1606_v8, 0.0  ;;  %v3463_v54 = vpop.eup %3462  ;;  %v1610_v36 = vmul.f32 %v3461_v39, %v4712_v15  ;;  %v1077_v8 = vadd.f32 %v4850_v24, %v4680_v48  ;;  %v1379_v41 = vadd.f32 %v907_v9, %v4732_v53 }
 0x3d8   :  { %v1601_v42 = vmul.f32 %v3463_v54, %v4712_v15  ;;  %3480 = vtanh.f32 %v1420_v56  ;;  %1746 = vadd.xlane.f32.xlu1 %v1745_v34  ;;  %v1132_v34 = vadd.f32 %v4720_v19, %v4680_v48 }
 0x3d9   :  { %v1413_v39 = vadd.f32 %v1077_v8, %v4732_v53  ;;  %3482 = vtanh.f32 %v1411_v20 }
 0x3da   :  { %v3465_v21 = vpop.eup %3464  ;;  %v1751_v25 = vsel %vm250_vm1, %v1601_v42, 0.0  ;;  %v1422_v42 = vadd.f32 %v1122_v61, %v4684_v52  ;;  %v1117_v61 = vadd.f32 %v4714_v32, %v4680_v48  ;;  %v1152_v32 = vadd.f32 %v4747_v50, %v4680_v48 }
 0x3db   :  { %1761 = vadd.xlane.f32.xlu0 %v1760_v29  ;;  %v887_v29 = vadd.f32 %v4613_v3, %v4680_v48  ;;  %v3467_v10 = vpop.eup %3466  ;;  %v1778_v3 = vsel %vm250_vm1, %v1610_v36, 0.0  ;;  %v1612_v16 = vmul.f32 %v3465_v21, %v4712_v15  ;;  %v4965_v36 = vpop.f32.mrf.mxu1  ;;  %v1162_v50 = vadd.f32 %v4762_v26, %v4680_v48 }
 0x3dc   :  { %v1603_v58 = vmul.f32 %v3467_v10, %v4712_v15  ;;  %1752 = vadd.xlane.f32.xlu1 %v1751_v25 }
 0x3dd   :  { %v1375_v43 = vadd.f32 %v887_v29, %v4732_v53  ;;  %v1106_v29 = vpop.f32.mrf.mxu0 }
 0x3de   :  { %v3469_v24 = vpop.eup %3468  ;;  %v1757_v8 = vsel %vm250_vm1, %v1603_v58, 0.0  ;;  %v1142_v58 = vadd.f32 %v4730_v51, %v4680_v48 }
 0x3df   :  { %1767 = vadd.xlane.f32.xlu0 %v1766_v31  ;;  %v1087_v31 = vadd.f32 %v4876_v40, %v4680_v48  ;;  %v3471_v0 = vpop.eup %3470  ;;  %3484 = vtanh.f32 %v1375_v43  ;;  %v1784_v40 = vsel %vm250_vm1, %v1612_v16, 0.0  ;;  %v1614_v54 = vmul.f32 %v3469_v24, %v4712_v15  ;;  %v4976_v16 = vpop.f32.mrf.mxu1 }
 0x3e0   :  { %v3473_v56 = vpop.eup %3472  ;;  %3486 = vtanh.f32 %v1413_v39  ;;  %v1605_v20 = vmul.f32 %v3471_v0, %v4712_v15  ;;  %1758 = vadd.xlane.f32.xlu1 %v1757_v8  ;;  %v1424_v39 = vadd.f32 %v1132_v34, %v4684_v52 }
 0x3e1   :  { %v1415_v21 = vadd.f32 %v1087_v31, %v4732_v53  ;;  %v3475_v14 = vpop.eup %3474  ;;  %3488 = vtanh.f32 %v1379_v41  ;;  %v1616_v10 = vmul.f32 %v3473_v56, %v4712_v15 }
 0x3e2   :  { %v3477_v43 = vpop.eup %3476  ;;  %v1763_v9 = vsel %vm250_vm1, %v1605_v20, 0.0  ;;  %v1607_v19 = vmul.f32 %v3475_v14, %v4712_v15  ;;  %v1421_v14 = vadd.f32 %v1117_v61, %v4732_v53 }
 0x3e3   :  { %1773 = vadd.xlane.f32.xlu0 %v1772_v55  ;;  %v1097_v55 = vadd.f32 %v4900_v45, %v4680_v48  ;;  %v1790_v45 = vsel %vm250_vm1, %v1614_v54, 0.0  ;;  %3490 = vtanh.f32 %v1415_v21  ;;  %v3479_v31 = vpop.eup %3478  ;;  %v1796_v0 = vsel %vm250_vm1, %v1616_v10, 0.0 }
 0x3e4   :  { %1764 = vadd.xlane.f32.xlu1 %v1763_v9  ;;  %3492 = vtanh.f32 %v1422_v42  ;;  %v1618_v41 = vmul.f32 %v3477_v43, %v4712_v15  ;;  %v1769_v56 = vsel %vm250_vm1, %v1607_v19, 0.0  ;;  %v1127_v42 = vadd.f32 %v4722_v22, %v4680_v48 }
 0x3e5   :  { %v1417_v24 = vadd.f32 %v1097_v55, %v4732_v53  ;;  %v3481_v25 = vpop.eup %3480  ;;  %v1609_v55 = vmul.f32 %v3479_v31, %v4712_v15  ;;  %v1137_v22 = vadd.f32 %v4740_v47, %v4680_v48 }
 0x3e6   :  { %v3483_v21 = vpop.eup %3482  ;;  %v1620_v51 = vmul.f32 %v3481_v25, %v4712_v15  ;;  %v1802_v8 = vsel %vm250_vm1, %v1618_v41, 0.0  ;;  %v1172_v41 = vadd.f32 %v4776_v28, %v4680_v48  ;;  %v1182_v28 = vadd.f32 %v4790_v33, %v4680_v48 }
 0x3e7   :  { %1779 = vadd.xlane.f32.xlu0 %v1778_v3  ;;  %v1107_v3 = vadd.f32 %v1106_v29, %v4680_v48  ;;  %3494 = vtanh.f32 %v1417_v24  ;;  %v1426_v29 = vadd.f32 %v1142_v58, %v4684_v52  ;;  %v1611_v10 = vmul.f32 %v3483_v21, %v4712_v15 }
 0x3e8   :  { %1770 = vadd.xlane.f32.xlu1 %v1769_v56  ;;  %3496 = vtanh.f32 %v1424_v39  ;;  %v1808_v24 = vsel %vm250_vm1, %v1620_v51, 0.0  ;;  %v1423_v39 = vadd.f32 %v1127_v42, %v4732_v53  ;;  %v1425_v56 = vadd.f32 %v1137_v22, %v4732_v53 }
 0x3e9   :  { %v1419_v54 = vadd.f32 %v1107_v3, %v4732_v53  ;;  %v1428_v3 = vadd.f32 %v1152_v32, %v4684_v52  ;;  %v1781_v26 = vsel %vm250_vm1, %v1611_v10, 0.0  ;;  %v1147_v21 = vadd.f32 %v4755_v12, %v4680_v48 }
 0x3ea   :  { %v1157_v12 = vadd.f32 %v4769_v27, %v4680_v48 }
 0x3eb   :  { %1785 = vadd.xlane.f32.xlu0 %v1784_v40  ;;  %v4988_v40 = vpop.f32.mrf.mxu1  ;;  %3498 = vtanh.f32 %v1419_v54  ;;  %v1427_v10 = vadd.f32 %v1147_v21, %v4732_v53 }
 0x3ec   :  { %v3485_v20 = vpop.eup %3484  ;;  %3500 = vtanh.f32 %v1426_v29  ;;  %v1429_v22 = vadd.f32 %v1157_v12, %v4732_v53  ;;  %v1187_v12 = vadd.f32 %v4831_v44, %v4680_v48  ;;  %v1197_v44 = vadd.f32 %v4857_v49, %v4680_v48 }
 0x3ed   :  { %v4999_v34 = vpop.f32.mrf.mxu1  ;;  %v3487_v43 = vpop.eup %3486  ;;  %v1575_v9 = vmul.f32 %v3485_v20, %v4712_v15  ;;  %3502 = vtanh.f32 %v1421_v14 }
 0x3ee   :  { %v3489_v19 = vpop.eup %3488  ;;  %v1613_v25 = vmul.f32 %v3487_v43, %v4712_v15  ;;  %3504 = vtanh.f32 %v1428_v3  ;;  %v1434_v3 = vadd.f32 %v1182_v28, %v4684_v52  ;;  %v1212_v28 = vadd.f32 %v4869_v37, %v4680_v48 }
 0x3ef   :  { %1791 = vadd.xlane.f32.xlu0 %v1790_v45  ;;  %v1775_v45 = vsel %vm250_vm1, %v1609_v55, 0.0  ;;  %v5012_v31 = vpop.f32.mrf.mxu1  ;;  %v1673_v47 = vsel %vm250_vm1, %v1575_v9, 0.0  ;;  %v1579_v61 = vmul.f32 %v3489_v19, %v4712_v15  ;;  %3506 = vtanh.f32 %v1423_v39 }
 0x3f0   :  { %1776 = vadd.xlane.f32.xlu1 %v1775_v45  ;;  %v3491_v58 = vpop.eup %3490  ;;  %v1787_v51 = vsel %vm250_vm1, %v1613_v25, 0.0  ;;  %v1222_v37 = vadd.f32 %v4894_v2, %v4680_v48 }
 0x3f1   :  { %v3493_v54 = vpop.eup %3492  ;;  %v5023_v55 = vpop.f32.mrf.mxu1  ;;  %v1615_v29 = vmul.f32 %v3491_v58, %v4712_v15  ;;  %v1685_v20 = vsel %vm250_vm1, %v1579_v61, 0.0 }
 0x3f2   :  { %v1622_v14 = vmul.f32 %v3493_v54, %v4712_v15 }
 0x3f3   :  { %1797 = vadd.xlane.f32.xlu0 %v1796_v0  ;;  %v1430_v0 = vadd.f32 %v1162_v50, %v4684_v52  ;;  %v5036_v45 = vpop.f32.mrf.mxu1  ;;  %v1793_v33 = vsel %vm250_vm1, %v1615_v29, 0.0 }
 0x3f4   :  { %1782 = vadd.xlane.f32.xlu1 %v1781_v26  ;;  %v3495_v32 = vpop.eup %3494  ;;  %v1814_v27 = vsel %vm250_vm1, %v1622_v14, 0.0  ;;  %v1167_v26 = vadd.f32 %v4783_v46, %v4680_v48  ;;  %v1177_v46 = vadd.f32 %v4802_v62, %v4680_v48 }
 0x3f5   :  { %3508 = vtanh.f32 %v1430_v0  ;;  %v3497_v42 = vpop.eup %3496  ;;  %v1617_v43 = vmul.f32 %v3495_v32, %v4712_v15  ;;  %v5047_v39 = vpop.f32.mrf.mxu1 }
 0x3f6   :  { %3510 = vtanh.f32 %v1425_v56  ;;  %v1624_v9 = vmul.f32 %v3497_v42, %v4712_v15  ;;  %v1431_v21 = vadd.f32 %v1167_v26, %v4732_v53  ;;  %v1433_v14 = vadd.f32 %v1177_v46, %v4732_v53 }
 0x3f7   :  { %1803 = vadd.xlane.f32.xlu0 %v1802_v8  ;;  %v1432_v8 = vadd.f32 %v1172_v41, %v4684_v52  ;;  %v1799_v25 = vsel %vm250_vm1, %v1617_v43, 0.0  ;;  %v5060_v56 = vpop.f32.mrf.mxu1 }
 0x3f8   :  { %1788 = vadd.xlane.f32.xlu1 %v1787_v51  ;;  %v3499_v50 = vpop.eup %3498 }
 0x3f9   :  { %3512 = vtanh.f32 %v1432_v8  ;;  %v3501_v19 = vpop.eup %3500  ;;  %v1619_v58 = vmul.f32 %v3499_v50, %v4712_v15  ;;  %v5071_v42 = vpop.f32.mrf.mxu1  ;;  %v1440_v50 = vadd.f32 %v1212_v28, %v4684_v52 }
 0x3fa   :  { %3514 = vtanh.f32 %v1427_v10  ;;  %v3503_v0 = vpop.eup %3502  ;;  %v1626_v61 = vmul.f32 %v3501_v19, %v4712_v15  ;;  %v1435_v19 = vadd.f32 %v1187_v12, %v4732_v53  ;;  %v1252_v12 = vadd.f32 %v4965_v36, %v4680_v48 }
 0x3fb   :  { %1809 = vadd.xlane.f32.xlu0 %v1808_v24  ;;  %v1192_v24 = vadd.f32 %v4817_v1, %v4680_v48  ;;  %v1202_v1 = vadd.f32 %v4843_v59, %v4680_v48  ;;  %3516 = vtanh.f32 %v1434_v3  ;;  %v3505_v54 = vpop.eup %3504  ;;  %v1805_v59 = vsel %vm250_vm1, %v1619_v58, 0.0 }
 0x3fc   :  { %1794 = vadd.xlane.f32.xlu1 %v1793_v33  ;;  %3518 = vtanh.f32 %v1429_v22  ;;  %v1621_v51 = vmul.f32 %v3503_v0, %v4712_v15  ;;  %v3507_v29 = vpop.eup %3506  ;;  %v1826_v62 = vsel %vm250_vm1, %v1626_v61, 0.0  ;;  %v1628_v8 = vmul.f32 %v3505_v54, %v4712_v15 }
 0x3fd   :  { %v1436_v41 = vadd.f32 %v1192_v24, %v4684_v52  ;;  %v1438_v32 = vadd.f32 %v1202_v1, %v4684_v52  ;;  %v1623_v33 = vmul.f32 %v3507_v29, %v4712_v15  ;;  %v1232_v58 = vadd.f32 %v4918_v4, %v4680_v48 }
 0x3fe   :  { %v1811_v10 = vsel %vm250_vm1, %v1621_v51, 0.0  ;;  %v1832_v3 = vsel %vm250_vm1, %v1628_v8, 0.0  ;;  %v1207_v61 = vadd.f32 %v4883_v63, %v4680_v48  ;;  %v1242_v4 = vadd.f32 %v4941_v38, %v4680_v48 }
 0x3ff   :  { %1674 = vadd.xlane.f32.xlu0 %v1673_v47  ;;  %v1820_v47 = vsel %vm250_vm1, %v1624_v9, 0.0  ;;  %3520 = vtanh.f32 %v1436_v41  ;;  %v5084_v9 = vpop.f32.mrf.mxu1  ;;  %v1817_v2 = vsel %vm250_vm1, %v1623_v33, 0.0  ;;  %v1437_v41 = vadd.f32 %v1197_v44, %v4732_v53 }
 0x400   :  { %1800 = vadd.xlane.f32.xlu1 %v1799_v25  ;;  %3522 = vtanh.f32 %v1431_v21  ;;  %v1442_v25 = vadd.f32 %v1222_v37, %v4684_v52  ;;  %v1217_v63 = vadd.f32 %v4907_v13, %v4680_v48  ;;  %v1262_v36 = vadd.f32 %v4988_v40, %v4680_v48 }
 0x401   :  { %3524 = vtanh.f32 %v1438_v32  ;;  %v1448_v44 = vadd.f32 %v1252_v12, %v4684_v52 }
 0x402   :  { %3526 = vtanh.f32 %v1433_v14  ;;  %v1446_v14 = vadd.f32 %v1242_v4, %v4684_v52 }
 0x403   :  { %1686 = vadd.xlane.f32.xlu0 %v1685_v20  ;;  %v3509_v20 = vpop.eup %3508  ;;  %3528 = vtanh.f32 %v1440_v50  ;;  %v1227_v50 = vadd.f32 %v4929_v35, %v4680_v48  ;;  %v1237_v35 = vadd.f32 %v4953_v18, %v4680_v48 }
 0x404   :  { %1806 = vadd.xlane.f32.xlu1 %v1805_v59  ;;  %v3511_v43 = vpop.eup %3510  ;;  %v1630_v24 = vmul.f32 %v3509_v20, %v4712_v15  ;;  %3530 = vtanh.f32 %v1435_v19  ;;  %v1444_v59 = vadd.f32 %v1232_v58, %v4684_v52 }
 0x405   :  { %v1625_v22 = vmul.f32 %v3511_v43, %v4712_v15  ;;  %3532 = vtanh.f32 %v1442_v25  ;;  %v1441_v43 = vadd.f32 %v1217_v63, %v4732_v53  ;;  %v1443_v25 = vadd.f32 %v1227_v50, %v4732_v53 }
 0x406   :  { %v1838_v49 = vsel %vm250_vm1, %v1630_v24, 0.0  ;;  %3534 = vtanh.f32 %v1437_v41 }
 0x407   :  { %1815 = vadd.xlane.f32.xlu0 %v1814_v27  ;;  %v3513_v27 = vpop.eup %3512  ;;  %v1823_v54 = vsel %vm250_vm1, %v1625_v22, 0.0  ;;  %3536 = vtanh.f32 %v1444_v59 }
 0x408   :  { %1812 = vadd.xlane.f32.xlu1 %v1811_v10  ;;  %v3515_v26 = vpop.eup %3514  ;;  %v1632_v0 = vmul.f32 %v3513_v27, %v4712_v15 }
 0x409   :  { %v3517_v1 = vpop.eup %3516  ;;  %v1627_v46 = vmul.f32 %v3515_v26, %v4712_v15 }
 0x40a   :  { %v3519_v21 = vpop.eup %3518  ;;  %v1844_v51 = vsel %vm250_vm1, %v1632_v0, 0.0  ;;  %v1634_v29 = vmul.f32 %v3517_v1, %v4712_v15  ;;  %v1450_v0 = vadd.f32 %v1262_v36, %v4684_v52  ;;  %v1272_v1 = vadd.f32 %v5012_v31, %v4680_v48 }
 0x40b   :  { %1821 = vadd.xlane.f32.xlu0 %v1820_v47  ;;  %v5095_v47 = vpop.f32.mrf.mxu1  ;;  %v1829_v38 = vsel %vm250_vm1, %v1627_v46, 0.0  ;;  %v1629_v8 = vmul.f32 %v3519_v21, %v4712_v15  ;;  %v1247_v21 = vadd.f32 %v4976_v16, %v4680_v48  ;;  %v1282_v31 = vadd.f32 %v5036_v45, %v4680_v48 }
 0x40c   :  { %1818 = vadd.xlane.f32.xlu1 %v1817_v2  ;;  %v3521_v32 = vpop.eup %3520  ;;  %v1850_v13 = vsel %vm250_vm1, %v1634_v29, 0.0  ;;  %v1452_v29 = vadd.f32 %v1272_v1, %v4684_v52  ;;  %v1257_v16 = vadd.f32 %v4999_v34, %v4680_v48 }
 0x40d   :  { %v5108_v28 = vpop.f32.mrf.mxu1  ;;  %v3523_v20 = vpop.eup %3522  ;;  %v1636_v10 = vmul.f32 %v3521_v32, %v4712_v15  ;;  %v1454_v12 = vadd.f32 %v1282_v31, %v4684_v52 }
 0x40e   :  { %v3525_v33 = vpop.eup %3524  ;;  %v1631_v24 = vmul.f32 %v3523_v20, %v4712_v15 }
 0x40f   :  { %1827 = vadd.xlane.f32.xlu0 %v1826_v62  ;;  %v1439_v62 = vadd.f32 %v1207_v61, %v4732_v53  ;;  %v5119_v37 = vpop.f32.mrf.mxu1  ;;  %v3527_v27 = vpop.eup %3526  ;;  %v1856_v19 = vsel %vm250_vm1, %v1636_v10, 0.0  ;;  %v1638_v2 = vmul.f32 %v3525_v33, %v4712_v15 }
 0x410   :  { %1824 = vadd.xlane.f32.xlu1 %v1823_v54  ;;  %v3529_v22 = vpop.eup %3528  ;;  %v1841_v40 = vsel %vm250_vm1, %v1631_v24, 0.0  ;;  %v1633_v58 = vmul.f32 %v3527_v27, %v4712_v15  ;;  %v1445_v54 = vadd.f32 %v1237_v35, %v4732_v53 }
 0x411   :  { %3538 = vtanh.f32 %v1439_v62  ;;  %v5132_v26 = vpop.f32.mrf.mxu1  ;;  %v1862_v18 = vsel %vm250_vm1, %v1638_v2, 0.0  ;;  %v1640_v41 = vmul.f32 %v3529_v22, %v4712_v15 }
 0x412   :  { %3540 = vtanh.f32 %v1446_v14  ;;  %v1847_v4 = vsel %vm250_vm1, %v1633_v58, 0.0 }
 0x413   :  { %1833 = vadd.xlane.f32.xlu0 %v1832_v3  ;;  %v1835_v3 = vsel %vm250_vm1, %v1629_v8, 0.0  ;;  %3542 = vtanh.f32 %v1441_v43  ;;  %v5143_v46 = vpop.f32.mrf.mxu1  ;;  %v1868_v32 = vsel %vm250_vm1, %v1640_v41, 0.0  ;;  %v1447_v8 = vadd.f32 %v1247_v21, %v4732_v53 }
 0x414   :  { %1830 = vadd.xlane.f32.xlu1 %v1829_v38  ;;  %3544 = vtanh.f32 %v1448_v44  ;;  %v1449_v43 = vadd.f32 %v1257_v16, %v4732_v53  ;;  %v1302_v44 = vadd.f32 %v5084_v9, %v4680_v48 }
 0x415   :  { %3546 = vtanh.f32 %v1443_v25  ;;  %v5156_v38 = vpop.f32.mrf.mxu1 }
 0x416   :  { %3548 = vtanh.f32 %v1450_v0  ;;  %v1458_v1 = vadd.f32 %v1302_v44, %v4684_v52 }
 0x417   :  { %1839 = vadd.xlane.f32.xlu0 %v1838_v49  ;;  %v3531_v49 = vpop.eup %3530  ;;  %3550 = vtanh.f32 %v1445_v54  ;;  %v5167_v50 = vpop.f32.mrf.mxu1 }
 0x418   :  { %1836 = vadd.xlane.f32.xlu1 %v1835_v3  ;;  %v3533_v61 = vpop.eup %3532  ;;  %v1635_v59 = vmul.f32 %v3531_v49, %v4712_v15  ;;  %3552 = vtanh.f32 %v1452_v29  ;;  %v1267_v3 = vadd.f32 %v5023_v55, %v4680_v48  ;;  %v1277_v55 = vadd.f32 %v5047_v39, %v4680_v48 }
 0x419   :  { %v1642_v63 = vmul.f32 %v3533_v61, %v4712_v15  ;;  %3554 = vtanh.f32 %v1447_v8  ;;  %v3353_v25 = vpop.f32.mrf.mxu1 }
 0x41a   :  { %v1853_v45 = vsel %vm250_vm1, %v1635_v59, 0.0  ;;  %3556 = vtanh.f32 %v1454_v12  ;;  %v1453_v54 = vadd.f32 %v1277_v55, %v4732_v53 }
 0x41b   :  { %1845 = vadd.xlane.f32.xlu0 %v1844_v51  ;;  %v3535_v51 = vpop.eup %3534  ;;  %v1874_v34 = vsel %vm250_vm1, %v1642_v63, 0.0  ;;  %3558 = vtanh.f32 %v1449_v43  ;;  %v5193_v21 = vpop.f32.mrf.mxu1 }
 0x41c   :  { %1842 = vadd.xlane.f32.xlu1 %v1841_v40  ;;  %v3537_v62 = vpop.eup %3536  ;;  %v1637_v20 = vmul.f32 %v3535_v51, %v4712_v15  ;;  %v1451_v40 = vadd.f32 %v1267_v3, %v4732_v53  ;;  %v1307_v3 = vadd.f32 %v5119_v37, %v4680_v48  ;;  %v1342_v37 = vadd.f32 %v3353_v25, %v4680_v48 }
 0x41d   :  { %v1644_v10 = vmul.f32 %v3537_v62, %v4712_v15  ;;  %v3356_v8 = vpop.f32.mrf.mxu1 }
 0x41e   :  { %v3539_v14 = vpop.eup %3538  ;;  %v1859_v24 = vsel %vm250_vm1, %v1637_v20, 0.0 }
 0x41f   :  { %1851 = vadd.xlane.f32.xlu0 %v1850_v13  ;;  %v1292_v13 = vadd.f32 %v5060_v56, %v4680_v48  ;;  %v3541_v33 = vpop.eup %3540  ;;  %v1639_v27 = vmul.f32 %v3539_v14, %v4712_v15  ;;  %v1880_v2 = vsel %vm250_vm1, %v1644_v10, 0.0  ;;  %v1332_v10 = vadd.f32 %v5156_v38, %v4680_v48 }
 0x420   :  { %1848 = vadd.xlane.f32.xlu1 %v1847_v4  ;;  %v3543_v56 = vpop.eup %3542  ;;  %v1646_v22 = vmul.f32 %v3541_v33, %v4712_v15  ;;  %v1287_v4 = vadd.f32 %v5071_v42, %v4680_v48  ;;  %v1297_v42 = vadd.f32 %v5095_v47, %v4680_v48 }
 0x421   :  { %v3545_v35 = vpop.eup %3544  ;;  %v1865_v58 = vsel %vm250_vm1, %v1639_v27, 0.0  ;;  %v1641_v9 = vmul.f32 %v3543_v56, %v4712_v15 }
 0x422   :  { %v3547_v0 = vpop.eup %3546  ;;  %v1886_v39 = vsel %vm250_vm1, %v1646_v22, 0.0  ;;  %v1648_v41 = vmul.f32 %v3545_v35, %v4712_v15  ;;  %v1457_v43 = vadd.f32 %v1297_v42, %v4732_v53  ;;  %v1464_v22 = vadd.f32 %v1332_v10, %v4684_v52 }
 0x423   :  { %1857 = vadd.xlane.f32.xlu0 %v1856_v19  ;;  %v1456_v19 = vadd.f32 %v1292_v13, %v4684_v52  ;;  %v3549_v61 = vpop.eup %3548  ;;  %v1871_v59 = vsel %vm250_vm1, %v1641_v9, 0.0  ;;  %v1317_v9 = vadd.f32 %v5143_v46, %v4680_v48 }
 0x424   :  { %1854 = vadd.xlane.f32.xlu1 %v1853_v45  ;;  %v3551_v31 = vpop.eup %3550  ;;  %v1892_v63 = vsel %vm250_vm1, %v1648_v41, 0.0  ;;  %v1650_v62 = vmul.f32 %v3549_v61, %v4712_v15  ;;  %v1455_v45 = vadd.f32 %v1287_v4, %v4732_v53  ;;  %v1466_v61 = vadd.f32 %v1342_v37, %v4684_v52 }
 0x425   :  { %3560 = vtanh.f32 %v1456_v19  ;;  %v3553_v16 = vpop.eup %3552  ;;  %v1645_v14 = vmul.f32 %v3551_v31, %v4712_v15  ;;  %v1461_v31 = vadd.f32 %v1317_v9, %v4732_v53 }
 0x426   :  { %3562 = vtanh.f32 %v1451_v40  ;;  %v1898_v47 = vsel %vm250_vm1, %v1650_v62, 0.0  ;;  %v1652_v33 = vmul.f32 %v3553_v16, %v4712_v15  ;;  %v1459_v40 = vadd.f32 %v1307_v3, %v4732_v53 }
 0x427   :  { %1863 = vadd.xlane.f32.xlu0 %v1862_v18  ;;  %v1312_v18 = vadd.f32 %v5108_v28, %v4680_v48  ;;  %v1643_v28 = vmul.f32 %v3547_v0, %v4712_v15  ;;  %3564 = vtanh.f32 %v1458_v1  ;;  %v1883_v27 = vsel %vm250_vm1, %v1645_v14, 0.0 }
 0x428   :  { %1860 = vadd.xlane.f32.xlu1 %v1859_v24  ;;  %3566 = vtanh.f32 %v1453_v54  ;;  %v5221_v24 = vpop.f32.mrf.mxu1  ;;  %v1904_v35 = vsel %vm250_vm1, %v1652_v33, 0.0  ;;  %v1352_v54 = vadd.f32 %v3356_v8, %v4680_v48  ;;  %v337_v16 = vsub.s32 2, %v4121_v30 }
 0x429   :  { %v1460_v29 = vadd.f32 %v1312_v18, %v4684_v52  ;;  %v1877_v20 = vsel %vm250_vm1, %v1643_v28, 0.0 }
 0x42b   :  { %1869 = vadd.xlane.f32.xlu0 %v1868_v32  ;;  %v1322_v32 = vadd.f32 %v5132_v26, %v4680_v48  ;;  %v3555_v26 = vpop.eup %3554  ;;  %3568 = vtanh.f32 %v1460_v29  ;;  %v1327_v29 = vadd.f32 %v5167_v50, %v4680_v48 }
 0x42c   :  { %1866 = vadd.xlane.f32.xlu1 %v1865_v58  ;;  %v3557_v13 = vpop.eup %3556  ;;  %3570 = vtanh.f32 %v1455_v45  ;;  %v1647_v44 = vmul.f32 %v3555_v26, %v4712_v15  ;;  %v3359_v58 = vpop.f32.mrf.mxu1  ;;  %v1468_v45 = vadd.f32 %v1352_v54, %v4684_v52 }
 0x42d   :  { %v3559_v19 = vpop.eup %3558  ;;  %v1463_v30 = vadd.f32 %v1327_v29, %v4732_v53 }
 0x42e   :  { %v5224_v56 = vpop.xlane.xlu1 %1677  ;;  %v1889_v0 = vsel %vm250_vm1, %v1647_v44, 0.0  ;;  %v1649_v1 = vmul.f32 %v3559_v19, %v4712_v15 }
 0x42f   :  { %1875 = vadd.xlane.f32.xlu0 %v1874_v34  ;;  %v1462_v34 = vadd.f32 %v1322_v32, %v4684_v52 }
 0x430   :  { %v5173_v36 = vpop.xlane.xlu0 %1689  ;;  %1872 = vadd.xlane.f32.xlu1 %v1871_v59  ;;  %v1356_v59 = vpop.f32.mrf.mxu1  ;;  %v1895_v32 = vsel %vm250_vm1, %v1649_v1, 0.0 }
 0x431   :  { %7027 = vst [vmem:[#allocation15_spill] sm:$0xff] %v5173_v36  ;;  %3572 = vtanh.f32 %v1462_v34  ;;  %v1337_v34 = vadd.f32 %v5193_v21, %v4680_v48 }
 0x432   :  { %v3561_v55 = vpop.eup %3560  ;;  %3574 = vtanh.f32 %v1457_v43  ;;  %v3362_v26 = vpop.f32.mrf.mxu1  ;;  %v3808_v43 = vld [vmem:[%s6913_s7] sm:$0xf] }
 0x433   :  { %1881 = vadd.xlane.f32.xlu0 %v1880_v2  ;;  %v1654_v2 = vmul.f32 %v3557_v13, %v4712_v15  ;;  %3576 = vtanh.f32 %v1464_v22  ;;  %v1656_v46 = vmul.f32 %v3561_v55, %v4712_v15  ;;  %v338_v3 = vrot.slane %v3808_v43, %v337_v16 }
 0x434   :  { %v5185_v49 = vpop.xlane.xlu0 %1683  ;;  %1878 = vadd.xlane.f32.xlu1 %v1877_v20  ;;  %3578 = vtanh.f32 %v1459_v40  ;;  %v1362_v20 = vadd.f32 %v3359_v58, %v4680_v48  ;;  %v1372_v19 = vadd.f32 %v3362_v26, %v4680_v48  ;;  %v1465_v55 = vadd.f32 %v1337_v34, %v4732_v53  ;;  %v1366_v29 = vpop.f32.mrf.mxu1 }
 0x435   :  { %7028 = vst [vmem:[#allocation16_spill] sm:$0xff] %v5185_v49  ;;  %v1910_v25 = vsel %vm250_vm1, %v1654_v2, 0.0  ;;  %3580 = vtanh.f32 %v1466_v61  ;;  %v1916_v50 = vsel %vm250_vm1, %v1656_v46, 0.0  ;;  %v1347_v40 = vadd.f32 %v5221_v24, %v4680_v48 }
 0x436   :  { %v5243_v4 = vpop.xlane.xlu1 %1680  ;;  %3582 = vtanh.f32 %v1461_v31  ;;  %v1470_v44 = vadd.f32 %v1362_v20, %v4684_v52  ;;  %v1472_v1 = vadd.f32 %v1372_v19, %v4684_v52  ;;  %v1367_v20 = vadd.f32 %v1366_v29, %v4680_v48 }
 0x437   :  { %1887 = vadd.xlane.f32.xlu0 %v1886_v39  ;;  %v3563_v39 = vpop.eup %3562  ;;  %7031 = vst [vmem:[#allocation19_spill] sm:$0xff] %v5243_v4  ;;  %3584 = vtanh.f32 %v1468_v45  ;;  %v1467_v46 = vadd.f32 %v1347_v40, %v4732_v53 }
 0x438   :  { %v5199_v51 = vpop.xlane.xlu0 %1695  ;;  %1884 = vadd.xlane.f32.xlu1 %v1883_v27  ;;  %v3565_v41 = vpop.eup %3564  ;;  %3586 = vtanh.f32 %v1463_v30 }
 0x439   :  { %7029 = vst [vmem:[#allocation17_spill] sm:$0xff] %v5199_v51  ;;  %v3567_v28 = vpop.eup %3566  ;;  %v1658_v42 = vmul.f32 %v3565_v41, %v4712_v15  ;;  %3588 = vtanh.f32 %v1470_v44 }
 0x43a   :  { %v3569_v8 = vpop.eup %3568  ;;  %v5257_v14 = vpop.xlane.xlu1 %1692  ;;  %v1653_v13 = vmul.f32 %v3567_v28, %v4712_v15  ;;  %3590 = vtanh.f32 %v1465_v55 }
 0x43b   :  { %1893 = vadd.xlane.f32.xlu0 %v1892_v63  ;;  %v1651_v63 = vmul.f32 %v3563_v39, %v4712_v15  ;;  %7033 = vst [vmem:[#allocation21_spill] sm:$0xff] %v5257_v14  ;;  %v3571_v33 = vpop.eup %3570  ;;  %v1922_v27 = vsel %vm250_vm1, %v1658_v42, 0.0  ;;  %v1660_v21 = vmul.f32 %v3569_v8, %v4712_v15  ;;  %3592 = vtanh.f32 %v1472_v1 }
 0x43c   :  { %v5211_v12 = vpop.xlane.xlu0 %1701  ;;  %1890 = vadd.xlane.f32.xlu1 %v1889_v0  ;;  %v1907_v37 = vsel %vm250_vm1, %v1653_v13, 0.0  ;;  %v1655_v58 = vmul.f32 %v3571_v33, %v4712_v15  ;;  %v417_v0 = vadd.f32 %v4697_v6, %v338_v3  ;;  %v1357_v6 = vadd.f32 %v1356_v59, %v4680_v48 }
 0x43d   :  { %v1901_v10 = vsel %vm250_vm1, %v1651_v63, 0.0  ;;  %3594 = vtanh.f32 %v1467_v46  ;;  %v412_v33 = vadd.f32 %v4704_v11, %v338_v3  ;;  %v1471_v48 = vadd.f32 %v1367_v20, %v4732_v53 }
 0x43e   :  { %v3573_v22 = vpop.eup %3572  ;;  %v1913_v28 = vsel %vm250_vm1, %v1655_v58, 0.0  ;;  %v1469_v59 = vadd.f32 %v1357_v6, %v4732_v53 }
 0x43f   :  { %1899 = vadd.xlane.f32.xlu0 %v1898_v47  ;;  %v5273_v2 = vpop.xlane.xlu1 %1698  ;;  %v1662_v41 = vmul.f32 %v3573_v22, %v4712_v15  ;;  %v1967_v11 = vadd.f32 %v412_v33, %v4732_v53 }
 0x440   :  { %v5227_v38 = vpop.xlane.xlu0 %1707  ;;  %1896 = vadd.xlane.f32.xlu1 %v1895_v32  ;;  %7034 = vst [vmem:[#allocation22_spill] sm:$0xff] %v5273_v2  ;;  %v1968_v32 = vadd.f32 %v417_v0, %v4684_v52 }
 0x441   :  { %v1934_v16 = vsel %vm250_vm1, %v1662_v41, 0.0 }
 0x442   :  { %3596 = vtanh.f32 %v1968_v32 }
 0x443   :  { %1905 = vadd.xlane.f32.xlu0 %v1904_v35  ;;  %v3575_v35 = vpop.eup %3574  ;;  %3598 = vtanh.f32 %v1469_v59 }
 0x444   :  { %v5238_v18 = vpop.xlane.xlu0 %1713  ;;  %1902 = vadd.xlane.f32.xlu1 %v1901_v10  ;;  %v3577_v61 = vpop.eup %3576  ;;  %v1657_v54 = vmul.f32 %v3575_v35, %v4712_v15  ;;  %3600 = vtanh.f32 %v1471_v48 }
 0x445   :  { %7030 = vst [vmem:[#allocation18_spill] sm:$0xff] %v5238_v18  ;;  %v5285_v39 = vpop.xlane.xlu1 %1704  ;;  %v3579_v24 = vpop.eup %3578  ;;  %v1664_v42 = vmul.f32 %v3577_v61, %v4712_v15  ;;  %3602 = vtanh.f32 %v1967_v11 }
 0x446   :  { %v3581_v8 = vpop.eup %3580  ;;  %v1919_v45 = vsel %vm250_vm1, %v1657_v54, 0.0 }
 0x447   :  { %1911 = vadd.xlane.f32.xlu0 %v1910_v25  ;;  %v1928_v25 = vsel %vm250_vm1, %v1660_v21, 0.0  ;;  %v3583_v52 = vpop.eup %3582  ;;  %v1940_v30 = vsel %vm250_vm1, %v1664_v42, 0.0  ;;  %v1666_v34 = vmul.f32 %v3581_v8, %v4712_v15 }
 0x448   :  { %v5251_v62 = vpop.xlane.xlu0 %1719  ;;  %1908 = vadd.xlane.f32.xlu1 %v1907_v37  ;;  %v3585_v10 = vpop.eup %3584 }
 0x449   :  { %7032 = vst [vmem:[#allocation20_spill] sm:$0xff] %v5251_v62  ;;  %v5296_v63 = vpop.xlane.xlu1 %1710  ;;  %v3587_v19 = vpop.eup %3586  ;;  %v1946_v22 = vsel %vm250_vm1, %v1666_v34, 0.0  ;;  %v1668_v37 = vmul.f32 %v3585_v10, %v4712_v15 }
 0x44a   :  { %7037 = vst [vmem:[#allocation25_spill] sm:$0xff] %v5296_v63  ;;  %v3589_v35 = vpop.eup %3588  ;;  %v1663_v55 = vmul.f32 %v3587_v19, %v4712_v15 }
 0x44b   :  { %1917 = vadd.xlane.f32.xlu0 %v1916_v50  ;;  %v1659_v50 = vmul.f32 %v3579_v24, %v4712_v15  ;;  %v3591_v58 = vpop.eup %3590  ;;  %v1952_v1 = vsel %vm250_vm1, %v1668_v37, 0.0 }
 0x44c   :  { %v5265_v47 = vpop.xlane.xlu0 %1725  ;;  %1914 = vadd.xlane.f32.xlu1 %v1913_v28  ;;  %v3593_v41 = vpop.eup %3592  ;;  %v1937_v53 = vsel %vm250_vm1, %v1663_v55, 0.0  ;;  %v1665_v61 = vmul.f32 %v3591_v58, %v4712_v15 }
 0x44d   :  { %v5306_v13 = vpop.xlane.xlu1 %1716  ;;  %v1925_v43 = vsel %vm250_vm1, %v1659_v50, 0.0  ;;  %v3595_v24 = vpop.eup %3594  ;;  %v1672_v28 = vmul.f32 %v3593_v41, %v4712_v15 }
 0x44e   :  { %v1943_v32 = vsel %vm250_vm1, %v1665_v61, 0.0 }
 0x44f   :  { %1923 = vadd.xlane.f32.xlu0 %v1922_v27  ;;  %v1661_v27 = vmul.f32 %v3583_v52, %v4712_v15  ;;  %v3597_v29 = vpop.eup %3596  ;;  %v1964_v59 = vsel %vm250_vm1, %v1672_v28, 0.0 }
 0x450   :  { %v5281_v9 = vpop.xlane.xlu0 %1731  ;;  %1920 = vadd.xlane.f32.xlu1 %v1919_v45  ;;  %v3599_v8 = vpop.eup %3598  ;;  %v1972_v20 = vmul.f32 %v3597_v29, %v4712_v15 }
 0x451   :  { %7035 = vst [vmem:[#allocation23_spill] sm:$0xff] %v5281_v9  ;;  %v5316_v21 = vpop.xlane.xlu1 %1722  ;;  %v1931_v3 = vsel %vm250_vm1, %v1661_v27, 0.0  ;;  %v1669_v52 = vmul.f32 %v3599_v8, %v4712_v15  ;;  %v3601_v34 = vpop.eup %3600 }
 0x452   :  { %7040 = vst [vmem:[#allocation28_spill] sm:$0xff] %v5316_v21  ;;  %v1976_v33 = vsel %vm250_vm1, %v1972_v20, 0.0  ;;  %v3603_v19 = vpop.eup %3602 }
 0x453   :  { %1929 = vadd.xlane.f32.xlu0 %v1928_v25  ;;  %v1670_v25 = vmul.f32 %v3589_v35, %v4712_v15  ;;  %v1955_v48 = vsel %vm250_vm1, %v1669_v52, 0.0  ;;  %v1971_v35 = vmul.f32 %v3603_v19, %v4712_v15 }
 0x454   :  { %v5293_v31 = vpop.xlane.xlu0 %1737  ;;  %1926 = vadd.xlane.f32.xlu1 %v1925_v43  ;;  %v1671_v43 = vmul.f32 %v3601_v34, %v4712_v15 }
 0x455   :  { %7036 = vst [vmem:[#allocation24_spill] sm:$0xff] %v5293_v31  ;;  %v5325_v0 = vpop.xlane.xlu1 %1728  ;;  %v1958_v6 = vsel %vm250_vm1, %v1670_v25, 0.0  ;;  %v1973_v55 = vsel %vm250_vm1, %v1971_v35, 0.0 }
 0x456   :  { %v1961_v37 = vsel %vm250_vm1, %v1671_v43, 0.0 }
 0x457   :  { %1935 = vadd.xlane.f32.xlu0 %v1934_v16  ;;  %v1667_v16 = vmul.f32 %v3595_v24, %v4712_v15 }
 0x458   :  { %v5304_v26 = vpop.xlane.xlu0 %1743  ;;  %1932 = vadd.xlane.f32.xlu1 %v1931_v3 }
 0x459   :  { %7038 = vst [vmem:[#allocation26_spill] sm:$0xff] %v5304_v26  ;;  %v5333_v46 = vpop.xlane.xlu1 %1734  ;;  %v1949_v50 = vsel %vm250_vm1, %v1667_v16, 0.0 }
 0x45a   :  { %7043 = vst [vmem:[#allocation31_spill] sm:$0xff] %v5333_v46 }
 0x45b   :  { %1941 = vadd.xlane.f32.xlu0 %v1940_v30 }
 0x45c   :  { %v5314_v44 = vpop.xlane.xlu0 %1749  ;;  %1938 = vadd.xlane.f32.xlu1 %v1937_v53 }
 0x45d   :  { %7039 = vst [vmem:[#allocation27_spill] sm:$0xff] %v5314_v44  ;;  %v5341_v45 = vpop.xlane.xlu1 %1740 }
 0x45f   :  { %1947 = vadd.xlane.f32.xlu0 %v1946_v22 }
 0x460   :  { %v5323_v40 = vpop.xlane.xlu0 %1755  ;;  %1944 = vadd.xlane.f32.xlu1 %v1943_v32 }
 0x461   :  { %7041 = vst [vmem:[#allocation29_spill] sm:$0xff] %v5323_v40  ;;  %v5349_v10 = vpop.xlane.xlu1 %1746 }
 0x462   :  { %7046 = vst [vmem:[#allocation34_spill] sm:$0xff] %v5349_v10 }
 0x463   :  { %1953 = vadd.xlane.f32.xlu0 %v1952_v1 }
 0x464   :  { %v5331_v54 = vpop.xlane.xlu0 %1761  ;;  %1950 = vadd.xlane.f32.xlu1 %v1949_v50 }
 0x465   :  { %7042 = vst [vmem:[#allocation30_spill] sm:$0xff] %v5331_v54  ;;  %v5356_v22 = vpop.xlane.xlu1 %1752 }
 0x467   :  { %1959 = vadd.xlane.f32.xlu0 %v1958_v6 }
 0x468   :  { %v5339_v42 = vpop.xlane.xlu0 %1767  ;;  %1956 = vadd.xlane.f32.xlu1 %v1955_v48 }
 0x469   :  { %7044 = vst [vmem:[#allocation32_spill] sm:$0xff] %v5339_v42  ;;  %v5362_v3 = vpop.xlane.xlu1 %1758 }
 0x46a   :  { %7049 = vst [vmem:[#allocation37_spill] sm:$0xff] %v5362_v3 }
 0x46b   :  { %1965 = vadd.xlane.f32.xlu0 %v1964_v59 }
 0x46c   :  { %v5347_v30 = vpop.xlane.xlu0 %1773  ;;  %1962 = vadd.xlane.f32.xlu1 %v1961_v37 }
 0x46d   :  { %7045 = vst [vmem:[#allocation33_spill] sm:$0xff] %v5347_v30  ;;  %v5367_v1 = vpop.xlane.xlu1 %1764 }
 0x46f   :  { %1977 = vadd.xlane.f32.xlu0 %v1976_v33 }
 0x470   :  { %v5354_v27 = vpop.xlane.xlu0 %1779  ;;  %1974 = vadd.xlane.f32.xlu1 %v1973_v55 }
 0x471   :  { %7047 = vst [vmem:[#allocation35_spill] sm:$0xff] %v5354_v27  ;;  %v5371_v41 = vpop.xlane.xlu1 %1770 }
 0x472   :  { %7052 = vst [vmem:[#allocation40_spill] sm:$0xff] %v5371_v41 }
 0x474   :  { %v5360_v11 = vpop.xlane.xlu0 %1785 }
 0x475   :  { %7048 = vst [vmem:[#allocation36_spill] sm:$0xff] %v5360_v11 }
 0x478   :  { %v5365_v58 = vpop.xlane.xlu0 %1791 }
 0x479   :  { %7050 = vst [vmem:[#allocation38_spill] sm:$0xff] %v5365_v58  ;;  %v5375_v61 = vpop.xlane.xlu1 %1776 }
 0x47a   :  { %7054 = vst [vmem:[#allocation42_spill] sm:$0xff] %v5375_v61 }
 0x47c   :  { %v5369_v25 = vpop.xlane.xlu0 %1797 }
 0x47d   :  { %7051 = vst [vmem:[#allocation39_spill] sm:$0xff] %v5369_v25  ;;  %v5379_v24 = vpop.xlane.xlu1 %1782 }
 0x47e   :  { %7056 = vst [vmem:[#allocation44_spill] sm:$0xff] %v5379_v24 }
 0x480   :  { %v5373_v53 = vpop.xlane.xlu0 %1803 }
 0x481   :  { %7053 = vst [vmem:[#allocation41_spill] sm:$0xff] %v5373_v53  ;;  %v5383_v28 = vpop.xlane.xlu1 %1788 }
 0x484   :  { %v5377_v15 = vpop.xlane.xlu0 %1809 }
 0x485   :  { %7055 = vst [vmem:[#allocation43_spill] sm:$0xff] %v5377_v15  ;;  %v5387_v32 = vpop.xlane.xlu1 %1794 }
 0x486   :  { %7059 = vst [vmem:[#allocation47_spill] sm:$0xff] %v5387_v32 }
 0x488   :  { %v5381_v6 = vpop.xlane.xlu0 %1674 }
 0x489   :  { %7057 = vst [vmem:[#allocation45_spill] sm:$0xff] %v5381_v6  ;;  %v5391_v8 = vpop.xlane.xlu1 %1800 }
 0x48c   :  { %v5385_v29 = vpop.xlane.xlu0 %1686 }
 0x48d   :  { %7058 = vst [vmem:[#allocation46_spill] sm:$0xff] %v5385_v29  ;;  %v5395_v20 = vpop.xlane.xlu1 %1806 }
 0x48e   :  { %7062 = vst [vmem:[#allocation50_spill] sm:$0xff] %v5395_v20 }
 0x490   :  { %v5389_v16 = vpop.xlane.xlu0 %1815 }
 0x491   :  { %7060 = vst [vmem:[#allocation48_spill] sm:$0xff] %v5389_v16  ;;  %v5399_v52 = vpop.xlane.xlu1 %1812 }
 0x494   :  { %v5393_v59 = vpop.xlane.xlu0 %1821 }
 0x495   :  { %7061 = vst [vmem:[#allocation49_spill] sm:$0xff] %v5393_v59  ;;  %v5403_v33 = vpop.xlane.xlu1 %1818 }
 0x496   :  { %7065 = vst [vmem:[#allocation53_spill] sm:$0xff] %v5403_v33 }
 0x498   :  { %v5397_v50 = vpop.xlane.xlu0 %1827 }
 0x499   :  { %7063 = vst [vmem:[#allocation51_spill] sm:$0xff] %v5397_v50  ;;  %v5407_v43 = vpop.xlane.xlu1 %1824 }
 0x49c   :  { %v5401_v34 = vpop.xlane.xlu0 %1833 }
 0x49d   :  { %7064 = vst [vmem:[#allocation52_spill] sm:$0xff] %v5401_v34  ;;  %v5411_v37 = vpop.xlane.xlu1 %1830 }
 0x49e   :  { %7068 = vst [vmem:[#allocation56_spill] sm:$0xff] %v5411_v37 }
 0x4a0   :  { %v5405_v48 = vpop.xlane.xlu0 %1839 }
 0x4a1   :  { %7066 = vst [vmem:[#allocation54_spill] sm:$0xff] %v5405_v48  ;;  %v5415_v55 = vpop.xlane.xlu1 %1836 }
 0x4a4   :  { %v5409_v19 = vpop.xlane.xlu0 %1845 }
 0x4a5   :  { %7067 = vst [vmem:[#allocation55_spill] sm:$0xff] %v5409_v19  ;;  %v5419_v5 = vpop.xlane.xlu1 %1842  ;;  %v1979_v19 = vmax.f32 %v5381_v6, %v5385_v29 }
 0x4a8   :  { %v5413_v35 = vpop.xlane.xlu0 %1851 }
 0x4a9   :  { %7069 = vst [vmem:[#allocation57_spill] sm:$0xff] %v5413_v35  ;;  %v5423_v60 = vpop.xlane.xlu1 %1848  ;;  %v1981_v35 = vmax.f32 %v1979_v19, %v5273_v2 }
 0x4ab   :  { %v1983_v50 = vmax.f32 %v1981_v35, %v5296_v63 }
 0x4ac   :  { %v5417_v7 = vpop.xlane.xlu0 %1857 }
 0x4ad   :  { %7070 = vst [vmem:[#allocation58_spill] sm:$0xff] %v5417_v7  ;;  %v5425_v57 = vpop.xlane.xlu1 %1854  ;;  %v1985_v16 = vmax.f32 %v1983_v50, %v5316_v21 }
 0x4af   :  { %v1987_v29 = vmax.f32 %v1985_v16, %v5333_v46  ;;  %v1980_v16 = vmax.f32 %v5243_v4, %v5257_v14 }
 0x4b0   :  { %v5421_v23 = vpop.xlane.xlu0 %1863 }
 0x4b1   :  { %7071 = vst [vmem:[#allocation59_spill] sm:$0xff] %v5421_v23  ;;  %v5431_v48 = vpop.xlane.xlu1 %1860  ;;  %v1989_v19 = vmax.f32 %v1987_v29, %v5349_v10  ;;  %v1982_v29 = vmax.f32 %v1980_v16, %v5285_v39 }
 0x4b3   :  { %v1991_v35 = vmax.f32 %v1989_v19, %v5362_v3  ;;  %v1984_v19 = vmax.f32 %v1982_v29, %v5306_v13 }
 0x4b4   :  { %v5427_v17 = vpop.xlane.xlu0 %1869 }
 0x4b5   :  { %7072 = vst [vmem:[#allocation60_spill] sm:$0xff] %v5427_v17  ;;  %v5436_v7 = vpop.xlane.xlu1 %1866  ;;  %v1993_v50 = vmax.f32 %v1991_v35, %v5371_v41  ;;  %v1986_v35 = vmax.f32 %v1984_v19, %v5325_v0 }
 0x4b7   :  { %v1995_v46 = vmax.f32 %v1993_v50, %v5379_v24 }
 0x4b8   :  { %v5434_v34 = vpop.xlane.xlu0 %1875 }
 0x4b9   :  { %7073 = vst [vmem:[#allocation61_spill] sm:$0xff] %v5434_v34  ;;  %v5439_v23 = vpop.xlane.xlu1 %1872  ;;  %v1997_v3 = vmax.f32 %v1995_v46, %v5387_v32 }
 0x4bb   :  { %v1999_v14 = vmax.f32 %v1997_v3, %v5395_v20  ;;  %v2027_v20 = vmax.f32 %v5224_v56, %v5173_v36 }
 0x4bc   :  { %v5441_v59 = vpop.xlane.xlu0 %1881 }
 0x4bd   :  { %7074 = vst [vmem:[#allocation62_spill] sm:$0xff] %v5441_v59  ;;  %v5444_v17 = vpop.xlane.xlu1 %1878  ;;  %v2001_v29 = vmax.f32 %v1999_v14, %v5403_v33  ;;  %v2029_v14 = vmax.f32 %v2027_v20, %v5211_v12 }
 0x4be   :  { %7075 = vst [vmem:[#allocation63_spill] sm:$0xff] %v5444_v17 }
 0x4bf   :  { %v2003_v3 = vmax.f32 %v2001_v29, %v5411_v37  ;;  %v2031_v29 = vmax.f32 %v2029_v14, %v5238_v18 }
 0x4c0   :  { %v5447_v6 = vpop.xlane.xlu0 %1887 }
 0x4c1   :  { %7076 = vst [vmem:[#allocation64_spill] sm:$0xff] %v5447_v6  ;;  %v5449_v15 = vpop.xlane.xlu1 %1884 }
 0x4c2   :  { %7077 = vst [vmem:[#allocation65_spill] sm:$0xff] %v5449_v15 }
 0x4c4   :  { %v5454_v34 = vpop.xlane.xlu0 %1893 }
 0x4c5   :  { %v5452_v2 = vpop.xlane.xlu1 %1890  ;;  %7078 = vst [vmem:[#allocation66_spill] sm:$0xff] %v5454_v34 }
 0x4c8   :  { %v5460_v21 = vpop.xlane.xlu0 %1899 }
 0x4c9   :  { %v5457_v63 = vpop.xlane.xlu1 %1896  ;;  %7079 = vst [vmem:[#allocation67_spill] sm:$0xff] %v5460_v21  ;;  %v1988_v21 = vmax.f32 %v1986_v35, %v5341_v45 }
 0x4cb   :  { %v1990_v50 = vmax.f32 %v1988_v21, %v5356_v22 }
 0x4cc   :  { %v5470_v34 = vpop.xlane.xlu0 %1905 }
 0x4cd   :  { %v5462_v59 = vpop.xlane.xlu1 %1902  ;;  %7080 = vst [vmem:[#allocation68_spill] sm:$0xff] %v5470_v34  ;;  %v1992_v24 = vmax.f32 %v1990_v50, %v5367_v1  ;;  %v2028_v50 = vmax.f32 %v5185_v49, %v5199_v51  ;;  %v2033_v51 = vmax.f32 %v2031_v29, %v5265_v47 }
 0x4cf   :  { %v1994_v46 = vmax.f32 %v1992_v24, %v5375_v61  ;;  %v2005_v61 = vmax.f32 %v2003_v3, %v5419_v5 }
 0x4d0   :  { %v5479_v4 = vpop.xlane.xlu0 %1911 }
 0x4d1   :  { %v5468_v10 = vpop.xlane.xlu1 %1908  ;;  %v1996_v35 = vmax.f32 %v1994_v46, %v5383_v28  ;;  %v2030_v46 = vmax.f32 %v2028_v50, %v5227_v38  ;;  %v2035_v50 = vmax.f32 %v2033_v51, %v5293_v31 }
 0x4d3   :  { %v1998_v21 = vmax.f32 %v1996_v35, %v5391_v8  ;;  %v2032_v35 = vmax.f32 %v2030_v46, %v5251_v62  ;;  %v2037_v46 = vmax.f32 %v2035_v50, %v5314_v44 }
 0x4d4   :  { %v5489_v19 = vpop.xlane.xlu0 %1917 }
 0x4d5   :  { %v5475_v41 = vpop.xlane.xlu1 %1914  ;;  %v2000_v24 = vmax.f32 %v1998_v21, %v5399_v52  ;;  %v2007_v21 = vmax.f32 %v2005_v61, %v5425_v57  ;;  %v2034_v3 = vmax.f32 %v2032_v35, %v5281_v9  ;;  %v2039_v51 = vmax.f32 %v2037_v46, %v5331_v54  ;;  %v7088_v54 = vld [vmem:[#allocation57_spill] sm:$0xff] }
 0x4d7   :  { %v2002_v36 = vmax.f32 %v2000_v24, %v5407_v43  ;;  %v2009_v18 = vmax.f32 %v2007_v21, %v5436_v7  ;;  %v2036_v24 = vmax.f32 %v2034_v3, %v5304_v26  ;;  %v2041_v50 = vmax.f32 %v2039_v51, %v5347_v30  ;;  %v7082_v30 = vld [vmem:[#allocation48_spill] sm:$0xff] }
 0x4d8   :  { %v5505_v37 = vpop.xlane.xlu0 %1923 }
 0x4d9   :  { %v5482_v16 = vpop.xlane.xlu1 %1920  ;;  %v2004_v20 = vmax.f32 %v2002_v36, %v5415_v55  ;;  %v2011_v61 = vmax.f32 %v2009_v18, %v5444_v17  ;;  %v2038_v35 = vmax.f32 %v2036_v24, %v5323_v40  ;;  %v2043_v24 = vmax.f32 %v2041_v50, %v5360_v11 }
 0x4db   :  { %v2006_v14 = vmax.f32 %v2004_v20, %v5423_v60  ;;  %v2013_v21 = vmax.f32 %v2011_v61, %v5452_v2  ;;  %v2040_v3 = vmax.f32 %v2038_v35, %v5339_v42  ;;  %v2045_v35 = vmax.f32 %v2043_v24, %v5369_v25  ;;  %v7083_v42 = vld [vmem:[#allocation49_spill] sm:$0xff]  ;;  %v7084_v25 = vld [vmem:[#allocation51_spill] sm:$0xff] }
 0x4dc   :  { %v5520_v62 = vpop.xlane.xlu0 %1929 }
 0x4dd   :  { %v5487_v32 = vpop.xlane.xlu1 %1926  ;;  %v2008_v36 = vmax.f32 %v2006_v14, %v5431_v48  ;;  %v2015_v14 = vmax.f32 %v2013_v21, %v5462_v59  ;;  %v2042_v18 = vmax.f32 %v2040_v3, %v5354_v27  ;;  %v7081_v27 = vld [vmem:[#allocation43_spill] sm:$0xff] }
 0x4de   :  { %v2047_v50 = vmax.f32 %v2045_v35, %v7081_v27  ;;  %v7086_v27 = vld [vmem:[#allocation54_spill] sm:$0xff] }
 0x4df   :  { %v2010_v20 = vmax.f32 %v2008_v36, %v5439_v23  ;;  %v2017_v36 = vmax.f32 %v2015_v14, %v5475_v41  ;;  %v2044_v61 = vmax.f32 %v2042_v18, %v5365_v58 }
 0x4e0   :  { %v5538_v40 = vpop.xlane.xlu0 %1935  ;;  %v2049_v18 = vmax.f32 %v2047_v50, %v7083_v42 }
 0x4e1   :  { %v5499_v33 = vpop.xlane.xlu1 %1932  ;;  %v2012_v26 = vmax.f32 %v2010_v20, %v5449_v15  ;;  %v2019_v21 = vmax.f32 %v2017_v36, %v5487_v32  ;;  %v2046_v3 = vmax.f32 %v2044_v61, %v5373_v53  ;;  %v7085_v53 = vld [vmem:[#allocation52_spill] sm:$0xff]  ;;  %v7089_v15 = vld [vmem:[#allocation58_spill] sm:$0xff] }
 0x4e2   :  { %v2051_v35 = vmax.f32 %v2049_v18, %v7085_v53  ;;  %v7092_v18 = vld [vmem:[#allocation60_spill] sm:$0xff] }
 0x4e3   :  { %v2014_v46 = vmax.f32 %v2012_v26, %v5457_v63  ;;  %v2048_v14 = vmax.f32 %v2046_v3, %v7082_v30  ;;  %v7087_v30 = vld [vmem:[#allocation55_spill] sm:$0xff] }
 0x4e4   :  { %v5554_v58 = vpop.xlane.xlu0 %1941  ;;  %v2053_v50 = vmax.f32 %v2051_v35, %v7087_v30 }
 0x4e5   :  { %v5510_v49 = vpop.xlane.xlu1 %1938  ;;  %v2016_v20 = vmax.f32 %v2014_v46, %v5468_v10  ;;  %v2050_v61 = vmax.f32 %v2048_v14, %v7084_v25  ;;  %v7091_v14 = vld [vmem:[#allocation59_spill] sm:$0xff] }
 0x4e6   :  { %v2021_v26 = vmax.f32 %v2019_v21, %v5510_v49 }
 0x4e7   :  { %v2018_v11 = vmax.f32 %v2016_v20, %v5482_v16  ;;  %v2052_v3 = vmax.f32 %v2050_v61, %v7086_v27  ;;  %v7094_v61 = vld [vmem:[#allocation62_spill] sm:$0xff] }
 0x4e8   :  { %v5569_v9 = vpop.xlane.xlu0 %1947 }
 0x4e9   :  { %v5522_v29 = vpop.xlane.xlu1 %1944  ;;  %v2020_v46 = vmax.f32 %v2018_v11, %v5499_v33  ;;  %v2054_v31 = vmax.f32 %v2052_v3, %v7088_v54  ;;  %v2055_v11 = vmax.f32 %v2053_v50, %v7089_v15  ;;  %7090 = vst [vmem:[#allocation55_spill] sm:$0xff] %v5569_v9  ;;  %v7095_v3 = vld [vmem:[#allocation66_spill] sm:$0xff] }
 0x4eb   :  { %v2022_v20 = vmax.f32 %v2020_v46, %v5522_v29  ;;  %v2056_v25 = vmax.f32 %v2054_v31, %v7091_v14  ;;  %v2057_v53 = vmax.f32 %v2055_v11, %v7092_v18  ;;  %v7098_v11 = vld [vmem:[#allocation45_spill] sm:$0xff] }
 0x4ec   :  { %v5582_v15 = vpop.xlane.xlu0 %1953 }
 0x4ed   :  { %v5532_v44 = vpop.xlane.xlu1 %1950  ;;  %v2059_v27 = vmax.f32 %v2057_v53, %v7094_v61  ;;  %7096 = vst [vmem:[#allocation57_spill] sm:$0xff] %v5582_v15  ;;  %v7100_v53 = vld [vmem:[#allocation46_spill] sm:$0xff]  ;;  %v7101_v61 = vld [vmem:[#allocation21_spill] sm:$0xff] }
 0x4ee   :  { %v2023_v36 = vmax.f32 %v2021_v26, %v5532_v44 }
 0x4ef   :  { %v2061_v50 = vmax.f32 %v2059_v27, %v7095_v3 }
 0x4f1   :  { %v5544_v51 = vpop.xlane.xlu1 %1956  ;;  %v2063_v31 = vmax.f32 %v2061_v50, %v5470_v34  ;;  %v5618_v34 = vpop.xlane.xlu0 %1959 }
 0x4f2   :  { %v2024_v42 = vmax.f32 %v2022_v20, %v5544_v51  ;;  %7102 = vst [vmem:[#allocation45_spill] sm:$0xff] %v5618_v34 }
 0x4f5   :  { %v5556_v24 = vpop.xlane.xlu1 %1962 }
 0x4f6   :  { %v2025_v21 = vmax.f32 %v2023_v36, %v5556_v24  ;;  %v7093_v36 = vld [vmem:[#allocation61_spill] sm:$0xff] }
 0x4f7   :  { %v2058_v17 = vmax.f32 %v2056_v25, %v7093_v36  ;;  %v7099_v25 = vld [vmem:[#allocation19_spill] sm:$0xff] }
 0x4f8   :  { %v2026_v26 = vmax.f32 %v2025_v21, %v2024_v42  ;;  %v7097_v42 = vld [vmem:[#allocation67_spill] sm:$0xff] }
 0x4f9   :  { %v5573_v46 = vpop.xlane.xlu1 %1974  ;;  %v2060_v20 = vmax.f32 %v2058_v17, %v5447_v6 }
 0x4fa   :  { %v5578_v35 = vmax.f32 %v2026_v26, %v5573_v46 }
 0x4fb   :  { %v2062_v21 = vmax.f32 %v2060_v20, %v7097_v42  ;;  %v7103_v20 = vld [vmem:[#allocation22_spill] sm:$0xff] }
 0x4fc   :  { %v2077_v18 = vsub.f32 %v7098_v11, %v5578_v35  ;;  %v2079_v36 = vsub.f32 %v7099_v25, %v5578_v35  ;;  %v2081_v26 = vsub.f32 %v7100_v53, %v5578_v35  ;;  %v2083_v17 = vsub.f32 %v7101_v61, %v5578_v35 }
 0x4fd   :  { %v2065_v53 = vmax.f32 %v2063_v31, %v5489_v19  ;;  %v2085_v3 = vsub.f32 %v7103_v20, %v5578_v35  ;;  %v2064_v50 = vmax.f32 %v2062_v21, %v5479_v4  ;;  %v2087_v25 = vsub.f32 %v5285_v39, %v5578_v35 }
 0x4fe   :  { %v2175_v27 = vmul.f32 1.442695, %v2077_v18  ;;  %v2179_v42 = vmul.f32 1.442695, %v2079_v36  ;;  %v2183_v6 = vmul.f32 1.442695, %v2081_v26  ;;  %v5633_v26 = vpop.xlane.xlu0 %1965  ;;  %v2091_v39 = vsub.f32 %v5306_v13, %v5578_v35 }
 0x4ff   :  { %v2067_v11 = vmax.f32 %v2065_v53, %v5520_v62  ;;  %v2187_v14 = vmul.f32 1.442695, %v2083_v17  ;;  %v2066_v31 = vmax.f32 %v2064_v50, %v5505_v37  ;;  %v7104_v18 = vld [vmem:[#allocation25_spill] sm:$0xff]  ;;  %v2191_v20 = vmul.f32 1.442695, %v2085_v3  ;;  %7105 = vst [vmem:[#allocation19_spill] sm:$0xff] %v5633_v26 }
 0x500   :  { %3604 = vpow2.f32 %v2175_v27  ;;  %v2089_v36 = vsub.f32 %v7104_v18, %v5578_v35  ;;  %v7107_v13 = vld [vmem:[#allocation31_spill] sm:$0xff] }
 0x501   :  { %3606 = vpow2.f32 %v2179_v42  ;;  %v2069_v61 = vmax.f32 %v2067_v11, %v5554_v58  ;;  %v2068_v21 = vmax.f32 %v2066_v31, %v5538_v40  ;;  %v2195_v42 = vmul.f32 1.442695, %v2087_v25  ;;  %v7106_v11 = vld [vmem:[#allocation28_spill] sm:$0xff] }
 0x502   :  { %3608 = vpow2.f32 %v2183_v6  ;;  %v2093_v53 = vsub.f32 %v7106_v11, %v5578_v35  ;;  %v2199_v6 = vmul.f32 1.442695, %v2089_v36  ;;  %v2095_v31 = vsub.f32 %v5325_v0, %v5578_v35  ;;  %v7109_v0 = vld [vmem:[#allocation34_spill] sm:$0xff] }
 0x503   :  { %v2071_v27 = vmax.f32 %v2069_v61, %v5582_v15  ;;  %3610 = vpow2.f32 %v2187_v14  ;;  %v2070_v17 = vmax.f32 %v2068_v21, %v5569_v9  ;;  %v2203_v61 = vmul.f32 1.442695, %v2091_v39  ;;  %v5648_v21 = vpop.xlane.xlu0 %1977 }
 0x504   :  { %3612 = vpow2.f32 %v2191_v20  ;;  %v2097_v14 = vsub.f32 %v7107_v13, %v5578_v35  ;;  %v2207_v25 = vmul.f32 1.442695, %v2093_v53  ;;  %7108 = vst [vmem:[#allocation46_spill] sm:$0xff] %v5648_v21  ;;  %v2099_v36 = vsub.f32 %v5341_v45, %v5578_v35 }
 0x505   :  { %v2073_v50 = vmax.f32 %v2071_v27, %v5633_v26  ;;  %v2072_v3 = vmax.f32 %v2070_v17, %v5618_v34  ;;  %3614 = vpow2.f32 %v2195_v42  ;;  %v2211_v20 = vmul.f32 1.442695, %v2095_v31 }
 0x506   :  { %3616 = vpow2.f32 %v2199_v6  ;;  %v2101_v39 = vsub.f32 %v7109_v0, %v5578_v35  ;;  %v2103_v45 = vsub.f32 %v5356_v22, %v5578_v35  ;;  %v7110_v6 = vld [vmem:[#allocation37_spill] sm:$0xff]  ;;  %v2219_v31 = vmul.f32 1.442695, %v2099_v36 }
 0x507   :  { %v2074_v18 = vmax.f32 %v2073_v50, %v2072_v3  ;;  %3618 = vpow2.f32 %v2203_v61  ;;  %v2215_v50 = vmul.f32 1.442695, %v2097_v14  ;;  %v2105_v3 = vsub.f32 %v7110_v6, %v5578_v35 }
 0x508   :  { %3620 = vpow2.f32 %v2207_v25  ;;  %v2227_v6 = vmul.f32 1.442695, %v2103_v45 }
 0x509   :  { %v5659_v42 = vmax.f32 %v2074_v18, %v5648_v21  ;;  %3622 = vpow2.f32 %v2211_v20  ;;  %v2223_v18 = vmul.f32 1.442695, %v2101_v39  ;;  %v2107_v39 = vsub.f32 %v5367_v1, %v5578_v35  ;;  %v7112_v20 = vld [vmem:[#allocation42_spill] sm:$0xff] }
 0x50a   :  { %3624 = vpow2.f32 %v2215_v50  ;;  %v7111_v50 = vld [vmem:[#allocation40_spill] sm:$0xff]  ;;  %v2231_v0 = vmul.f32 1.442695, %v2105_v3  ;;  %v2111_v26 = vsub.f32 %v7112_v20, %v5578_v35 }
 0x50b   :  { %3626 = vpow2.f32 %v2219_v31  ;;  %v2235_v1 = vmul.f32 1.442695, %v2107_v39 }
 0x50c   :  { %3628 = vpow2.f32 %v2223_v18  ;;  %v2243_v20 = vmul.f32 1.442695, %v2111_v26 }
 0x50d   :  { %v5650_v27 = vpop.eup %3604  ;;  %3630 = vpow2.f32 %v2227_v6 }
 0x50e   :  { %v5654_v17 = vpop.eup %3606  ;;  %3632 = vpow2.f32 %v2231_v0 }
 0x50f   :  { %v2377_v11 = vadd.f32 %v5654_v17, %v5650_v27  ;;  %v5663_v53 = vpop.eup %3608  ;;  %3634 = vpow2.f32 %v2235_v1 }
 0x510   :  { %v5670_v13 = vpop.eup %3610 }
 0x511   :  { %v2378_v61 = vadd.f32 %v5663_v53, %v2377_v11  ;;  %v5683_v11 = vpop.eup %3612 }
 0x512   :  { %v5688_v14 = vpop.eup %3614 }
 0x513   :  { %v2379_v22 = vadd.f32 %v5670_v13, %v2378_v61  ;;  %v2109_v61 = vsub.f32 %v7111_v50, %v5578_v35  ;;  %v5693_v21 = vpop.eup %3616 }
 0x514   :  { %v5698_v31 = vpop.eup %3618 }
 0x515   :  { %v2380_v25 = vadd.f32 %v5683_v11, %v2379_v22  ;;  %v7113_v22 = vld [vmem:[#allocation44_spill] sm:$0xff]  ;;  %v2239_v50 = vmul.f32 1.442695, %v2109_v61  ;;  %v5703_v18 = vpop.eup %3620 }
 0x516   :  { %v2113_v34 = vsub.f32 %v7113_v22, %v5578_v35  ;;  %v5708_v6 = vpop.eup %3622 }
 0x517   :  { %v2381_v36 = vadd.f32 %v5688_v14, %v2380_v25  ;;  %v2115_v25 = vsub.f32 %v5383_v28, %v5578_v35  ;;  %3636 = vpow2.f32 %v2239_v50  ;;  %v5713_v61 = vpop.eup %3624 }
 0x518   :  { %v2247_v22 = vmul.f32 1.442695, %v2113_v34  ;;  %7115 = vst [vmem:[#allocation21_spill] sm:$0xff] %v5713_v61  ;;  %3638 = vpow2.f32 %v2243_v20  ;;  %v5718_v1 = vpop.eup %3626 }
 0x519   :  { %v2382_v45 = vadd.f32 %v5693_v21, %v2381_v36  ;;  %v7114_v36 = vld [vmem:[#allocation47_spill] sm:$0xff]  ;;  %v2251_v28 = vmul.f32 1.442695, %v2115_v25  ;;  %v5723_v50 = vpop.eup %3628 }
 0x51a   :  { %v2117_v15 = vsub.f32 %v7114_v36, %v5578_v35  ;;  %3640 = vpow2.f32 %v2247_v22  ;;  %7117 = vst [vmem:[#allocation22_spill] sm:$0xff] %v5723_v50  ;;  %v5728_v20 = vpop.eup %3630 }
 0x51b   :  { %v2383_v3 = vadd.f32 %v5698_v31, %v2382_v45  ;;  %v2119_v45 = vsub.f32 %v5391_v8, %v5578_v35  ;;  %3642 = vpow2.f32 %v2251_v28  ;;  %7118 = vst [vmem:[#allocation25_spill] sm:$0xff] %v5728_v20  ;;  %v5733_v22 = vpop.eup %3632 }
 0x51c   :  { %v2255_v36 = vmul.f32 1.442695, %v2117_v15  ;;  %7120 = vst [vmem:[#allocation28_spill] sm:$0xff] %v5733_v22 }
 0x51d   :  { %v2384_v39 = vadd.f32 %v5703_v18, %v2383_v3  ;;  %v7116_v3 = vld [vmem:[#allocation50_spill] sm:$0xff]  ;;  %v2259_v8 = vmul.f32 1.442695, %v2119_v45 }
 0x51e   :  { %v2121_v9 = vsub.f32 %v7116_v3, %v5578_v35  ;;  %3644 = vpow2.f32 %v2255_v36  ;;  %v2078_v36 = vsub.f32 %v5224_v56, %v5659_v42 }
 0x51f   :  { %v2385_v0 = vadd.f32 %v5708_v6, %v2384_v39  ;;  %v2123_v39 = vsub.f32 %v5399_v52, %v5578_v35  ;;  %v7121_v52 = vld [vmem:[#allocation56_spill] sm:$0xff]  ;;  %3646 = vpow2.f32 %v2259_v8  ;;  %v2131_v8 = vsub.f32 %v5415_v55, %v5578_v35 }
 0x520   :  { %v2263_v3 = vmul.f32 1.442695, %v2121_v9  ;;  %v2129_v28 = vsub.f32 %v7121_v52, %v5578_v35 }
 0x521   :  { %v2386_v26 = vadd.f32 %v5713_v61, %v2385_v0  ;;  %v7119_v0 = vld [vmem:[#allocation53_spill] sm:$0xff]  ;;  %v2267_v45 = vmul.f32 1.442695, %v2123_v39 }
 0x522   :  { %v2125_v61 = vsub.f32 %v7119_v0, %v5578_v35  ;;  %3648 = vpow2.f32 %v2263_v3  ;;  %v7123_v0 = vld [vmem:[#allocation16_spill] sm:$0xff] }
 0x523   :  { %v2387_v34 = vadd.f32 %v5718_v1, %v2386_v26  ;;  %v2127_v26 = vsub.f32 %v5407_v43, %v5578_v35  ;;  %3650 = vpow2.f32 %v2267_v45 }
 0x524   :  { %v2271_v9 = vmul.f32 1.442695, %v2125_v61  ;;  %v2133_v61 = vsub.f32 %v5419_v5, %v5578_v35  ;;  %v2086_v5 = vsub.f32 %v5211_v12, %v5659_v42  ;;  %v2139_v12 = vsub.f32 %v5431_v48, %v5578_v35  ;;  %v7127_v48 = vld [vmem:[#allocation20_spill] sm:$0xff] }
 0x525   :  { %v2388_v25 = vadd.f32 %v5723_v50, %v2387_v34  ;;  %v5740_v50 = vpop.eup %3634  ;;  %v2275_v39 = vmul.f32 1.442695, %v2127_v26 }
 0x526   :  { %7122 = vst [vmem:[#allocation31_spill] sm:$0xff] %v5740_v50  ;;  %v5747_v43 = vpop.eup %3636  ;;  %3652 = vpow2.f32 %v2271_v9 }
 0x527   :  { %v2389_v15 = vadd.f32 %v5728_v20, %v2388_v25  ;;  %v2080_v20 = vsub.f32 %v7123_v0, %v5659_v42  ;;  %v5754_v3 = vpop.eup %3638  ;;  %3654 = vpow2.f32 %v2275_v39 }
 0x528   :  { %v5761_v45 = vpop.eup %3640 }
 0x529   :  { %v2390_v34 = vadd.f32 %v5733_v22, %v2389_v15  ;;  %v2279_v15 = vmul.f32 1.442695, %v2129_v28  ;;  %v7124_v22 = vld [vmem:[#allocation15_spill] sm:$0xff]  ;;  %v2181_v26 = vmul.f32 1.442695, %v2080_v20  ;;  %v2135_v28 = vsub.f32 %v5423_v60, %v5578_v35  ;;  %v5768_v9 = vpop.eup %3642 }
 0x52a   :  { %v2082_v56 = vsub.f32 %v7124_v22, %v5659_v42  ;;  %v2283_v22 = vmul.f32 1.442695, %v2131_v8  ;;  %v2287_v20 = vmul.f32 1.442695, %v2133_v61  ;;  %v2088_v60 = vsub.f32 %v5227_v38, %v5659_v42 }
 0x52b   :  { %v2391_v25 = vadd.f32 %v5740_v50, %v2390_v34  ;;  %v2177_v34 = vmul.f32 1.442695, %v2078_v36  ;;  %v7125_v50 = vld [vmem:[#allocation17_spill] sm:$0xff]  ;;  %3656 = vpow2.f32 %v2279_v15  ;;  %v5775_v39 = vpop.eup %3644  ;;  %v2291_v15 = vmul.f32 1.442695, %v2135_v28 }
 0x52c   :  { %v2084_v55 = vsub.f32 %v7125_v50, %v5659_v42  ;;  %v2185_v36 = vmul.f32 1.442695, %v2082_v56  ;;  %v2137_v50 = vsub.f32 %v5425_v57, %v5578_v35  ;;  %v7126_v57 = vld [vmem:[#allocation18_spill] sm:$0xff]  ;;  %v2141_v38 = vsub.f32 %v5436_v7, %v5578_v35 }
 0x52d   :  { %v2392_v52 = vadd.f32 %v5747_v43, %v2391_v25  ;;  %3658 = vpow2.f32 %v2177_v34  ;;  %v2090_v61 = vsub.f32 %v7126_v57, %v5659_v42  ;;  %v2193_v34 = vmul.f32 1.442695, %v2086_v5 }
 0x52e   :  { %3660 = vpow2.f32 %v2181_v26  ;;  %v2189_v8 = vmul.f32 1.442695, %v2084_v55  ;;  %v2295_v55 = vmul.f32 1.442695, %v2137_v50  ;;  %v2197_v28 = vmul.f32 1.442695, %v2088_v60 }
 0x52f   :  { %v2393_v0 = vadd.f32 %v5754_v3, %v2392_v52  ;;  %3662 = vpow2.f32 %v2283_v22  ;;  %v2092_v22 = vsub.f32 %v7127_v48, %v5659_v42  ;;  %v2299_v5 = vmul.f32 1.442695, %v2139_v12 }
 0x530   :  { %3664 = vpow2.f32 %v2185_v36  ;;  %v2143_v36 = vsub.f32 %v5439_v23, %v5578_v35  ;;  %v2094_v7 = vsub.f32 %v5265_v47, %v5659_v42  ;;  %v2201_v50 = vmul.f32 1.442695, %v2090_v61  ;;  %v7131_v23 = vld [vmem:[#allocation23_spill] sm:$0xff]  ;;  %v7132_v47 = vld [vmem:[#allocation65_spill] sm:$0xff] }
 0x531   :  { %v2394_v25 = vadd.f32 %v5761_v45, %v2393_v0  ;;  %v5782_v0 = vpop.eup %3646  ;;  %3666 = vpow2.f32 %v2287_v20  ;;  %v2303_v60 = vmul.f32 1.442695, %v2141_v38  ;;  %v2205_v12 = vmul.f32 1.442695, %v2092_v22  ;;  %v7134_v38 = vld [vmem:[#allocation24_spill] sm:$0xff] }
 0x532   :  { %3668 = vpow2.f32 %v2189_v8  ;;  %v2307_v61 = vmul.f32 1.442695, %v2143_v36 }
 0x533   :  { %v2395_v52 = vadd.f32 %v5768_v9, %v2394_v25  ;;  %v5789_v25 = vpop.eup %3648  ;;  %3670 = vpow2.f32 %v2291_v15  ;;  %v2096_v15 = vsub.f32 %v7131_v23, %v5659_v42 }
 0x534   :  { %7128 = vst [vmem:[#allocation34_spill] sm:$0xff] %v5789_v25  ;;  %3672 = vpow2.f32 %v2193_v34  ;;  %v5796_v20 = vpop.eup %3650  ;;  %v2147_v34 = vsub.f32 %v7132_v47, %v5578_v35 }
 0x535   :  { %v2396_v56 = vadd.f32 %v5775_v39, %v2395_v52  ;;  %7129 = vst [vmem:[#allocation37_spill] sm:$0xff] %v5796_v20  ;;  %3674 = vpow2.f32 %v2295_v55  ;;  %v2098_v55 = vsub.f32 %v7134_v38, %v5659_v42  ;;  %v2213_v47 = vmul.f32 1.442695, %v2096_v15 }
 0x536   :  { %3676 = vpow2.f32 %v2197_v28  ;;  %v7142_v15 = vsub.f32 %v5452_v2, %v5578_v35  ;;  %v7147_v2 = vld [vmem:[#allocation30_spill] sm:$0xff] }
 0x537   :  { %v2397_v26 = vadd.f32 %v5782_v0, %v2396_v56  ;;  %v7130_v56 = vld [vmem:[#allocation63_spill] sm:$0xff]  ;;  %3678 = vpow2.f32 %v2299_v5  ;;  %v7137_v5 = vld [vmem:[#allocation26_spill] sm:$0xff] }
 0x538   :  { %v2145_v8 = vsub.f32 %v7130_v56, %v5578_v35  ;;  %3680 = vpow2.f32 %v2201_v50  ;;  %v2100_v36 = vsub.f32 %v7137_v5, %v5659_v42  ;;  %v7139_v50 = vld [vmem:[#allocation27_spill] sm:$0xff] }
 0x539   :  { %v2398_v52 = vadd.f32 %v5789_v25, %v2397_v26  ;;  %v5803_v26 = vpop.eup %3652  ;;  %3682 = vpow2.f32 %v2303_v60  ;;  %v2217_v60 = vmul.f32 1.442695, %v2098_v55 }
 0x53a   :  { %v5807_v48 = vpop.eup %3654  ;;  %v2311_v22 = vmul.f32 1.442695, %v2145_v8  ;;  %3684 = vpow2.f32 %v2205_v12  ;;  %v2319_v12 = vmul.f32 1.442695, %v7142_v15  ;;  %v2106_v15 = vsub.f32 %v7147_v2, %v5659_v42 }
 0x53b   :  { %v2399_v57 = vadd.f32 %v5796_v20, %v2398_v52  ;;  %7133 = vst [vmem:[#allocation40_spill] sm:$0xff] %v5807_v48  ;;  %v2209_v52 = vmul.f32 1.442695, %v2094_v7  ;;  %v5812_v20 = vpop.eup %3656  ;;  %3686 = vpow2.f32 %v2307_v61  ;;  %v2102_v7 = vsub.f32 %v7139_v50, %v5659_v42 }
 0x53c   :  { %7135 = vst [vmem:[#allocation42_spill] sm:$0xff] %v5812_v20  ;;  %v5814_v28 = vpop.eup %3658 }
 0x53d   :  { %v2400_v56 = vadd.f32 %v5803_v26, %v2399_v57  ;;  %7136 = vst [vmem:[#allocation44_spill] sm:$0xff] %v5814_v28  ;;  %v5819_v25 = vpop.eup %3660  ;;  %v2315_v57 = vmul.f32 1.442695, %v2147_v34  ;;  %3688 = vpow2.f32 %v2209_v52  ;;  %v7143_v34 = vld [vmem:[#allocation29_spill] sm:$0xff]  ;;  %v2221_v52 = vmul.f32 1.442695, %v2100_v36 }
 0x53e   :  { %7138 = vst [vmem:[#allocation47_spill] sm:$0xff] %v5819_v25  ;;  %v5823_v38 = vpop.eup %3662  ;;  %3690 = vpow2.f32 %v2311_v22  ;;  %v2104_v61 = vsub.f32 %v7143_v34, %v5659_v42  ;;  %v7146_v22 = vsub.f32 %v5457_v63, %v5578_v35  ;;  %v7150_v63 = vld [vmem:[#allocation32_spill] sm:$0xff] }
 0x53f   :  { %v2401_v23 = vadd.f32 %v5807_v48, %v2400_v56  ;;  %7140 = vst [vmem:[#allocation50_spill] sm:$0xff] %v5823_v38  ;;  %v2425_v56 = vadd.f32 %v5819_v25, %v5814_v28  ;;  %v5828_v48 = vpop.eup %3664  ;;  %3692 = vpow2.f32 %v2213_v47 }
 0x540   :  { %7141 = vst [vmem:[#allocation53_spill] sm:$0xff] %v5828_v48  ;;  %v5835_v5 = vpop.eup %3666  ;;  %3694 = vpow2.f32 %v2315_v57  ;;  %v2323_v25 = vmul.f32 1.442695, %v7146_v22  ;;  %v7149_v57 = vsub.f32 %v5462_v59, %v5578_v35  ;;  %v2108_v22 = vsub.f32 %v7150_v63, %v5659_v42  ;;  %v7153_v59 = vld [vmem:[#allocation33_spill] sm:$0xff] }
 0x541   :  { %v2402_v8 = vadd.f32 %v5812_v20, %v2401_v23  ;;  %7144 = vst [vmem:[#allocation56_spill] sm:$0xff] %v5835_v5  ;;  %v2426_v55 = vadd.f32 %v5828_v48, %v2425_v56  ;;  %v5839_v23 = vpop.eup %3668  ;;  %3696 = vpow2.f32 %v2217_v60 }
 0x542   :  { %7145 = vst [vmem:[#allocation16_spill] sm:$0xff] %v5839_v23  ;;  %v5846_v28 = vpop.eup %3670  ;;  %3698 = vpow2.f32 %v2319_v12  ;;  %v2327_v56 = vmul.f32 1.442695, %v7149_v57  ;;  %v7152_v12 = vsub.f32 %v5468_v10, %v5578_v35  ;;  %v2110_v57 = vsub.f32 %v7153_v59, %v5659_v42 }
 0x543   :  { %v2403_v50 = vadd.f32 %v5823_v38, %v2402_v8  ;;  %v2225_v8 = vmul.f32 1.442695, %v2102_v7  ;;  %v2427_v36 = vadd.f32 %v5839_v23, %v2426_v55  ;;  %v5850_v47 = vpop.eup %3672  ;;  %3700 = vpow2.f32 %v2221_v52 }
 0x544   :  { %7148 = vst [vmem:[#allocation15_spill] sm:$0xff] %v5850_v47  ;;  %v5857_v48 = vpop.eup %3674  ;;  %3702 = vpow2.f32 %v2323_v25  ;;  %v2331_v55 = vmul.f32 1.442695, %v7152_v12  ;;  %v7155_v25 = vsub.f32 %v5475_v41, %v5578_v35  ;;  %v2237_v59 = vmul.f32 1.442695, %v2108_v22 }
 0x545   :  { %v2404_v34 = vadd.f32 %v5835_v5, %v2403_v50  ;;  %v2229_v50 = vmul.f32 1.442695, %v2104_v61  ;;  %v2428_v7 = vadd.f32 %v5850_v47, %v2427_v36  ;;  %v5861_v60 = vpop.eup %3676  ;;  %3704 = vpow2.f32 %v2225_v8 }
 0x546   :  { %7151 = vst [vmem:[#allocation17_spill] sm:$0xff] %v5861_v60  ;;  %v5868_v23 = vpop.eup %3678  ;;  %3706 = vpow2.f32 %v2327_v56  ;;  %v2335_v36 = vmul.f32 1.442695, %v7155_v25  ;;  %v7158_v56 = vld [vmem:[#allocation35_spill] sm:$0xff] }
 0x547   :  { %v2405_v2 = vadd.f32 %v5846_v28, %v2404_v34  ;;  %v2233_v34 = vmul.f32 1.442695, %v2106_v15  ;;  %v2429_v61 = vadd.f32 %v5861_v60, %v2428_v7  ;;  %v5872_v52 = vpop.eup %3680  ;;  %3708 = vpow2.f32 %v2229_v50 }
 0x548   :  { %7154 = vst [vmem:[#allocation18_spill] sm:$0xff] %v5872_v52  ;;  %v5877_v10 = vpop.eup %3682  ;;  %3710 = vpow2.f32 %v2331_v55  ;;  %v7157_v15 = vsub.f32 %v5482_v16, %v5578_v35  ;;  %v2112_v7 = vsub.f32 %v7158_v56, %v5659_v42  ;;  %v7160_v16 = vsub.f32 %v5487_v32, %v5578_v35 }
 0x549   :  { %v2406_v63 = vadd.f32 %v5857_v48, %v2405_v2  ;;  %v2430_v47 = vadd.f32 %v5872_v52, %v2429_v61  ;;  %v5881_v2 = vpop.eup %3684  ;;  %3712 = vpow2.f32 %v2233_v34 }
 0x54a   :  { %7156 = vst [vmem:[#allocation20_spill] sm:$0xff] %v5881_v2  ;;  %v2339_v8 = vmul.f32 1.442695, %v7157_v15  ;;  %v5888_v41 = vpop.eup %3686  ;;  %3714 = vpow2.f32 %v2335_v36  ;;  %v2343_v55 = vmul.f32 1.442695, %v7160_v16  ;;  %v7163_v36 = vsub.f32 %v5499_v33, %v5578_v35 }
 0x54b   :  { %v2407_v12 = vadd.f32 %v5868_v23, %v2406_v63  ;;  %v2241_v63 = vmul.f32 1.442695, %v2110_v57  ;;  %v2431_v22 = vadd.f32 %v5881_v2, %v2430_v47  ;;  %v5892_v50 = vpop.eup %3688  ;;  %3716 = vpow2.f32 %v2237_v59  ;;  %v7162_v57 = vld [vmem:[#allocation36_spill] sm:$0xff] }
 0x54c   :  { %7159 = vst [vmem:[#allocation63_spill] sm:$0xff] %v5892_v50  ;;  %v5894_v61 = vpop.eup %3690  ;;  %3718 = vpow2.f32 %v2339_v8  ;;  %v2114_v47 = vsub.f32 %v7162_v57, %v5659_v42  ;;  %v2245_v34 = vmul.f32 1.442695, %v2112_v7  ;;  %v2347_v2 = vmul.f32 1.442695, %v7163_v36 }
 0x54d   :  { %v2408_v25 = vadd.f32 %v5877_v10, %v2407_v12  ;;  %v2432_v56 = vadd.f32 %v5892_v50, %v2431_v22  ;;  %v5901_v52 = vpop.eup %3692  ;;  %3720 = vpow2.f32 %v2241_v63  ;;  %v7165_v8 = vsub.f32 %v5510_v49, %v5578_v35 }
 0x54e   :  { %7161 = vst [vmem:[#allocation23_spill] sm:$0xff] %v5901_v52  ;;  %v5905_v12 = vpop.eup %3694  ;;  %3722 = vpow2.f32 %v2343_v55  ;;  %v7168_v55 = vsub.f32 %v5522_v29, %v5578_v35  ;;  %v2371_v29 = vsub.f32 %v5573_v46, %v5578_v35  ;;  %v7175_v46 = vsub.f32 %v5556_v24, %v5578_v35 }
 0x54f   :  { %v2409_v15 = vadd.f32 %v5888_v41, %v2408_v25  ;;  %v2433_v59 = vadd.f32 %v5901_v52, %v2432_v56  ;;  %v5912_v25 = vpop.eup %3696  ;;  %v2351_v7 = vmul.f32 1.442695, %v7165_v8  ;;  %3724 = vpow2.f32 %v2245_v34 }
 0x550   :  { %7164 = vst [vmem:[#allocation65_spill] sm:$0xff] %v5912_v25  ;;  %v5914_v22 = vpop.eup %3698  ;;  %v2249_v56 = vmul.f32 1.442695, %v2114_v47  ;;  %3726 = vpow2.f32 %v2347_v2  ;;  %v2355_v52 = vmul.f32 1.442695, %v7168_v55  ;;  %v7170_v34 = vsub.f32 %v5532_v44, %v5578_v35 }
 0x551   :  { %v2410_v32 = vadd.f32 %v5894_v61, %v2409_v15  ;;  %v2434_v57 = vadd.f32 %v5912_v25, %v2433_v59  ;;  %v5921_v33 = vpop.eup %3700  ;;  %v7167_v15 = vld [vmem:[#allocation38_spill] sm:$0xff]  ;;  %3728 = vpow2.f32 %v2351_v7  ;;  %v7173_v44 = vsub.f32 %v5544_v51, %v5578_v35  ;;  %v7177_v51 = vld [vmem:[#allocation41_spill] sm:$0xff] }
 0x552   :  { %7166 = vst [vmem:[#allocation24_spill] sm:$0xff] %v5921_v33  ;;  %v2116_v63 = vsub.f32 %v7167_v15, %v5659_v42  ;;  %v5925_v36 = vpop.eup %3702  ;;  %v2359_v47 = vmul.f32 1.442695, %v7170_v34  ;;  %3730 = vpow2.f32 %v2249_v56 }
 0x553   :  { %v2411_v16 = vadd.f32 %v5905_v12, %v2410_v32  ;;  %v2435_v32 = vadd.f32 %v5921_v33, %v2434_v57  ;;  %v5932_v8 = vpop.eup %3704  ;;  %3732 = vpow2.f32 %v2355_v52  ;;  %v2363_v7 = vmul.f32 1.442695, %v7173_v44 }
 0x554   :  { %7169 = vst [vmem:[#allocation26_spill] sm:$0xff] %v5932_v8  ;;  %v5934_v59 = vpop.eup %3706  ;;  %v2253_v55 = vmul.f32 1.442695, %v2116_v63  ;;  %3734 = vpow2.f32 %v2359_v47  ;;  %v2367_v63 = vmul.f32 1.442695, %v7175_v46 }
 0x555   :  { %v2412_v49 = vadd.f32 %v5914_v22, %v2411_v16  ;;  %v2436_v2 = vadd.f32 %v5932_v8, %v2435_v32  ;;  %v5941_v25 = vpop.eup %3708  ;;  %v7172_v16 = vld [vmem:[#allocation39_spill] sm:$0xff] }
 0x556   :  { %7171 = vst [vmem:[#allocation27_spill] sm:$0xff] %v5941_v25  ;;  %v2118_v57 = vsub.f32 %v7172_v16, %v5659_v42  ;;  %v5947_v33 = vpop.eup %3710  ;;  %3736 = vpow2.f32 %v2253_v55  ;;  %v7179_v55 = vld [vmem:[#allocation43_spill] sm:$0xff] }
 0x557   :  { %v2413_v15 = vadd.f32 %v5925_v36, %v2412_v49  ;;  %v2437_v32 = vadd.f32 %v5941_v25, %v2436_v2  ;;  %v5954_v34 = vpop.eup %3712  ;;  %3738 = vpow2.f32 %v2363_v7  ;;  %v2373_v25 = vmul.f32 1.442695, %v2371_v29 }
 0x558   :  { %7174 = vst [vmem:[#allocation29_spill] sm:$0xff] %v5954_v34  ;;  %v5956_v8 = vpop.eup %3714  ;;  %v2257_v2 = vmul.f32 1.442695, %v2118_v57  ;;  %3740 = vpow2.f32 %v2367_v63  ;;  %v2122_v57 = vsub.f32 %v7179_v55, %v5659_v42 }
 0x559   :  { %v2414_v49 = vadd.f32 %v5934_v59, %v2413_v15  ;;  %v2438_v52 = vadd.f32 %v5954_v34, %v2437_v32  ;;  %v5963_v16 = vpop.eup %3716  ;;  %v2120_v15 = vsub.f32 %v7177_v51, %v5659_v42 }
 0x55a   :  { %7176 = vst [vmem:[#allocation30_spill] sm:$0xff] %v5963_v16  ;;  %v5967_v44 = vpop.eup %3718  ;;  %3742 = vpow2.f32 %v2257_v2  ;;  %v2265_v55 = vmul.f32 1.442695, %v2122_v57 }
 0x55b   :  { %v2415_v56 = vadd.f32 %v5947_v33, %v2414_v49  ;;  %v2439_v24 = vadd.f32 %v5963_v16, %v2438_v52  ;;  %v5971_v35 = vpop.eup %3720  ;;  %v2261_v51 = vmul.f32 1.442695, %v2120_v15  ;;  %3744 = vpow2.f32 %v2373_v25 }
 0x55c   :  { %7178 = vst [vmem:[#allocation32_spill] sm:$0xff] %v5971_v35  ;;  %v5975_v46 = vpop.eup %3722 }
 0x55d   :  { %v2416_v47 = vadd.f32 %v5956_v8, %v2415_v56  ;;  %v2440_v32 = vadd.f32 %v5971_v35, %v2439_v24  ;;  %v5979_v7 = vpop.eup %3724  ;;  %v7181_v24 = vld [vmem:[#allocation48_spill] sm:$0xff]  ;;  %3746 = vpow2.f32 %v2261_v51 }
 0x55e   :  { %7180 = vst [vmem:[#allocation33_spill] sm:$0xff] %v5979_v7  ;;  %v5982_v56 = vpop.eup %3726  ;;  %v2124_v35 = vsub.f32 %v7181_v24, %v5659_v42  ;;  %3748 = vpow2.f32 %v2265_v55 }
 0x55f   :  { %v2417_v49 = vadd.f32 %v5967_v44, %v2416_v47  ;;  %v2441_v63 = vadd.f32 %v5979_v7, %v2440_v32  ;;  %v5986_v47 = vpop.eup %3728 }
 0x560   :  { %v5990_v2 = vpop.eup %3730  ;;  %v2269_v34 = vmul.f32 1.442695, %v2124_v35 }
 0x561   :  { %v2418_v29 = vadd.f32 %v5975_v46, %v2417_v49  ;;  %7182 = vst [vmem:[#allocation35_spill] sm:$0xff] %v5990_v2  ;;  %v5993_v25 = vpop.eup %3732  ;;  %v2442_v49 = vadd.f32 %v5990_v2, %v2441_v63 }
 0x562   :  { %v5997_v32 = vpop.eup %3734  ;;  %3750 = vpow2.f32 %v2269_v34 }
 0x563   :  { %v2419_v52 = vadd.f32 %v5982_v56, %v2418_v29  ;;  %v7183_v29 = vld [vmem:[#allocation49_spill] sm:$0xff]  ;;  %v6001_v24 = vpop.eup %3736 }
 0x564   :  { %v2126_v7 = vsub.f32 %v7183_v29, %v5659_v42  ;;  %7184 = vst [vmem:[#allocation36_spill] sm:$0xff] %v6001_v24  ;;  %v6004_v51 = vpop.eup %3738 }
 0x565   :  { %v2420_v15 = vadd.f32 %v5986_v47, %v2419_v52  ;;  %v2443_v52 = vadd.f32 %v6001_v24, %v2442_v49  ;;  %v6008_v63 = vpop.eup %3740  ;;  %v7187_v49 = vld [vmem:[#allocation52_spill] sm:$0xff] }
 0x566   :  { %v2273_v60 = vmul.f32 1.442695, %v2126_v7 }
 0x567   :  { %v2421_v16 = vadd.f32 %v5993_v25, %v2420_v15  ;;  %v7185_v15 = vld [vmem:[#allocation51_spill] sm:$0xff]  ;;  %v6012_v29 = vpop.eup %3742 }
 0x568   :  { %v2128_v2 = vsub.f32 %v7185_v15, %v5659_v42  ;;  %7186 = vst [vmem:[#allocation38_spill] sm:$0xff] %v6012_v29  ;;  %v6015_v55 = vpop.eup %3744  ;;  %3752 = vpow2.f32 %v2273_v60  ;;  %v2134_v60 = vsub.f32 %v7087_v30, %v5659_v42 }
 0x569   :  { %v2422_v57 = vadd.f32 %v5997_v32, %v2421_v16  ;;  %v2444_v16 = vadd.f32 %v6012_v29, %v2443_v52  ;;  %v7203_v29 = vld [vmem:[#allocation66_spill] sm:$0xff] }
 0x56a   :  { %v2277_v24 = vmul.f32 1.442695, %v2128_v2  ;;  %v6021_v38 = vpop.eup %3746 }
 0x56b   :  { %v2423_v50 = vadd.f32 %v6004_v51, %v2422_v57  ;;  %v2130_v57 = vsub.f32 %v7187_v49, %v5659_v42  ;;  %7188 = vst [vmem:[#allocation39_spill] sm:$0xff] %v6021_v38  ;;  %v2445_v34 = vadd.f32 %v6021_v38, %v2444_v16  ;;  %v6024_v15 = vpop.eup %3748 }
 0x56c   :  { %3754 = vpow2.f32 %v2277_v24  ;;  %7189 = vst [vmem:[#allocation41_spill] sm:$0xff] %v6024_v15  ;;  %v2136_v24 = vsub.f32 %v7088_v54, %v5659_v42  ;;  %v7197_v54 = vld [vmem:[#allocation60_spill] sm:$0xff] }
 0x56d   :  { %v2424_v35 = vadd.f32 %v6008_v63, %v2423_v50  ;;  %v2281_v7 = vmul.f32 1.442695, %v2130_v57  ;;  %v7190_v50 = vld [vmem:[#allocation54_spill] sm:$0xff]  ;;  %v2446_v52 = vadd.f32 %v6024_v15, %v2445_v34  ;;  %v7195_v15 = vld [vmem:[#allocation59_spill] sm:$0xff] }
 0x56e   :  { %v2132_v20 = vsub.f32 %v7190_v50, %v5659_v42  ;;  %v7194_v34 = vld [vmem:[#allocation58_spill] sm:$0xff]  ;;  %v2140_v30 = vsub.f32 %v7195_v15, %v5659_v42 }
 0x56f   :  { %v2473_v5 = vadd.f32 %v6015_v55, %v2424_v35  ;;  %v6029_v35 = vpop.eup %3750 }
 0x570   :  { %7191 = vst [vmem:[#allocation43_spill] sm:$0xff] %v6029_v35  ;;  %v2285_v2 = vmul.f32 1.442695, %v2132_v20  ;;  %v2447_v49 = vadd.f32 %v6029_v35, %v2446_v52  ;;  %v2293_v20 = vmul.f32 1.442695, %v2136_v24 }
 0x571   :  { %3756 = vrcp.f32 %v2473_v5  ;;  %v2289_v5 = vmul.f32 1.442695, %v2134_v60  ;;  %v2142_v60 = vsub.f32 %v7197_v54, %v5659_v42 }
 0x572   :  { %3758 = vpow2.f32 %v2281_v7  ;;  %v2138_v7 = vsub.f32 %v7194_v34, %v5659_v42 }
 0x573   :  { %3760 = vpow2.f32 %v2285_v2  ;;  %v2305_v54 = vmul.f32 1.442695, %v2142_v60 }
 0x574   :  { %3762 = vpow2.f32 %v2289_v5  ;;  %v2297_v2 = vmul.f32 1.442695, %v2138_v7 }
 0x575   :  { %v6034_v16 = vpop.eup %3752  ;;  %3764 = vpow2.f32 %v2293_v20 }
 0x576   :  { %7192 = vst [vmem:[#allocation48_spill] sm:$0xff] %v6034_v16  ;;  %v2448_v57 = vadd.f32 %v6034_v16, %v2447_v49  ;;  %v2301_v49 = vmul.f32 1.442695, %v2140_v30  ;;  %3766 = vpow2.f32 %v2297_v2 }
 0x578   :  { %3768 = vpow2.f32 %v2301_v49 }
 0x579   :  { %v6039_v50 = vpop.eup %3754  ;;  %3770 = vpow2.f32 %v2305_v54 }
 0x57a   :  { %7193 = vst [vmem:[#allocation49_spill] sm:$0xff] %v6039_v50  ;;  %v2449_v52 = vadd.f32 %v6039_v50, %v2448_v57 }
 0x57e   :  { %v6046_v35 = vpop.eup %3756 }
 0x57f   :  { %v6048_v38 = vpop.eup %3758  ;;  %v6054_v34 = vmul.f32 %v6046_v35, %v5846_v28  ;;  %v6058_v15 = vmul.f32 %v6046_v35, %v5857_v48  ;;  %v6062_v24 = vmul.f32 %v6046_v35, %v5868_v23  ;;  %v6067_v57 = vmul.f32 %v6046_v35, %v5877_v10 }
 0x580   :  { %7196 = vst [vmem:[#allocation51_spill] sm:$0xff] %v6048_v38  ;;  %v2450_v5 = vadd.f32 %v6048_v38, %v2449_v52  ;;  %v6071_v7 = vmul.f32 %v6046_v35, %v5888_v41  ;;  %v6075_v28 = vmul.f32 %v6046_v35, %v5894_v61  ;;  %v6079_v48 = vmul.f32 %v6046_v35, %v5905_v12  ;;  %v6125_v30 = vpop.eup %3760  ;;  %v7201_v52 = vld [vmem:[#allocation62_spill] sm:$0xff] }
 0x581   :  { %v6083_v23 = vmul.f32 %v6046_v35, %v5914_v22  ;;  %v6087_v10 = vmul.f32 %v6046_v35, %v5925_v36  ;;  %v6091_v41 = vmul.f32 %v6046_v35, %v5934_v59  ;;  %v6095_v61 = vmul.f32 %v6046_v35, %v5947_v33  ;;  %7199 = vst [vmem:[#allocation54_spill] sm:$0xff] %v6125_v30  ;;  %v6132_v38 = vpop.eup %3762 }
 0x582   :  { %v6099_v12 = vmul.f32 %v6046_v35, %v5956_v8  ;;  %v6103_v22 = vmul.f32 %v6046_v35, %v5967_v44  ;;  %v6107_v36 = vmul.f32 %v6046_v35, %v5975_v46  ;;  %v6111_v59 = vmul.f32 %v6046_v35, %v5982_v56  ;;  %v7200_v46 = vld [vmem:[#allocation61_spill] sm:$0xff]  ;;  %v6137_v16 = vpop.eup %3764 }
 0x583   :  { %v6115_v33 = vmul.f32 %v6046_v35, %v5986_v47  ;;  %v6119_v8 = vmul.f32 %v6046_v35, %v5993_v25  ;;  %v6123_v44 = vmul.f32 %v6046_v35, %v5997_v32  ;;  %v2144_v20 = vsub.f32 %v7200_v46, %v5659_v42  ;;  %v7202_v25 = vld [vmem:[#allocation64_spill] sm:$0xff]  ;;  %v6150_v54 = vpop.eup %3766 }
 0x584   :  { %v2451_v56 = vadd.f32 %v6125_v30, %v2450_v5  ;;  %v2146_v47 = vsub.f32 %v7201_v52, %v5659_v42  ;;  %v2148_v50 = vsub.f32 %v7202_v25, %v5659_v42  ;;  %v2150_v46 = vsub.f32 %v7203_v29, %v5659_v42  ;;  %v7204_v30 = vld [vmem:[#allocation67_spill] sm:$0xff] }
 0x585   :  { %7198 = vst [vmem:[#allocation52_spill] sm:$0xff] %v6123_v44  ;;  %v2309_v32 = vmul.f32 1.442695, %v2144_v20  ;;  %v2152_v52 = vsub.f32 %v7204_v30, %v5659_v42  ;;  %v7205_v44 = vld [vmem:[#allocation68_spill] sm:$0xff]  ;;  %v2477_v20 = vmul.f32 %v6046_v35, %v5650_v27  ;;  %v2156_v30 = vsub.f32 %v5479_v4, %v5659_v42  ;;  %v3810_v4 = vld [vmem:[%s6909_s3 + $0x10] sm:$0xff] }
 0x586   :  { %v2452_v2 = vadd.f32 %v6132_v38, %v2451_v56  ;;  %v2313_v5 = vmul.f32 1.442695, %v2146_v47  ;;  %v2317_v60 = vmul.f32 1.442695, %v2148_v50  ;;  %v2154_v25 = vsub.f32 %v7205_v44, %v5659_v42 }
 0x587   :  { %3772 = vpow2.f32 %v2309_v32  ;;  %v2479_v56 = vmul.f32 %v6046_v35, %v5654_v17  ;;  %v2321_v29 = vmul.f32 1.442695, %v2150_v46  ;;  %v2158_v50 = vsub.f32 %v5489_v19, %v5659_v42  ;;  %v3809_v17 = vld [vmem:[%s6909_s3] sm:$0xff]  ;;  %v6165_v19 = vpop.eup %3768 }
 0x588   :  { %v2453_v49 = vadd.f32 %v6137_v16, %v2452_v2  ;;  %3774 = vpow2.f32 %v2313_v5  ;;  %v2325_v47 = vmul.f32 1.442695, %v2152_v52  ;;  %v2329_v32 = vmul.f32 1.442695, %v2154_v25 }
 0x589   :  { %3776 = vpow2.f32 %v2317_v60  ;;  %v2481_v27 = vmul.f32 %v6046_v35, %v5663_v53  ;;  %v2577_v2 = vmul.f32 %v3809_v17, %v2477_v20  ;;  %v2579_v46 = vmul.f32 %v3810_v4, %v2479_v56  ;;  %v3811_v56 = vld [vmem:[%s6909_s3 + $0x20] sm:$0xff] }
 0x58a   :  { %v2454_v44 = vadd.f32 %v6150_v54, %v2453_v49  ;;  %3778 = vpow2.f32 %v2321_v29  ;;  %v2160_v5 = vsub.f32 %v5505_v37, %v5659_v42  ;;  %v2162_v52 = vsub.f32 %v5520_v62, %v5659_v42 }
 0x58b   :  { %v2333_v53 = vmul.f32 1.442695, %v2156_v30  ;;  %v2483_v60 = vmul.f32 %v6046_v35, %v5670_v13  ;;  %3780 = vpow2.f32 %v2325_v47  ;;  %v2337_v49 = vmul.f32 1.442695, %v2158_v50  ;;  %v6181_v30 = vpop.eup %3770 }
 0x58c   :  { %v2455_v25 = vadd.f32 %v6165_v19, %v2454_v44  ;;  %3782 = vpow2.f32 %v2329_v32  ;;  %v2485_v20 = vmul.f32 %v6046_v35, %v5683_v11  ;;  %v2581_v37 = vmul.f32 %v3811_v56, %v2481_v27  ;;  %v3812_v44 = vld [vmem:[%s6909_s3 + $0x30] sm:$0xff] }
 0x58d   :  { %v2675_v29 = vsel %vm250_vm1, %v2577_v2, 0.0  ;;  %v2676_v62 = vsel %vm250_vm1, %v2579_v46, 0.0  ;;  %v2164_v13 = vsub.f32 %v5538_v40, %v5659_v42  ;;  %3784 = vpow2.f32 %v2333_v53 }
 0x58e   :  { %v2341_v50 = vmul.f32 1.442695, %v2160_v5  ;;  %v2345_v47 = vmul.f32 1.442695, %v2162_v52  ;;  %v2487_v11 = vmul.f32 %v6046_v35, %v5688_v14  ;;  %v2583_v32 = vmul.f32 %v3812_v44, %v2483_v60  ;;  %v3813_v5 = vld [vmem:[%s6909_s3 + $0x40] sm:$0xff] }
 0x58f   :  { %3786 = vpow2.f32 %v2337_v49  ;;  %v2456_v27 = vadd.f32 %v6181_v30, %v2455_v25  ;;  %v2677_v2 = vadd.f32 %v2676_v62, %v2675_v29  ;;  %v6195_v40 = vmul.f32 %v6046_v35, %v6004_v51 }
 0x590   :  { %v6199_v4 = vmul.f32 %v6046_v35, %v6008_v63  ;;  %v6203_v14 = vmul.f32 %v6046_v35, %v6015_v55  ;;  %v2489_v46 = vmul.f32 %v6046_v35, %v5693_v21  ;;  %v2585_v52 = vmul.f32 %v3813_v5, %v2485_v20  ;;  %v3814_v21 = vld [vmem:[%s6909_s3 + $0x50] sm:$0xff] }
 0x591   :  { %v2678_v53 = vsel %vm250_vm1, %v2581_v37, 0.0  ;;  %3788 = vpow2.f32 %v2341_v50  ;;  %v2349_v63 = vmul.f32 1.442695, %v2164_v13  ;;  %v2491_v55 = vmul.f32 %v6046_v35, %v5698_v31  ;;  %v3815_v50 = vld [vmem:[%s6909_s3 + $0x60] sm:$0xff] }
 0x592   :  { %v2679_v49 = vadd.f32 %v2678_v53, %v2677_v2  ;;  %v2587_v25 = vmul.f32 %v3814_v21, %v2487_v11  ;;  %v2680_v56 = vsel %vm250_vm1, %v2583_v32, 0.0  ;;  %3790 = vpow2.f32 %v2345_v47  ;;  %v7207_v47 = vld [vmem:[#allocation55_spill] sm:$0xff]  ;;  %v3816_v53 = vld [vmem:[%s6909_s3 + $0x70] sm:$0xff] }
 0x593   :  { %v7206_v29 = vsub.f32 %v5554_v58, %v5659_v42  ;;  %v2493_v31 = vmul.f32 %v6046_v35, %v5703_v18  ;;  %v2589_v11 = vmul.f32 %v3815_v50, %v2489_v46  ;;  %v2682_v44 = vsel %vm250_vm1, %v2585_v52, 0.0 }
 0x594   :  { %v6191_v17 = vpop.eup %3772  ;;  %v2681_v13 = vadd.f32 %v2680_v56, %v2679_v49  ;;  %3792 = vpow2.f32 %v2349_v63  ;;  %v7208_v58 = vsub.f32 %v7207_v47, %v5659_v42  ;;  %v2495_v18 = vmul.f32 %v6046_v35, %v5708_v6  ;;  %v7209_v63 = vld [vmem:[#allocation57_spill] sm:$0xff] }
 0x595   :  { %v2457_v51 = vadd.f32 %v6191_v17, %v2456_v27  ;;  %v6212_v60 = vpop.eup %3774  ;;  %v2353_v62 = vmul.f32 1.442695, %v7206_v29  ;;  %v2591_v46 = vmul.f32 %v3816_v53, %v2491_v55  ;;  %v2684_v52 = vsel %vm250_vm1, %v2587_v25, 0.0  ;;  %v7211_v6 = vld [vmem:[#allocation21_spill] sm:$0xff]  ;;  %v3817_v55 = vld [vmem:[%s6909_s3 + $0x80] sm:$0xff] }
 0x596   :  { %v6221_v37 = vpop.eup %3776  ;;  %v2357_v2 = vmul.f32 1.442695, %v7208_v58  ;;  %v2683_v5 = vadd.f32 %v2682_v44, %v2681_v13  ;;  %v7210_v21 = vsub.f32 %v7209_v63, %v5659_v42  ;;  %v2497_v13 = vmul.f32 %v6046_v35, %v7211_v6  ;;  %v7214_v58 = vld [vmem:[#allocation46_spill] sm:$0xff]  ;;  %v7215_v6 = vld [vmem:[#allocation19_spill] sm:$0xff] }
 0x597   :  { %v2458_v20 = vadd.f32 %v6212_v60, %v2457_v51  ;;  %v6233_v27 = vpop.eup %3778  ;;  %3794 = vpow2.f32 %v2353_v62  ;;  %v2593_v25 = vmul.f32 %v3817_v55, %v2493_v31  ;;  %v2686_v50 = vsel %vm250_vm1, %v2589_v11, 0.0  ;;  %v7212_v62 = vld [vmem:[#allocation45_spill] sm:$0xff] }
 0x598   :  { %v6245_v49 = vpop.eup %3780  ;;  %v2361_v56 = vmul.f32 1.442695, %v7210_v21  ;;  %3796 = vpow2.f32 %v2357_v2  ;;  %v2499_v63 = vmul.f32 %v6046_v35, %v5718_v1  ;;  %v3818_v31 = vld [vmem:[%s6909_s3 + $0x90] sm:$0xff]  ;;  %v2688_v2 = vsel %vm250_vm1, %v2591_v46, 0.0 }
 0x599   :  { %v2459_v32 = vadd.f32 %v6221_v37, %v2458_v20  ;;  %v2685_v20 = vadd.f32 %v2684_v52, %v2683_v5  ;;  %v6250_v29 = vpop.eup %3782  ;;  %v2372_v5 = vsub.f32 %v7214_v58, %v5659_v42  ;;  %v2595_v11 = vmul.f32 %v3818_v31, %v2495_v18 }
 0x59a   :  { %v6264_v52 = vpop.eup %3784  ;;  %3798 = vpow2.f32 %v2361_v56  ;;  %v2690_v46 = vsel %vm250_vm1, %v2593_v25, 0.0 }
 0x59b   :  { %v2460_v51 = vadd.f32 %v6233_v27, %v2459_v32  ;;  %v7213_v32 = vsub.f32 %v7212_v62, %v5659_v42  ;;  %v2687_v53 = vadd.f32 %v2686_v50, %v2685_v20  ;;  %v7216_v20 = vsub.f32 %v7215_v6, %v5659_v42  ;;  %v7217_v62 = vld [vmem:[#allocation22_spill] sm:$0xff]  ;;  %v7218_v42 = vld [vmem:[#allocation25_spill] sm:$0xff] }
 0x59c   :  { %v6273_v21 = vpop.eup %3786  ;;  %v2501_v1 = vmul.f32 %v6046_v35, %v7217_v62  ;;  %v2375_v58 = vmul.f32 1.442695, %v2372_v5 }
 0x59d   :  { %v2461_v44 = vadd.f32 %v6245_v49, %v2460_v51  ;;  %v2365_v47 = vmul.f32 1.442695, %v7213_v32  ;;  %v2369_v55 = vmul.f32 1.442695, %v7216_v20  ;;  %v2689_v50 = vadd.f32 %v2688_v2, %v2687_v53  ;;  %v3819_v32 = vld [vmem:[%s6909_s3 + $0xa0] sm:$0xff]  ;;  %v3820_v2 = vld [vmem:[%s6909_s3 + $0xb0] sm:$0xff] }
 0x59e   :  { %v2597_v18 = vmul.f32 %v3819_v32, %v2497_v13  ;;  %v6285_v31 = vpop.eup %3788  ;;  %v2503_v53 = vmul.f32 %v6046_v35, %v7218_v42  ;;  %v2599_v6 = vmul.f32 %v3820_v2, %v2499_v63  ;;  %v2692_v20 = vsel %vm250_vm1, %v2595_v11, 0.0 }
 0x59f   :  { %v2462_v51 = vadd.f32 %v6250_v29, %v2461_v44  ;;  %3800 = vpow2.f32 %v2365_v47  ;;  %v2691_v56 = vadd.f32 %v2690_v46, %v2689_v50  ;;  %v7219_v47 = vld [vmem:[#allocation28_spill] sm:$0xff]  ;;  %v3821_v50 = vld [vmem:[%s6909_s3 + $0xc0] sm:$0xff] }
 0x5a0   :  { %3802 = vpow2.f32 %v2369_v55  ;;  %v2505_v5 = vmul.f32 %v6046_v35, %v7219_v47  ;;  %v2601_v62 = vmul.f32 %v3821_v50, %v2501_v1  ;;  %v2694_v32 = vsel %vm250_vm1, %v2597_v18, 0.0  ;;  %v7220_v55 = vld [vmem:[#allocation31_spill] sm:$0xff] }
 0x5a1   :  { %v2463_v44 = vadd.f32 %v6264_v52, %v2462_v51  ;;  %v2693_v25 = vadd.f32 %v2692_v20, %v2691_v56  ;;  %v6294_v51 = vpop.eup %3790  ;;  %3804 = vpow2.f32 %v2375_v58  ;;  %v3822_v56 = vld [vmem:[%s6909_s3 + $0xd0] sm:$0xff]  ;;  %v2696_v2 = vsel %vm250_vm1, %v2599_v6, 0.0 }
 0x5a2   :  { %v6303_v46 = vpop.eup %3792  ;;  %v2603_v42 = vmul.f32 %v3822_v56, %v2503_v53  ;;  %v2509_v58 = vmul.f32 %v6046_v35, %v5747_v43  ;;  %v2698_v47 = vsel %vm250_vm1, %v2601_v62, 0.0  ;;  %v2511_v6 = vmul.f32 %v6046_v35, %v5754_v3 }
 0x5a3   :  { %v2464_v13 = vadd.f32 %v6273_v21, %v2463_v44  ;;  %v2695_v11 = vadd.f32 %v2694_v32, %v2693_v25  ;;  %v2507_v44 = vmul.f32 %v6046_v35, %v7220_v55  ;;  %v2513_v62 = vmul.f32 %v6046_v35, %v5761_v45 }
 0x5a4   :  { %v6312_v18 = vpop.eup %3794 }
 0x5a5   :  { %v2465_v63 = vadd.f32 %v6285_v31, %v2464_v13  ;;  %v2697_v20 = vadd.f32 %v2696_v2, %v2695_v11  ;;  %v3823_v13 = vld [vmem:[%s6909_s3 + $0xe0] sm:$0xff]  ;;  %v6321_v32 = vpop.eup %3796  ;;  %v2700_v11 = vsel %vm250_vm1, %v2603_v42, 0.0  ;;  %v2515_v42 = vmul.f32 %v6046_v35, %v5768_v9 }
 0x5a6   :  { %v2605_v25 = vmul.f32 %v3823_v13, %v2505_v5  ;;  %v3825_v2 = vld [vmem:[%s6909_s3 + $0x100] sm:$0xff] }
 0x5a7   :  { %v2466_v1 = vadd.f32 %v6294_v51, %v2465_v63  ;;  %v2699_v53 = vadd.f32 %v2698_v47, %v2697_v20  ;;  %v3824_v63 = vld [vmem:[%s6909_s3 + $0xf0] sm:$0xff]  ;;  %v6330_v56 = vpop.eup %3798  ;;  %v2609_v3 = vmul.f32 %v3825_v2, %v2509_v58 }
 0x5a8   :  { %v2607_v43 = vmul.f32 %v3824_v63, %v2507_v44  ;;  %v3826_v47 = vld [vmem:[%s6909_s3 + $0x110] sm:$0xff] }
 0x5a9   :  { %v2467_v50 = vadd.f32 %v6303_v46, %v2466_v1  ;;  %v2701_v5 = vadd.f32 %v2700_v11, %v2699_v53  ;;  %v2702_v1 = vsel %vm250_vm1, %v2605_v25, 0.0  ;;  %v2611_v45 = vmul.f32 %v3826_v47, %v2511_v6  ;;  %v3827_v11 = vld [vmem:[%s6909_s3 + $0x120] sm:$0xff] }
 0x5aa   :  { %v2517_v25 = vmul.f32 %v6046_v35, %v5775_v39  ;;  %v2613_v9 = vmul.f32 %v3827_v11, %v2513_v62 }
 0x5ab   :  { %v2468_v55 = vadd.f32 %v6312_v18, %v2467_v50  ;;  %v2703_v44 = vadd.f32 %v2702_v1, %v2701_v5  ;;  %v2704_v50 = vsel %vm250_vm1, %v2607_v43, 0.0  ;;  %v2519_v43 = vmul.f32 %v6046_v35, %v5782_v0  ;;  %v3828_v1 = vld [vmem:[%s6909_s3 + $0x130] sm:$0xff] }
 0x5ac   :  { %v6339_v13 = vpop.eup %3800  ;;  %v2615_v39 = vmul.f32 %v3828_v1, %v2515_v42  ;;  %v3830_v42 = vld [vmem:[%s6909_s3 + $0x150] sm:$0xff] }
 0x5ad   :  { %v2469_v20 = vadd.f32 %v6321_v32, %v2468_v55  ;;  %v2705_v58 = vadd.f32 %v2704_v50, %v2703_v44  ;;  %v6348_v63 = vpop.eup %3802  ;;  %v2706_v55 = vsel %vm250_vm1, %v2609_v3, 0.0  ;;  %v3829_v3 = vld [vmem:[%s6909_s3 + $0x140] sm:$0xff]  ;;  %v2710_v50 = vsel %vm250_vm1, %v2613_v9, 0.0 }
 0x5ae   :  { %v6357_v2 = vpop.eup %3804  ;;  %v2617_v47 = vmul.f32 %v3829_v3, %v2517_v25  ;;  %v7222_v25 = vld [vmem:[#allocation37_spill] sm:$0xff] }
 0x5af   :  { %v2470_v53 = vadd.f32 %v6330_v56, %v2469_v20  ;;  %v2707_v6 = vadd.f32 %v2706_v55, %v2705_v58  ;;  %v2708_v20 = vsel %vm250_vm1, %v2611_v45, 0.0  ;;  %v7221_v58 = vld [vmem:[#allocation34_spill] sm:$0xff]  ;;  %v2619_v45 = vmul.f32 %v3830_v42, %v2519_v43 }
 0x5b0   :  { %v2521_v11 = vmul.f32 %v6046_v35, %v7221_v58  ;;  %v2712_v55 = vsel %vm250_vm1, %v2615_v39, 0.0  ;;  %v2523_v9 = vmul.f32 %v6046_v35, %v7222_v25  ;;  %v2525_v43 = vmul.f32 %v6046_v35, %v5803_v26  ;;  %v3832_v39 = vld [vmem:[%s6909_s3 + $0x170] sm:$0xff]  ;;  %v7223_v58 = vld [vmem:[#allocation40_spill] sm:$0xff] }
 0x5b1   :  { %v2471_v5 = vadd.f32 %v6339_v13, %v2470_v53  ;;  %v2709_v62 = vadd.f32 %v2708_v20, %v2707_v6  ;;  %v2714_v6 = vsel %vm250_vm1, %v2617_v47, 0.0  ;;  %v3831_v20 = vld [vmem:[%s6909_s3 + $0x160] sm:$0xff]  ;;  %v2527_v42 = vmul.f32 %v6046_v35, %v7223_v58 }
 0x5b2   :  { %v2623_v47 = vmul.f32 %v3832_v39, %v2523_v9  ;;  %v7225_v9 = vld [vmem:[#allocation50_spill] sm:$0xff] }
 0x5b3   :  { %v2472_v44 = vadd.f32 %v6348_v63, %v2471_v5  ;;  %v2711_v0 = vadd.f32 %v2710_v50, %v2709_v62  ;;  %v2716_v62 = vsel %vm250_vm1, %v2619_v45, 0.0 }
 0x5b5   :  { %v2474_v53 = vadd.f32 %v6357_v2, %v2472_v44  ;;  %v2713_v5 = vadd.f32 %v2712_v55, %v2711_v0  ;;  %v2621_v44 = vmul.f32 %v3831_v20, %v2521_v11  ;;  %v3833_v11 = vld [vmem:[%s6909_s3 + $0x180] sm:$0xff]  ;;  %v7224_v55 = vld [vmem:[#allocation42_spill] sm:$0xff]  ;;  %v2531_v20 = vmul.f32 %v6046_v35, %v7225_v9 }
 0x5b6   :  { %v2625_v45 = vmul.f32 %v3833_v11, %v2525_v43  ;;  %v2529_v26 = vmul.f32 %v6046_v35, %v7224_v55 }
 0x5b7   :  { %v2715_v1 = vadd.f32 %v2714_v6, %v2713_v5  ;;  %3806 = vrcp.f32 %v2474_v53  ;;  %v2718_v50 = vsel %vm250_vm1, %v2621_v44, 0.0  ;;  %v2720_v53 = vsel %vm250_vm1, %v2623_v47, 0.0  ;;  %v3834_v6 = vld [vmem:[%s6909_s3 + $0x190] sm:$0xff]  ;;  %v7226_v44 = vld [vmem:[#allocation56_spill] sm:$0xff] }
 0x5b8   :  { %v2722_v25 = vsel %vm250_vm1, %v2625_v45, 0.0 }
 0x5b9   :  { %v2717_v3 = vadd.f32 %v2716_v62, %v2715_v1  ;;  %v2627_v1 = vmul.f32 %v3834_v6, %v2527_v42  ;;  %v2533_v62 = vmul.f32 %v6046_v35, %v7226_v44  ;;  %v3837_v42 = vld [vmem:[%s6909_s3 + $0x1c0] sm:$0xff]  ;;  %v3840_v44 = vld [vmem:[%s6909_s3 + $0x1f0] sm:$0xff] }
 0x5bb   :  { %v2719_v0 = vadd.f32 %v2718_v50, %v2717_v3  ;;  %v3835_v3 = vld [vmem:[%s6909_s3 + $0x1a0] sm:$0xff]  ;;  %v2724_v50 = vsel %vm250_vm1, %v2627_v1, 0.0  ;;  %v2633_v35 = vmul.f32 %v3837_v42, %v2533_v62  ;;  %v2639_v62 = vmul.f32 %v3840_v44, %v6062_v24 }
 0x5bc   :  { %v2629_v43 = vmul.f32 %v3835_v3, %v2529_v26 }
 0x5bd   :  { %v2721_v5 = vadd.f32 %v2720_v53, %v2719_v0  ;;  %v3836_v0 = vld [vmem:[%s6909_s3 + $0x1b0] sm:$0xff]  ;;  %v2736_v24 = vsel %vm250_vm1, %v2639_v62, 0.0 }
 0x5be   :  { %v2631_v58 = vmul.f32 %v3836_v0, %v2531_v20  ;;  %v2726_v11 = vsel %vm250_vm1, %v2629_v43, 0.0  ;;  %v2730_v20 = vsel %vm250_vm1, %v2633_v35, 0.0  ;;  %v3841_v43 = vld [vmem:[%s6909_s3 + $0x200] sm:$0xff]  ;;  %v3842_v0 = vld [vmem:[%s6909_s3 + $0x210] sm:$0xff] }
 0x5bf   :  { %v2723_v39 = vadd.f32 %v2722_v25, %v2721_v5  ;;  %v3843_v35 = vld [vmem:[%s6909_s3 + $0x220] sm:$0xff] }
 0x5c0   :  { %v2728_v25 = vsel %vm250_vm1, %v2631_v58, 0.0  ;;  %v2643_v58 = vmul.f32 %v3842_v0, %v6071_v7  ;;  %v3848_v0 = vld [vmem:[%s6909_s3 + $0x8] sm:$0xff] }
 0x5c1   :  { %v2725_v45 = vadd.f32 %v2724_v50, %v2723_v39  ;;  %v2641_v39 = vmul.f32 %v3841_v43, %v6067_v57 }
 0x5c2   :  { %v2740_v7 = vsel %vm250_vm1, %v2643_v58, 0.0 }
 0x5c3   :  { %v2727_v1 = vadd.f32 %v2726_v11, %v2725_v45  ;;  %v2645_v11 = vmul.f32 %v3843_v35, %v6075_v28  ;;  %v2738_v57 = vsel %vm250_vm1, %v2641_v39, 0.0 }
 0x5c4   :  { %v6409_v47 = vpop.eup %3806 }
 0x5c5   :  { %v6421_v53 = vmul.f32 %v6409_v47, %v6181_v30  ;;  %v6425_v55 = vmul.f32 %v6409_v47, %v6191_v17  ;;  %v6429_v26 = vmul.f32 %v6409_v47, %v6212_v60  ;;  %v6433_v5 = vmul.f32 %v6409_v47, %v6221_v37 }
 0x5c6   :  { %v6437_v6 = vmul.f32 %v6409_v47, %v6233_v27  ;;  %v6441_v30 = vmul.f32 %v6409_v47, %v6245_v49  ;;  %v6445_v17 = vmul.f32 %v6409_v47, %v6250_v29  ;;  %v6449_v60 = vmul.f32 %v6409_v47, %v6264_v52 }
 0x5c7   :  { %v6453_v37 = vmul.f32 %v6409_v47, %v6273_v21  ;;  %v6457_v27 = vmul.f32 %v6409_v47, %v6285_v31  ;;  %v6461_v49 = vmul.f32 %v6409_v47, %v6294_v51  ;;  %v6465_v29 = vmul.f32 %v6409_v47, %v6303_v46  ;;  %v3838_v51 = vld [vmem:[%s6909_s3 + $0x1d0] sm:$0xff] }
 0x5c8   :  { %v6469_v52 = vmul.f32 %v6409_v47, %v6312_v18  ;;  %v6473_v21 = vmul.f32 %v6409_v47, %v6321_v32  ;;  %v6477_v31 = vmul.f32 %v6409_v47, %v6330_v56  ;;  %v2635_v46 = vmul.f32 %v3838_v51, %v6054_v34  ;;  %v3839_v18 = vld [vmem:[%s6909_s3 + $0x1e0] sm:$0xff] }
 0x5c9   :  { %v2729_v9 = vadd.f32 %v2728_v25, %v2727_v1  ;;  %v2637_v32 = vmul.f32 %v3839_v18, %v6058_v15  ;;  %v3844_v1 = vld [vmem:[%s6909_s3 + $0x230] sm:$0xff]  ;;  %v3845_v25 = vld [vmem:[%s6909_s3 + $0x240] sm:$0xff]  ;;  %v2742_v28 = vsel %vm250_vm1, %v2645_v11, 0.0  ;;  %v7227_v18 = vld [vmem:[#allocation44_spill] sm:$0xff] }
 0x5ca   :  { %v2732_v34 = vsel %vm250_vm1, %v2635_v46, 0.0  ;;  %v2647_v51 = vmul.f32 %v3844_v1, %v6079_v48  ;;  %v3846_v48 = vld [vmem:[%s6909_s3 + $0x250] sm:$0xff]  ;;  %v3851_v11 = vld [vmem:[%s6909_s3 + $0x280] sm:$0xff]  ;;  %v7230_v1 = vld [vmem:[#allocation16_spill] sm:$0xff] }
 0x5cb   :  { %v2731_v56 = vadd.f32 %v2730_v20, %v2729_v9  ;;  %v2734_v15 = vsel %vm250_vm1, %v2637_v32, 0.0  ;;  %v2649_v9 = vmul.f32 %v3845_v25, %v6083_v23  ;;  %v2478_v32 = vmul.f32 %v6409_v47, %v7227_v18  ;;  %v7228_v20 = vld [vmem:[#allocation47_spill] sm:$0xff] }
 0x5cc   :  { %v2651_v62 = vmul.f32 %v3846_v48, %v6087_v10  ;;  %v3847_v23 = vld [vmem:[%s6909_s3 + $0x260] sm:$0xff]  ;;  %v3849_v10 = vld [vmem:[%s6909_s3 + $0x18] sm:$0xff] }
 0x5cd   :  { %v2733_v3 = vadd.f32 %v2732_v34, %v2731_v56  ;;  %v2480_v56 = vmul.f32 %v6409_v47, %v7228_v20  ;;  %v2744_v34 = vsel %vm250_vm1, %v2647_v51, 0.0  ;;  %v2746_v39 = vsel %vm250_vm1, %v2649_v9, 0.0  ;;  %v7231_v25 = vld [vmem:[#allocation15_spill] sm:$0xff] }
 0x5ce   :  { %v2578_v58 = vmul.f32 %v3848_v0, %v2478_v32  ;;  %v2484_v51 = vmul.f32 %v6409_v47, %v7230_v1  ;;  %v2486_v9 = vmul.f32 %v6409_v47, %v7231_v25  ;;  %v3853_v32 = vld [vmem:[%s6909_s3 + $0x290] sm:$0xff]  ;;  %v7233_v0 = vld [vmem:[#allocation18_spill] sm:$0xff] }
 0x5cf   :  { %v2735_v50 = vadd.f32 %v2734_v15, %v2733_v3  ;;  %v2653_v3 = vmul.f32 %v3847_v23, %v6091_v41  ;;  %v7229_v15 = vld [vmem:[#allocation53_spill] sm:$0xff]  ;;  %v2659_v20 = vmul.f32 %v3853_v32, %v6103_v22 }
 0x5d0   :  { %v3850_v41 = vld [vmem:[%s6909_s3 + $0x270] sm:$0xff]  ;;  %v2772_v18 = vsel %vm250_vm1, %v2578_v58, 0.0  ;;  %v2490_v58 = vmul.f32 %v6409_v47, %v7233_v0 }
 0x5d1   :  { %v2737_v42 = vadd.f32 %v2736_v24, %v2735_v50  ;;  %v2482_v50 = vmul.f32 %v6409_v47, %v7229_v15  ;;  %v2580_v24 = vmul.f32 %v3849_v10, %v2480_v56  ;;  %v2655_v35 = vmul.f32 %v3850_v41, %v6095_v61  ;;  %v3852_v61 = vld [vmem:[%s6909_s3 + $0x28] sm:$0xff]  ;;  %v3854_v56 = vld [vmem:[%s6909_s3 + $0x2a0] sm:$0xff]  ;;  %v7232_v23 = vld [vmem:[#allocation17_spill] sm:$0xff] }
 0x5d2   :  { %v3856_v10 = vld [vmem:[%s6909_s3 + $0x48] sm:$0xff]  ;;  %v6591_v41 = vmul.f32 %v6409_v47, %v6357_v2 }
 0x5d3   :  { %v2739_v45 = vadd.f32 %v2738_v57, %v2737_v42  ;;  %v2657_v57 = vmul.f32 %v3851_v11, %v6099_v12  ;;  %v2773_v12 = vsel %vm250_vm1, %v2580_v24, 0.0  ;;  %v2586_v24 = vmul.f32 %v3856_v10, %v2486_v9  ;;  %v7238_v10 = vld [vmem:[#allocation65_spill] sm:$0xff] }
 0x5d4   :  { %v2774_v15 = vadd.f32 %v2773_v12, %v2772_v18  ;;  %v3860_v12 = vld [vmem:[%s6909_s3 + $0x68] sm:$0xff] }
 0x5d5   :  { %v2741_v46 = vadd.f32 %v2740_v7, %v2739_v45  ;;  %v2748_v45 = vsel %vm250_vm1, %v2651_v62, 0.0  ;;  %v2750_v7 = vsel %vm250_vm1, %v2653_v3, 0.0  ;;  %v2752_v62 = vsel %vm250_vm1, %v2655_v35, 0.0 }
 0x5d6   :  { %v2488_v3 = vmul.f32 %v6409_v47, %v7232_v23  ;;  %v2590_v32 = vmul.f32 %v3860_v12, %v2490_v58 }
 0x5d7   :  { %v2743_v44 = vadd.f32 %v2742_v28, %v2741_v46  ;;  %v2582_v28 = vmul.f32 %v3852_v61, %v2482_v50  ;;  %v6577_v50 = vmul.f32 %v6409_v47, %v6339_v13  ;;  %v3857_v13 = vld [vmem:[%s6909_s3 + $0x2b0] sm:$0xff] }
 0x5d9   :  { %v2745_v43 = vadd.f32 %v2744_v34, %v2743_v44  ;;  %v2661_v44 = vmul.f32 %v3854_v56, %v6107_v36  ;;  %v2754_v34 = vsel %vm250_vm1, %v2657_v57, 0.0  ;;  %v6581_v36 = vmul.f32 %v6409_v47, %v6348_v63  ;;  %v3861_v56 = vld [vmem:[%s6909_s3 + $0x2d0] sm:$0xff] }
 0x5da   :  { %v2663_v63 = vmul.f32 %v3857_v13, %v6111_v59  ;;  %v2756_v57 = vsel %vm250_vm1, %v2659_v20, 0.0  ;;  %v2779_v20 = vsel %vm250_vm1, %v2586_v24, 0.0  ;;  %v2498_v24 = vmul.f32 %v6409_v47, %v7238_v10  ;;  %v3864_v13 = vld [vmem:[%s6909_s3 + $0x88] sm:$0xff] }
 0x5db   :  { %v2747_v42 = vadd.f32 %v2746_v39, %v2745_v43  ;;  %v3855_v43 = vld [vmem:[%s6909_s3 + $0x38] sm:$0xff]  ;;  %v2758_v61 = vsel %vm250_vm1, %v2661_v44, 0.0 }
 0x5dc   :  { %v2584_v39 = vmul.f32 %v3855_v43, %v2484_v51  ;;  %v3858_v51 = vld [vmem:[%s6909_s3 + $0x58] sm:$0xff]  ;;  %v2760_v23 = vsel %vm250_vm1, %v2663_v63, 0.0 }
 0x5dd   :  { %v2749_v46 = vadd.f32 %v2748_v45, %v2747_v42  ;;  %v2775_v42 = vsel %vm250_vm1, %v2582_v28, 0.0  ;;  %v7234_v45 = vld [vmem:[#allocation20_spill] sm:$0xff]  ;;  %v7235_v28 = vld [vmem:[#allocation63_spill] sm:$0xff] }
 0x5de   :  { %v2776_v11 = vadd.f32 %v2775_v42, %v2774_v15  ;;  %v2492_v1 = vmul.f32 %v6409_v47, %v7234_v45  ;;  %v2777_v2 = vsel %vm250_vm1, %v2584_v39, 0.0  ;;  %v2494_v18 = vmul.f32 %v6409_v47, %v7235_v28  ;;  %v7237_v15 = vld [vmem:[#allocation52_spill] sm:$0xff] }
 0x5df   :  { %v2751_v48 = vadd.f32 %v2750_v7, %v2749_v46  ;;  %v2588_v7 = vmul.f32 %v3858_v51, %v2488_v3  ;;  %v3859_v46 = vld [vmem:[%s6909_s3 + $0x2c0] sm:$0xff]  ;;  %v3862_v3 = vld [vmem:[%s6909_s3 + $0x78] sm:$0xff]  ;;  %v7239_v51 = vld [vmem:[#allocation24_spill] sm:$0xff] }
 0x5e0   :  { %v2665_v59 = vmul.f32 %v3859_v46, %v6115_v33  ;;  %v2778_v9 = vadd.f32 %v2777_v2, %v2776_v11  ;;  %v2667_v33 = vmul.f32 %v3861_v56, %v6119_v8  ;;  %v2592_v43 = vmul.f32 %v3862_v3, %v2492_v1  ;;  %v3865_v11 = vld [vmem:[%s6909_s3 + $0x2f0] sm:$0xff]  ;;  %v3866_v46 = vld [vmem:[%s6909_s3 + $0x98] sm:$0xff] }
 0x5e1   :  { %v2753_v22 = vadd.f32 %v2752_v62, %v2751_v48  ;;  %v2781_v39 = vsel %vm250_vm1, %v2588_v7, 0.0  ;;  %v2594_v63 = vmul.f32 %v3864_v13, %v2494_v18  ;;  %v2500_v7 = vmul.f32 %v6409_v47, %v7239_v51  ;;  %v7240_v18 = vld [vmem:[#allocation26_spill] sm:$0xff]  ;;  %v7243_v13 = vld [vmem:[#allocation13_spill] sm:$0xff] }
 0x5e2   :  { %v2780_v62 = vadd.f32 %v2779_v20, %v2778_v9  ;;  %v2762_v42 = vsel %vm250_vm1, %v2665_v59, 0.0  ;;  %v2764_v2 = vsel %vm250_vm1, %v2667_v33, 0.0  ;;  %v3867_v9 = vld [vmem:[%s6909_s3 + $0x300] sm:$0xff]  ;;  %v2502_v12 = vmul.f32 %v6409_v47, %v7240_v18  ;;  %v3868_v20 = vld [vmem:[%s6909_s3 + $0xa8] sm:$0xff]  ;;  %v3873_v18 = vld [vmem:[%s6909_s3 + $0xf8] sm:$0xff] }
 0x5e3   :  { %v2755_v35 = vadd.f32 %v2754_v34, %v2753_v22  ;;  %v7236_v34 = vld [vmem:[#allocation23_spill] sm:$0xff]  ;;  %v2598_v56 = vmul.f32 %v3868_v20, %v2498_v24  ;;  %v2787_v33 = vsel %vm250_vm1, %v2594_v63, 0.0  ;;  %v2869_v63 = vmul.f32 %v6203_v14, %v7243_v13  ;;  %v3872_v14 = vld [vmem:[%s6909_s3 + $0xe8] sm:$0xff] }
 0x5e4   :  { %v2496_v44 = vmul.f32 %v6409_v47, %v7236_v34  ;;  %v3863_v22 = vld [vmem:[%s6909_s3 + $0x2e0] sm:$0xff]  ;;  %v2782_v58 = vadd.f32 %v2781_v39, %v2780_v62 }
 0x5e5   :  { %v2757_v25 = vadd.f32 %v2756_v57, %v2755_v35  ;;  %v2669_v8 = vmul.f32 %v3863_v22, %v7237_v15  ;;  %v2783_v35 = vsel %vm250_vm1, %v2590_v32, 0.0  ;;  %v2671_v57 = vmul.f32 %v3865_v11, %v6195_v40  ;;  %v7241_v34 = vld [vmem:[#allocation27_spill] sm:$0xff]  ;;  %v7242_v15 = vld [vmem:[#allocation29_spill] sm:$0xff]  ;;  %v7244_v11 = vld [vmem:[#allocation30_spill] sm:$0xff] }
 0x5e6   :  { %v2784_v1 = vadd.f32 %v2783_v35, %v2782_v58  ;;  %v2596_v59 = vmul.f32 %v3866_v46, %v2496_v44  ;;  %v2673_v40 = vmul.f32 %v3867_v9, %v6199_v4  ;;  %v2504_v44 = vmul.f32 %v6409_v47, %v7241_v34  ;;  %v3870_v58 = vld [vmem:[%s6909_s3 + $0xc8] sm:$0xff] }
 0x5e7   :  { %v2759_v48 = vadd.f32 %v2758_v61, %v2757_v25  ;;  %v2785_v25 = vsel %vm250_vm1, %v2592_v43, 0.0  ;;  %v2766_v32 = vsel %vm250_vm1, %v2669_v8, 0.0  ;;  %v2768_v4 = vsel %vm250_vm1, %v2671_v57, 0.0  ;;  %v7245_v46 = vld [vmem:[#allocation32_spill] sm:$0xff] }
 0x5e8   :  { %v2786_v28 = vadd.f32 %v2785_v25, %v2784_v1  ;;  %v2789_v43 = vsel %vm250_vm1, %v2596_v59, 0.0  ;;  %v2506_v8 = vmul.f32 %v6409_v47, %v7242_v15  ;;  %v2602_v10 = vmul.f32 %v3870_v58, %v2502_v12  ;;  %v3876_v58 = vld [vmem:[%s6909_s3 + $0x128] sm:$0xff] }
 0x5e9   :  { %v2761_v0 = vadd.f32 %v2760_v23, %v2759_v48  ;;  %v3869_v23 = vld [vmem:[%s6909_s3 + $0xb8] sm:$0xff]  ;;  %v2791_v24 = vsel %vm250_vm1, %v2598_v56, 0.0  ;;  %v2508_v57 = vmul.f32 %v6409_v47, %v7244_v11  ;;  %v2510_v59 = vmul.f32 %v6409_v47, %v7245_v46  ;;  %v7247_v56 = vld [vmem:[#allocation35_spill] sm:$0xff] }
 0x5ea   :  { %v2788_v62 = vadd.f32 %v2787_v33, %v2786_v28  ;;  %v2600_v3 = vmul.f32 %v3869_v23, %v2500_v7  ;;  %v2606_v25 = vmul.f32 %v3872_v14, %v2506_v8  ;;  %v2795_v9 = vsel %vm250_vm1, %v2602_v10, 0.0  ;;  %v7249_v23 = vld [vmem:[#allocation36_spill] sm:$0xff]  ;;  %v7250_v8 = vld [vmem:[#allocation38_spill] sm:$0xff] }
 0x5eb   :  { %v2763_v45 = vadd.f32 %v2762_v42, %v2761_v0  ;;  %v2770_v0 = vsel %vm250_vm1, %v2673_v40, 0.0  ;;  %v2608_v12 = vmul.f32 %v3873_v18, %v2508_v57  ;;  %v2514_v33 = vmul.f32 %v6409_v47, %v7247_v56  ;;  %v3877_v11 = vld [vmem:[%s6909_s3 + $0x138] sm:$0xff] }
 0x5ec   :  { %v2790_v22 = vadd.f32 %v2789_v43, %v2788_v62  ;;  %v2793_v51 = vsel %vm250_vm1, %v2600_v3, 0.0  ;;  %v2799_v34 = vsel %vm250_vm1, %v2606_v25, 0.0  ;;  %v2516_v3 = vmul.f32 %v6409_v47, %v7249_v23  ;;  %v3875_v43 = vld [vmem:[%s6909_s3 + $0x118] sm:$0xff]  ;;  %v7254_v25 = vld [vmem:[#allocation43_spill] sm:$0xff] }
 0x5ed   :  { %v2765_v61 = vadd.f32 %v2764_v2, %v2763_v45  ;;  %v3871_v45 = vld [vmem:[%s6909_s3 + $0xd8] sm:$0xff]  ;;  %v2614_v10 = vmul.f32 %v3876_v58, %v2514_v33 }
 0x5ee   :  { %v2792_v35 = vadd.f32 %v2791_v24, %v2790_v22  ;;  %v2604_v1 = vmul.f32 %v3871_v45, %v2504_v44  ;;  %v7248_v44 = vld [vmem:[#allocation9_spill] sm:$0xff]  ;;  %v2801_v22 = vsel %vm250_vm1, %v2608_v12, 0.0  ;;  %v2616_v57 = vmul.f32 %v3877_v11, %v2516_v3  ;;  %v7255_v12 = vld [vmem:[#allocation48_spill] sm:$0xff]  ;;  %v7258_v58 = vld [vmem:[#allocation54_spill] sm:$0xff] }
 0x5ef   :  { %v2767_v48 = vadd.f32 %v2766_v32, %v2765_v61  ;;  %v7246_v61 = vld [vmem:[#allocation33_spill] sm:$0xff]  ;;  %v3884_v11 = vld [vmem:[%s6909_s3 + $0x1a8] sm:$0xff] }
 0x5f0   :  { %v2794_v2 = vadd.f32 %v2793_v51, %v2792_v35  ;;  %v2512_v28 = vmul.f32 %v6409_v47, %v7246_v61  ;;  %v2797_v32 = vsel %vm250_vm1, %v2604_v1, 0.0  ;;  %v7253_v51 = vld [vmem:[#allocation41_spill] sm:$0xff] }
 0x5f1   :  { %v2769_v39 = vadd.f32 %v2768_v4, %v2767_v48  ;;  %v3874_v48 = vld [vmem:[%s6909_s3 + $0x108] sm:$0xff] }
 0x5f2   :  { %v2796_v40 = vadd.f32 %v2795_v9, %v2794_v2  ;;  %v2610_v62 = vmul.f32 %v3874_v48, %v2510_v59  ;;  %v3878_v2 = vld [vmem:[%s6909_s3 + $0x148] sm:$0xff]  ;;  %v2807_v59 = vsel %vm250_vm1, %v2614_v10, 0.0  ;;  %v2524_v9 = vmul.f32 %v6409_v47, %v7254_v25 }
 0x5f3   :  { %v2771_v42 = vadd.f32 %v2770_v0, %v2769_v39  ;;  %v2612_v39 = vmul.f32 %v3875_v43, %v2512_v28  ;;  %v2518_v0 = vmul.f32 %v6409_v47, %v7250_v8  ;;  %v2809_v28 = vsel %vm250_vm1, %v2616_v57, 0.0  ;;  %v7257_v43 = vld [vmem:[#allocation51_spill] sm:$0xff] }
 0x5f4   :  { %v2798_v20 = vadd.f32 %v2797_v32, %v2796_v40  ;;  %v2803_v24 = vsel %vm250_vm1, %v2610_v62, 0.0  ;;  %v3879_v40 = vld [vmem:[%s6909_s3 + $0x158] sm:$0xff]  ;;  %v2526_v32 = vmul.f32 %v6409_v47, %v7255_v12  ;;  %v7256_v62 = vld [vmem:[#allocation49_spill] sm:$0xff]  ;;  %v2532_v10 = vmul.f32 %v6409_v47, %v7258_v58 }
 0x5f5   :  { %v2871_v7 = vadd.f32 %v2869_v63, %v2771_v42  ;;  %v7251_v42 = vld [vmem:[#allocation10_spill] sm:$0xff]  ;;  %v7252_v63 = vld [vmem:[#allocation39_spill] sm:$0xff]  ;;  %v2805_v45 = vsel %vm250_vm1, %v2612_v39, 0.0  ;;  %v2618_v46 = vmul.f32 %v3878_v2, %v2518_v0  ;;  %v2530_v39 = vmul.f32 %v6409_v47, %v7257_v43 }
 0x5f6   :  { %v2800_v4 = vadd.f32 %v2799_v34, %v2798_v20  ;;  %v2520_v35 = vmul.f32 %v6409_v47, %v7252_v63  ;;  %v3880_v20 = vld [vmem:[%s6909_s3 + $0x168] sm:$0xff]  ;;  %v2528_v34 = vmul.f32 %v6409_v47, %v7256_v62 }
 0x5f7   :  { %2875 = vrot.lane.b32.xlu1 %v2871_v7, %s3974_s20  ;;  %v2522_v7 = vmul.f32 %v6409_v47, %v7253_v51  ;;  %v2811_v33 = vsel %vm250_vm1, %v2618_v46, 0.0  ;;  %v2630_v57 = vmul.f32 %v3884_v11, %v2530_v39  ;;  %v2536_v51 = vmul.f32 %v6409_v47, %v6137_v16  ;;  %v3890_v62 = vld [vmem:[%s6909_s3 + $0x208] sm:$0xff] }
 0x5f8   :  { %v2802_v15 = vadd.f32 %v2801_v22, %v2800_v4  ;;  %v2620_v61 = vmul.f32 %v3879_v40, %v2520_v35  ;;  %v3882_v22 = vld [vmem:[%s6909_s3 + $0x188] sm:$0xff]  ;;  %v2534_v35 = vmul.f32 %v6409_v47, %v6132_v38  ;;  %v2538_v38 = vmul.f32 %v6409_v47, %v6150_v54 }
 0x5f9   :  { %v2622_v56 = vmul.f32 %v3880_v20, %v2522_v7  ;;  %v3885_v7 = vld [vmem:[%s6909_s3 + $0x1b8] sm:$0xff]  ;;  %v2540_v16 = vmul.f32 %v6409_v47, %v6165_v19  ;;  %v3888_v54 = vld [vmem:[%s6909_s3 + $0x1e8] sm:$0xff] }
 0x5fa   :  { %v2804_v13 = vadd.f32 %v2803_v24, %v2802_v15  ;;  %v2813_v23 = vsel %vm250_vm1, %v2620_v61, 0.0  ;;  %v2626_v15 = vmul.f32 %v3882_v22, %v2526_v32  ;;  %v3883_v24 = vld [vmem:[%s6909_s3 + $0x198] sm:$0xff]  ;;  %v2632_v2 = vmul.f32 %v3885_v7, %v2532_v10  ;;  %v3892_v22 = vld [vmem:[%s6909_s3 + $0x228] sm:$0xff] }
 0x5fb   :  { %2901 = vrot.lane.b32.xlu1 %v7248_v44, %s3974_s20  ;;  %v3881_v44 = vld [vmem:[%s6909_s3 + $0x178] sm:$0xff]  ;;  %v2815_v8 = vsel %vm250_vm1, %v2622_v56, 0.0  ;;  %v2638_v32 = vmul.f32 %v3888_v54, %v2538_v38  ;;  %v3902_v54 = vld [vmem:[%s6909_s3 + $0x2c8] sm:$0xff] }
 0x5fc   :  { %v2806_v1 = vadd.f32 %v2805_v45, %v2804_v13  ;;  %v2624_v4 = vmul.f32 %v3881_v44, %v2524_v9  ;;  %v2819_v45 = vsel %vm250_vm1, %v2626_v15, 0.0  ;;  %v2823_v9 = vsel %vm250_vm1, %v2630_v57, 0.0  ;;  %v3887_v61 = vld [vmem:[%s6909_s3 + $0x1d8] sm:$0xff]  ;;  %v3896_v57 = vld [vmem:[%s6909_s3 + $0x268] sm:$0xff] }
 0x5fd   :  { %v3889_v19 = vld [vmem:[%s6909_s3 + $0x1f8] sm:$0xff]  ;;  %v2831_v44 = vsel %vm250_vm1, %v2638_v32, 0.0  ;;  %v2646_v15 = vmul.f32 %v3892_v22, %v6429_v26  ;;  %v2666_v32 = vmul.f32 %v3902_v54, %v6469_v52 }
 0x5fe   :  { %v2808_v14 = vadd.f32 %v2807_v59, %v2806_v1  ;;  %v2817_v13 = vsel %vm250_vm1, %v2624_v4, 0.0  ;;  %v2640_v47 = vmul.f32 %v3889_v19, %v2540_v16 }
 0x5ff   :  { %2903 = vrot.lane.b32.xlu1 %v7251_v42, %s3974_s20  ;;  %v2628_v42 = vmul.f32 %v3883_v24, %v2528_v34  ;;  %v2642_v34 = vmul.f32 %v3890_v62, %v6421_v53  ;;  %v3894_v24 = vld [vmem:[%s6909_s3 + $0x248] sm:$0xff]  ;;  %v2839_v26 = vsel %vm250_vm1, %v2646_v15, 0.0  ;;  %v2859_v52 = vsel %vm250_vm1, %v2666_v32, 0.0 }
 0x600   :  { %v2810_v18 = vadd.f32 %v2809_v28, %v2808_v14  ;;  %v3886_v14 = vld [vmem:[%s6909_s3 + $0x1c8] sm:$0xff]  ;;  %v2636_v28 = vmul.f32 %v3887_v61, %v2536_v51  ;;  %v2833_v43 = vsel %vm250_vm1, %v2640_v47, 0.0  ;;  %v3897_v51 = vld [vmem:[%s6909_s3 + $0x278] sm:$0xff] }
 0x601   :  { %v2821_v46 = vsel %vm250_vm1, %v2628_v42, 0.0  ;;  %v2634_v25 = vmul.f32 %v3886_v14, %v2534_v35  ;;  %v2835_v53 = vsel %vm250_vm1, %v2642_v34, 0.0  ;;  %v2650_v42 = vmul.f32 %v3894_v24, %v6437_v6  ;;  %v3899_v14 = vld [vmem:[%s6909_s3 + $0x298] sm:$0xff] }
 0x602   :  { %v2812_v48 = vadd.f32 %v2811_v33, %v2810_v18  ;;  %v2825_v18 = vsel %vm250_vm1, %v2632_v2, 0.0  ;;  %v2829_v33 = vsel %vm250_vm1, %v2636_v28, 0.0  ;;  %v2656_v7 = vmul.f32 %v3897_v51, %v6449_v60  ;;  %v3901_v28 = vld [vmem:[%s6909_s3 + $0x2b8] sm:$0xff] }
 0x603   :  { %v2827_v20 = vsel %vm250_vm1, %v2634_v25, 0.0  ;;  %v2843_v6 = vsel %vm250_vm1, %v2650_v42, 0.0  ;;  %v2660_v25 = vmul.f32 %v3899_v14, %v6457_v27  ;;  %v3905_v34 = vld [vmem:[%s6909_s3 + $0x2f8] sm:$0xff] }
 0x604   :  { %v2814_v3 = vadd.f32 %v2813_v23, %v2812_v48  ;;  %v3891_v23 = vld [vmem:[%s6909_s3 + $0x218] sm:$0xff]  ;;  %v2849_v60 = vsel %vm250_vm1, %v2656_v7, 0.0 }
 0x605   :  { %v2853_v27 = vsel %vm250_vm1, %v2660_v25, 0.0 }
 0x606   :  { %v2816_v0 = vadd.f32 %v2815_v8, %v2814_v3  ;;  %v2644_v3 = vmul.f32 %v3891_v23, %v6425_v55  ;;  %v3906_v23 = vld [vmem:[%s6909_s3 + $0x308] sm:$0xff] }
 0x608   :  { %v2818_v63 = vadd.f32 %v2817_v13, %v2816_v0  ;;  %v3893_v0 = vld [vmem:[%s6909_s3 + $0x238] sm:$0xff]  ;;  %v2837_v55 = vsel %vm250_vm1, %v2644_v3, 0.0  ;;  %v2674_v3 = vmul.f32 %v3906_v23, %v6581_v36 }
 0x609   :  { %v2648_v58 = vmul.f32 %v3893_v0, %v6433_v5 }
 0x60a   :  { %v2820_v1 = vadd.f32 %v2819_v45, %v2818_v63  ;;  %v3895_v63 = vld [vmem:[%s6909_s3 + $0x258] sm:$0xff]  ;;  %v2654_v45 = vmul.f32 %v3896_v57, %v6445_v17  ;;  %v2867_v15 = vsel %vm250_vm1, %v2674_v3, 0.0 }
 0x60b   :  { %v2652_v35 = vmul.f32 %v3895_v63, %v6441_v30  ;;  %v2841_v5 = vsel %vm250_vm1, %v2648_v58, 0.0 }
 0x60c   :  { %v2822_v59 = vadd.f32 %v2821_v46, %v2820_v1  ;;  %v3898_v46 = vld [vmem:[%s6909_s3 + $0x288] sm:$0xff]  ;;  %v2847_v17 = vsel %vm250_vm1, %v2654_v45, 0.0 }
 0x60d   :  { %v2845_v30 = vsel %vm250_vm1, %v2652_v35, 0.0 }
 0x60e   :  { %v2824_v40 = vadd.f32 %v2823_v9, %v2822_v59  ;;  %v2658_v59 = vmul.f32 %v3898_v46, %v6453_v37 }
 0x610   :  { %v2826_v12 = vadd.f32 %v2825_v18, %v2824_v40  ;;  %v3900_v40 = vld [vmem:[%s6909_s3 + $0x2a8] sm:$0xff]  ;;  %v2851_v37 = vsel %vm250_vm1, %v2658_v59, 0.0  ;;  %v2664_v18 = vmul.f32 %v3901_v28, %v6465_v29 }
 0x611   :  { %v2662_v16 = vmul.f32 %v3900_v40, %v6461_v49 }
 0x612   :  { %v2828_v56 = vadd.f32 %v2827_v20, %v2826_v12  ;;  %v2857_v29 = vsel %vm250_vm1, %v2664_v18, 0.0 }
 0x613   :  { %v2855_v49 = vsel %vm250_vm1, %v2662_v16, 0.0 }
 0x614   :  { %v2830_v48 = vadd.f32 %v2829_v33, %v2828_v56  ;;  %v3903_v56 = vld [vmem:[%s6909_s3 + $0x2d8] sm:$0xff]  ;;  %v3904_v33 = vld [vmem:[%s6909_s3 + $0x2e8] sm:$0xff]  ;;  %s3975_s3 = smov [#allocation4]  }
 0x615   :  { %v2668_v19 = vmul.f32 %v3903_v56, %v6473_v21  ;;  %s2926_s29 = sshll.u32 %s3975_s3, 4  ;;  %s2927_s29 = int_to_ptr.vmem [resolvable:$true] %s2926_s29 }
 0x616   :  { %v2832_v4 = vadd.f32 %v2831_v44, %v2830_v48  ;;  %v2670_v48 = vmul.f32 %v3904_v33, %v6477_v31  ;;  %v2672_v44 = vmul.f32 %v3905_v34, %v6577_v50  ;;  %s3907_s12 = scalar_lea.vmem %s2927_s29, 256  ;;  %p3912_p1 = scmp.lt.s32.totalorder %s2927_s29, %s2927_s29 }
 0x617   :  { %v2861_v21 = vsel %vm250_vm1, %v2668_v19, 0.0  ;;  %p3908_p0 = scmp.ne.s32.totalorder %s2927_s29, %s3907_s12  ;;  %p3913_p2 = scmp.lt.s32.totalorder %s3907_s12, %s3907_s12 }
 0x618   :  { %v2834_v39 = vadd.f32 %v2833_v43, %v2832_v4  ;;  %v2863_v31 = vsel %vm250_vm1, %v2670_v48, 0.0 }
 0x619   :  { %p3914_p3 = por %p3913_p2, %p3912_p1 }
 0x61a   :  { %v2836_v8 = vadd.f32 %v2835_v53, %v2834_v39  ;;  %v2865_v39 = vsel %vm250_vm1, %v2672_v44, 0.0 }
 0x61b   :  { %p3915_p4 = pnand %p3914_p3, %p3908_p0 }
 0x61c   :  { %v2838_v10 = vadd.f32 %v2837_v55, %v2836_v8  ;;  %v7259_v8 = vld [vmem:[#allocation14_spill] sm:$0xff]  ;;  %v7260_v55 = vld [vmem:[#allocation11_spill] sm:$0xff] }
 0x61d   :  { %v2870_v50 = vmul.f32 %v6591_v41, %v7259_v8 }
 0x61e   :  { %v2840_v13 = vadd.f32 %v2839_v26, %v2838_v10 }
 0x620   :  { %v2842_v11 = vadd.f32 %v2841_v5, %v2840_v13 }
 0x622   :  { %v2844_v1 = vadd.f32 %v2843_v6, %v2842_v11 }
 0x624   :  { %v2846_v2 = vadd.f32 %v2845_v30, %v2844_v1 }
 0x626   :  { %v2848_v38 = vadd.f32 %v2847_v17, %v2846_v2 }
 0x628   :  { %v2850_v9 = vadd.f32 %v2849_v60, %v2848_v38 }
 0x62a   :  { %v2852_v61 = vadd.f32 %v2851_v37, %v2850_v9 }
 0x62c   :  { %v2854_v12 = vadd.f32 %v2853_v27, %v2852_v61 }
 0x62e   :  { %v2856_v20 = vadd.f32 %v2855_v49, %v2854_v12 }
 0x630   :  { %v2858_v47 = vadd.f32 %v2857_v29, %v2856_v20 }
 0x632   :  { %v2860_v62 = vadd.f32 %v2859_v52, %v2858_v47 }
 0x634   :  { %v2862_v4 = vadd.f32 %v2861_v21, %v2860_v62 }
 0x636   :  { %v2864_v43 = vadd.f32 %v2863_v31, %v2862_v4 }
 0x638   :  { %v2866_v22 = vadd.f32 %v2865_v39, %v2864_v43 }
 0x63a   :  { %v2868_v53 = vadd.f32 %v2867_v15, %v2866_v22 }
 0x63c   :  { %v2872_v0 = vadd.f32 %v2870_v50, %v2868_v53 }
 0x63e   :  { %2877 = vrot.lane.b32.xlu0 %v2872_v0, %s3974_s20 }
 0x669   :  { %v2876_v58 = vpop.permute.xlu1 %2875 }
 0x66a   :  { %v2881_v10 = vadd.f32 %v2876_v58, %v7260_v55 }
 0x66c   :  { %v2883_v24 = vmul.f32 0.70710677, %v2881_v10 }
 0x66d   :  { %v2902_v36 = vpop.permute.xlu1 %2901 }
 0x66e   :  { %2907 = vst.msk [vmem:[#allocation4] sm:$0xff] %vm250_vm1, %v2902_v36  ;;  %2887 = vrot.lane.b32.xlu0 %v2883_v24, %s3972_s17 }
 0x671   :  { %v2904_v42 = vpop.permute.xlu1 %2903 }
 0x672   :  { %2908 = vst.msk [vmem:[#allocation4 + $0x8] sm:$0xff] %vm250_vm1, %v2904_v42 }
 0x673   :  { %3918 = shalt.err (!%p3915_p4)
}
 0x674   :  { %s3977_s20 = smov 128   ;;  %s3978_s7 = smov 8  }
 0x675   :  { %2932 = dma.vmem_to_hbm [thread:$0]  %s2927_s29, 256, %s6915_s9, [#allocation5], %s3977_s20, %s3977_s20, %s3978_s7  }
 0x676   :  { %s3927_s15 = scalar_lea.vmem %s2915_s11, 256  ;;  %p3932_p6 = scmp.lt.s32.totalorder %s2915_s11, %s2915_s11 }
 0x677   :  { %p3928_p5 = scmp.ne.s32.totalorder %s2915_s11, %s3927_s15  ;;  %p3933_p7 = scmp.lt.s32.totalorder %s3927_s15, %s3927_s15 }
 0x679   :  { %p3934_p8 = por %p3933_p7, %p3932_p6 }
 0x67b   :  { %p3935_p9 = pnand %p3934_p8, %p3928_p5 }
 0x67d   :  { %3938 = shalt.err (!%p3935_p9)
}
 0x67e   :  { %2920 = dma.vmem_to_hbm [thread:$0]  %s2915_s11, 256, %s6914_s8, [#allocation3], %s3977_s20, %s3977_s20, %s3978_s7   ;;  %v7261_v26 = vld [vmem:[#allocation12_spill] sm:$0xff] }
 0x67f   :  { %s3979_s9 = smov [#allocation6]  }
 0x680   :  { %s2938_s19 = sshll.u32 %s3979_s9, 4  ;;  %s2939_s19 = int_to_ptr.vmem [resolvable:$true] %s2938_s19 }
 0x681   :  { %s3947_s21 = scalar_lea.vmem %s2939_s19, 256  ;;  %p3952_p11 = scmp.lt.s32.totalorder %s2939_s19, %s2939_s19 }
 0x682   :  { %p3948_p10 = scmp.ne.s32.totalorder %s2939_s19, %s3947_s21  ;;  %p3953_p12 = scmp.lt.s32.totalorder %s3947_s21, %s3947_s21 }
 0x684   :  { %p3954_p13 = por %p3953_p12, %p3952_p11 }
 0x686   :  { %p3955_p0 = pnand %p3954_p13, %p3948_p10 }
 0x6b0   :  { %v2878_v41 = vpop.permute.xlu0 %2877 }
 0x6b1   :  { %v2882_v13 = vadd.f32 %v2878_v41, %v7261_v26 }
 0x6b3   :  { %v2884_v63 = vmul.f32 0.70710677, %v2882_v13 }
 0x6b5   :  { %2889 = vrot.lane.b32.xlu1 %v2884_v63, %s3972_s17 }
 0x6e0   :  { %v2888_v35 = vpop.permute.xlu0 %2887 }
 0x6e1   :  { %2893 = vst.msk [vmem:[#allocation6] sm:$0xff] %vm250_vm1, %v2888_v35 }
 0x727   :  { %v2890_v5 = vpop.permute.xlu1 %2889 }
 0x728   :  { %2894 = vst.msk [vmem:[#allocation6 + $0x8] sm:$0xff] %vm250_vm1, %v2890_v5 }
 0x729   :  { %3958 = shalt.err (!%p3955_p0)
}
 0x72a   :  { %2944 = dma.vmem_to_hbm [thread:$0]  %s2939_s19, 256, %s6916_s10, [#allocation5], %s3977_s20, %s3977_s20, %s3978_s7  }
 0x72b   :  { %3967 = dma.done.wait [#allocation3], 256  }
 0x72c   :  { %3968 = vsyncadd [#allocation3], 4294967040 }
 0x72d   :  { %3969 = dma.done.wait [#allocation5], 512  }
 0x72e   :  { %3970 = vsyncadd [#allocation5], 4294966784 }
 0x72f   :  { %2954 = vsyncpa [#allocation3], 1 }
 0x730   :  { %2955 = vsyncpa [#allocation5], 1 }

</bundles_post_ra>
